<compile_context>
chip_gen: v7x
topology: tpu7x:2x2x1
jax: 0.10.0
libtpu: 0.0.40
codegen_flags: <defaults>
</compile_context>

<pallas_src>
import functools

import numpy as np
import jax
import jax.numpy as jnp
from jax.experimental import pallas as pl
from jax.experimental.pallas import tpu as pltpu


def _make_shift_operators(H, W):
    """S[t, q, p] = 1 iff source pixel q feeds output pixel p for 3x3 tap t.

    (F @ S[t])[c, p] == F[c, (h+dh)*W + (w+dw)] with zeros outside the image,
    i.e. the zero-padded spatial shift needed for conv tap (kh, kw),
    dh = kh - 1, dw = kw - 1, t = kh*3 + kw.
    """
    HW = H * W
    q = np.arange(HW)[:, None]          # source flat index
    p = np.arange(HW)[None, :]          # destination flat index
    h, w = p // W, p % W
    mats = []
    for kh in range(3):
        for kw in range(3):
            dh, dw = kh - 1, kw - 1
            hs, ws = h + dh, w + dw
            valid = (hs >= 0) & (hs < H) & (ws >= 0) & (ws < W)
            mats.append(((q == hs * W + ws) & valid).astype(np.float32))
    return np.stack(mats)               # (9, HW, HW)


def _rdb_kernel(x_ref, s_ref, *refs, n_dense, growth, n_ch, c_slot):
    # refs = (w_dense_0..n_dense-1, w_1x1, o_ref, feat_scratch, col_scratch)
    w_refs = refs[:n_dense]              # each (growth, 9*c_slot)
    w1x1_ref = refs[n_dense]             # (n_ch, c_final)
    o_ref = refs[n_dense + 1]            # (1, n_ch, HW)
    feat = refs[n_dense + 2]             # VMEM (c_final, HW) f32
    col = refs[n_dense + 3]              # VMEM (9*c_slot, HW) f32

    f32 = jnp.float32

    # The im2col slab must be finite everywhere: padded channel slots meet
    # zero weight columns, but 0 * uninitialized(NaN) would poison the matmul.
    col[...] = jnp.zeros_like(col)

    # The residual input occupies the first n_ch rows of the feature scratch.
    feat[0:n_ch, :] = x_ref[0].astype(f32)

    c_in = n_ch
    for i in range(n_dense):
        f_in = feat[0:c_in, :]                               # (c_in, HW)
        # Build the im2col slab: each tap is a lane permutation + halo
        # zeroing performed on the (otherwise idle) MXU.
        for t in range(9):
            col[t * c_slot:t * c_slot + c_in, :] = jnp.dot(
                f_in, s_ref[t], preferred_element_type=f32)
        # ONE matmul per dense layer: (growth, 9*c_slot) @ (9*c_slot, HW).
        pre = jnp.dot(w_refs[i][...], col[...], preferred_element_type=f32)
        # ReLU, and "concatenate" = append rows to the feature scratch.
        feat[c_in:c_in + growth, :] = jnp.maximum(pre, 0.0)
        c_in += growth

    # 1x1 fusion conv over all concatenated features, then the residual add.
    full = feat[...]                                         # (c_final, HW)
    y = jnp.dot(w1x1_ref[...], full, preferred_element_type=f32)
    y = y + full[0:n_ch, :]                                  # + x (residual)
    o_ref[...] = y.astype(o_ref.dtype).reshape((1,) + y.shape)


def rdb_forward(x_nchw, params, n_dense, growth):
    """RDB forward. x_nchw: (N, n_ch, H, W) -> (N, n_ch, H, W)."""
    N, n_ch, H, W = x_nchw.shape
    HW = H * W
    c_final = n_ch + n_dense * growth
    c_conv_max = n_ch + (n_dense - 1) * growth   # widest 3x3 conv input
    c_slot = ((c_conv_max + 7) // 8) * 8         # sublane-aligned channel slot

    x_lanes = x_nchw.reshape(N, n_ch, HW)        # lane-dense input slab
    shift_ops = jnp.asarray(_make_shift_operators(H, W))

    # Pack 3x3 weights OIHW -> (growth, 9*c_slot): tap-major, channel slot
    # zero-padded to c_slot (zero columns meet the unused im2col rows).
    w_dense = []
    c_in = n_ch
    for i in range(n_dense):
        w = params["dense"][i]                                  # (growth, c_in, 3, 3)
        w_t = jnp.transpose(w, (0, 2, 3, 1)).reshape(growth, 9, c_in)
        w_p = jnp.zeros((growth, 9, c_slot), w.dtype).at[:, :, :c_in].set(w_t)
        w_dense.append(w_p.reshape(growth, 9 * c_slot))
        c_in += growth
    w1x1 = params["w1x1"].reshape(n_ch, c_final)

    kernel = functools.partial(_rdb_kernel, n_dense=n_dense, growth=growth,
                               n_ch=n_ch, c_slot=c_slot)

    in_specs = [
        pl.BlockSpec((1, n_ch, HW), lambda n: (n, 0, 0)),       # x
        pl.BlockSpec((9, HW, HW), lambda n: (0, 0, 0)),         # shift operators
    ]
    in_specs += [pl.BlockSpec((growth, 9 * c_slot), lambda n: (0, 0))
                 for _ in range(n_dense)]                       # dense weights
    in_specs.append(pl.BlockSpec((n_ch, c_final), lambda n: (0, 0)))  # 1x1 weight

    out = pl.pallas_call(
        kernel,
        out_shape=jax.ShapeDtypeStruct((N, n_ch, HW), x_nchw.dtype),
        grid=(N,),
        in_specs=in_specs,
        out_specs=pl.BlockSpec((1, n_ch, HW), lambda n: (n, 0, 0)),
        scratch_shapes=[
            pltpu.VMEM((c_final, HW), jnp.float32),      # concatenated features
            pltpu.VMEM((9 * c_slot, HW), jnp.float32),   # im2col slab
        ],
        compiler_params=pltpu.CompilerParams(
            dimension_semantics=("parallel",)),
    )(x_lanes, shift_ops, *w_dense, w1x1)

    return out.reshape(N, n_ch, H, W)


def init_params(key, n_ch, n_dense, growth):
    """PyTorch Conv2d default init: U(-b, b), b = 1/sqrt(fan_in); bias=False."""
    keys = jax.random.split(key, n_dense + 1)
    dense = []
    c_in = n_ch
    for i in range(n_dense):
        b = 1.0 / np.sqrt(c_in * 9)
        dense.append(jax.random.uniform(keys[i], (growth, c_in, 3, 3),
                                        jnp.float32, -b, b))
        c_in += growth
    b = 1.0 / np.sqrt(c_in)
    w1x1 = jax.random.uniform(keys[n_dense], (n_ch, c_in, 1, 1),
                              jnp.float32, -b, b)
    return {"dense": dense, "w1x1": w1x1}


def ref_forward(x_nchw, params):
    """Pure-JAX (lax.conv) reference of the PyTorch RDB forward."""
    dn = ("NCHW", "OIHW", "NCHW")
    out = x_nchw
    for w in params["dense"]:
        y = jax.lax.conv_general_dilated(out, w, (1, 1), "SAME",
                                         dimension_numbers=dn)
        out = jnp.concatenate([out, jax.nn.relu(y)], axis=1)
    y = jax.lax.conv_general_dilated(out, params["w1x1"], (1, 1), "VALID",
                                     dimension_numbers=dn)
    return y + x_nchw


if __name__ == "__main__":
    # RDB(nChannels=4, nDenselayer=3, growthRate=4) at batch=2, 16x16 spatial.
    N, n_ch, H, W = 2, 4, 16, 16
    n_dense, growth = 3, 4

    key = jax.random.PRNGKey(0)
    kx, kp = jax.random.split(key)
    x = jax.random.normal(kx, (N, n_ch, H, W), jnp.float32)
    params = init_params(kp, n_ch, n_dense, growth)

    out = jax.block_until_ready(rdb_forward(x, params, n_dense, growth))
    assert out.shape == (N, n_ch, H, W), out.shape

    ref = jax.block_until_ready(ref_forward(x, params))
    err = float(jnp.max(jnp.abs(out - ref)))
    assert jnp.allclose(out, ref, atol=1e-4, rtol=1e-4), err

    print("KERNEL_OK")
</pallas_src>

<mosaic_0001>
module attributes {stable_mosaic.version = 11 : i64} {
  func.func @_rdb_kernel(%arg0: i32, %arg1: memref<1x4x256xf32, #tpu.memory_space<vmem>>, %arg2: memref<9x256x256xf32, #tpu.memory_space<vmem>>, %arg3: memref<4x144xf32, #tpu.memory_space<vmem>>, %arg4: memref<4x144xf32, #tpu.memory_space<vmem>>, %arg5: memref<4x144xf32, #tpu.memory_space<vmem>>, %arg6: memref<4x16xf32, #tpu.memory_space<vmem>>, %arg7: memref<1x4x256xf32, #tpu.memory_space<vmem>>, %arg8: memref<16x256xf32, #tpu.memory_space<vmem>>, %arg9: memref<144x256xf32, #tpu.memory_space<vmem>>) attributes {dimension_semantics = [#tpu.dimension_semantics<parallel>], iteration_bounds = array<i64: 2>, scalar_prefetch = 0 : i64, scratch_operands = 2 : i64, tpu.core_type = #tpu.core_type<tc>, window_params = [{transform_indices = @transform_0, window_bounds = array<i64: 1, 4, 256>}, {pipeline_mode = #tpu.pipeline_mode<synchronous>, transform_indices = @transform_1, window_bounds = array<i64: 9, 256, 256>}, {pipeline_mode = #tpu.pipeline_mode<synchronous>, transform_indices = @transform_2, window_bounds = array<i64: 4, 144>}, {pipeline_mode = #tpu.pipeline_mode<synchronous>, transform_indices = @transform_3, window_bounds = array<i64: 4, 144>}, {pipeline_mode = #tpu.pipeline_mode<synchronous>, transform_indices = @transform_4, window_bounds = array<i64: 4, 144>}, {pipeline_mode = #tpu.pipeline_mode<synchronous>, transform_indices = @transform_5, window_bounds = array<i64: 4, 16>}, {transform_indices = @transform_6, window_bounds = array<i64: 1, 4, 256>}]} {
    %cst = arith.constant 0.000000e+00 : f32
    %0 = vector.broadcast %cst : f32 to vector<144x256xf32>
    %c0 = arith.constant 0 : index
    %c0_0 = arith.constant 0 : index
    %1 = vector.load %arg9[%c0, %c0_0] : memref<144x256xf32, #tpu.memory_space<vmem>>, vector<144x256xf32>
    tpu.vector_store %arg9[%c0, %c0_0], %0 {strides = array<i32>} : memref<144x256xf32, #tpu.memory_space<vmem>>, vector<144x256xf32>,
    %c0_1 = arith.constant 0 : index
    %c0_2 = arith.constant 0 : index
    %c0_3 = arith.constant 0 : index
    %2 = vector.load %arg1[%c0_1, %c0_2, %c0_3] : memref<1x4x256xf32, #tpu.memory_space<vmem>>, vector<1x4x256xf32>
    %3 = vector.shape_cast %2 : vector<1x4x256xf32> to vector<4x256xf32>
    %c0_4 = arith.constant 0 : index
    %c0_5 = arith.constant 0 : index
    %4 = vector.load %arg8[%c0_4, %c0_5] : memref<16x256xf32, #tpu.memory_space<vmem>>, vector<4x256xf32>
    tpu.vector_store %arg8[%c0_4, %c0_5], %3 {strides = array<i32>} : memref<16x256xf32, #tpu.memory_space<vmem>>, vector<4x256xf32>,
    %c0_6 = arith.constant 0 : index
    %c0_7 = arith.constant 0 : index
    %5 = vector.load %arg8[%c0_6, %c0_7] : memref<16x256xf32, #tpu.memory_space<vmem>>, vector<4x256xf32>
    %c0_8 = arith.constant 0 : index
    %c0_9 = arith.constant 0 : index
    %c0_10 = arith.constant 0 : index
    %6 = vector.load %arg2[%c0_8, %c0_9, %c0_10] : memref<9x256x256xf32, #tpu.memory_space<vmem>>, vector<1x256x256xf32>
    %7 = vector.shape_cast %6 : vector<1x256x256xf32> to vector<256x256xf32>
    %cst_11 = arith.constant dense<0.000000e+00> : vector<4x256xf32>
    %8 = tpu.matmul %5, %7, %cst_11 {dimension_numbers = #tpu.dot_dimension_numbers<[1], [0], [0], [1], [0, 0, 1, 1], [], []>} : vector<4x256xf32>, vector<256x256xf32>, vector<4x256xf32> -> vector<4x256xf32>
    %c0_12 = arith.constant 0 : index
    %c0_13 = arith.constant 0 : index
    %9 = vector.load %arg9[%c0_12, %c0_13] : memref<144x256xf32, #tpu.memory_space<vmem>>, vector<4x256xf32>
    tpu.vector_store %arg9[%c0_12, %c0_13], %8 {strides = array<i32>} : memref<144x256xf32, #tpu.memory_space<vmem>>, vector<4x256xf32>,
    %c1 = arith.constant 1 : index
    %c0_14 = arith.constant 0 : index
    %c0_15 = arith.constant 0 : index
    %10 = vector.load %arg2[%c1, %c0_14, %c0_15] : memref<9x256x256xf32, #tpu.memory_space<vmem>>, vector<1x256x256xf32>
    %11 = vector.shape_cast %10 : vector<1x256x256xf32> to vector<256x256xf32>
    %cst_16 = arith.constant dense<0.000000e+00> : vector<4x256xf32>
    %12 = tpu.matmul %5, %11, %cst_16 {dimension_numbers = #tpu.dot_dimension_numbers<[1], [0], [0], [1], [0, 0, 1, 1], [], []>} : vector<4x256xf32>, vector<256x256xf32>, vector<4x256xf32> -> vector<4x256xf32>
    %c16 = arith.constant 16 : index
    %c0_17 = arith.constant 0 : index
    %13 = vector.load %arg9[%c16, %c0_17] : memref<144x256xf32, #tpu.memory_space<vmem>>, vector<4x256xf32>
    tpu.vector_store %arg9[%c16, %c0_17], %12 {strides = array<i32>} : memref<144x256xf32, #tpu.memory_space<vmem>>, vector<4x256xf32>,
    %c2 = arith.constant 2 : index
    %c0_18 = arith.constant 0 : index
    %c0_19 = arith.constant 0 : index
    %14 = vector.load %arg2[%c2, %c0_18, %c0_19] : memref<9x256x256xf32, #tpu.memory_space<vmem>>, vector<1x256x256xf32>
    %15 = vector.shape_cast %14 : vector<1x256x256xf32> to vector<256x256xf32>
    %cst_20 = arith.constant dense<0.000000e+00> : vector<4x256xf32>
    %16 = tpu.matmul %5, %15, %cst_20 {dimension_numbers = #tpu.dot_dimension_numbers<[1], [0], [0], [1], [0, 0, 1, 1], [], []>} : vector<4x256xf32>, vector<256x256xf32>, vector<4x256xf32> -> vector<4x256xf32>
    %c32 = arith.constant 32 : index
    %c0_21 = arith.constant 0 : index
    %17 = vector.load %arg9[%c32, %c0_21] : memref<144x256xf32, #tpu.memory_space<vmem>>, vector<4x256xf32>
    tpu.vector_store %arg9[%c32, %c0_21], %16 {strides = array<i32>} : memref<144x256xf32, #tpu.memory_space<vmem>>, vector<4x256xf32>,
    %c3 = arith.constant 3 : index
    %c0_22 = arith.constant 0 : index
    %c0_23 = arith.constant 0 : index
    %18 = vector.load %arg2[%c3, %c0_22, %c0_23] : memref<9x256x256xf32, #tpu.memory_space<vmem>>, vector<1x256x256xf32>
    %19 = vector.shape_cast %18 : vector<1x256x256xf32> to vector<256x256xf32>
    %cst_24 = arith.constant dense<0.000000e+00> : vector<4x256xf32>
    %20 = tpu.matmul %5, %19, %cst_24 {dimension_numbers = #tpu.dot_dimension_numbers<[1], [0], [0], [1], [0, 0, 1, 1], [], []>} : vector<4x256xf32>, vector<256x256xf32>, vector<4x256xf32> -> vector<4x256xf32>
    %c48 = arith.constant 48 : index
    %c0_25 = arith.constant 0 : index
    %21 = vector.load %arg9[%c48, %c0_25] : memref<144x256xf32, #tpu.memory_space<vmem>>, vector<4x256xf32>
    tpu.vector_store %arg9[%c48, %c0_25], %20 {strides = array<i32>} : memref<144x256xf32, #tpu.memory_space<vmem>>, vector<4x256xf32>,
    %c4 = arith.constant 4 : index
    %c0_26 = arith.constant 0 : index
    %c0_27 = arith.constant 0 : index
    %22 = vector.load %arg2[%c4, %c0_26, %c0_27] : memref<9x256x256xf32, #tpu.memory_space<vmem>>, vector<1x256x256xf32>
    %23 = vector.shape_cast %22 : vector<1x256x256xf32> to vector<256x256xf32>
    %cst_28 = arith.constant dense<0.000000e+00> : vector<4x256xf32>
    %24 = tpu.matmul %5, %23, %cst_28 {dimension_numbers = #tpu.dot_dimension_numbers<[1], [0], [0], [1], [0, 0, 1, 1], [], []>} : vector<4x256xf32>, vector<256x256xf32>, vector<4x256xf32> -> vector<4x256xf32>
    %c64 = arith.constant 64 : index
    %c0_29 = arith.constant 0 : index
    %25 = vector.load %arg9[%c64, %c0_29] : memref<144x256xf32, #tpu.memory_space<vmem>>, vector<4x256xf32>
    tpu.vector_store %arg9[%c64, %c0_29], %24 {strides = array<i32>} : memref<144x256xf32, #tpu.memory_space<vmem>>, vector<4x256xf32>,
    %c5 = arith.constant 5 : index
    %c0_30 = arith.constant 0 : index
    %c0_31 = arith.constant 0 : index
    %26 = vector.load %arg2[%c5, %c0_30, %c0_31] : memref<9x256x256xf32, #tpu.memory_space<vmem>>, vector<1x256x256xf32>
    %27 = vector.shape_cast %26 : vector<1x256x256xf32> to vector<256x256xf32>
    %cst_32 = arith.constant dense<0.000000e+00> : vector<4x256xf32>
    %28 = tpu.matmul %5, %27, %cst_32 {dimension_numbers = #tpu.dot_dimension_numbers<[1], [0], [0], [1], [0, 0, 1, 1], [], []>} : vector<4x256xf32>, vector<256x256xf32>, vector<4x256xf32> -> vector<4x256xf32>
    %c80 = arith.constant 80 : index
    %c0_33 = arith.constant 0 : index
    %29 = vector.load %arg9[%c80, %c0_33] : memref<144x256xf32, #tpu.memory_space<vmem>>, vector<4x256xf32>
    tpu.vector_store %arg9[%c80, %c0_33], %28 {strides = array<i32>} : memref<144x256xf32, #tpu.memory_space<vmem>>, vector<4x256xf32>,
    %c6 = arith.constant 6 : index
    %c0_34 = arith.constant 0 : index
    %c0_35 = arith.constant 0 : index
    %30 = vector.load %arg2[%c6, %c0_34, %c0_35] : memref<9x256x256xf32, #tpu.memory_space<vmem>>, vector<1x256x256xf32>
    %31 = vector.shape_cast %30 : vector<1x256x256xf32> to vector<256x256xf32>
    %cst_36 = arith.constant dense<0.000000e+00> : vector<4x256xf32>
    %32 = tpu.matmul %5, %31, %cst_36 {dimension_numbers = #tpu.dot_dimension_numbers<[1], [0], [0], [1], [0, 0, 1, 1], [], []>} : vector<4x256xf32>, vector<256x256xf32>, vector<4x256xf32> -> vector<4x256xf32>
    %c96 = arith.constant 96 : index
    %c0_37 = arith.constant 0 : index
    %33 = vector.load %arg9[%c96, %c0_37] : memref<144x256xf32, #tpu.memory_space<vmem>>, vector<4x256xf32>
    tpu.vector_store %arg9[%c96, %c0_37], %32 {strides = array<i32>} : memref<144x256xf32, #tpu.memory_space<vmem>>, vector<4x256xf32>,
    %c7 = arith.constant 7 : index
    %c0_38 = arith.constant 0 : index
    %c0_39 = arith.constant 0 : index
    %34 = vector.load %arg2[%c7, %c0_38, %c0_39] : memref<9x256x256xf32, #tpu.memory_space<vmem>>, vector<1x256x256xf32>
    %35 = vector.shape_cast %34 : vector<1x256x256xf32> to vector<256x256xf32>
    %cst_40 = arith.constant dense<0.000000e+00> : vector<4x256xf32>
    %36 = tpu.matmul %5, %35, %cst_40 {dimension_numbers = #tpu.dot_dimension_numbers<[1], [0], [0], [1], [0, 0, 1, 1], [], []>} : vector<4x256xf32>, vector<256x256xf32>, vector<4x256xf32> -> vector<4x256xf32>
    %c112 = arith.constant 112 : index
    %c0_41 = arith.constant 0 : index
    %37 = vector.load %arg9[%c112, %c0_41] : memref<144x256xf32, #tpu.memory_space<vmem>>, vector<4x256xf32>
    tpu.vector_store %arg9[%c112, %c0_41], %36 {strides = array<i32>} : memref<144x256xf32, #tpu.memory_space<vmem>>, vector<4x256xf32>,
    %c8 = arith.constant 8 : index
    %c0_42 = arith.constant 0 : index
    %c0_43 = arith.constant 0 : index
    %38 = vector.load %arg2[%c8, %c0_42, %c0_43] : memref<9x256x256xf32, #tpu.memory_space<vmem>>, vector<1x256x256xf32>
    %39 = vector.shape_cast %38 : vector<1x256x256xf32> to vector<256x256xf32>
    %cst_44 = arith.constant dense<0.000000e+00> : vector<4x256xf32>
    %40 = tpu.matmul %5, %39, %cst_44 {dimension_numbers = #tpu.dot_dimension_numbers<[1], [0], [0], [1], [0, 0, 1, 1], [], []>} : vector<4x256xf32>, vector<256x256xf32>, vector<4x256xf32> -> vector<4x256xf32>
    %c128 = arith.constant 128 : index
    %c0_45 = arith.constant 0 : index
    %41 = vector.load %arg9[%c128, %c0_45] : memref<144x256xf32, #tpu.memory_space<vmem>>, vector<4x256xf32>
    tpu.vector_store %arg9[%c128, %c0_45], %40 {strides = array<i32>} : memref<144x256xf32, #tpu.memory_space<vmem>>, vector<4x256xf32>,
    %c0_46 = arith.constant 0 : index
    %c0_47 = arith.constant 0 : index
    %42 = vector.load %arg3[%c0_46, %c0_47] : memref<4x144xf32, #tpu.memory_space<vmem>>, vector<4x144xf32>
    %c0_48 = arith.constant 0 : index
    %c0_49 = arith.constant 0 : index
    %43 = vector.load %arg9[%c0_48, %c0_49] : memref<144x256xf32, #tpu.memory_space<vmem>>, vector<144x256xf32>
    %cst_50 = arith.constant dense<0.000000e+00> : vector<4x256xf32>
    %44 = tpu.matmul %42, %43, %cst_50 {dimension_numbers = #tpu.dot_dimension_numbers<[1], [0], [0], [1], [0, 0, 1, 1], [], []>} : vector<4x144xf32>, vector<144x256xf32>, vector<4x256xf32> -> vector<4x256xf32>
    %cst_51 = arith.constant 0.000000e+00 : f32
    %45 = vector.broadcast %cst_51 : f32 to vector<4x256xf32>
    %46 = arith.maximumf %44, %45 : vector<4x256xf32>
    %c4_52 = arith.constant 4 : index
    %c0_53 = arith.constant 0 : index
    %47 = vector.load %arg8[%c4_52, %c0_53] : memref<16x256xf32, #tpu.memory_space<vmem>>, vector<4x256xf32>
    tpu.vector_store %arg8[%c4_52, %c0_53], %46 {strides = array<i32>} : memref<16x256xf32, #tpu.memory_space<vmem>>, vector<4x256xf32>,
    %c0_54 = arith.constant 0 : index
    %c0_55 = arith.constant 0 : index
    %48 = vector.load %arg8[%c0_54, %c0_55] : memref<16x256xf32, #tpu.memory_space<vmem>>, vector<8x256xf32>
    %c0_56 = arith.constant 0 : index
    %c0_57 = arith.constant 0 : index
    %c0_58 = arith.constant 0 : index
    %49 = vector.load %arg2[%c0_56, %c0_57, %c0_58] : memref<9x256x256xf32, #tpu.memory_space<vmem>>, vector<1x256x256xf32>
    %50 = vector.shape_cast %49 : vector<1x256x256xf32> to vector<256x256xf32>
    %cst_59 = arith.constant dense<0.000000e+00> : vector<8x256xf32>
    %51 = tpu.matmul %48, %50, %cst_59 {dimension_numbers = #tpu.dot_dimension_numbers<[1], [0], [0], [1], [0, 0, 1, 1], [], []>} : vector<8x256xf32>, vector<256x256xf32>, vector<8x256xf32> -> vector<8x256xf32>
    %c0_60 = arith.constant 0 : index
    %c0_61 = arith.constant 0 : index
    %52 = vector.load %arg9[%c0_60, %c0_61] : memref<144x256xf32, #tpu.memory_space<vmem>>, vector<8x256xf32>
    tpu.vector_store %arg9[%c0_60, %c0_61], %51 {strides = array<i32>} : memref<144x256xf32, #tpu.memory_space<vmem>>, vector<8x256xf32>,
    %c1_62 = arith.constant 1 : index
    %c0_63 = arith.constant 0 : index
    %c0_64 = arith.constant 0 : index
    %53 = vector.load %arg2[%c1_62, %c0_63, %c0_64] : memref<9x256x256xf32, #tpu.memory_space<vmem>>, vector<1x256x256xf32>
    %54 = vector.shape_cast %53 : vector<1x256x256xf32> to vector<256x256xf32>
    %cst_65 = arith.constant dense<0.000000e+00> : vector<8x256xf32>
    %55 = tpu.matmul %48, %54, %cst_65 {dimension_numbers = #tpu.dot_dimension_numbers<[1], [0], [0], [1], [0, 0, 1, 1], [], []>} : vector<8x256xf32>, vector<256x256xf32>, vector<8x256xf32> -> vector<8x256xf32>
    %c16_66 = arith.constant 16 : index
    %c0_67 = arith.constant 0 : index
    %56 = vector.load %arg9[%c16_66, %c0_67] : memref<144x256xf32, #tpu.memory_space<vmem>>, vector<8x256xf32>
    tpu.vector_store %arg9[%c16_66, %c0_67], %55 {strides = array<i32>} : memref<144x256xf32, #tpu.memory_space<vmem>>, vector<8x256xf32>,
    %c2_68 = arith.constant 2 : index
    %c0_69 = arith.constant 0 : index
    %c0_70 = arith.constant 0 : index
    %57 = vector.load %arg2[%c2_68, %c0_69, %c0_70] : memref<9x256x256xf32, #tpu.memory_space<vmem>>, vector<1x256x256xf32>
    %58 = vector.shape_cast %57 : vector<1x256x256xf32> to vector<256x256xf32>
    %cst_71 = arith.constant dense<0.000000e+00> : vector<8x256xf32>
    %59 = tpu.matmul %48, %58, %cst_71 {dimension_numbers = #tpu.dot_dimension_numbers<[1], [0], [0], [1], [0, 0, 1, 1], [], []>} : vector<8x256xf32>, vector<256x256xf32>, vector<8x256xf32> -> vector<8x256xf32>
    %c32_72 = arith.constant 32 : index
    %c0_73 = arith.constant 0 : index
    %60 = vector.load %arg9[%c32_72, %c0_73] : memref<144x256xf32, #tpu.memory_space<vmem>>, vector<8x256xf32>
    tpu.vector_store %arg9[%c32_72, %c0_73], %59 {strides = array<i32>} : memref<144x256xf32, #tpu.memory_space<vmem>>, vector<8x256xf32>,
    %c3_74 = arith.constant 3 : index
    %c0_75 = arith.constant 0 : index
    %c0_76 = arith.constant 0 : index
    %61 = vector.load %arg2[%c3_74, %c0_75, %c0_76] : memref<9x256x256xf32, #tpu.memory_space<vmem>>, vector<1x256x256xf32>
    %62 = vector.shape_cast %61 : vector<1x256x256xf32> to vector<256x256xf32>
    %cst_77 = arith.constant dense<0.000000e+00> : vector<8x256xf32>
    %63 = tpu.matmul %48, %62, %cst_77 {dimension_numbers = #tpu.dot_dimension_numbers<[1], [0], [0], [1], [0, 0, 1, 1], [], []>} : vector<8x256xf32>, vector<256x256xf32>, vector<8x256xf32> -> vector<8x256xf32>
    %c48_78 = arith.constant 48 : index
    %c0_79 = arith.constant 0 : index
    %64 = vector.load %arg9[%c48_78, %c0_79] : memref<144x256xf32, #tpu.memory_space<vmem>>, vector<8x256xf32>
    tpu.vector_store %arg9[%c48_78, %c0_79], %63 {strides = array<i32>} : memref<144x256xf32, #tpu.memory_space<vmem>>, vector<8x256xf32>,
    %c4_80 = arith.constant 4 : index
    %c0_81 = arith.constant 0 : index
    %c0_82 = arith.constant 0 : index
    %65 = vector.load %arg2[%c4_80, %c0_81, %c0_82] : memref<9x256x256xf32, #tpu.memory_space<vmem>>, vector<1x256x256xf32>
    %66 = vector.shape_cast %65 : vector<1x256x256xf32> to vector<256x256xf32>
    %cst_83 = arith.constant dense<0.000000e+00> : vector<8x256xf32>
    %67 = tpu.matmul %48, %66, %cst_83 {dimension_numbers = #tpu.dot_dimension_numbers<[1], [0], [0], [1], [0, 0, 1, 1], [], []>} : vector<8x256xf32>, vector<256x256xf32>, vector<8x256xf32> -> vector<8x256xf32>
    %c64_84 = arith.constant 64 : index
    %c0_85 = arith.constant 0 : index
    %68 = vector.load %arg9[%c64_84, %c0_85] : memref<144x256xf32, #tpu.memory_space<vmem>>, vector<8x256xf32>
    tpu.vector_store %arg9[%c64_84, %c0_85], %67 {strides = array<i32>} : memref<144x256xf32, #tpu.memory_space<vmem>>, vector<8x256xf32>,
    %c5_86 = arith.constant 5 : index
    %c0_87 = arith.constant 0 : index
    %c0_88 = arith.constant 0 : index
    %69 = vector.load %arg2[%c5_86, %c0_87, %c0_88] : memref<9x256x256xf32, #tpu.memory_space<vmem>>, vector<1x256x256xf32>
    %70 = vector.shape_cast %69 : vector<1x256x256xf32> to vector<256x256xf32>
    %cst_89 = arith.constant dense<0.000000e+00> : vector<8x256xf32>
    %71 = tpu.matmul %48, %70, %cst_89 {dimension_numbers = #tpu.dot_dimension_numbers<[1], [0], [0], [1], [0, 0, 1, 1], [], []>} : vector<8x256xf32>, vector<256x256xf32>, vector<8x256xf32> -> vector<8x256xf32>
    %c80_90 = arith.constant 80 : index
    %c0_91 = arith.constant 0 : index
    %72 = vector.load %arg9[%c80_90, %c0_91] : memref<144x256xf32, #tpu.memory_space<vmem>>, vector<8x256xf32>
    tpu.vector_store %arg9[%c80_90, %c0_91], %71 {strides = array<i32>} : memref<144x256xf32, #tpu.memory_space<vmem>>, vector<8x256xf32>,
    %c6_92 = arith.constant 6 : index
    %c0_93 = arith.constant 0 : index
    %c0_94 = arith.constant 0 : index
    %73 = vector.load %arg2[%c6_92, %c0_93, %c0_94] : memref<9x256x256xf32, #tpu.memory_space<vmem>>, vector<1x256x256xf32>
    %74 = vector.shape_cast %73 : vector<1x256x256xf32> to vector<256x256xf32>
    %cst_95 = arith.constant dense<0.000000e+00> : vector<8x256xf32>
    %75 = tpu.matmul %48, %74, %cst_95 {dimension_numbers = #tpu.dot_dimension_numbers<[1], [0], [0], [1], [0, 0, 1, 1], [], []>} : vector<8x256xf32>, vector<256x256xf32>, vector<8x256xf32> -> vector<8x256xf32>
    %c96_96 = arith.constant 96 : index
    %c0_97 = arith.constant 0 : index
    %76 = vector.load %arg9[%c96_96, %c0_97] : memref<144x256xf32, #tpu.memory_space<vmem>>, vector<8x256xf32>
    tpu.vector_store %arg9[%c96_96, %c0_97], %75 {strides = array<i32>} : memref<144x256xf32, #tpu.memory_space<vmem>>, vector<8x256xf32>,
    %c7_98 = arith.constant 7 : index
    %c0_99 = arith.constant 0 : index
    %c0_100 = arith.constant 0 : index
    %77 = vector.load %arg2[%c7_98, %c0_99, %c0_100] : memref<9x256x256xf32, #tpu.memory_space<vmem>>, vector<1x256x256xf32>
    %78 = vector.shape_cast %77 : vector<1x256x256xf32> to vector<256x256xf32>
    %cst_101 = arith.constant dense<0.000000e+00> : vector<8x256xf32>
    %79 = tpu.matmul %48, %78, %cst_101 {dimension_numbers = #tpu.dot_dimension_numbers<[1], [0], [0], [1], [0, 0, 1, 1], [], []>} : vector<8x256xf32>, vector<256x256xf32>, vector<8x256xf32> -> vector<8x256xf32>
    %c112_102 = arith.constant 112 : index
    %c0_103 = arith.constant 0 : index
    %80 = vector.load %arg9[%c112_102, %c0_103] : memref<144x256xf32, #tpu.memory_space<vmem>>, vector<8x256xf32>
    tpu.vector_store %arg9[%c112_102, %c0_103], %79 {strides = array<i32>} : memref<144x256xf32, #tpu.memory_space<vmem>>, vector<8x256xf32>,
    %c8_104 = arith.constant 8 : index
    %c0_105 = arith.constant 0 : index
    %c0_106 = arith.constant 0 : index
    %81 = vector.load %arg2[%c8_104, %c0_105, %c0_106] : memref<9x256x256xf32, #tpu.memory_space<vmem>>, vector<1x256x256xf32>
    %82 = vector.shape_cast %81 : vector<1x256x256xf32> to vector<256x256xf32>
    %cst_107 = arith.constant dense<0.000000e+00> : vector<8x256xf32>
    %83 = tpu.matmul %48, %82, %cst_107 {dimension_numbers = #tpu.dot_dimension_numbers<[1], [0], [0], [1], [0, 0, 1, 1], [], []>} : vector<8x256xf32>, vector<256x256xf32>, vector<8x256xf32> -> vector<8x256xf32>
    %c128_108 = arith.constant 128 : index
    %c0_109 = arith.constant 0 : index
    %84 = vector.load %arg9[%c128_108, %c0_109] : memref<144x256xf32, #tpu.memory_space<vmem>>, vector<8x256xf32>
    tpu.vector_store %arg9[%c128_108, %c0_109], %83 {strides = array<i32>} : memref<144x256xf32, #tpu.memory_space<vmem>>, vector<8x256xf32>,
    %c0_110 = arith.constant 0 : index
    %c0_111 = arith.constant 0 : index
    %85 = vector.load %arg4[%c0_110, %c0_111] : memref<4x144xf32, #tpu.memory_space<vmem>>, vector<4x144xf32>
    %c0_112 = arith.constant 0 : index
    %c0_113 = arith.constant 0 : index
    %86 = vector.load %arg9[%c0_112, %c0_113] : memref<144x256xf32, #tpu.memory_space<vmem>>, vector<144x256xf32>
    %cst_114 = arith.constant dense<0.000000e+00> : vector<4x256xf32>
    %87 = tpu.matmul %85, %86, %cst_114 {dimension_numbers = #tpu.dot_dimension_numbers<[1], [0], [0], [1], [0, 0, 1, 1], [], []>} : vector<4x144xf32>, vector<144x256xf32>, vector<4x256xf32> -> vector<4x256xf32>
    %cst_115 = arith.constant 0.000000e+00 : f32
    %88 = vector.broadcast %cst_115 : f32 to vector<4x256xf32>
    %89 = arith.maximumf %87, %88 : vector<4x256xf32>
    %c8_116 = arith.constant 8 : index
    %c0_117 = arith.constant 0 : index
    %90 = vector.load %arg8[%c8_116, %c0_117] : memref<16x256xf32, #tpu.memory_space<vmem>>, vector<4x256xf32>
    tpu.vector_store %arg8[%c8_116, %c0_117], %89 {strides = array<i32>} : memref<16x256xf32, #tpu.memory_space<vmem>>, vector<4x256xf32>,
    %c0_118 = arith.constant 0 : index
    %c0_119 = arith.constant 0 : index
    %91 = vector.load %arg8[%c0_118, %c0_119] : memref<16x256xf32, #tpu.memory_space<vmem>>, vector<12x256xf32>
    %c0_120 = arith.constant 0 : index
    %c0_121 = arith.constant 0 : index
    %c0_122 = arith.constant 0 : index
    %92 = vector.load %arg2[%c0_120, %c0_121, %c0_122] : memref<9x256x256xf32, #tpu.memory_space<vmem>>, vector<1x256x256xf32>
    %93 = vector.shape_cast %92 : vector<1x256x256xf32> to vector<256x256xf32>
    %cst_123 = arith.constant dense<0.000000e+00> : vector<12x256xf32>
    %94 = tpu.matmul %91, %93, %cst_123 {dimension_numbers = #tpu.dot_dimension_numbers<[1], [0], [0], [1], [0, 0, 1, 1], [], []>} : vector<12x256xf32>, vector<256x256xf32>, vector<12x256xf32> -> vector<12x256xf32>
    %c0_124 = arith.constant 0 : index
    %c0_125 = arith.constant 0 : index
    %95 = vector.load %arg9[%c0_124, %c0_125] : memref<144x256xf32, #tpu.memory_space<vmem>>, vector<12x256xf32>
    tpu.vector_store %arg9[%c0_124, %c0_125], %94 {strides = array<i32>} : memref<144x256xf32, #tpu.memory_space<vmem>>, vector<12x256xf32>,
    %c1_126 = arith.constant 1 : index
    %c0_127 = arith.constant 0 : index
    %c0_128 = arith.constant 0 : index
    %96 = vector.load %arg2[%c1_126, %c0_127, %c0_128] : memref<9x256x256xf32, #tpu.memory_space<vmem>>, vector<1x256x256xf32>
    %97 = vector.shape_cast %96 : vector<1x256x256xf32> to vector<256x256xf32>
    %cst_129 = arith.constant dense<0.000000e+00> : vector<12x256xf32>
    %98 = tpu.matmul %91, %97, %cst_129 {dimension_numbers = #tpu.dot_dimension_numbers<[1], [0], [0], [1], [0, 0, 1, 1], [], []>} : vector<12x256xf32>, vector<256x256xf32>, vector<12x256xf32> -> vector<12x256xf32>
    %c16_130 = arith.constant 16 : index
    %c0_131 = arith.constant 0 : index
    %99 = vector.load %arg9[%c16_130, %c0_131] : memref<144x256xf32, #tpu.memory_space<vmem>>, vector<12x256xf32>
    tpu.vector_store %arg9[%c16_130, %c0_131], %98 {strides = array<i32>} : memref<144x256xf32, #tpu.memory_space<vmem>>, vector<12x256xf32>,
    %c2_132 = arith.constant 2 : index
    %c0_133 = arith.constant 0 : index
    %c0_134 = arith.constant 0 : index
    %100 = vector.load %arg2[%c2_132, %c0_133, %c0_134] : memref<9x256x256xf32, #tpu.memory_space<vmem>>, vector<1x256x256xf32>
    %101 = vector.shape_cast %100 : vector<1x256x256xf32> to vector<256x256xf32>
    %cst_135 = arith.constant dense<0.000000e+00> : vector<12x256xf32>
    %102 = tpu.matmul %91, %101, %cst_135 {dimension_numbers = #tpu.dot_dimension_numbers<[1], [0], [0], [1], [0, 0, 1, 1], [], []>} : vector<12x256xf32>, vector<256x256xf32>, vector<12x256xf32> -> vector<12x256xf32>
    %c32_136 = arith.constant 32 : index
    %c0_137 = arith.constant 0 : index
    %103 = vector.load %arg9[%c32_136, %c0_137] : memref<144x256xf32, #tpu.memory_space<vmem>>, vector<12x256xf32>
    tpu.vector_store %arg9[%c32_136, %c0_137], %102 {strides = array<i32>} : memref<144x256xf32, #tpu.memory_space<vmem>>, vector<12x256xf32>,
    %c3_138 = arith.constant 3 : index
    %c0_139 = arith.constant 0 : index
    %c0_140 = arith.constant 0 : index
    %104 = vector.load %arg2[%c3_138, %c0_139, %c0_140] : memref<9x256x256xf32, #tpu.memory_space<vmem>>, vector<1x256x256xf32>
    %105 = vector.shape_cast %104 : vector<1x256x256xf32> to vector<256x256xf32>
    %cst_141 = arith.constant dense<0.000000e+00> : vector<12x256xf32>
    %106 = tpu.matmul %91, %105, %cst_141 {dimension_numbers = #tpu.dot_dimension_numbers<[1], [0], [0], [1], [0, 0, 1, 1], [], []>} : vector<12x256xf32>, vector<256x256xf32>, vector<12x256xf32> -> vector<12x256xf32>
    %c48_142 = arith.constant 48 : index
    %c0_143 = arith.constant 0 : index
    %107 = vector.load %arg9[%c48_142, %c0_143] : memref<144x256xf32, #tpu.memory_space<vmem>>, vector<12x256xf32>
    tpu.vector_store %arg9[%c48_142, %c0_143], %106 {strides = array<i32>} : memref<144x256xf32, #tpu.memory_space<vmem>>, vector<12x256xf32>,
    %c4_144 = arith.constant 4 : index
    %c0_145 = arith.constant 0 : index
    %c0_146 = arith.constant 0 : index
    %108 = vector.load %arg2[%c4_144, %c0_145, %c0_146] : memref<9x256x256xf32, #tpu.memory_space<vmem>>, vector<1x256x256xf32>
    %109 = vector.shape_cast %108 : vector<1x256x256xf32> to vector<256x256xf32>
    %cst_147 = arith.constant dense<0.000000e+00> : vector<12x256xf32>
    %110 = tpu.matmul %91, %109, %cst_147 {dimension_numbers = #tpu.dot_dimension_numbers<[1], [0], [0], [1], [0, 0, 1, 1], [], []>} : vector<12x256xf32>, vector<256x256xf32>, vector<12x256xf32> -> vector<12x256xf32>
    %c64_148 = arith.constant 64 : index
    %c0_149 = arith.constant 0 : index
    %111 = vector.load %arg9[%c64_148, %c0_149] : memref<144x256xf32, #tpu.memory_space<vmem>>, vector<12x256xf32>
    tpu.vector_store %arg9[%c64_148, %c0_149], %110 {strides = array<i32>} : memref<144x256xf32, #tpu.memory_space<vmem>>, vector<12x256xf32>,
    %c5_150 = arith.constant 5 : index
    %c0_151 = arith.constant 0 : index
    %c0_152 = arith.constant 0 : index
    %112 = vector.load %arg2[%c5_150, %c0_151, %c0_152] : memref<9x256x256xf32, #tpu.memory_space<vmem>>, vector<1x256x256xf32>
    %113 = vector.shape_cast %112 : vector<1x256x256xf32> to vector<256x256xf32>
    %cst_153 = arith.constant dense<0.000000e+00> : vector<12x256xf32>
    %114 = tpu.matmul %91, %113, %cst_153 {dimension_numbers = #tpu.dot_dimension_numbers<[1], [0], [0], [1], [0, 0, 1, 1], [], []>} : vector<12x256xf32>, vector<256x256xf32>, vector<12x256xf32> -> vector<12x256xf32>
    %c80_154 = arith.constant 80 : index
    %c0_155 = arith.constant 0 : index
    %115 = vector.load %arg9[%c80_154, %c0_155] : memref<144x256xf32, #tpu.memory_space<vmem>>, vector<12x256xf32>
    tpu.vector_store %arg9[%c80_154, %c0_155], %114 {strides = array<i32>} : memref<144x256xf32, #tpu.memory_space<vmem>>, vector<12x256xf32>,
    %c6_156 = arith.constant 6 : index
    %c0_157 = arith.constant 0 : index
    %c0_158 = arith.constant 0 : index
    %116 = vector.load %arg2[%c6_156, %c0_157, %c0_158] : memref<9x256x256xf32, #tpu.memory_space<vmem>>, vector<1x256x256xf32>
    %117 = vector.shape_cast %116 : vector<1x256x256xf32> to vector<256x256xf32>
    %cst_159 = arith.constant dense<0.000000e+00> : vector<12x256xf32>
    %118 = tpu.matmul %91, %117, %cst_159 {dimension_numbers = #tpu.dot_dimension_numbers<[1], [0], [0], [1], [0, 0, 1, 1], [], []>} : vector<12x256xf32>, vector<256x256xf32>, vector<12x256xf32> -> vector<12x256xf32>
    %c96_160 = arith.constant 96 : index
    %c0_161 = arith.constant 0 : index
    %119 = vector.load %arg9[%c96_160, %c0_161] : memref<144x256xf32, #tpu.memory_space<vmem>>, vector<12x256xf32>
    tpu.vector_store %arg9[%c96_160, %c0_161], %118 {strides = array<i32>} : memref<144x256xf32, #tpu.memory_space<vmem>>, vector<12x256xf32>,
    %c7_162 = arith.constant 7 : index
    %c0_163 = arith.constant 0 : index
    %c0_164 = arith.constant 0 : index
    %120 = vector.load %arg2[%c7_162, %c0_163, %c0_164] : memref<9x256x256xf32, #tpu.memory_space<vmem>>, vector<1x256x256xf32>
    %121 = vector.shape_cast %120 : vector<1x256x256xf32> to vector<256x256xf32>
    %cst_165 = arith.constant dense<0.000000e+00> : vector<12x256xf32>
    %122 = tpu.matmul %91, %121, %cst_165 {dimension_numbers = #tpu.dot_dimension_numbers<[1], [0], [0], [1], [0, 0, 1, 1], [], []>} : vector<12x256xf32>, vector<256x256xf32>, vector<12x256xf32> -> vector<12x256xf32>
    %c112_166 = arith.constant 112 : index
    %c0_167 = arith.constant 0 : index
    %123 = vector.load %arg9[%c112_166, %c0_167] : memref<144x256xf32, #tpu.memory_space<vmem>>, vector<12x256xf32>
    tpu.vector_store %arg9[%c112_166, %c0_167], %122 {strides = array<i32>} : memref<144x256xf32, #tpu.memory_space<vmem>>, vector<12x256xf32>,
    %c8_168 = arith.constant 8 : index
    %c0_169 = arith.constant 0 : index
    %c0_170 = arith.constant 0 : index
    %124 = vector.load %arg2[%c8_168, %c0_169, %c0_170] : memref<9x256x256xf32, #tpu.memory_space<vmem>>, vector<1x256x256xf32>
    %125 = vector.shape_cast %124 : vector<1x256x256xf32> to vector<256x256xf32>
    %cst_171 = arith.constant dense<0.000000e+00> : vector<12x256xf32>
    %126 = tpu.matmul %91, %125, %cst_171 {dimension_numbers = #tpu.dot_dimension_numbers<[1], [0], [0], [1], [0, 0, 1, 1], [], []>} : vector<12x256xf32>, vector<256x256xf32>, vector<12x256xf32> -> vector<12x256xf32>
    %c128_172 = arith.constant 128 : index
    %c0_173 = arith.constant 0 : index
    %127 = vector.load %arg9[%c128_172, %c0_173] : memref<144x256xf32, #tpu.memory_space<vmem>>, vector<12x256xf32>
    tpu.vector_store %arg9[%c128_172, %c0_173], %126 {strides = array<i32>} : memref<144x256xf32, #tpu.memory_space<vmem>>, vector<12x256xf32>,
    %c0_174 = arith.constant 0 : index
    %c0_175 = arith.constant 0 : index
    %128 = vector.load %arg5[%c0_174, %c0_175] : memref<4x144xf32, #tpu.memory_space<vmem>>, vector<4x144xf32>
    %c0_176 = arith.constant 0 : index
    %c0_177 = arith.constant 0 : index
    %129 = vector.load %arg9[%c0_176, %c0_177] : memref<144x256xf32, #tpu.memory_space<vmem>>, vector<144x256xf32>
    %cst_178 = arith.constant dense<0.000000e+00> : vector<4x256xf32>
    %130 = tpu.matmul %128, %129, %cst_178 {dimension_numbers = #tpu.dot_dimension_numbers<[1], [0], [0], [1], [0, 0, 1, 1], [], []>} : vector<4x144xf32>, vector<144x256xf32>, vector<4x256xf32> -> vector<4x256xf32>
    %cst_179 = arith.constant 0.000000e+00 : f32
    %131 = vector.broadcast %cst_179 : f32 to vector<4x256xf32>
    %132 = arith.maximumf %130, %131 : vector<4x256xf32>
    %c12 = arith.constant 12 : index
    %c0_180 = arith.constant 0 : index
    %133 = vector.load %arg8[%c12, %c0_180] : memref<16x256xf32, #tpu.memory_space<vmem>>, vector<4x256xf32>
    tpu.vector_store %arg8[%c12, %c0_180], %132 {strides = array<i32>} : memref<16x256xf32, #tpu.memory_space<vmem>>, vector<4x256xf32>,
    %c0_181 = arith.constant 0 : index
    %c0_182 = arith.constant 0 : index
    %134 = vector.load %arg8[%c0_181, %c0_182] : memref<16x256xf32, #tpu.memory_space<vmem>>, vector<16x256xf32>
    %c0_183 = arith.constant 0 : index
    %c0_184 = arith.constant 0 : index
    %135 = vector.load %arg6[%c0_183, %c0_184] : memref<4x16xf32, #tpu.memory_space<vmem>>, vector<4x16xf32>
    %cst_185 = arith.constant dense<0.000000e+00> : vector<4x256xf32>
    %136 = tpu.matmul %135, %134, %cst_185 {dimension_numbers = #tpu.dot_dimension_numbers<[1], [0], [0], [1], [0, 0, 1, 1], [], []>} : vector<4x16xf32>, vector<16x256xf32>, vector<4x256xf32> -> vector<4x256xf32>
    %137 = vector.extract_strided_slice %134 {offsets = [0, 0], sizes = [4, 256], strides = [1, 1]} : vector<16x256xf32> to vector<4x256xf32>
    %138 = arith.addf %136, %137 : vector<4x256xf32>
    %139 = vector.shape_cast %138 : vector<4x256xf32> to vector<1x4x256xf32>
    %c0_186 = arith.constant 0 : index
    %c0_187 = arith.constant 0 : index
    %c0_188 = arith.constant 0 : index
    %140 = vector.load %arg7[%c0_186, %c0_187, %c0_188] : memref<1x4x256xf32, #tpu.memory_space<vmem>>, vector<1x4x256xf32>
    tpu.vector_store %arg7[%c0_186, %c0_187, %c0_188], %139 {strides = array<i32>} : memref<1x4x256xf32, #tpu.memory_space<vmem>>, vector<1x4x256xf32>,
    return
  }
  func.func @transform_0(%arg0: i32) -> (i32, i32, i32) {
    %c0_i32 = arith.constant 0 : i32
    %c0_i32_0 = arith.constant 0 : i32
    %c0_i32_1 = arith.constant 0 : i32
    return %arg0, %c0_i32, %c0_i32_0 : i32, i32, i32
  }
  func.func @transform_1(%arg0: i32) -> (i32, i32, i32) {
    %c0_i32 = arith.constant 0 : i32
    %c0_i32_0 = arith.constant 0 : i32
    %c0_i32_1 = arith.constant 0 : i32
    %c0_i32_2 = arith.constant 0 : i32
    return %c0_i32, %c0_i32_0, %c0_i32_1 : i32, i32, i32
  }
  func.func @transform_2(%arg0: i32) -> (i32, i32) {
    %c0_i32 = arith.constant 0 : i32
    %c0_i32_0 = arith.constant 0 : i32
    %c0_i32_1 = arith.constant 0 : i32
    return %c0_i32, %c0_i32_0 : i32, i32
  }
  func.func @transform_3(%arg0: i32) -> (i32, i32) {
    %c0_i32 = arith.constant 0 : i32
    %c0_i32_0 = arith.constant 0 : i32
    %c0_i32_1 = arith.constant 0 : i32
    return %c0_i32, %c0_i32_0 : i32, i32
  }
  func.func @transform_4(%arg0: i32) -> (i32, i32) {
    %c0_i32 = arith.constant 0 : i32
    %c0_i32_0 = arith.constant 0 : i32
    %c0_i32_1 = arith.constant 0 : i32
    return %c0_i32, %c0_i32_0 : i32, i32
  }
  func.func @transform_5(%arg0: i32) -> (i32, i32) {
    %c0_i32 = arith.constant 0 : i32
    %c0_i32_0 = arith.constant 0 : i32
    %c0_i32_1 = arith.constant 0 : i32
    return %c0_i32, %c0_i32_0 : i32, i32
  }
  func.func @transform_6(%arg0: i32) -> (i32, i32, i32) {
    %c0_i32 = arith.constant 0 : i32
    %c0_i32_0 = arith.constant 0 : i32
    %c0_i32_1 = arith.constant 0 : i32
    return %arg0, %c0_i32, %c0_i32_0 : i32, i32, i32
  }
}

</mosaic_0001>

<bundles_post_ra>
// kernel: tpu_custom_call.1
= control target key start
LH: loop header
LB: loop body
LE: loop exit
PB: predicated region body
PF: predicated region fallthrough
CT: control target
= control target key end

     0   :  { %11 = vsyncpa [#allocation5], 0  ;;  %s7501_s0 = inlined_call_operand.hbm [shape: f32[2,4,256], index: 0, kind: input, shape index: {}]   ;;  %s7502_s1 = inlined_call_operand.hbm [shape: f32[9,256,256], index: 1, kind: input, shape index: {}]   ;;  %s7503_s2 = inlined_call_operand.hbm [shape: f32[4,144], index: 2, kind: input, shape index: {}]   ;;  %s7504_s3 = inlined_call_operand.hbm [shape: f32[4,144], index: 3, kind: input, shape index: {}]   ;;  %s7505_s4 = inlined_call_operand.hbm [shape: f32[4,144], index: 4, kind: input, shape index: {}]   ;;  %s7506_s5 = inlined_call_operand.hbm [shape: f32[4,16], index: 5, kind: input, shape index: {}]   ;;  %s7507_s6 = inlined_call_operand.hbm [shape: f32[2,4,256], index: 6, kind: output, shape index: {}]  }
   0x1   :  { %13 = vsyncpa [#allocation5 + $0x1], 0 }
   0x2   :  { %14 = vsyncpa [#allocation8], 0 }
   0x3   :  { %15 = vsyncpa [#allocation11], 0 }
   0x4   :  { %16 = vsyncpa [#allocation14], 0 }
   0x5   :  { %17 = vsyncpa [#allocation6], 0 }
   0x6   :  { %19 = vsyncpa [#allocation6 + $0x1], 0  ;;  %s7020_s21 = smov 0   ;;  %s7022_s22 = smov 0  }
   0x7   :  { %s7024_s23 = smov 0   ;;  %s7026_s24 = smov 0  }
   0x8 LB: > { %s6975_s25 = smov [#allocation7]   ;;  %s7041_s27 = sadd.s32 4294967295, %s6973_s24   ;;  %s6973_s24 = sphi %s7026_s24, %s7532_s24   ;;  %s6969_s23 = sphi %s7024_s23, %s7531_s23   ;;  %s6965_s22 = sphi %s7022_s22, %s7530_s22   ;;  %s6961_s21 = sphi %s7020_s21, %s7529_s21  }
   0x9   : > { %s199_s26 = sshll.u32 %s6975_s25, 4  ;;  %p4741_p0 = scmp.ge.s32.totalorder %s6973_s24, 1  ;;  %s7046_s26 = int_to_ptr.vmem [resolvable:$true] %s199_s26 }
   0xa   : > { %p7508_p1 = scmp.eq.s32.totalorder %s7041_s27, 0  ;;  %p187_p2 = scmp.lt.s32.totalorder %s6973_s24, 3 }
   0xb   : > { %s6976_s29 = smov [#allocation10]   ;;  %s6977_s8 = smov [#allocation9]  }
   0xc   : > { %p7048_p3 = pnand %p4741_p0, %p187_p2  ;;  %s224_s30 = sshll.u32 %s6976_s29, 4  ;;  %s7061_s30 = int_to_ptr.vmem [resolvable:$true] %s224_s30 }
   0xd   : > { %s213_s9 = sshll.u32 %s6977_s8, 4  ;;  %s6725_s12 = scalar_lea.hbm %s7502_s1, 73728  ;;  %s7063_s9 = int_to_ptr.vmem [resolvable:$true] %s213_s9 }
   0xe   : > { %s7511_s28 = scalar_select %p7048_p3, 1, 0 }
   0xf   : > { %p6634_p5 = pneg %p7048_p3  ;;  %p6726_p7 = scmp.ne.s32.totalorder %s7502_s1, %s6725_s12 }
  0x10   : > { %p6732_p11 = scmp.lt.u32.totalorder %s6725_s12, %s7502_s1 }
  0x11   : > { %p7057_p6 = pnand %p6634_p5, %p7508_p1 }
  0x13   : > { %p7073_p8 = pneg %p7057_p6 }
  0x15   : > { %p6728_p9 = pnand %p7073_p8, %p6726_p7 }
  0x17   : > { %p6729_p10 = pneg %p6728_p9 }
  0x19   : > { %p6734_p12 = pnand %p6732_p11, %p6729_p10 }
  0x1b   : > { %6737 = shalt.err (!%p6734_p12)
}
  0x1c   : > { %s6738_s18 = scalar_lea.vmem %s7046_s26, 73728  ;;  %p6746_p5 = scmp.lt.s32.totalorder %s7046_s26, %s7046_s26 }
  0x1d   : > { %p6739_p13 = scmp.ne.s32.totalorder %s7046_s26, %s6738_s18  ;;  %p6747_p4 = scmp.lt.s32.totalorder %s6738_s18, %s6738_s18 }
  0x1f   : > { %p6741_p0 = pnand %p6739_p13, %p7073_p8  ;;  %p6748_p7 = por %p6747_p4, %p6746_p5 }
  0x21   : > { %p6742_p2 = pneg %p6741_p0 }
  0x23   : > { %p6749_p9 = pnand %p6748_p7, %p6742_p2 }
  0x25   : > { %6752 = shalt.err (!%p6749_p9)
}
  0x26   : > { %s6978_s19 = smov 256   ;;  %s6979_s20 = smov 16  }
  0x27   : > { %6637 = dma.hbm_to_vmem [thread:$0]  (!%p7057_p6), %s7502_s1, 73728, %s7046_s26, [#allocation8], %s6978_s19, %s6978_s19, %s6979_s20  }
  0x28   : > { %s6753_s11 = scalar_lea.hbm %s7504_s3, 128 }
  0x29   : > { %p6754_p4 = scmp.ne.s32.totalorder %s7504_s3, %s6753_s11  ;;  %p6760_p12 = scmp.lt.u32.totalorder %s6753_s11, %s7504_s3 }
  0x2b   : > { %p6756_p10 = pnand %p6754_p4, %p7073_p8 }
  0x2d   : > { %p6757_p11 = pneg %p6756_p10 }
  0x2f   : > { %p6762_p13 = pnand %p6760_p12, %p6757_p11 }
  0x31   : > { %6765 = shalt.err (!%p6762_p13)
}
  0x32   : > { %s6766_s26 = scalar_lea.vmem %s7061_s30, 128  ;;  %p6774_p7 = scmp.lt.s32.totalorder %s7061_s30, %s7061_s30 }
  0x33   : > { %p6767_p0 = scmp.ne.s32.totalorder %s7061_s30, %s6766_s26  ;;  %p6775_p9 = scmp.lt.s32.totalorder %s6766_s26, %s6766_s26 }
  0x35   : > { %p6769_p2 = pnand %p6767_p0, %p7073_p8  ;;  %p6776_p4 = por %p6775_p9, %p6774_p7 }
  0x37   : > { %p6770_p5 = pneg %p6769_p2 }
  0x39   : > { %p6777_p10 = pnand %p6776_p4, %p6770_p5 }
  0x3b   : > { %6780 = shalt.err (!%p6777_p10)
}
  0x3c   : > { %6643 = dma.hbm_to_vmem [thread:$0]  (!%p7057_p6), %s7504_s3, 128, %s7061_s30, [#allocation11]  }
  0x3d   : > { %s6781_s25 = scalar_lea.hbm %s7503_s2, 128 }
  0x3e   : > { %p6782_p11 = scmp.ne.s32.totalorder %s7503_s2, %s6781_s25  ;;  %p6788_p0 = scmp.lt.u32.totalorder %s6781_s25, %s7503_s2 }
  0x40   : > { %p6784_p12 = pnand %p6782_p11, %p7073_p8 }
  0x42   : > { %p6785_p13 = pneg %p6784_p12 }
  0x44   : > { %p6790_p2 = pnand %p6788_p0, %p6785_p13 }
  0x46   : > { %6793 = shalt.err (!%p6790_p2)
}
  0x47   : > { %s6794_s30 = scalar_lea.vmem %s7063_s9, 128  ;;  %p6802_p4 = scmp.lt.s32.totalorder %s7063_s9, %s7063_s9 }
  0x48   : > { %p6795_p5 = scmp.ne.s32.totalorder %s7063_s9, %s6794_s30  ;;  %p6803_p10 = scmp.lt.s32.totalorder %s6794_s30, %s6794_s30 }
  0x4a   : > { %p6797_p7 = pnand %p6795_p5, %p7073_p8  ;;  %p6804_p11 = por %p6803_p10, %p6802_p4 }
  0x4c   : > { %p6798_p9 = pneg %p6797_p7 }
  0x4e   : > { %p6805_p12 = pnand %p6804_p11, %p6798_p9 }
  0x50   : > { %6808 = shalt.err (!%p6805_p12)
}
  0x51   : > { %6640 = dma.hbm_to_vmem [thread:$0]  (!%p7057_p6), %s7503_s2, 128, %s7063_s9, [#allocation8]  }
  0x52   : > { %s6980_s14 = smov [#allocation12]   ;;  %s6981_s26 = smov [#allocation13]  }
  0x53   : > { %s235_s16 = sshll.u32 %s6980_s14, 4  ;;  %s246_s17 = sshll.u32 %s6981_s26, 4  ;;  %s236_s16 = int_to_ptr.vmem [resolvable:$true] %s235_s16  ;;  %s247_s17 = int_to_ptr.vmem [resolvable:$true] %s246_s17 }
  0x54   : > { %s6809_s20 = scalar_lea.hbm %s7505_s4, 128 }
  0x55   : > { %p6810_p13 = scmp.ne.s32.totalorder %s7505_s4, %s6809_s20  ;;  %p6816_p5 = scmp.lt.u32.totalorder %s6809_s20, %s7505_s4 }
  0x57   : > { %p6812_p0 = pnand %p6810_p13, %p7073_p8 }
  0x59   : > { %p6813_p2 = pneg %p6812_p0 }
  0x5b   : > { %p6818_p7 = pnand %p6816_p5, %p6813_p2 }
  0x5d   : > { %6821 = shalt.err (!%p6818_p7)
}
  0x5e   : > { %s6822_s9 = scalar_lea.vmem %s236_s16, 128  ;;  %p6830_p11 = scmp.lt.s32.totalorder %s236_s16, %s236_s16 }
  0x5f   : > { %p6823_p9 = scmp.ne.s32.totalorder %s236_s16, %s6822_s9  ;;  %p6831_p12 = scmp.lt.s32.totalorder %s6822_s9, %s6822_s9 }
  0x61   : > { %p6825_p4 = pnand %p6823_p9, %p7073_p8  ;;  %p6832_p1 = por %p6831_p12, %p6830_p11 }
  0x63   : > { %p6826_p10 = pneg %p6825_p4 }
  0x65   : > { %p6833_p3 = pnand %p6832_p1, %p6826_p10 }
  0x67   : > { %6836 = shalt.err (!%p6833_p3)
}
  0x68   : > { %6646 = dma.hbm_to_vmem [thread:$0]  (!%p7057_p6), %s7505_s4, 128, %s236_s16, [#allocation11]  }
  0x69   : > { %s6837_s14 = scalar_lea.hbm %s7506_s5, 64 }
  0x6a   : > { %p6838_p13 = scmp.ne.s32.totalorder %s7506_s5, %s6837_s14  ;;  %p6844_p3 = scmp.lt.u32.totalorder %s6837_s14, %s7506_s5 }
  0x6c   : > { %p6840_p0 = pnand %p6838_p13, %p7073_p8 }
  0x6e   : > { %p6841_p1 = pneg %p6840_p0 }
  0x70   : > { %p6846_p2 = pnand %p6844_p3, %p6841_p1 }
  0x72   : > { %6849 = shalt.err (!%p6846_p2)
}
  0x73   : > { %s6850_s25 = scalar_lea.vmem %s247_s17, 64  ;;  %p6858_p4 = scmp.lt.s32.totalorder %s247_s17, %s247_s17 }
  0x74   : > { %p6851_p5 = scmp.ne.s32.totalorder %s247_s17, %s6850_s25  ;;  %p6859_p10 = scmp.lt.s32.totalorder %s6850_s25, %s6850_s25 }
  0x76   : > { %p6853_p7 = pnand %p6851_p5, %p7073_p8  ;;  %p6860_p11 = por %p6859_p10, %p6858_p4 }
  0x78   : > { %p6854_p9 = pneg %p6853_p7 }
  0x7a   : > { %p6861_p12 = pnand %p6860_p11, %p6854_p9 }
  0x7c   : > { %6864 = shalt.err (!%p6861_p12)
}
  0x7d   : > { %6649 = dma.hbm_to_vmem [thread:$0]  (!%p7057_p6), %s7506_s5, 64, %s247_s17, [#allocation14]  }
  0x7e   : > { %s4740_s15 = sadd.s32 4294967294, %s6973_s24   ;;  %s7178_s7 = sadd.s32 1, %s6973_s24  }
  0x7f   : > { %s32_s8 = sadd.s32 1, %s6969_s23  ;;  %s29_s10 = ssub.s32 %s6973_s24, %s7178_s7 }
  0x80   : > { %p39_p8 = scmp.ne.s32.totalorder %s6969_s23, %s6965_s22  ;;  %p30_p13 = scmp.eq.s32.totalorder %s29_s10, 0 }
  0x81   : > { %p40_p0 = scmp.eq.s32.totalorder %s6973_s24, 0  ;;  %p45_p1 = scmp.ne.s32.totalorder %s6965_s22, %s6961_s21 }
  0x82   : > { %p174_p3 = scmp.eq.s32.totalorder %s7041_s27, 1  ;;  %p7514_p5 = scmp.eq.s32.totalorder %s7041_s27, 0 }
  0x83   : > { %s7190_s9 = scalar_select %p30_p13, %s6969_s23, %s32_s8  }
  0x84   : > { %p41_p2 = por %p40_p0, %p39_p8  ;;  %p7194_p7 = por %p7514_p5, %p45_p1 }
  0x85   : > { %p7198_p6 = por %p174_p3, %p39_p8  ;;  %p180_p9 = scmp.eq.s32.totalorder %s4740_s15, 1 }
  0x86   : > { %p6663_p4 = scmp.lt.s32.totalorder %s6973_s24, 2  ;;  %s257_s30 = sand.u32 1, %s6969_s23  }
  0x87   : > { %s7516_s17 = scalar_select %p7198_p6, 1, 0 }
  0x88   : > { %p7204_p10 = por %p180_p9, %p45_p1  ;;  %s4748_s13 = sshll.u32 %s257_s30, 3 }
  0x89   : > { %s4768_s14 = sshll.u32 %s6973_s24, 7  ;;  %s261_s20 = scalar_lea.vmem [#allocation4], %s4748_s13 }
  0x8a   : > { %s7517_s12 = scalar_select %p7204_p10, 1, 0 }
  0x8b   : > { %s7212_s19 = scalar_lea.hbm %s7501_s0, %s4768_s14  ;;  %s269_s25 = sshll.u32 %s261_s20, 4  ;;  %s7218_s25 = int_to_ptr.vmem [resolvable:$true] %s269_s25 }
  0x8c   : > { %p7214_p11 = pnand %p6663_p4, %p41_p2  ;;  %s258_s29 = scalar_lea.sflag [#allocation5], %s257_s30 }
  0x8d   : > { %s6865_s15 = scalar_lea.hbm %s7212_s19, 128  ;;  %s6870_s13 = scalar_lea.hbm %s7501_s0, 256 }
  0x8e   : > { %p6866_p12 = scmp.ne.s32.totalorder %s7212_s19, %s6865_s15  ;;  %p6867_p8 = pneg %p7214_p11 }
  0x8f   : > { %p6871_p1 = scmp.lt.u32.totalorder %s7212_s19, %s7501_s0  ;;  %p6872_p3 = scmp.lt.u32.totalorder %s6870_s13, %s6865_s15 }
  0x90   : > { %p6868_p13 = pnand %p6867_p8, %p6866_p12  ;;  %p6874_p5 = scmp.lt.u32.totalorder %s6865_s15, %s7212_s19 }
  0x91   : > { %p6873_p2 = por %p6872_p3, %p6871_p1 }
  0x92   : > { %p6869_p0 = pneg %p6868_p13 }
  0x93   : > { %p6875_p9 = por %p6874_p5, %p6873_p2 }
  0x95   : > { %p6876_p4 = pnand %p6875_p9, %p6869_p0 }
  0x97   : > { %6879 = shalt.err (!%p6876_p4)
}
  0x98   : > { %s6880_s30 = scalar_lea.vmem %s7218_s25, 128  ;;  %s6982_s18 = smov [#allocation4]  }
  0x99   : > { %p6881_p12 = scmp.ne.s32.totalorder %s7218_s25, %s6880_s30  ;;  %s6885_s20 = sshll.u32 %s6982_s18, 4  ;;  %s6886_s20 = int_to_ptr.vmem [resolvable:$false] %s6885_s20 }
  0x9a   : > { %s6887_s8 = scalar_lea.vmem %s6886_s20, 256  ;;  %p6888_p6 = scmp.lt.s32.totalorder %s7218_s25, %s6886_s20 }
  0x9b   : > { %p6883_p13 = pnand %p6881_p12, %p6867_p8  ;;  %p6889_p1 = scmp.lt.s32.totalorder %s6887_s8, %s6880_s30 }
  0x9d   : > { %p6884_p10 = pneg %p6883_p13  ;;  %p6890_p3 = por %p6889_p1, %p6888_p6 }
  0x9f   : > { %p6891_p2 = pnand %p6890_p3, %p6884_p10 }
  0xa1   : > { %6894 = shalt.err (!%p6891_p2)
}
  0xa2   : > { %6653 = dma.hbm_to_vmem [thread:$0]  (!%p7214_p11), %s7212_s19, 128, %s7218_s25, %s258_s29  }
  0xa3   : > { %p7519_p0 = scmp.ne.s32.totalorder %s7511_s28, 0 }
  0xa4   : > { %s7248_s15 = sand.u32 (!%p7519_p0), 1, %s6965_s22  }
  0xa5   : > { %278 = sbr.rel (%p7519_p0) target bundleno = 2548 (0x9f4), region = 44  ;;  %s4752_s10 = sshll.u32 (!%p7519_p0), %s7248_s15, 3 }
  0xa6   : > { %s281_s13 = scalar_lea.sflag (!%p7519_p0), [#allocation5], %s7248_s15  ;;  %s7254_s14 = scalar_lea.vmem (!%p7519_p0), [#allocation4], %s4752_s10 }
  0xac   : > { %6940 = dma.done.wait (%p7194_p7), %s281_s13, 128  }
  0xad   : > { %6942 = vsyncadd (%p7194_p7), %s281_s13, 4294967168  ;;  %p7520_p6 = scmp.eq.s32.totalorder %s7041_s27, 0 }
  0xaf   : > { %6944 = dma.done.wait (%p7520_p6), [#allocation8], 73856   ;;  %p7521_p10 = pmov %p7520_p6 }
  0xb0   : > { %p7522_p11 = pmov %p7520_p6 }
  0xb1   : > { %6946 = vsyncadd (%p7521_p10), [#allocation8], 4294893440 }
  0xb2   : > { %6948 = dma.done.wait (%p7522_p11), [#allocation11], 256   ;;  %p7523_p8 = pmov %p7520_p6 }
  0xb3   : > { %p7524_p5 = pmov %p7520_p6 }
  0xb4   : > { %6950 = vsyncadd (%p7523_p8), [#allocation11], 4294967040 }
  0xb5   : > { %6952 = dma.done.wait (%p7524_p5), [#allocation14], 64   ;;  %p7525_p9 = pmov %p7524_p5 }
  0xb6   : > { %v378_v0 = vld [vmem:[#allocation7 + $0x8] sm:$0xff]  ;;  %v380_v1 = vld [vmem:[#allocation7 + $0x18] sm:$0xff]  ;;  %v377_v2 = vld [vmem:[#allocation7] sm:$0xff]  ;;  %vm1657_vm0 = vcmask 130048   ;;  %s4769_s28 = sshll.u32 %s7041_s27, 7  ;;  %s332_s11 = scalar_lea.vmem [#allocation15], %s4752_s10 }
  0xb7   : > { %6954 = vsyncadd (%p7525_p9), [#allocation14], 4294967232  ;;  %v4770_v3 = vpack.c.bf16 %v380_v1, %v378_v0  ;;  %v379_v4 = vld [vmem:[#allocation7 + $0x10] sm:$0xff]  ;;  %v382_v5 = vld [vmem:[#allocation7 + $0x28] sm:$0xff]  ;;  %s4622_s19 = sshll.u32 %s332_s11, 4  ;;  %s7457_s29 = scalar_lea.hbm %s7507_s6, %s4769_s28  ;;  %s7459_s19 = int_to_ptr.vmem [resolvable:$true] %s4622_s19 }
  0xb8   : > { %v384_v6 = vld [vmem:[#allocation7 + $0x38] sm:$0xff]  ;;  %v4772_v7 = vpack.c.bf16 %v379_v4, %v377_v2  ;;  %v381_v9 = vld [vmem:[#allocation7 + $0x20] sm:$0xff]  ;;  %v383_v10 = vld [vmem:[#allocation7 + $0x30] sm:$0xff]  ;;  %s4608_s26 = scalar_lea.sflag [#allocation6], %s7248_s15  ;;  %s6895_s30 = scalar_lea.vmem %s7459_s19, 128 }
  0xb9   : > { %v4774_v8 = vpack.c.bf16 %v384_v6, %v382_v5  ;;  %v386_v11 = vld [vmem:[#allocation7 + $0x48] sm:$0xff]  ;;  %4771 = vmatprep.subr.bf16.mxu0 %v4770_v3  ;;  %v388_v12 = vld [vmem:[#allocation7 + $0x58] sm:$0xff]  ;;  %v4776_v13 = vpack.c.bf16 %v383_v10, %v381_v9  ;;  %v385_v15 = vld [vmem:[#allocation7 + $0x40] sm:$0xff]  ;;  %p6896_p7 = scmp.ne.s32.totalorder %s7459_s19, %s6895_s30  ;;  %p7526_p4 = scmp.ne.s32.totalorder %s7516_s17, 0 }
  0xba   : > { %4773 = vmatpush1.bf16.msra.mxu0 %v4772_v7  ;;  %v4778_v14 = vpack.c.bf16 %v388_v12, %v386_v11  ;;  %v387_v16 = vld [vmem:[#allocation7 + $0x50] sm:$0xff]  ;;  %v390_v17 = vld [vmem:[#allocation7 + $0x68] sm:$0xff]  ;;  %v392_v18 = vld [vmem:[#allocation7 + $0x78] sm:$0xff]  ;;  %s6984_s27 = smov [#allocation15]  }
  0xbb   : > { %4775 = vmatprep.subr.bf16.mxu0 %v4774_v8  ;;  %v4780_v19 = vpack.c.bf16 %v387_v16, %v385_v15  ;;  %v4782_v20 = vpack.c.bf16 %v392_v18, %v390_v17  ;;  %v389_v21 = vld [vmem:[#allocation7 + $0x60] sm:$0xff]  ;;  %v391_v22 = vld [vmem:[#allocation7 + $0x70] sm:$0xff]  ;;  %v394_v23 = vld [vmem:[#allocation7 + $0x88] sm:$0xff]  ;;  %p6897_p12 = pnand %p6896_p7, %p7526_p4  ;;  %s6899_s18 = sshll.u32 %s6984_s27, 4  ;;  %s6900_s18 = int_to_ptr.vmem [resolvable:$false] %s6899_s18 }
  0xbc   : > { %v396_v24 = vld [vmem:[#allocation7 + $0x98] sm:$0xff]  ;;  %v516_v25 = vld [vmem:[#allocation7 + $0x208] sm:$0xff]  ;;  %v4784_v27 = vpack.c.bf16 %v391_v22, %v389_v21  ;;  %v393_v28 = vld [vmem:[#allocation7 + $0x80] sm:$0xff]  ;;  %s6901_s20 = scalar_lea.vmem %s6900_s18, 256  ;;  %p6902_p1 = scmp.lt.s32.totalorder %s7459_s19, %s6900_s18 }
  0xbd   : > { %v518_v26 = vld [vmem:[#allocation7 + $0x218] sm:$0xff]  ;;  %v515_v30 = vld [vmem:[#allocation7 + $0x200] sm:$0xff]  ;;  %v517_v31 = vld [vmem:[#allocation7 + $0x210] sm:$0xff]  ;;  %v4786_v32 = vpack.c.bf16 %v396_v24, %v394_v23  ;;  %p6898_p13 = pneg %p6897_p12  ;;  %p6903_p3 = scmp.lt.s32.totalorder %s6901_s20, %s6895_s30 }
  0xbe   : > { %4777 = vmatpush1.bf16.msra.mxu0 %v4776_v13  ;;  %v4834_v29 = vpack.c.bf16 %v518_v26, %v516_v25  ;;  %v395_v33 = vld [vmem:[#allocation7 + $0x90] sm:$0xff]  ;;  %v4836_v34 = vpack.c.bf16 %v517_v31, %v515_v30  ;;  %v520_v35 = vld [vmem:[#allocation7 + $0x228] sm:$0xff]  ;;  %v522_v36 = vld [vmem:[#allocation7 + $0x238] sm:$0xff] }
  0xbf   : > { %4779 = vmatprep.subr.bf16.mxu0 %v4778_v14  ;;  %v398_v37 = vld [vmem:[#allocation7 + $0xa8] sm:$0xff]  ;;  %v400_v38 = vld [vmem:[#allocation7 + $0xb8] sm:$0xff]  ;;  %v4838_v39 = vpack.c.bf16 %v522_v36, %v520_v35  ;;  %v519_v40 = vld [vmem:[#allocation7 + $0x220] sm:$0xff]  ;;  %v4788_v42 = vpack.c.bf16 %v395_v33, %v393_v28  ;;  %p6904_p2 = por %p6903_p3, %p6902_p1 }
  0xc0   : > { %4835 = vmatprep.subr.bf16.mxu1 %v4834_v29  ;;  %v521_v41 = vld [vmem:[#allocation7 + $0x230] sm:$0xff]  ;;  %v397_v43 = vld [vmem:[#allocation7 + $0xa0] sm:$0xff]  ;;  %v524_v45 = vld [vmem:[#allocation7 + $0x248] sm:$0xff]  ;;  %v4790_v47 = vpack.c.bf16 %v400_v38, %v398_v37 }
  0xc1   : > { %4837 = vmatpush1.bf16.msra.mxu1 %v4836_v34  ;;  %v4840_v44 = vpack.c.bf16 %v521_v41, %v519_v40  ;;  %v526_v46 = vld [vmem:[#allocation7 + $0x258] sm:$0xff]  ;;  %v399_v48 = vld [vmem:[#allocation7 + $0xb0] sm:$0xff]  ;;  %v523_v50 = vld [vmem:[#allocation7 + $0x240] sm:$0xff]  ;;  %p6905_p0 = pnand %p6904_p2, %p6898_p13 }
  0xc2   : > { %4781 = vmatpush1.bf16.msra.mxu0 %v4780_v19  ;;  %4839 = vmatprep.subr.bf16.mxu1 %v4838_v39  ;;  %v4842_v49 = vpack.c.bf16 %v526_v46, %v524_v45  ;;  %v525_v51 = vld [vmem:[#allocation7 + $0x250] sm:$0xff]  ;;  %v402_v52 = vld [vmem:[#allocation7 + $0xc8] sm:$0xff]  ;;  %v404_v53 = vld [vmem:[#allocation7 + $0xd8] sm:$0xff]  ;;  %v4792_v57 = vpack.c.bf16 %v399_v48, %v397_v43 }
  0xc3   : > { %4783 = vmatprep.subr.bf16.mxu0 %v4782_v20  ;;  %v528_v54 = vld [vmem:[#allocation7 + $0x268] sm:$0xff]  ;;  %v4844_v55 = vpack.c.bf16 %v525_v51, %v523_v50  ;;  %v530_v56 = vld [vmem:[#allocation7 + $0x278] sm:$0xff]  ;;  %v401_v58 = vld [vmem:[#allocation7 + $0xc0] sm:$0xff]  ;;  %v4794_v62 = vpack.c.bf16 %v404_v53, %v402_v52 }
  0xc4   : > { %v4846_v59 = vpack.c.bf16 %v530_v56, %v528_v54  ;;  %v527_v60 = vld [vmem:[#allocation7 + $0x260] sm:$0xff]  ;;  %v529_v61 = vld [vmem:[#allocation7 + $0x270] sm:$0xff]  ;;  %v532_v0 = vld [vmem:[#allocation7 + $0x288] sm:$0xff] }
  0xc5   : > { %4841 = vmatpush1.bf16.msra.mxu1 %v4840_v44  ;;  %v403_v63 = vld [vmem:[#allocation7 + $0xd0] sm:$0xff]  ;;  %v534_v1 = vld [vmem:[#allocation7 + $0x298] sm:$0xff]  ;;  %v406_v2 = vld [vmem:[#allocation7 + $0xe8] sm:$0xff]  ;;  %v4848_v4 = vpack.c.bf16 %v529_v61, %v527_v60 }
  0xc6   : > { %4785 = vmatpush1.bf16.msra.mxu0 %v4784_v27  ;;  %4843 = vmatprep.subr.bf16.mxu1 %v4842_v49  ;;  %v408_v3 = vld [vmem:[#allocation7 + $0xf8] sm:$0xff]  ;;  %v4796_v5 = vpack.c.bf16 %v403_v63, %v401_v58  ;;  %v405_v6 = vld [vmem:[#allocation7 + $0xe0] sm:$0xff]  ;;  %v4850_v7 = vpack.c.bf16 %v534_v1, %v532_v0  ;;  %v533_v9 = vld [vmem:[#allocation7 + $0x290] sm:$0xff] }
  0xc7   : > { %4787 = vmatprep.subr.bf16.mxu0 %v4786_v32  ;;  %v531_v8 = vld [vmem:[#allocation7 + $0x280] sm:$0xff]  ;;  %v4798_v10 = vpack.c.bf16 %v408_v3, %v406_v2  ;;  %v407_v11 = vld [vmem:[#allocation7 + $0xf0] sm:$0xff]  ;;  %v536_v12 = vld [vmem:[#allocation7 + $0x2a8] sm:$0xff] }
  0xc8   : > { %v538_v13 = vld [vmem:[#allocation7 + $0x2b8] sm:$0xff]  ;;  %v410_v14 = vld [vmem:[#allocation7 + $0x108] sm:$0xff]  ;;  %v4852_v16 = vpack.c.bf16 %v533_v9, %v531_v8  ;;  %v4800_v17 = vpack.c.bf16 %v407_v11, %v405_v6  ;;  %v409_v18 = vld [vmem:[#allocation7 + $0x100] sm:$0xff] }
  0xc9   : > { %4845 = vmatpush1.bf16.msra.mxu1 %v4844_v55  ;;  %v412_v15 = vld [vmem:[#allocation7 + $0x118] sm:$0xff]  ;;  %v4854_v19 = vpack.c.bf16 %v538_v13, %v536_v12  ;;  %v535_v20 = vld [vmem:[#allocation7 + $0x2a0] sm:$0xff]  ;;  %v537_v21 = vld [vmem:[#allocation7 + $0x2b0] sm:$0xff] }
  0xca   : > { %4789 = vmatpush1.bf16.msra.mxu0 %v4788_v42  ;;  %4847 = vmatprep.subr.bf16.mxu1 %v4846_v59  ;;  %v4802_v22 = vpack.c.bf16 %v412_v15, %v410_v14  ;;  %v411_v23 = vld [vmem:[#allocation7 + $0x110] sm:$0xff]  ;;  %v540_v24 = vld [vmem:[#allocation7 + $0x2c8] sm:$0xff]  ;;  %v542_v25 = vld [vmem:[#allocation7 + $0x2d8] sm:$0xff]  ;;  %v4856_v29 = vpack.c.bf16 %v537_v21, %v535_v20 }
  0xcb   : > { %4791 = vmatprep.subr.bf16.mxu0 %v4790_v47  ;;  %v414_v26 = vld [vmem:[#allocation7 + $0x128] sm:$0xff]  ;;  %v416_v27 = vld [vmem:[#allocation7 + $0x138] sm:$0xff]  ;;  %v413_v28 = vld [vmem:[#allocation7 + $0x120] sm:$0xff]  ;;  %v4804_v30 = vpack.c.bf16 %v411_v23, %v409_v18  ;;  %v4858_v31 = vpack.c.bf16 %v542_v25, %v540_v24 }
  0xcc   : > { %v539_v32 = vld [vmem:[#allocation7 + $0x2c0] sm:$0xff]  ;;  %v541_v33 = vld [vmem:[#allocation7 + $0x2d0] sm:$0xff]  ;;  %v4806_v35 = vpack.c.bf16 %v416_v27, %v414_v26  ;;  %v544_v37 = vld [vmem:[#allocation7 + $0x2e8] sm:$0xff] }
  0xcd   : > { %4849 = vmatpush1.bf16.msra.mxu1 %v4848_v4  ;;  %v369_v34 = vld [vmem:[%s7254_s14] sm:$0xff]  ;;  %v418_v40 = vld [vmem:[#allocation7 + $0x148] sm:$0xff]  ;;  %v4860_v42 = vpack.c.bf16 %v541_v33, %v539_v32  ;;  %v417_v44 = vld [vmem:[#allocation7 + $0x140] sm:$0xff] }
  0xce   : > { %4793 = vmatpush1.bf16.msra.mxu0 %v4792_v57  ;;  %4851 = vmatprep.subr.bf16.mxu1 %v4850_v7  ;;  %v415_v36 = vld [vmem:[#allocation7 + $0x130] sm:$0xff]  ;;  %v546_v38 = vld [vmem:[#allocation7 + $0x2f8] sm:$0xff]  ;;  %v371_v39 = vcombine.high %v369_v34, %v369_v34  ;;  %373 = vst [vmem:[#allocation2] sm:$0xf] %v369_v34  ;;  %v543_v46 = vld [vmem:[#allocation7 + $0x2e0] sm:$0xff] }
  0xcf   : > { %4795 = vmatprep.subr.bf16.mxu0 %v4794_v62  ;;  %v420_v41 = vld [vmem:[#allocation7 + $0x158] sm:$0xff]  ;;  %v4808_v43 = vpack.c.bf16 %v415_v36, %v413_v28  ;;  %v4862_v45 = vpack.c.bf16 %v546_v38, %v544_v37  ;;  %v545_v47 = vld [vmem:[#allocation7 + $0x2f0] sm:$0xff]  ;;  %v548_v50 = vld [vmem:[#allocation7 + $0x308] sm:$0xff] }
  0xd0   : > { %374 = vst [vmem:[#allocation2 + $0x8] sm:$0xf] %v371_v39  ;;  %v4810_v48 = vpack.c.bf16 %v420_v41, %v418_v40  ;;  %v419_v49 = vld [vmem:[#allocation7 + $0x150] sm:$0xff]  ;;  %v550_v51 = vld [vmem:[#allocation7 + $0x318] sm:$0xff]  ;;  %v422_v52 = vld [vmem:[#allocation7 + $0x168] sm:$0xff]  ;;  %v4864_v54 = vpack.c.bf16 %v545_v47, %v543_v46 }
  0xd1   : > { %4853 = vmatpush1.bf16.msra.mxu1 %v4852_v16  ;;  %v424_v53 = vld [vmem:[#allocation7 + $0x178] sm:$0xff]  ;;  %v4812_v55 = vpack.c.bf16 %v419_v49, %v417_v44  ;;  %v421_v56 = vld [vmem:[#allocation7 + $0x160] sm:$0xff]  ;;  %v4866_v57 = vpack.c.bf16 %v550_v51, %v548_v50  ;;  %v549_v59 = vld [vmem:[#allocation7 + $0x310] sm:$0xff] }
  0xd2   : > { %4797 = vmatpush1.bf16.msra.mxu0 %v4796_v5  ;;  %4855 = vmatprep.subr.bf16.mxu1 %v4854_v19  ;;  %v547_v58 = vld [vmem:[#allocation7 + $0x300] sm:$0xff]  ;;  %v4814_v60 = vpack.c.bf16 %v424_v53, %v422_v52  ;;  %v423_v61 = vld [vmem:[#allocation7 + $0x170] sm:$0xff]  ;;  %v552_v62 = vld [vmem:[#allocation7 + $0x328] sm:$0xff] }
  0xd3   : > { %4799 = vmatprep.subr.bf16.mxu0 %v4798_v10  ;;  %v554_v63 = vld [vmem:[#allocation7 + $0x338] sm:$0xff]  ;;  %v426_v0 = vld [vmem:[#allocation7 + $0x188] sm:$0xff]  ;;  %v4868_v3 = vpack.c.bf16 %v549_v59, %v547_v58  ;;  %v4816_v4 = vpack.c.bf16 %v423_v61, %v421_v56  ;;  %v425_v5 = vld [vmem:[#allocation7 + $0x180] sm:$0xff] }
  0xd4   : > { %v428_v1 = vld [vmem:[#allocation7 + $0x198] sm:$0xff]  ;;  %v4870_v6 = vpack.c.bf16 %v554_v63, %v552_v62  ;;  %v551_v7 = vld [vmem:[#allocation7 + $0x320] sm:$0xff]  ;;  %v553_v8 = vld [vmem:[#allocation7 + $0x330] sm:$0xff] }
  0xd5   : > { %4857 = vmatpush1.bf16.msra.mxu1 %v4856_v29  ;;  %v4818_v9 = vpack.c.bf16 %v428_v1, %v426_v0  ;;  %v427_v10 = vld [vmem:[#allocation7 + $0x190] sm:$0xff]  ;;  %v556_v11 = vld [vmem:[#allocation7 + $0x348] sm:$0xff]  ;;  %v558_v12 = vld [vmem:[#allocation7 + $0x358] sm:$0xff]  ;;  %v4872_v15 = vpack.c.bf16 %v553_v8, %v551_v7 }
  0xd6   : > { %4801 = vmatpush1.bf16.msra.mxu0 %v4800_v17  ;;  %4859 = vmatprep.subr.bf16.mxu1 %v4858_v31  ;;  %v430_v13 = vld [vmem:[#allocation7 + $0x1a8] sm:$0xff]  ;;  %v432_v14 = vld [vmem:[#allocation7 + $0x1b8] sm:$0xff]  ;;  %v4820_v16 = vpack.c.bf16 %v427_v10, %v425_v5  ;;  %v429_v17 = vld [vmem:[#allocation7 + $0x1a0] sm:$0xff]  ;;  %v4874_v18 = vpack.c.bf16 %v558_v12, %v556_v11 }
  0xd7   : > { %4803 = vmatprep.subr.bf16.mxu0 %v4802_v22  ;;  %v7273_v2 = vld [vmem:[#allocation2 + $0x8] sm:$0xf]  ;;  %v555_v19 = vld [vmem:[#allocation7 + $0x340] sm:$0xff]  ;;  %v557_v20 = vld [vmem:[#allocation7 + $0x350] sm:$0xff]  ;;  %v4822_v21 = vpack.c.bf16 %v432_v14, %v430_v13 }
  0xd8   : > { %505 = vmatprep.mubr.f32.mxu0 %v7273_v2  ;;  %643 = vmatprep.mubr.f32.mxu1 %v7273_v2  ;;  %v431_v22 = vld [vmem:[#allocation7 + $0x1b0] sm:$0xff]  ;;  %v560_v23 = vld [vmem:[#allocation7 + $0x368] sm:$0xff]  ;;  %v562_v24 = vld [vmem:[#allocation7 + $0x378] sm:$0xff]  ;;  %v4876_v27 = vpack.c.bf16 %v557_v20, %v555_v19 }
  0xd9   : > { %4861 = vmatpush1.bf16.msra.mxu1 %v4860_v42  ;;  %v434_v25 = vld [vmem:[#allocation7 + $0x1c8] sm:$0xff]  ;;  %v436_v26 = vld [vmem:[#allocation7 + $0x1d8] sm:$0xff]  ;;  %v4824_v28 = vpack.c.bf16 %v431_v22, %v429_v17  ;;  %v433_v29 = vld [vmem:[#allocation7 + $0x1c0] sm:$0xff] }
  0xda   : > { %4805 = vmatpush1.bf16.msra.mxu0 %v4804_v30  ;;  %4863 = vmatprep.subr.bf16.mxu1 %v4862_v45  ;;  %v4878_v30 = vpack.c.bf16 %v562_v24, %v560_v23  ;;  %v559_v31 = vld [vmem:[#allocation7 + $0x360] sm:$0xff]  ;;  %v561_v32 = vld [vmem:[#allocation7 + $0x370] sm:$0xff]  ;;  %v4826_v33 = vpack.c.bf16 %v436_v26, %v434_v25  ;;  %v566_v36 = vld [vmem:[#allocation7 + $0x398] sm:$0xff] }
  0xdb   : > { %4807 = vmatprep.subr.bf16.mxu0 %v4806_v35  ;;  %v435_v34 = vld [vmem:[#allocation7 + $0x1d0] sm:$0xff]  ;;  %v564_v35 = vld [vmem:[#allocation7 + $0x388] sm:$0xff]  ;;  %v440_v38 = vld [vmem:[#allocation7 + $0x1f8] sm:$0xff]  ;;  %v4880_v39 = vpack.c.bf16 %v561_v32, %v559_v31 }
  0xdc   : > { %v438_v37 = vld [vmem:[#allocation7 + $0x1e8] sm:$0xff]  ;;  %v4828_v40 = vpack.c.bf16 %v435_v34, %v433_v29  ;;  %v437_v41 = vld [vmem:[#allocation7 + $0x1e0] sm:$0xff]  ;;  %v4882_v42 = vpack.c.bf16 %v566_v36, %v564_v35  ;;  %v565_v44 = vld [vmem:[#allocation7 + $0x390] sm:$0xff] }
  0xdd   : > { %4865 = vmatpush1.bf16.msra.mxu1 %v4864_v54  ;;  %v4830_v45 = vpack.c.bf16 %v440_v38, %v438_v37  ;;  %v439_v46 = vld [vmem:[#allocation7 + $0x1f0] sm:$0xff]  ;;  %v568_v47 = vld [vmem:[#allocation7 + $0x3a8] sm:$0xff]  ;;  %v656_v50 = vld [vmem:[#allocation7 + $0x418] sm:$0xff] }
  0xde   : > { %4809 = vmatpush1.bf16.msra.mxu0 %v4808_v43  ;;  %4867 = vmatprep.subr.bf16.mxu1 %v4866_v57  ;;  %v563_v43 = vld [vmem:[#allocation7 + $0x380] sm:$0xff]  ;;  %v654_v49 = vld [vmem:[#allocation7 + $0x408] sm:$0xff]  ;;  %v4832_v52 = vpack.c.bf16 %v439_v46, %v437_v41  ;;  %v569_v56 = vld [vmem:[#allocation7 + $0x3b0] sm:$0xff] }
  0xdf   : > { %4811 = vmatprep.subr.bf16.mxu0 %v4810_v48  ;;  %v570_v48 = vld [vmem:[#allocation7 + $0x3b8] sm:$0xff]  ;;  %v4884_v51 = vpack.c.bf16 %v565_v44, %v563_v43  ;;  %v653_v53 = vld [vmem:[#allocation7 + $0x400] sm:$0xff]  ;;  %v4898_v57 = vpack.c.bf16 %v656_v50, %v654_v49  ;;  %v655_v58 = vld [vmem:[#allocation7 + $0x410] sm:$0xff] }
  0xe0   : > { %v4886_v54 = vpack.c.bf16 %v570_v48, %v568_v47  ;;  %v572_v59 = vld [vmem:[#allocation7 + $0x3c8] sm:$0xff]  ;;  %v660_v62 = vld [vmem:[#allocation7 + $0x438] sm:$0xff]  ;;  %v657_v63 = vld [vmem:[#allocation7 + $0x420] sm:$0xff] }
  0xe1   : > { %4869 = vmatpush1.bf16.msra.mxu1 %v4868_v3  ;;  %v658_v61 = vld [vmem:[#allocation7 + $0x428] sm:$0xff]  ;;  %v7277_v1 = vld [vmem:[#allocation2] sm:$0xf]  ;;  %v4900_v3 = vpack.c.bf16 %v655_v58, %v653_v53  ;;  %v571_v5 = vld [vmem:[#allocation7 + $0x3c0] sm:$0xff] }
  0xe2   : > { %4813 = vmatpush1.bf16.msra.mxu0 %v4812_v55  ;;  %4871 = vmatprep.subr.bf16.mxu1 %v4870_v6  ;;  %v567_v55 = vld [vmem:[#allocation7 + $0x3a0] sm:$0xff]  ;;  %v573_v6 = vld [vmem:[#allocation7 + $0x3d0] sm:$0xff]  ;;  %v4902_v7 = vpack.c.bf16 %v660_v62, %v658_v61  ;;  %v578_v10 = vld [vmem:[#allocation7 + $0x3f8] sm:$0xff] }
  0xe3   : > { %4815 = vmatprep.subr.bf16.mxu0 %v4814_v60  ;;  %v574_v60 = vld [vmem:[#allocation7 + $0x3d8] sm:$0xff]  ;;  %v4888_v0 = vpack.c.bf16 %v569_v56, %v567_v55  ;;  %v659_v8 = vld [vmem:[#allocation7 + $0x430] sm:$0xff]  ;;  %v662_v11 = vld [vmem:[#allocation7 + $0x448] sm:$0xff]  ;;  %v4892_v13 = vpack.c.bf16 %v573_v6, %v571_v5 }
  0xe4   : > { %v664_v12 = vld [vmem:[#allocation7 + $0x458] sm:$0xff]  ;;  %v4904_v14 = vpack.c.bf16 %v659_v8, %v657_v63  ;;  %v575_v17 = vld [vmem:[#allocation7 + $0x3e0] sm:$0xff]  ;;  %v663_v20 = vld [vmem:[#allocation7 + $0x450] sm:$0xff] }
  0xe5   : > { %4873 = vmatpush1.bf16.msra.mxu1 %v4872_v15  ;;  %v661_v15 = vld [vmem:[#allocation7 + $0x440] sm:$0xff]  ;;  %v4906_v19 = vpack.c.bf16 %v664_v12, %v662_v11  ;;  %v794_v22 = vld [vmem:[#allocation7 + $0x618] sm:$0xff]  ;;  %v666_v23 = vld [vmem:[#allocation7 + $0x468] sm:$0xff] }
  0xe6   : > { %4817 = vmatpush1.bf16.msra.mxu0 %v4816_v4  ;;  %4875 = vmatprep.subr.bf16.mxu1 %v4874_v18  ;;  %v4890_v4 = vpack.c.bf16 %v574_v60, %v572_v59  ;;  %v577_v18 = vld [vmem:[#allocation7 + $0x3f0] sm:$0xff]  ;;  %v668_v24 = vld [vmem:[#allocation7 + $0x478] sm:$0xff]  ;;  %v4908_v26 = vpack.c.bf16 %v663_v20, %v661_v15  ;;  %v791_v29 = vld [vmem:[#allocation7 + $0x600] sm:$0xff] }
  0xe7   : > { %4819 = vmatprep.subr.bf16.mxu0 %v4818_v9  ;;  %v576_v9 = vld [vmem:[#allocation7 + $0x3e8] sm:$0xff]  ;;  %v4896_v25 = vpack.c.bf16 %v577_v18, %v575_v17  ;;  %v4910_v31 = vpack.c.bf16 %v668_v24, %v666_v23  ;;  %v667_v32 = vld [vmem:[#allocation7 + $0x470] sm:$0xff]  ;;  %v798_v34 = vld [vmem:[#allocation7 + $0x638] sm:$0xff] }
  0xe8   : > { %v670_v35 = vld [vmem:[#allocation7 + $0x488] sm:$0xff]  ;;  %v672_v36 = vld [vmem:[#allocation7 + $0x498] sm:$0xff]  ;;  %v795_v41 = vld [vmem:[#allocation7 + $0x620] sm:$0xff] }
  0xe9   : > { %4877 = vmatpush1.bf16.msra.mxu1 %v4876_v27  ;;  %v665_v27 = vld [vmem:[#allocation7 + $0x460] sm:$0xff]  ;;  %v4914_v43 = vpack.c.bf16 %v672_v36, %v670_v35  ;;  %v671_v44 = vld [vmem:[#allocation7 + $0x490] sm:$0xff]  ;;  %v802_v46 = vld [vmem:[#allocation7 + $0x658] sm:$0xff] }
  0xea   : > { %4821 = vmatpush1.bf16.msra.mxu0 %v4820_v16  ;;  %4879 = vmatprep.subr.bf16.mxu1 %v4878_v30  ;;  %v4894_v16 = vpack.c.bf16 %v578_v10, %v576_v9  ;;  %v793_v30 = vld [vmem:[#allocation7 + $0x610] sm:$0xff]  ;;  %v4912_v38 = vpack.c.bf16 %v667_v32, %v665_v27  ;;  %v674_v47 = vld [vmem:[#allocation7 + $0x4a8] sm:$0xff]  ;;  %v676_v48 = vld [vmem:[#allocation7 + $0x4b8] sm:$0xff] }
  0xeb   : > { %4823 = vmatprep.subr.bf16.mxu0 %v4822_v21  ;;  %v792_v21 = vld [vmem:[#allocation7 + $0x608] sm:$0xff]  ;;  %v4964_v37 = vpack.c.bf16 %v793_v30, %v791_v29  ;;  %v799_v53 = vld [vmem:[#allocation7 + $0x640] sm:$0xff]  ;;  %v4918_v55 = vpack.c.bf16 %v676_v48, %v674_v47  ;;  %v675_v56 = vld [vmem:[#allocation7 + $0x4b0] sm:$0xff] }
  0xec   : > { %v806_v58 = vld [vmem:[#allocation7 + $0x678] sm:$0xff]  ;;  %v678_v59 = vld [vmem:[#allocation7 + $0x4c8] sm:$0xff]  ;;  %v677_v63 = vld [vmem:[#allocation7 + $0x4c0] sm:$0xff] }
  0xed   : > { %4881 = vmatpush1.bf16.msra.mxu1 %v4880_v39  ;;  %v669_v39 = vld [vmem:[#allocation7 + $0x480] sm:$0xff]  ;;  %v680_v60 = vld [vmem:[#allocation7 + $0x4d8] sm:$0xff]  ;;  %v679_v6 = vld [vmem:[#allocation7 + $0x4d0] sm:$0xff] }
  0xee   : > { %4825 = vmatpush1.bf16.msra.mxu0 %v4824_v28  ;;  %4883 = vmatprep.subr.bf16.mxu1 %v4882_v42  ;;  %v4962_v28 = vpack.c.bf16 %v794_v22, %v792_v21  ;;  %v797_v42 = vld [vmem:[#allocation7 + $0x630] sm:$0xff]  ;;  %v4916_v50 = vpack.c.bf16 %v671_v44, %v669_v39  ;;  %v4922_v5 = vpack.c.bf16 %v680_v60, %v678_v59  ;;  %v810_v8 = vld [vmem:[#allocation7 + $0x698] sm:$0xff]  ;;  %v682_v9 = vld [vmem:[#allocation7 + $0x4e8] sm:$0xff] }
  0xef   : > { %4827 = vmatprep.subr.bf16.mxu0 %v4826_v33  ;;  %v796_v33 = vld [vmem:[#allocation7 + $0x628] sm:$0xff]  ;;  %v4968_v49 = vpack.c.bf16 %v797_v42, %v795_v41  ;;  %v684_v10 = vld [vmem:[#allocation7 + $0x4f8] sm:$0xff]  ;;  %v4924_v12 = vpack.c.bf16 %v679_v6, %v677_v63  ;;  %v807_v15 = vld [vmem:[#allocation7 + $0x680] sm:$0xff] }
  0xf0   : > { %v4926_v17 = vpack.c.bf16 %v684_v10, %v682_v9  ;;  %v683_v18 = vld [vmem:[#allocation7 + $0x4f0] sm:$0xff]  ;;  %v814_v20 = vld [vmem:[#allocation7 + $0x6b8] sm:$0xff]  ;;  %v686_v21 = vld [vmem:[#allocation7 + $0x508] sm:$0xff] }
  0xf1   : > { %4885 = vmatpush1.bf16.msra.mxu1 %v4884_v51  ;;  %v673_v51 = vld [vmem:[#allocation7 + $0x4a0] sm:$0xff]  ;;  %v688_v22 = vld [vmem:[#allocation7 + $0x518] sm:$0xff]  ;;  %v687_v30 = vld [vmem:[#allocation7 + $0x510] sm:$0xff] }
  0xf2   : > { %4829 = vmatpush1.bf16.msra.mxu0 %v4828_v40  ;;  %4887 = vmatprep.subr.bf16.mxu1 %v4886_v54  ;;  %v4966_v40 = vpack.c.bf16 %v798_v34, %v796_v33  ;;  %v801_v54 = vld [vmem:[#allocation7 + $0x650] sm:$0xff]  ;;  %v4920_v62 = vpack.c.bf16 %v675_v56, %v673_v51  ;;  %v811_v27 = vld [vmem:[#allocation7 + $0x6a0] sm:$0xff]  ;;  %v4930_v29 = vpack.c.bf16 %v688_v22, %v686_v21  ;;  %v818_v32 = vld [vmem:[#allocation7 + $0x6d8] sm:$0xff] }
  0xf3   : > { %4831 = vmatprep.subr.bf16.mxu0 %v4830_v45  ;;  %v800_v45 = vld [vmem:[#allocation7 + $0x648] sm:$0xff]  ;;  %v4972_v61 = vpack.c.bf16 %v801_v54, %v799_v53  ;;  %v692_v34 = vld [vmem:[#allocation7 + $0x538] sm:$0xff]  ;;  %v815_v39 = vld [vmem:[#allocation7 + $0x6c0] sm:$0xff] }
  0xf4   : > { %v690_v33 = vld [vmem:[#allocation7 + $0x528] sm:$0xff]  ;;  %v691_v42 = vld [vmem:[#allocation7 + $0x530] sm:$0xff]  ;;  %v822_v44 = vld [vmem:[#allocation7 + $0x6f8] sm:$0xff] }
  0xf5   : > { %4889 = vmatpush1.bf16.msra.mxu1 %v4888_v0  ;;  %v4934_v41 = vpack.c.bf16 %v692_v34, %v690_v33  ;;  %v819_v51 = vld [vmem:[#allocation7 + $0x6e0] sm:$0xff]  ;;  %v695_v54 = vld [vmem:[#allocation7 + $0x550] sm:$0xff]  ;;  %v826_v56 = vld [vmem:[#allocation7 + $0x718] sm:$0xff] }
  0xf6   : > { %4833 = vmatpush1.bf16.msra.mxu0 %v4832_v52  ;;  %4891 = vmatprep.subr.bf16.mxu1 %v4890_v4  ;;  %v4970_v52 = vpack.c.bf16 %v802_v46, %v800_v45  ;;  %v805_v4 = vld [vmem:[#allocation7 + $0x670] sm:$0xff]  ;;  %v694_v45 = vld [vmem:[#allocation7 + $0x548] sm:$0xff]  ;;  %v696_v46 = vld [vmem:[#allocation7 + $0x558] sm:$0xff] }
  0xf7   : > { %4899 = vmatprep.subr.bf16.mxu0 %v4898_v57  ;;  %v804_v57 = vld [vmem:[#allocation7 + $0x668] sm:$0xff]  ;;  %v4938_v53 = vpack.c.bf16 %v696_v46, %v694_v45  ;;  %v823_v63 = vld [vmem:[#allocation7 + $0x700] sm:$0xff]  ;;  %v830_v6 = vld [vmem:[#allocation7 + $0x738] sm:$0xff] }
  0xf8   : > { %v4974_v0 = vpack.c.bf16 %v806_v58, %v804_v57  ;;  %v698_v57 = vld [vmem:[#allocation7 + $0x568] sm:$0xff]  ;;  %v700_v58 = vld [vmem:[#allocation7 + $0x578] sm:$0xff] }
  0xf9   : > { %506 = vmatmul.mubr.f32.vlgmr.msra.gmra.mrb[0].mxu0 %v7277_v1  ;;  %4893 = vmatpush1.bf16.msra.mxu1 %v4892_v13  ;;  %v681_v13 = vld [vmem:[#allocation7 + $0x4e0] sm:$0xff] }
  0xfa   : > { %4901 = vmatpush1.bf16.msra.mxu0 %v4900_v3  ;;  %781 = vmatprep.mubr.f32.mxu0 %v7273_v2  ;;  %v803_v3 = vld [vmem:[#allocation7 + $0x660] sm:$0xff]  ;;  %v4928_v24 = vpack.c.bf16 %v683_v18, %v681_v13  ;;  %v834_v18 = vld [vmem:[#allocation7 + $0x758] sm:$0xff] }
  0xfb   : > { %4903 = vmatprep.subr.bf16.mxu0 %v4902_v7  ;;  %4895 = vmatprep.subr.bf16.mxu1 %v4894_v16  ;;  %v808_v7 = vld [vmem:[#allocation7 + $0x688] sm:$0xff]  ;;  %v4976_v11 = vpack.c.bf16 %v805_v4, %v803_v3  ;;  %v809_v16 = vld [vmem:[#allocation7 + $0x690] sm:$0xff]  ;;  %v4942_v3 = vpack.c.bf16 %v700_v58, %v698_v57  ;;  %v827_v13 = vld [vmem:[#allocation7 + $0x720] sm:$0xff] }
  0xfc   : > { %v4980_v23 = vpack.c.bf16 %v809_v16, %v807_v15  ;;  %v699_v4 = vld [vmem:[#allocation7 + $0x570] sm:$0xff] }
  0xfd   : > { %4897 = vmatpush1.bf16.msra.mxu1 %v4896_v25  ;;  %v685_v25 = vld [vmem:[#allocation7 + $0x500] sm:$0xff]  ;;  %v703_v16 = vld [vmem:[#allocation7 + $0x590] sm:$0xff] }
  0xfe   : > { %4905 = vmatpush1.bf16.msra.mxu0 %v4904_v14  ;;  %4963 = vmatprep.subr.bf16.mxu1 %v4962_v28  ;;  %v4978_v14 = vpack.c.bf16 %v810_v8, %v808_v7  ;;  %v813_v28 = vld [vmem:[#allocation7 + $0x6b0] sm:$0xff]  ;;  %v4932_v36 = vpack.c.bf16 %v687_v30, %v685_v25  ;;  %v702_v7 = vld [vmem:[#allocation7 + $0x588] sm:$0xff]  ;;  %v704_v8 = vld [vmem:[#allocation7 + $0x598] sm:$0xff] }
  0xff   : > { %4907 = vmatprep.subr.bf16.mxu0 %v4906_v19  ;;  %v812_v19 = vld [vmem:[#allocation7 + $0x6a8] sm:$0xff]  ;;  %v4984_v35 = vpack.c.bf16 %v813_v28, %v811_v27  ;;  %v4946_v15 = vpack.c.bf16 %v704_v8, %v702_v7  ;;  %v831_v25 = vld [vmem:[#allocation7 + $0x740] sm:$0xff]  ;;  %v707_v28 = vld [vmem:[#allocation7 + $0x5b0] sm:$0xff] }
 0x100   : > { %644 = vmatmul.mubr.f32.vlgmr.msra.gmra.mrb[0].mxu1 %v7277_v1  ;;  %v838_v30 = vld [vmem:[#allocation7 + $0x778] sm:$0xff] }
 0x101   : > { %4965 = vmatpush1.bf16.msra.mxu1 %v4964_v37  ;;  %919 = vmatprep.mubr.f32.mxu1 %v7273_v2  ;;  %v689_v37 = vld [vmem:[#allocation7 + $0x520] sm:$0xff] }
 0x102   : > { %4909 = vmatpush1.bf16.msra.mxu0 %v4908_v26  ;;  %4967 = vmatprep.subr.bf16.mxu1 %v4966_v40  ;;  %v4982_v26 = vpack.c.bf16 %v814_v20, %v812_v19  ;;  %v817_v40 = vld [vmem:[#allocation7 + $0x6d0] sm:$0xff]  ;;  %v4936_v48 = vpack.c.bf16 %v691_v42, %v689_v37  ;;  %v706_v19 = vld [vmem:[#allocation7 + $0x5a8] sm:$0xff]  ;;  %v708_v20 = vld [vmem:[#allocation7 + $0x5b8] sm:$0xff] }
 0x103   : > { %4911 = vmatprep.subr.bf16.mxu0 %v4910_v31  ;;  %v816_v31 = vld [vmem:[#allocation7 + $0x6c8] sm:$0xff]  ;;  %v4988_v47 = vpack.c.bf16 %v817_v40, %v815_v39  ;;  %v4950_v27 = vpack.c.bf16 %v708_v20, %v706_v19  ;;  %v835_v37 = vld [vmem:[#allocation7 + $0x760] sm:$0xff]  ;;  %v711_v40 = vld [vmem:[#allocation7 + $0x5d0] sm:$0xff] }
 0x104   : > { %v842_v42 = vld [vmem:[#allocation7 + $0x798] sm:$0xff] }
 0x105   : > { %4969 = vmatpush1.bf16.msra.mxu1 %v4968_v49  ;;  %v693_v49 = vld [vmem:[#allocation7 + $0x540] sm:$0xff] }
 0x106   : > { %4913 = vmatpush1.bf16.msra.mxu0 %v4912_v38  ;;  %4971 = vmatprep.subr.bf16.mxu1 %v4970_v52  ;;  %v4986_v38 = vpack.c.bf16 %v818_v32, %v816_v31  ;;  %v821_v52 = vld [vmem:[#allocation7 + $0x6f0] sm:$0xff]  ;;  %v4940_v60 = vpack.c.bf16 %v695_v54, %v693_v49  ;;  %v710_v31 = vld [vmem:[#allocation7 + $0x5c8] sm:$0xff]  ;;  %v712_v32 = vld [vmem:[#allocation7 + $0x5d8] sm:$0xff] }
 0x107   : > { %4915 = vmatprep.subr.bf16.mxu0 %v4914_v43  ;;  %v820_v43 = vld [vmem:[#allocation7 + $0x6e8] sm:$0xff]  ;;  %v4992_v59 = vpack.c.bf16 %v821_v52, %v819_v51  ;;  %v4954_v39 = vpack.c.bf16 %v712_v32, %v710_v31  ;;  %v839_v49 = vld [vmem:[#allocation7 + $0x780] sm:$0xff]  ;;  %v715_v52 = vld [vmem:[#allocation7 + $0x5f0] sm:$0xff] }
 0x108   : > { %v846_v54 = vld [vmem:[#allocation7 + $0x7b8] sm:$0xff] }
 0x109   : > { %4973 = vmatpush1.bf16.msra.mxu1 %v4972_v61  ;;  %v697_v61 = vld [vmem:[#allocation7 + $0x560] sm:$0xff] }
 0x10a   : > { %4917 = vmatpush1.bf16.msra.mxu0 %v4916_v50  ;;  %4975 = vmatprep.subr.bf16.mxu1 %v4974_v0  ;;  %v4990_v50 = vpack.c.bf16 %v822_v44, %v820_v43  ;;  %v825_v0 = vld [vmem:[#allocation7 + $0x710] sm:$0xff]  ;;  %v4944_v10 = vpack.c.bf16 %v699_v4, %v697_v61  ;;  %v714_v43 = vld [vmem:[#allocation7 + $0x5e8] sm:$0xff]  ;;  %v716_v44 = vld [vmem:[#allocation7 + $0x5f8] sm:$0xff] }
 0x10b   : > { %4919 = vmatprep.subr.bf16.mxu0 %v4918_v55  ;;  %v824_v55 = vld [vmem:[#allocation7 + $0x708] sm:$0xff]  ;;  %v4996_v9 = vpack.c.bf16 %v825_v0, %v823_v63  ;;  %v4958_v51 = vpack.c.bf16 %v716_v44, %v714_v43  ;;  %v843_v61 = vld [vmem:[#allocation7 + $0x7a0] sm:$0xff]  ;;  %v931_v0 = vld [vmem:[#allocation7 + $0x810] sm:$0xff] }
 0x10c   : > { %v850_v4 = vld [vmem:[#allocation7 + $0x7d8] sm:$0xff] }
 0x10d   : > { %4977 = vmatpush1.bf16.msra.mxu1 %v4976_v11  ;;  %v701_v11 = vld [vmem:[#allocation7 + $0x580] sm:$0xff] }
 0x10e   : > { %4921 = vmatpush1.bf16.msra.mxu0 %v4920_v62  ;;  %4979 = vmatprep.subr.bf16.mxu1 %v4978_v14  ;;  %v4994_v62 = vpack.c.bf16 %v826_v56, %v824_v55  ;;  %v829_v14 = vld [vmem:[#allocation7 + $0x730] sm:$0xff]  ;;  %v4948_v22 = vpack.c.bf16 %v703_v16, %v701_v11  ;;  %v930_v55 = vld [vmem:[#allocation7 + $0x808] sm:$0xff]  ;;  %v932_v56 = vld [vmem:[#allocation7 + $0x818] sm:$0xff] }
 0x10f   : > { %4923 = vmatprep.subr.bf16.mxu0 %v4922_v5  ;;  %v828_v5 = vld [vmem:[#allocation7 + $0x728] sm:$0xff]  ;;  %v5000_v21 = vpack.c.bf16 %v829_v14, %v827_v13  ;;  %v5026_v63 = vpack.c.bf16 %v932_v56, %v930_v55  ;;  %v847_v11 = vld [vmem:[#allocation7 + $0x7c0] sm:$0xff]  ;;  %v935_v14 = vld [vmem:[#allocation7 + $0x830] sm:$0xff] }
 0x110   : > { %v854_v16 = vld [vmem:[#allocation7 + $0x7f8] sm:$0xff] }
 0x111   : > { %4981 = vmatpush1.bf16.msra.mxu1 %v4980_v23  ;;  %v705_v23 = vld [vmem:[#allocation7 + $0x5a0] sm:$0xff] }
 0x112   : > { %4925 = vmatpush1.bf16.msra.mxu0 %v4924_v12  ;;  %4983 = vmatprep.subr.bf16.mxu1 %v4982_v26  ;;  %v4998_v12 = vpack.c.bf16 %v830_v6, %v828_v5  ;;  %v833_v26 = vld [vmem:[#allocation7 + $0x750] sm:$0xff]  ;;  %v4952_v34 = vpack.c.bf16 %v707_v28, %v705_v23  ;;  %v934_v5 = vld [vmem:[#allocation7 + $0x828] sm:$0xff]  ;;  %v936_v6 = vld [vmem:[#allocation7 + $0x838] sm:$0xff] }
 0x113   : > { %4927 = vmatprep.subr.bf16.mxu0 %v4926_v17  ;;  %v832_v17 = vld [vmem:[#allocation7 + $0x748] sm:$0xff]  ;;  %v5004_v33 = vpack.c.bf16 %v833_v26, %v831_v25  ;;  %v5030_v13 = vpack.c.bf16 %v936_v6, %v934_v5  ;;  %v851_v23 = vld [vmem:[#allocation7 + $0x7e0] sm:$0xff]  ;;  %v939_v26 = vld [vmem:[#allocation7 + $0x850] sm:$0xff] }
 0x114   : > { %v1070_v28 = vld [vmem:[#allocation7 + $0xa18] sm:$0xff]  ;;  %v7294_v5 = vld [vmem:[#allocation7 + $0x8c0] sm:$0xff] }
 0x115   : > { %4985 = vmatpush1.bf16.msra.mxu1 %v4984_v35  ;;  %v709_v35 = vld [vmem:[#allocation7 + $0x5c0] sm:$0xff] }
 0x116   : > { %4929 = vmatpush1.bf16.msra.mxu0 %v4928_v24  ;;  %4987 = vmatprep.subr.bf16.mxu1 %v4986_v38  ;;  %v5002_v24 = vpack.c.bf16 %v834_v18, %v832_v17  ;;  %v837_v38 = vld [vmem:[#allocation7 + $0x770] sm:$0xff]  ;;  %v4956_v46 = vpack.c.bf16 %v711_v40, %v709_v35  ;;  %v938_v17 = vld [vmem:[#allocation7 + $0x848] sm:$0xff]  ;;  %v940_v18 = vld [vmem:[#allocation7 + $0x858] sm:$0xff] }
 0x117   : > { %4931 = vmatprep.subr.bf16.mxu0 %v4930_v29  ;;  %v836_v29 = vld [vmem:[#allocation7 + $0x768] sm:$0xff]  ;;  %v5008_v45 = vpack.c.bf16 %v837_v38, %v835_v37  ;;  %v5034_v25 = vpack.c.bf16 %v940_v18, %v938_v17  ;;  %v1067_v35 = vld [vmem:[#allocation7 + $0xa00] sm:$0xff]  ;;  %v943_v38 = vld [vmem:[#allocation7 + $0x870] sm:$0xff] }
 0x118   : > { %v1074_v40 = vld [vmem:[#allocation7 + $0xa38] sm:$0xff]  ;;  %v957_v18 = vld [vmem:[#allocation7 + $0x8e0] sm:$0xff] }
 0x119   : > { %4989 = vmatpush1.bf16.msra.mxu1 %v4988_v47  ;;  %v713_v47 = vld [vmem:[#allocation7 + $0x5e0] sm:$0xff] }
 0x11a   : > { %4933 = vmatpush1.bf16.msra.mxu0 %v4932_v36  ;;  %4991 = vmatprep.subr.bf16.mxu1 %v4990_v50  ;;  %v5006_v36 = vpack.c.bf16 %v838_v30, %v836_v29  ;;  %v841_v50 = vld [vmem:[#allocation7 + $0x790] sm:$0xff]  ;;  %v4960_v58 = vpack.c.bf16 %v715_v52, %v713_v47  ;;  %v942_v29 = vld [vmem:[#allocation7 + $0x868] sm:$0xff]  ;;  %v944_v30 = vld [vmem:[#allocation7 + $0x878] sm:$0xff] }
 0x11b   : > { %4935 = vmatprep.subr.bf16.mxu0 %v4934_v41  ;;  %v840_v41 = vld [vmem:[#allocation7 + $0x788] sm:$0xff]  ;;  %v5012_v57 = vpack.c.bf16 %v841_v50, %v839_v49  ;;  %v5038_v37 = vpack.c.bf16 %v944_v30, %v942_v29  ;;  %v1071_v47 = vld [vmem:[#allocation7 + $0xa20] sm:$0xff]  ;;  %v947_v50 = vld [vmem:[#allocation7 + $0x890] sm:$0xff] }
 0x11c   : > { %v1078_v52 = vld [vmem:[#allocation7 + $0xa58] sm:$0xff]  ;;  %v961_v30 = vld [vmem:[#allocation7 + $0x900] sm:$0xff] }
 0x11d   : > { %4993 = vmatpush1.bf16.msra.mxu1 %v4992_v59  ;;  %v929_v59 = vld [vmem:[#allocation7 + $0x800] sm:$0xff] }
 0x11e   : > { %4937 = vmatpush1.bf16.msra.mxu0 %v4936_v48  ;;  %4995 = vmatprep.subr.bf16.mxu1 %v4994_v62  ;;  %v5010_v48 = vpack.c.bf16 %v842_v42, %v840_v41  ;;  %v845_v62 = vld [vmem:[#allocation7 + $0x7b0] sm:$0xff]  ;;  %v5028_v8 = vpack.c.bf16 %v931_v0, %v929_v59  ;;  %v946_v41 = vld [vmem:[#allocation7 + $0x888] sm:$0xff]  ;;  %v948_v42 = vld [vmem:[#allocation7 + $0x898] sm:$0xff] }
 0x11f   : > { %4939 = vmatprep.subr.bf16.mxu0 %v4938_v53  ;;  %v844_v53 = vld [vmem:[#allocation7 + $0x7a8] sm:$0xff]  ;;  %v5016_v7 = vpack.c.bf16 %v845_v62, %v843_v61  ;;  %v5042_v49 = vpack.c.bf16 %v948_v42, %v946_v41  ;;  %v1075_v59 = vld [vmem:[#allocation7 + $0xa40] sm:$0xff]  ;;  %v951_v62 = vld [vmem:[#allocation7 + $0x8b0] sm:$0xff] }
 0x120   : > { %v1082_v0 = vld [vmem:[#allocation7 + $0xa78] sm:$0xff]  ;;  %v965_v42 = vld [vmem:[#allocation7 + $0x920] sm:$0xff] }
 0x121   : > { %4997 = vmatpush1.bf16.msra.mxu1 %v4996_v9  ;;  %v933_v9 = vld [vmem:[#allocation7 + $0x820] sm:$0xff] }
 0x122   : > { %4941 = vmatpush1.bf16.msra.mxu0 %v4940_v60  ;;  %4999 = vmatprep.subr.bf16.mxu1 %v4998_v12  ;;  %v5014_v60 = vpack.c.bf16 %v846_v54, %v844_v53  ;;  %v849_v12 = vld [vmem:[#allocation7 + $0x7d0] sm:$0xff]  ;;  %v5032_v20 = vpack.c.bf16 %v935_v14, %v933_v9  ;;  %v950_v53 = vld [vmem:[#allocation7 + $0x8a8] sm:$0xff]  ;;  %v952_v54 = vld [vmem:[#allocation7 + $0x8b8] sm:$0xff] }
 0x123   : > { %4943 = vmatprep.subr.bf16.mxu0 %v4942_v3  ;;  %v848_v3 = vld [vmem:[#allocation7 + $0x7c8] sm:$0xff]  ;;  %v5020_v19 = vpack.c.bf16 %v849_v12, %v847_v11  ;;  %v5046_v61 = vpack.c.bf16 %v952_v54, %v950_v53  ;;  %v1086_v12 = vld [vmem:[#allocation7 + $0xa98] sm:$0xff]  ;;  %v969_v54 = vld [vmem:[#allocation7 + $0x940] sm:$0xff] }
 0x124   : > { %v1084_v11 = vld [vmem:[#allocation7 + $0xa88] sm:$0xff] }
 0x125   : > { %5001 = vmatpush1.bf16.msra.mxu1 %v5000_v21  ;;  %v937_v21 = vld [vmem:[#allocation7 + $0x840] sm:$0xff]  ;;  %v958_v14 = vld [vmem:[#allocation7 + $0x8e8] sm:$0xff] }
 0x126   : > { %4945 = vmatpush1.bf16.msra.mxu0 %v4944_v10  ;;  %5003 = vmatprep.subr.bf16.mxu1 %v5002_v24  ;;  %v5018_v10 = vpack.c.bf16 %v850_v4, %v848_v3  ;;  %v853_v24 = vld [vmem:[#allocation7 + $0x7f0] sm:$0xff]  ;;  %v5036_v32 = vpack.c.bf16 %v939_v26, %v937_v21  ;;  %v7289_v3 = vld [vmem:[#allocation7 + $0x8c8] sm:$0xff] }
 0x127   : > { %4947 = vmatprep.subr.bf16.mxu0 %v4946_v15  ;;  %v852_v15 = vld [vmem:[#allocation7 + $0x7e8] sm:$0xff]  ;;  %v5024_v31 = vpack.c.bf16 %v853_v24, %v851_v23  ;;  %v1085_v21 = vld [vmem:[#allocation7 + $0xa90] sm:$0xff] }
 0x128   : > { %v959_v23 = vld [vmem:[#allocation7 + $0x8f0] sm:$0xff]  ;;  %v1088_v24 = vld [vmem:[#allocation7 + $0xaa8] sm:$0xff] }
 0x129   : > { %5005 = vmatpush1.bf16.msra.mxu1 %v5004_v33  ;;  %v941_v33 = vld [vmem:[#allocation7 + $0x860] sm:$0xff]  ;;  %v962_v26 = vld [vmem:[#allocation7 + $0x908] sm:$0xff]  ;;  %v5056_v29 = vpack.c.bf16 %v959_v23, %v957_v18  ;;  %v984_v23 = vld [vmem:[#allocation7 + $0x9b8] sm:$0xff] }
 0x12a   : > { %4949 = vmatpush1.bf16.msra.mxu0 %v4948_v22  ;;  %5007 = vmatprep.subr.bf16.mxu1 %v5006_v36  ;;  %v5022_v22 = vpack.c.bf16 %v854_v16, %v852_v15  ;;  %v1069_v36 = vld [vmem:[#allocation7 + $0xa10] sm:$0xff]  ;;  %v5040_v44 = vpack.c.bf16 %v943_v38, %v941_v33  ;;  %v960_v15 = vld [vmem:[#allocation7 + $0x8f8] sm:$0xff]  ;;  %v966_v38 = vld [vmem:[#allocation7 + $0x928] sm:$0xff] }
 0x12b   : > { %4951 = vmatprep.subr.bf16.mxu0 %v4950_v27  ;;  %v1068_v27 = vld [vmem:[#allocation7 + $0xa08] sm:$0xff]  ;;  %v5092_v43 = vpack.c.bf16 %v1069_v36, %v1067_v35  ;;  %v1089_v33 = vld [vmem:[#allocation7 + $0xab0] sm:$0xff] }
 0x12c   : > { %v963_v35 = vld [vmem:[#allocation7 + $0x910] sm:$0xff]  ;;  %v1092_v36 = vld [vmem:[#allocation7 + $0xac8] sm:$0xff] }
 0x12d   : > { %5009 = vmatpush1.bf16.msra.mxu1 %v5008_v45  ;;  %v945_v45 = vld [vmem:[#allocation7 + $0x880] sm:$0xff]  ;;  %v5060_v41 = vpack.c.bf16 %v963_v35, %v961_v30  ;;  %v988_v35 = vld [vmem:[#allocation7 + $0x9d8] sm:$0xff] }
 0x12e   : > { %4953 = vmatpush1.bf16.msra.mxu0 %v4952_v34  ;;  %5011 = vmatprep.subr.bf16.mxu1 %v5010_v48  ;;  %v5090_v34 = vpack.c.bf16 %v1070_v28, %v1068_v27  ;;  %v1073_v48 = vld [vmem:[#allocation7 + $0xa30] sm:$0xff]  ;;  %v5044_v56 = vpack.c.bf16 %v947_v50, %v945_v45  ;;  %v964_v27 = vld [vmem:[#allocation7 + $0x918] sm:$0xff]  ;;  %v970_v50 = vld [vmem:[#allocation7 + $0x948] sm:$0xff] }
 0x12f   : > { %4955 = vmatprep.subr.bf16.mxu0 %v4954_v39  ;;  %v1072_v39 = vld [vmem:[#allocation7 + $0xa28] sm:$0xff]  ;;  %v5096_v55 = vpack.c.bf16 %v1073_v48, %v1071_v47  ;;  %v1093_v45 = vld [vmem:[#allocation7 + $0xad0] sm:$0xff] }
 0x130   : > { %v967_v47 = vld [vmem:[#allocation7 + $0x930] sm:$0xff]  ;;  %v1096_v48 = vld [vmem:[#allocation7 + $0xae8] sm:$0xff] }
 0x131   : > { %5013 = vmatpush1.bf16.msra.mxu1 %v5012_v57  ;;  %v7287_v57 = vld [vmem:[#allocation7 + $0x8a0] sm:$0xff]  ;;  %v5064_v53 = vpack.c.bf16 %v967_v47, %v965_v42  ;;  %v992_v47 = vld [vmem:[#allocation7 + $0x9f8] sm:$0xff] }
 0x132   : > { %4957 = vmatpush1.bf16.msra.mxu0 %v4956_v46  ;;  %5015 = vmatprep.subr.bf16.mxu1 %v5014_v60  ;;  %v5094_v46 = vpack.c.bf16 %v1074_v40, %v1072_v39  ;;  %v1077_v60 = vld [vmem:[#allocation7 + $0xa50] sm:$0xff]  ;;  %v968_v39 = vld [vmem:[#allocation7 + $0x938] sm:$0xff] }
 0x133   : > { %4959 = vmatprep.subr.bf16.mxu0 %v4958_v51  ;;  %v1076_v51 = vld [vmem:[#allocation7 + $0xa48] sm:$0xff]  ;;  %v5100_v4 = vpack.c.bf16 %v1077_v60, %v1075_v59  ;;  %v971_v59 = vld [vmem:[#allocation7 + $0x950] sm:$0xff] }
 0x134   : > { %v1100_v60 = vld [vmem:[#allocation7 + $0xb08] sm:$0xff] }
 0x135   : > { %5017 = vmatpush1.bf16.msra.mxu1 %v5016_v7  ;;  %v1079_v7 = vld [vmem:[#allocation7 + $0xa60] sm:$0xff] }
 0x136   : > { %4961 = vmatpush1.bf16.msra.mxu0 %v4960_v58  ;;  %5019 = vmatprep.subr.bf16.mxu1 %v5018_v10  ;;  %v5098_v58 = vpack.c.bf16 %v1078_v52, %v1076_v51  ;;  %v955_v10 = vld [vmem:[#allocation7 + $0x8d0] sm:$0xff]  ;;  %v972_v51 = vld [vmem:[#allocation7 + $0x958] sm:$0xff] }
 0x137   : > { %5027 = vmatprep.subr.bf16.mxu0 %v5026_v63  ;;  %v1080_v63 = vld [vmem:[#allocation7 + $0xa68] sm:$0xff]  ;;  %v5052_v17 = vpack.c.bf16 %v955_v10, %v7294_v5  ;;  %v1101_v5 = vld [vmem:[#allocation7 + $0xb10] sm:$0xff] }
 0x138   : > { %v5102_v6 = vpack.c.bf16 %v1082_v0, %v1080_v63  ;;  %v976_v63 = vld [vmem:[#allocation7 + $0x978] sm:$0xff]  ;;  %v978_v10 = vld [vmem:[#allocation7 + $0x988] sm:$0xff] }
 0x139   : > { %782 = vmatmul.mubr.f32.vlgmr.msra.gmra.mrb[2].mxu0 %v7277_v1  ;;  %5021 = vmatpush1.bf16.msra.mxu1 %v5020_v19  ;;  %v5106_v19 = vpack.c.bf16 %v1086_v12, %v1084_v11  ;;  %v980_v11 = vld [vmem:[#allocation7 + $0x998] sm:$0xff] }
 0x13a   : > { %5029 = vmatpush1.bf16.msra.mxu0 %v5028_v8  ;;  %1057 = vmatprep.mubr.f32.mxu0 %v7273_v2  ;;  %v1081_v8 = vld [vmem:[#allocation7 + $0xa70] sm:$0xff]  ;;  %v5074_v18 = vpack.c.bf16 %v980_v11, %v978_v10  ;;  %v1209_v10 = vld [vmem:[#allocation7 + $0xc20] sm:$0xff] }
 0x13b   : > { %5031 = vmatprep.subr.bf16.mxu0 %v5030_v13  ;;  %5023 = vmatprep.subr.bf16.mxu1 %v5022_v22  ;;  %v6983_v13 = vmov 0.0   ;;  %v5104_v16 = vpack.c.bf16 %v1081_v8, %v1079_v7  ;;  %v5054_v22 = vpack.c.bf16 %v960_v15, %v958_v14  ;;  %v975_v7 = vld [vmem:[#allocation7 + $0x970] sm:$0xff]  ;;  %v1104_v8 = vld [vmem:[#allocation7 + $0xb28] sm:$0xff]  ;;  %v977_v14 = vld [vmem:[#allocation7 + $0x980] sm:$0xff] }
 0x13c   : > { %333 = vst [vmem:[#allocation3] sm:$0xff] %v6983_v13  ;;  %334 = vst [vmem:[#allocation3 + $0x8] sm:$0xff] %v6983_v13 }
 0x13d   : > { %5025 = vmatpush1.bf16.msra.mxu1 %v5024_v31  ;;  %335 = vst [vmem:[#allocation3 + $0x10] sm:$0xff] %v6983_v13  ;;  %336 = vst [vmem:[#allocation3 + $0x18] sm:$0xff] %v6983_v13 }
 0x13e   : > { %5033 = vmatpush1.bf16.msra.mxu0 %v5032_v20  ;;  %5091 = vmatprep.subr.bf16.mxu1 %v5090_v34  ;;  %337 = vst [vmem:[#allocation3 + $0x20] sm:$0xff] %v6983_v13  ;;  %338 = vst [vmem:[#allocation3 + $0x28] sm:$0xff] %v6983_v13  ;;  %v1083_v20 = vld [vmem:[#allocation7 + $0xa80] sm:$0xff]  ;;  %v5058_v34 = vpack.c.bf16 %v964_v27, %v962_v26 }
 0x13f   : > { %5035 = vmatprep.subr.bf16.mxu0 %v5034_v25  ;;  %339 = vst [vmem:[#allocation3 + $0x30] sm:$0xff] %v6983_v13  ;;  %340 = vst [vmem:[#allocation3 + $0x38] sm:$0xff] %v6983_v13  ;;  %v1090_v25 = vld [vmem:[#allocation7 + $0xab8] sm:$0xff]  ;;  %v5108_v28 = vpack.c.bf16 %v1085_v21, %v1083_v20  ;;  %v1108_v20 = vld [vmem:[#allocation7 + $0xb48] sm:$0xff] }
 0x140   : > { %920 = vmatmul.mubr.f32.vlgmr.msra.gmra.mrb[2].mxu1 %v7277_v1  ;;  %v7291_v1 = vld [vmem:[#allocation7 + $0x8d8] sm:$0xff]  ;;  %341 = vst [vmem:[#allocation3 + $0x40] sm:$0xff] %v6983_v13  ;;  %342 = vst [vmem:[#allocation3 + $0x48] sm:$0xff] %v6983_v13  ;;  %v5110_v31 = vpack.c.bf16 %v1090_v25, %v1088_v24  ;;  %v981_v26 = vld [vmem:[#allocation7 + $0x9a0] sm:$0xff] }
 0x141   : > { %5093 = vmatpush1.bf16.msra.mxu1 %v5092_v43  ;;  %1195 = vmatprep.mubr.f32.mxu1 %v7273_v2  ;;  %v5048_v2 = vpack.c.bf16 %v951_v62, %v7287_v57  ;;  %v5050_v9 = vpack.c.bf16 %v7291_v1, %v7289_v3  ;;  %343 = vst [vmem:[#allocation3 + $0x50] sm:$0xff] %v6983_v13  ;;  %344 = vst [vmem:[#allocation3 + $0x58] sm:$0xff] %v6983_v13  ;;  %v1097_v57 = vld [vmem:[#allocation7 + $0xaf0] sm:$0xff]  ;;  %v974_v62 = vld [vmem:[#allocation7 + $0x968] sm:$0xff] }
 0x142   : > { %5037 = vmatpush1.bf16.msra.mxu0 %v5036_v32  ;;  %5095 = vmatprep.subr.bf16.mxu1 %v5094_v46  ;;  %345 = vst [vmem:[#allocation3 + $0x60] sm:$0xff] %v6983_v13  ;;  %346 = vst [vmem:[#allocation3 + $0x68] sm:$0xff] %v6983_v13  ;;  %v1087_v32 = vld [vmem:[#allocation7 + $0xaa0] sm:$0xff]  ;;  %v5062_v46 = vpack.c.bf16 %v968_v39, %v966_v38  ;;  %v5068_v3 = vpack.c.bf16 %v971_v59, %v969_v54  ;;  %v1110_v21 = vld [vmem:[#allocation7 + $0xb58] sm:$0xff] }
 0x143   : > { %5039 = vmatprep.subr.bf16.mxu0 %v5038_v37  ;;  %347 = vst [vmem:[#allocation3 + $0x70] sm:$0xff] %v6983_v13  ;;  %348 = vst [vmem:[#allocation3 + $0x78] sm:$0xff] %v6983_v13  ;;  %v1094_v37 = vld [vmem:[#allocation7 + $0xad8] sm:$0xff]  ;;  %v5112_v40 = vpack.c.bf16 %v1089_v33, %v1087_v32  ;;  %v973_v1 = vld [vmem:[#allocation7 + $0x960] sm:$0xff]  ;;  %v5130_v27 = vpack.c.bf16 %v1110_v21, %v1108_v20 }
 0x144   : > { %349 = vst [vmem:[#allocation3 + $0x80] sm:$0xff] %v6983_v13  ;;  %350 = vst [vmem:[#allocation3 + $0x88] sm:$0xff] %v6983_v13  ;;  %v5114_v43 = vpack.c.bf16 %v1094_v37, %v1092_v36  ;;  %v1112_v32 = vld [vmem:[#allocation7 + $0xb68] sm:$0xff]  ;;  %v1114_v33 = vld [vmem:[#allocation7 + $0xb78] sm:$0xff] }
 0x145   : > { %5097 = vmatpush1.bf16.msra.mxu1 %v5096_v55  ;;  %351 = vst [vmem:[#allocation3 + $0x90] sm:$0xff] %v6983_v13  ;;  %352 = vst [vmem:[#allocation3 + $0x98] sm:$0xff] %v6983_v13  ;;  %v985_v38 = vld [vmem:[#allocation7 + $0x9c0] sm:$0xff]  ;;  %v5134_v39 = vpack.c.bf16 %v1114_v33, %v1112_v32  ;;  %v1208_v59 = vld [vmem:[#allocation7 + $0xc18] sm:$0xff] }
 0x146   : > { %5041 = vmatpush1.bf16.msra.mxu0 %v5040_v44  ;;  %5099 = vmatprep.subr.bf16.mxu1 %v5098_v58  ;;  %353 = vst [vmem:[#allocation3 + $0xa0] sm:$0xff] %v6983_v13  ;;  %354 = vst [vmem:[#allocation3 + $0xa8] sm:$0xff] %v6983_v13  ;;  %v1091_v44 = vld [vmem:[#allocation7 + $0xac0] sm:$0xff]  ;;  %v5066_v58 = vpack.c.bf16 %v972_v51, %v970_v50  ;;  %v7299_v20 = vld [vmem:[#allocation2] sm:$0xf] }
 0x147   : > { %5043 = vmatprep.subr.bf16.mxu0 %v5042_v49  ;;  %355 = vst [vmem:[#allocation3 + $0xb0] sm:$0xff] %v6983_v13  ;;  %356 = vst [vmem:[#allocation3 + $0xb8] sm:$0xff] %v6983_v13  ;;  %v1098_v49 = vld [vmem:[#allocation7 + $0xaf8] sm:$0xff]  ;;  %v5116_v52 = vpack.c.bf16 %v1093_v45, %v1091_v44  ;;  %v1116_v44 = vld [vmem:[#allocation7 + $0xb88] sm:$0xff] }
 0x148   : > { %357 = vst [vmem:[#allocation3 + $0xc0] sm:$0xff] %v6983_v13  ;;  %358 = vst [vmem:[#allocation3 + $0xc8] sm:$0xff] %v6983_v13  ;;  %v5118_v55 = vpack.c.bf16 %v1098_v49, %v1096_v48  ;;  %v1118_v45 = vld [vmem:[#allocation7 + $0xb98] sm:$0xff]  ;;  %v989_v50 = vld [vmem:[#allocation7 + $0x9e0] sm:$0xff] }
 0x149   : > { %359 = vst [vmem:[#allocation3 + $0xd0] sm:$0xff] %v6983_v13  ;;  %360 = vst [vmem:[#allocation3 + $0xd8] sm:$0xff] %v6983_v13  ;;  %5101 = vmatpush1.bf16.msra.mxu1 %v5100_v4  ;;  %v5138_v51 = vpack.c.bf16 %v1118_v45, %v1116_v44  ;;  %v1218_v32 = vld [vmem:[#allocation7 + $0xc68] sm:$0xff]  ;;  %v1220_v33 = vld [vmem:[#allocation7 + $0xc78] sm:$0xff] }
 0x14a   : > { %5045 = vmatpush1.bf16.msra.mxu0 %v5044_v56  ;;  %361 = vst [vmem:[#allocation3 + $0xe0] sm:$0xff] %v6983_v13  ;;  %362 = vst [vmem:[#allocation3 + $0xe8] sm:$0xff] %v6983_v13  ;;  %5103 = vmatprep.subr.bf16.mxu1 %v5102_v6  ;;  %v1095_v56 = vld [vmem:[#allocation7 + $0xae0] sm:$0xff]  ;;  %v5070_v6 = vpack.c.bf16 %v976_v63, %v974_v62  ;;  %v1222_v44 = vld [vmem:[#allocation7 + $0xc88] sm:$0xff] }
 0x14b   : > { %5047 = vmatprep.subr.bf16.mxu0 %v5046_v61  ;;  %363 = vst [vmem:[#allocation3 + $0xf0] sm:$0xff] %v6983_v13  ;;  %364 = vst [vmem:[#allocation3 + $0xf8] sm:$0xff] %v6983_v13  ;;  %v1102_v61 = vld [vmem:[#allocation7 + $0xb18] sm:$0xff]  ;;  %v5120_v0 = vpack.c.bf16 %v1097_v57, %v1095_v56  ;;  %v1120_v56 = vld [vmem:[#allocation7 + $0xba8] sm:$0xff] }
 0x14c   : > { %365 = vst [vmem:[#allocation3 + $0x100] sm:$0xff] %v6983_v13  ;;  %366 = vst [vmem:[#allocation3 + $0x108] sm:$0xff] %v6983_v13  ;;  %v5122_v4 = vpack.c.bf16 %v1102_v61, %v1100_v60  ;;  %v1122_v57 = vld [vmem:[#allocation7 + $0xbb8] sm:$0xff]  ;;  %v1205_v62 = vld [vmem:[#allocation7 + $0xc00] sm:$0xff] }
 0x14d   : > { %367 = vst [vmem:[#allocation3 + $0x110] sm:$0xff] %v6983_v13  ;;  %368 = vst [vmem:[#allocation3 + $0x118] sm:$0xff] %v6983_v13  ;;  %5105 = vmatpush1.bf16.msra.mxu1 %v5104_v16  ;;  %v5072_v13 = vpack.c.bf16 %v975_v7, %v973_v1  ;;  %v1103_v16 = vld [vmem:[#allocation7 + $0xb20] sm:$0xff]  ;;  %v5142_v63 = vpack.c.bf16 %v1122_v57, %v1120_v56  ;;  %v1212_v7 = vld [vmem:[#allocation7 + $0xc38] sm:$0xff] }
 0x14e   : > { %5049 = vmatpush1.bf16.msra.mxu0 %v5048_v2  ;;  %5107 = vmatprep.subr.bf16.mxu1 %v5106_v19  ;;  %v1099_v2 = vld [vmem:[#allocation7 + $0xb00] sm:$0xff]  ;;  %v979_v19 = vld [vmem:[#allocation7 + $0x990] sm:$0xff]  ;;  %v1224_v45 = vld [vmem:[#allocation7 + $0xc98] sm:$0xff] }
 0x14f   : > { %5051 = vmatprep.subr.bf16.mxu0 %v5050_v9  ;;  %v1106_v9 = vld [vmem:[#allocation7 + $0xb38] sm:$0xff]  ;;  %v5124_v12 = vpack.c.bf16 %v1101_v5, %v1099_v2  ;;  %v5076_v25 = vpack.c.bf16 %v979_v19, %v977_v14  ;;  %v1124_v2 = vld [vmem:[#allocation7 + $0xbc8] sm:$0xff] }
 0x150   : > { %v5126_v15 = vpack.c.bf16 %v1106_v9, %v1104_v8  ;;  %v1126_v5 = vld [vmem:[#allocation7 + $0xbd8] sm:$0xff]  ;;  %v1226_v56 = vld [vmem:[#allocation7 + $0xca8] sm:$0xff] }
 0x151   : > { %5109 = vmatpush1.bf16.msra.mxu1 %v5108_v28  ;;  %v1107_v28 = vld [vmem:[#allocation7 + $0xb40] sm:$0xff]  ;;  %v5146_v11 = vpack.c.bf16 %v1126_v5, %v1124_v2  ;;  %v1216_v19 = vld [vmem:[#allocation7 + $0xc58] sm:$0xff]  ;;  %v1230_v2 = vld [vmem:[#allocation7 + $0xcc8] sm:$0xff] }
 0x152   : > { %5053 = vmatpush1.bf16.msra.mxu0 %v5052_v17  ;;  %5111 = vmatprep.subr.bf16.mxu1 %v5110_v31  ;;  %v1105_v17 = vld [vmem:[#allocation7 + $0xb30] sm:$0xff]  ;;  %v1228_v57 = vld [vmem:[#allocation7 + $0xcb8] sm:$0xff] }
 0x153   : > { %5055 = vmatprep.subr.bf16.mxu0 %v5054_v22  ;;  %v982_v22 = vld [vmem:[#allocation7 + $0x9a8] sm:$0xff]  ;;  %v5128_v24 = vpack.c.bf16 %v1105_v17, %v1103_v16  ;;  %v983_v31 = vld [vmem:[#allocation7 + $0x9b0] sm:$0xff]  ;;  %v1130_v17 = vld [vmem:[#allocation7 + $0xbf8] sm:$0xff] }
 0x154   : > { %v5078_v30 = vpack.c.bf16 %v984_v23, %v982_v22  ;;  %v5080_v37 = vpack.c.bf16 %v983_v31, %v981_v26  ;;  %v1128_v16 = vld [vmem:[#allocation7 + $0xbe8] sm:$0xff]  ;;  %v1213_v23 = vld [vmem:[#allocation7 + $0xc40] sm:$0xff]  ;;  %v1129_v26 = vld [vmem:[#allocation7 + $0xbf0] sm:$0xff] }
 0x155   : > { %5113 = vmatpush1.bf16.msra.mxu1 %v5112_v40  ;;  %v1111_v40 = vld [vmem:[#allocation7 + $0xb60] sm:$0xff]  ;;  %v7302_v31 = vld [vmem:[#allocation2 + $0x8] sm:$0xf] }
 0x156   : > { %5057 = vmatpush1.bf16.msra.mxu0 %v5056_v29  ;;  %5115 = vmatprep.subr.bf16.mxu1 %v5114_v43  ;;  %v1109_v29 = vld [vmem:[#allocation7 + $0xb50] sm:$0xff]  ;;  %v1232_v5 = vld [vmem:[#allocation7 + $0xcd8] sm:$0xff] }
 0x157   : > { %5059 = vmatprep.subr.bf16.mxu0 %v5058_v34  ;;  %v986_v34 = vld [vmem:[#allocation7 + $0x9c8] sm:$0xff]  ;;  %v5132_v36 = vpack.c.bf16 %v1109_v29, %v1107_v28  ;;  %v987_v43 = vld [vmem:[#allocation7 + $0x9d0] sm:$0xff] }
 0x158   : > { %v5082_v42 = vpack.c.bf16 %v988_v35, %v986_v34  ;;  %v5084_v49 = vpack.c.bf16 %v987_v43, %v985_v38  ;;  %v1215_v28 = vld [vmem:[#allocation7 + $0xc50] sm:$0xff]  ;;  %v1344_v29 = vld [vmem:[#allocation7 + $0xe08] sm:$0xff]  ;;  %v1343_v38 = vld [vmem:[#allocation7 + $0xe00] sm:$0xff] }
 0x159   : > { %5117 = vmatpush1.bf16.msra.mxu1 %v5116_v52  ;;  %v1115_v52 = vld [vmem:[#allocation7 + $0xb80] sm:$0xff]  ;;  %v5164_v35 = vpack.c.bf16 %v1215_v28, %v1213_v23  ;;  %v1350_v43 = vld [vmem:[#allocation7 + $0xe38] sm:$0xff] }
 0x15a   : > { %5061 = vmatpush1.bf16.msra.mxu0 %v5060_v41  ;;  %5119 = vmatprep.subr.bf16.mxu1 %v5118_v55  ;;  %v1113_v41 = vld [vmem:[#allocation7 + $0xb70] sm:$0xff]  ;;  %v1359_v23 = vld [vmem:[#allocation7 + $0xe80] sm:$0xff]  ;;  %v1366_v28 = vld [vmem:[#allocation7 + $0xeb8] sm:$0xff] }
 0x15b   : > { %5063 = vmatprep.subr.bf16.mxu0 %v5062_v46  ;;  %v990_v46 = vld [vmem:[#allocation7 + $0x9e8] sm:$0xff]  ;;  %v5136_v48 = vpack.c.bf16 %v1113_v41, %v1111_v40  ;;  %v991_v55 = vld [vmem:[#allocation7 + $0x9f0] sm:$0xff]  ;;  %v5166_v40 = vpack.c.bf16 %v1220_v33, %v1218_v32 }
 0x15c   : > { %v5086_v54 = vpack.c.bf16 %v992_v47, %v990_v46  ;;  %v5088_v61 = vpack.c.bf16 %v991_v55, %v989_v50  ;;  %v1219_v41 = vld [vmem:[#allocation7 + $0xc70] sm:$0xff]  ;;  %v1347_v50 = vld [vmem:[#allocation7 + $0xe20] sm:$0xff]  ;;  %v1354_v55 = vld [vmem:[#allocation7 + $0xe58] sm:$0xff] }
 0x15d   : > { %5121 = vmatpush1.bf16.msra.mxu1 %v5120_v0  ;;  %v1119_v0 = vld [vmem:[#allocation7 + $0xba0] sm:$0xff] }
 0x15e   : > { %5065 = vmatpush1.bf16.msra.mxu0 %v5064_v53  ;;  %5123 = vmatprep.subr.bf16.mxu1 %v5122_v4  ;;  %v1117_v53 = vld [vmem:[#allocation7 + $0xb90] sm:$0xff] }
 0x15f   : > { %5067 = vmatprep.subr.bf16.mxu0 %v5066_v58  ;;  %v1206_v58 = vld [vmem:[#allocation7 + $0xc08] sm:$0xff]  ;;  %v5140_v60 = vpack.c.bf16 %v1117_v53, %v1115_v52  ;;  %v1207_v4 = vld [vmem:[#allocation7 + $0xc10] sm:$0xff]  ;;  %v5170_v52 = vpack.c.bf16 %v1224_v45, %v1222_v44 }
 0x160   : > { %v5154_v1 = vpack.c.bf16 %v1208_v59, %v1206_v58  ;;  %v5156_v9 = vpack.c.bf16 %v1207_v4, %v1205_v62  ;;  %v1223_v53 = vld [vmem:[#allocation7 + $0xc90] sm:$0xff]  ;;  %v1351_v62 = vld [vmem:[#allocation7 + $0xe40] sm:$0xff]  ;;  %v1358_v4 = vld [vmem:[#allocation7 + $0xe78] sm:$0xff] }
 0x161   : > { %5125 = vmatpush1.bf16.msra.mxu1 %v5124_v12  ;;  %v1123_v12 = vld [vmem:[#allocation7 + $0xbc0] sm:$0xff] }
 0x162   : > { %5069 = vmatpush1.bf16.msra.mxu0 %v5068_v3  ;;  %5127 = vmatprep.subr.bf16.mxu1 %v5126_v15  ;;  %v1121_v3 = vld [vmem:[#allocation7 + $0xbb0] sm:$0xff] }
 0x163   : > { %5071 = vmatprep.subr.bf16.mxu0 %v5070_v6  ;;  %v1210_v6 = vld [vmem:[#allocation7 + $0xc28] sm:$0xff]  ;;  %v5144_v8 = vpack.c.bf16 %v1121_v3, %v1119_v0  ;;  %v1211_v15 = vld [vmem:[#allocation7 + $0xc30] sm:$0xff]  ;;  %v5174_v0 = vpack.c.bf16 %v1228_v57, %v1226_v56 }
 0x164   : > { %v5158_v14 = vpack.c.bf16 %v1212_v7, %v1210_v6  ;;  %v5160_v22 = vpack.c.bf16 %v1211_v15, %v1209_v10  ;;  %v1227_v3 = vld [vmem:[#allocation7 + $0xcb0] sm:$0xff]  ;;  %v1355_v10 = vld [vmem:[#allocation7 + $0xe60] sm:$0xff]  ;;  %v1362_v15 = vld [vmem:[#allocation7 + $0xe98] sm:$0xff] }
 0x165   : > { %5129 = vmatpush1.bf16.msra.mxu1 %v5128_v24  ;;  %v5150_v24 = vpack.c.bf16 %v1130_v17, %v1128_v16  ;;  %v1234_v16 = vld [vmem:[#allocation7 + $0xce8] sm:$0xff]  ;;  %v1236_v17 = vld [vmem:[#allocation7 + $0xcf8] sm:$0xff] }
 0x166   : > { %5073 = vmatpush1.bf16.msra.mxu0 %v5072_v13  ;;  %5131 = vmatprep.subr.bf16.mxu1 %v5130_v27  ;;  %v1125_v13 = vld [vmem:[#allocation7 + $0xbd0] sm:$0xff] }
 0x167   : > { %5075 = vmatprep.subr.bf16.mxu0 %v5074_v18  ;;  %v1214_v18 = vld [vmem:[#allocation7 + $0xc48] sm:$0xff]  ;;  %v5148_v21 = vpack.c.bf16 %v1125_v13, %v1123_v12  ;;  %v5178_v12 = vpack.c.bf16 %v1232_v5, %v1230_v2  ;;  %v1231_v13 = vld [vmem:[#allocation7 + $0xcd0] sm:$0xff] }
 0x168   : > { %v5162_v27 = vpack.c.bf16 %v1216_v19, %v1214_v18 }
 0x169   : > { %5133 = vmatpush1.bf16.msra.mxu1 %v5132_v36  ;;  %v1217_v36 = vld [vmem:[#allocation7 + $0xc60] sm:$0xff] }
 0x16a   : > { %5077 = vmatpush1.bf16.msra.mxu0 %v5076_v25  ;;  %5135 = vmatprep.subr.bf16.mxu1 %v5134_v39  ;;  %v1127_v25 = vld [vmem:[#allocation7 + $0xbe0] sm:$0xff]  ;;  %v1345_v39 = vld [vmem:[#allocation7 + $0xe10] sm:$0xff]  ;;  %v5168_v47 = vpack.c.bf16 %v1219_v41, %v1217_v36  ;;  %v1370_v41 = vld [vmem:[#allocation7 + $0xed8] sm:$0xff] }
 0x16b   : > { %5079 = vmatprep.subr.bf16.mxu0 %v5078_v30  ;;  %v1346_v30 = vld [vmem:[#allocation7 + $0xe18] sm:$0xff]  ;;  %v5152_v34 = vpack.c.bf16 %v1129_v26, %v1127_v25  ;;  %v5220_v46 = vpack.c.bf16 %v1345_v39, %v1343_v38  ;;  %v5182_v25 = vpack.c.bf16 %v1236_v17, %v1234_v16  ;;  %v1235_v26 = vld [vmem:[#allocation7 + $0xcf0] sm:$0xff]  ;;  %v1363_v36 = vld [vmem:[#allocation7 + $0xea0] sm:$0xff] }
 0x16c   : > { %v1239_v39 = vld [vmem:[#allocation7 + $0xd10] sm:$0xff] }
 0x16d   : > { %5137 = vmatpush1.bf16.msra.mxu1 %v5136_v48  ;;  %v1221_v48 = vld [vmem:[#allocation7 + $0xc80] sm:$0xff] }
 0x16e   : > { %5081 = vmatpush1.bf16.msra.mxu0 %v5080_v37  ;;  %5139 = vmatprep.subr.bf16.mxu1 %v5138_v51  ;;  %v5218_v37 = vpack.c.bf16 %v1346_v30, %v1344_v29  ;;  %v1349_v51 = vld [vmem:[#allocation7 + $0xe30] sm:$0xff]  ;;  %v5172_v59 = vpack.c.bf16 %v1223_v53, %v1221_v48  ;;  %v1238_v29 = vld [vmem:[#allocation7 + $0xd08] sm:$0xff]  ;;  %v1240_v30 = vld [vmem:[#allocation7 + $0xd18] sm:$0xff] }
 0x16f   : > { %5083 = vmatprep.subr.bf16.mxu0 %v5082_v42  ;;  %v1348_v42 = vld [vmem:[#allocation7 + $0xe28] sm:$0xff]  ;;  %v5224_v58 = vpack.c.bf16 %v1349_v51, %v1347_v50  ;;  %v5186_v38 = vpack.c.bf16 %v1240_v30, %v1238_v29  ;;  %v1367_v48 = vld [vmem:[#allocation7 + $0xec0] sm:$0xff]  ;;  %v1243_v51 = vld [vmem:[#allocation7 + $0xd30] sm:$0xff] }
 0x170   : > { %v1374_v53 = vld [vmem:[#allocation7 + $0xef8] sm:$0xff] }
 0x171   : > { %5141 = vmatpush1.bf16.msra.mxu1 %v5140_v60  ;;  %v1225_v60 = vld [vmem:[#allocation7 + $0xca0] sm:$0xff] }
 0x172   : > { %5085 = vmatpush1.bf16.msra.mxu0 %v5084_v49  ;;  %5143 = vmatprep.subr.bf16.mxu1 %v5142_v63  ;;  %v5222_v49 = vpack.c.bf16 %v1350_v43, %v1348_v42  ;;  %v1353_v63 = vld [vmem:[#allocation7 + $0xe50] sm:$0xff]  ;;  %v5176_v7 = vpack.c.bf16 %v1227_v3, %v1225_v60  ;;  %v1242_v42 = vld [vmem:[#allocation7 + $0xd28] sm:$0xff]  ;;  %v1244_v43 = vld [vmem:[#allocation7 + $0xd38] sm:$0xff] }
 0x173   : > { %5087 = vmatprep.subr.bf16.mxu0 %v5086_v54  ;;  %v1352_v54 = vld [vmem:[#allocation7 + $0xe48] sm:$0xff]  ;;  %v5228_v6 = vpack.c.bf16 %v1353_v63, %v1351_v62  ;;  %v5190_v50 = vpack.c.bf16 %v1244_v43, %v1242_v42  ;;  %v1371_v60 = vld [vmem:[#allocation7 + $0xee0] sm:$0xff]  ;;  %v1247_v63 = vld [vmem:[#allocation7 + $0xd50] sm:$0xff] }
 0x174   : > { %v1378_v3 = vld [vmem:[#allocation7 + $0xf18] sm:$0xff] }
 0x175   : > { %5145 = vmatpush1.bf16.msra.mxu1 %v5144_v8  ;;  %v1229_v8 = vld [vmem:[#allocation7 + $0xcc0] sm:$0xff] }
 0x176   : > { %5089 = vmatpush1.bf16.msra.mxu0 %v5088_v61  ;;  %5147 = vmatprep.subr.bf16.mxu1 %v5146_v11  ;;  %v5226_v61 = vpack.c.bf16 %v1354_v55, %v1352_v54  ;;  %v1357_v11 = vld [vmem:[#allocation7 + $0xe70] sm:$0xff]  ;;  %v5180_v19 = vpack.c.bf16 %v1231_v13, %v1229_v8  ;;  %v1246_v54 = vld [vmem:[#allocation7 + $0xd48] sm:$0xff]  ;;  %v1248_v55 = vld [vmem:[#allocation7 + $0xd58] sm:$0xff] }
 0x177   : > { %5155 = vmatprep.subr.bf16.mxu0 %v5154_v1  ;;  %v1356_v1 = vld [vmem:[#allocation7 + $0xe68] sm:$0xff]  ;;  %v5232_v18 = vpack.c.bf16 %v1357_v11, %v1355_v10  ;;  %v5194_v62 = vpack.c.bf16 %v1248_v55, %v1246_v54  ;;  %v1375_v8 = vld [vmem:[#allocation7 + $0xf00] sm:$0xff]  ;;  %v1251_v11 = vld [vmem:[#allocation7 + $0xd70] sm:$0xff] }
 0x178   : > { %v1382_v13 = vld [vmem:[#allocation7 + $0xf38] sm:$0xff] }
 0x179   : > { %1058 = vmatmul.mubr.f32.vlgmr.msra.gmra.mrb[4].mxu0 %v7299_v20  ;;  %5149 = vmatpush1.bf16.msra.mxu1 %v5148_v21  ;;  %v1233_v21 = vld [vmem:[#allocation7 + $0xce0] sm:$0xff] }
 0x17a   : > { %5157 = vmatpush1.bf16.msra.mxu0 %v5156_v9  ;;  %1333 = vmatprep.mubr.f32.mxu0 %v7302_v31  ;;  %v5230_v9 = vpack.c.bf16 %v1358_v4, %v1356_v1  ;;  %v5184_v33 = vpack.c.bf16 %v1235_v26, %v1233_v21  ;;  %v1250_v1 = vld [vmem:[#allocation7 + $0xd68] sm:$0xff]  ;;  %v1252_v4 = vld [vmem:[#allocation7 + $0xd78] sm:$0xff]  ;;  %v1379_v21 = vld [vmem:[#allocation7 + $0xf20] sm:$0xff] }
 0x17b   : > { %5159 = vmatprep.subr.bf16.mxu0 %v5158_v14  ;;  %5151 = vmatprep.subr.bf16.mxu1 %v5150_v24  ;;  %v1360_v14 = vld [vmem:[#allocation7 + $0xe88] sm:$0xff]  ;;  %v1361_v24 = vld [vmem:[#allocation7 + $0xe90] sm:$0xff]  ;;  %v5198_v10 = vpack.c.bf16 %v1252_v4, %v1250_v1  ;;  %v1386_v26 = vld [vmem:[#allocation7 + $0xf58] sm:$0xff] }
 0x17c   : > { %v5236_v32 = vpack.c.bf16 %v1361_v24, %v1359_v23  ;;  %v1255_v24 = vld [vmem:[#allocation7 + $0xd90] sm:$0xff] }
 0x17d   : > { %5153 = vmatpush1.bf16.msra.mxu1 %v5152_v34  ;;  %v1237_v34 = vld [vmem:[#allocation7 + $0xd00] sm:$0xff] }
 0x17e   : > { %5161 = vmatpush1.bf16.msra.mxu0 %v5160_v22  ;;  %5219 = vmatprep.subr.bf16.mxu1 %v5218_v37  ;;  %v5234_v22 = vpack.c.bf16 %v1362_v15, %v1360_v14  ;;  %v1365_v37 = vld [vmem:[#allocation7 + $0xeb0] sm:$0xff]  ;;  %v5188_v45 = vpack.c.bf16 %v1239_v39, %v1237_v34  ;;  %v1254_v14 = vld [vmem:[#allocation7 + $0xd88] sm:$0xff]  ;;  %v1256_v15 = vld [vmem:[#allocation7 + $0xd98] sm:$0xff] }
 0x17f   : > { %5163 = vmatprep.subr.bf16.mxu0 %v5162_v27  ;;  %v1364_v27 = vld [vmem:[#allocation7 + $0xea8] sm:$0xff]  ;;  %v5240_v44 = vpack.c.bf16 %v1365_v37, %v1363_v36  ;;  %v5202_v23 = vpack.c.bf16 %v1256_v15, %v1254_v14  ;;  %v1383_v34 = vld [vmem:[#allocation7 + $0xf40] sm:$0xff]  ;;  %v1259_v37 = vld [vmem:[#allocation7 + $0xdb0] sm:$0xff] }
 0x180   : > { %1196 = vmatmul.mubr.f32.vlgmr.msra.gmra.mrb[4].mxu1 %v7299_v20  ;;  %v1390_v39 = vld [vmem:[#allocation7 + $0xf78] sm:$0xff] }
 0x181   : > { %5221 = vmatpush1.bf16.msra.mxu1 %v5220_v46  ;;  %1471 = vmatprep.mubr.f32.mxu1 %v7302_v31  ;;  %v1241_v46 = vld [vmem:[#allocation7 + $0xd20] sm:$0xff] }
 0x182   : > { %5165 = vmatpush1.bf16.msra.mxu0 %v5164_v35  ;;  %5223 = vmatprep.subr.bf16.mxu1 %v5222_v49  ;;  %v5238_v35 = vpack.c.bf16 %v1366_v28, %v1364_v27  ;;  %v1369_v49 = vld [vmem:[#allocation7 + $0xed0] sm:$0xff]  ;;  %v5192_v57 = vpack.c.bf16 %v1243_v51, %v1241_v46  ;;  %v1258_v27 = vld [vmem:[#allocation7 + $0xda8] sm:$0xff]  ;;  %v1260_v28 = vld [vmem:[#allocation7 + $0xdb8] sm:$0xff] }
 0x183   : > { %5167 = vmatprep.subr.bf16.mxu0 %v5166_v40  ;;  %v1368_v40 = vld [vmem:[#allocation7 + $0xec8] sm:$0xff]  ;;  %v5244_v56 = vpack.c.bf16 %v1369_v49, %v1367_v48  ;;  %v5206_v36 = vpack.c.bf16 %v1260_v28, %v1258_v27  ;;  %v1387_v46 = vld [vmem:[#allocation7 + $0xf60] sm:$0xff]  ;;  %v1263_v49 = vld [vmem:[#allocation7 + $0xdd0] sm:$0xff] }
 0x184   : > { %v1394_v51 = vld [vmem:[#allocation7 + $0xf98] sm:$0xff] }
 0x185   : > { %5225 = vmatpush1.bf16.msra.mxu1 %v5224_v58  ;;  %v1245_v58 = vld [vmem:[#allocation7 + $0xd40] sm:$0xff] }
 0x186   : > { %5169 = vmatpush1.bf16.msra.mxu0 %v5168_v47  ;;  %5227 = vmatprep.subr.bf16.mxu1 %v5226_v61  ;;  %v5242_v47 = vpack.c.bf16 %v1370_v41, %v1368_v40  ;;  %v1373_v61 = vld [vmem:[#allocation7 + $0xef0] sm:$0xff]  ;;  %v5196_v5 = vpack.c.bf16 %v1247_v63, %v1245_v58  ;;  %v1262_v40 = vld [vmem:[#allocation7 + $0xdc8] sm:$0xff]  ;;  %v1264_v41 = vld [vmem:[#allocation7 + $0xdd8] sm:$0xff] }
 0x187   : > { %5171 = vmatprep.subr.bf16.mxu0 %v5170_v52  ;;  %v1372_v52 = vld [vmem:[#allocation7 + $0xee8] sm:$0xff]  ;;  %v5248_v2 = vpack.c.bf16 %v1373_v61, %v1371_v60  ;;  %v5210_v48 = vpack.c.bf16 %v1264_v41, %v1262_v40  ;;  %v1391_v58 = vld [vmem:[#allocation7 + $0xf80] sm:$0xff]  ;;  %v1267_v61 = vld [vmem:[#allocation7 + $0xdf0] sm:$0xff] }
 0x188   : > { %v1398_v63 = vld [vmem:[#allocation7 + $0xfb8] sm:$0xff]  ;;  %v1493_v41 = vld [vmem:[#allocation7 + $0x1060] sm:$0xff] }
 0x189   : > { %5229 = vmatpush1.bf16.msra.mxu1 %v5228_v6  ;;  %v1249_v6 = vld [vmem:[#allocation7 + $0xd60] sm:$0xff] }
 0x18a   : > { %5173 = vmatpush1.bf16.msra.mxu0 %v5172_v59  ;;  %5231 = vmatprep.subr.bf16.mxu1 %v5230_v9  ;;  %v5246_v59 = vpack.c.bf16 %v1374_v53, %v1372_v52  ;;  %v1377_v9 = vld [vmem:[#allocation7 + $0xf10] sm:$0xff]  ;;  %v5200_v17 = vpack.c.bf16 %v1251_v11, %v1249_v6  ;;  %v1266_v52 = vld [vmem:[#allocation7 + $0xde8] sm:$0xff]  ;;  %v1268_v53 = vld [vmem:[#allocation7 + $0xdf8] sm:$0xff] }
 0x18b   : > { %5175 = vmatprep.subr.bf16.mxu0 %v5174_v0  ;;  %v1376_v0 = vld [vmem:[#allocation7 + $0xf08] sm:$0xff]  ;;  %v5252_v16 = vpack.c.bf16 %v1377_v9, %v1375_v8  ;;  %v5214_v60 = vpack.c.bf16 %v1268_v53, %v1266_v52  ;;  %v1395_v6 = vld [vmem:[#allocation7 + $0xfa0] sm:$0xff]  ;;  %v1483_v9 = vld [vmem:[#allocation7 + $0x1010] sm:$0xff] }
 0x18c   : > { %v1402_v11 = vld [vmem:[#allocation7 + $0xfd8] sm:$0xff]  ;;  %v1501_v52 = vld [vmem:[#allocation7 + $0x10a0] sm:$0xff]  ;;  %v1503_v53 = vld [vmem:[#allocation7 + $0x10b0] sm:$0xff] }
 0x18d   : > { %5233 = vmatpush1.bf16.msra.mxu1 %v5232_v18  ;;  %v1253_v18 = vld [vmem:[#allocation7 + $0xd80] sm:$0xff] }
 0x18e   : > { %5177 = vmatpush1.bf16.msra.mxu0 %v5176_v7  ;;  %5235 = vmatprep.subr.bf16.mxu1 %v5234_v22  ;;  %v5250_v7 = vpack.c.bf16 %v1378_v3, %v1376_v0  ;;  %v1381_v22 = vld [vmem:[#allocation7 + $0xf30] sm:$0xff]  ;;  %v5204_v30 = vpack.c.bf16 %v1255_v24, %v1253_v18  ;;  %v1482_v0 = vld [vmem:[#allocation7 + $0x1008] sm:$0xff]  ;;  %v1484_v3 = vld [vmem:[#allocation7 + $0x1018] sm:$0xff] }
 0x18f   : > { %5179 = vmatprep.subr.bf16.mxu0 %v5178_v12  ;;  %v1380_v12 = vld [vmem:[#allocation7 + $0xf28] sm:$0xff]  ;;  %v5256_v29 = vpack.c.bf16 %v1381_v22, %v1379_v21  ;;  %v5282_v8 = vpack.c.bf16 %v1484_v3, %v1482_v0  ;;  %v1399_v18 = vld [vmem:[#allocation7 + $0xfc0] sm:$0xff]  ;;  %v1487_v22 = vld [vmem:[#allocation7 + $0x1030] sm:$0xff] }
 0x190   : > { %v1406_v24 = vld [vmem:[#allocation7 + $0xff8] sm:$0xff] }
 0x191   : > { %5237 = vmatpush1.bf16.msra.mxu1 %v5236_v32  ;;  %v1257_v32 = vld [vmem:[#allocation7 + $0xda0] sm:$0xff] }
 0x192   : > { %5181 = vmatpush1.bf16.msra.mxu0 %v5180_v19  ;;  %5239 = vmatprep.subr.bf16.mxu1 %v5238_v35  ;;  %v5254_v19 = vpack.c.bf16 %v1382_v13, %v1380_v12  ;;  %v1385_v35 = vld [vmem:[#allocation7 + $0xf50] sm:$0xff]  ;;  %v5208_v43 = vpack.c.bf16 %v1259_v37, %v1257_v32  ;;  %v1486_v12 = vld [vmem:[#allocation7 + $0x1028] sm:$0xff]  ;;  %v1488_v13 = vld [vmem:[#allocation7 + $0x1038] sm:$0xff] }
 0x193   : > { %5183 = vmatprep.subr.bf16.mxu0 %v5182_v25  ;;  %v1384_v25 = vld [vmem:[#allocation7 + $0xf48] sm:$0xff]  ;;  %v5260_v42 = vpack.c.bf16 %v1385_v35, %v1383_v34  ;;  %v5286_v21 = vpack.c.bf16 %v1488_v13, %v1486_v12  ;;  %v1405_v32 = vld [vmem:[#allocation7 + $0xff0] sm:$0xff]  ;;  %v1489_v34 = vld [vmem:[#allocation7 + $0x1040] sm:$0xff] }
 0x194   : > { %v1491_v35 = vld [vmem:[#allocation7 + $0x1050] sm:$0xff]  ;;  %v1496_v37 = vld [vmem:[#allocation7 + $0x1078] sm:$0xff] }
 0x195   : > { %5241 = vmatpush1.bf16.msra.mxu1 %v5240_v44  ;;  %v1261_v44 = vld [vmem:[#allocation7 + $0xdc0] sm:$0xff]  ;;  %v1520_v12 = vld [vmem:[#allocation7 + $0x1138] sm:$0xff] }
 0x196   : > { %5185 = vmatpush1.bf16.msra.mxu0 %v5184_v33  ;;  %5243 = vmatprep.subr.bf16.mxu1 %v5242_v47  ;;  %v5258_v33 = vpack.c.bf16 %v1386_v26, %v1384_v25  ;;  %v1389_v47 = vld [vmem:[#allocation7 + $0xf70] sm:$0xff]  ;;  %v5212_v55 = vpack.c.bf16 %v1263_v49, %v1261_v44  ;;  %v1490_v25 = vld [vmem:[#allocation7 + $0x1048] sm:$0xff]  ;;  %v1492_v26 = vld [vmem:[#allocation7 + $0x1058] sm:$0xff] }
 0x197   : > { %5187 = vmatprep.subr.bf16.mxu0 %v5186_v38  ;;  %v1388_v38 = vld [vmem:[#allocation7 + $0xf68] sm:$0xff]  ;;  %v5264_v54 = vpack.c.bf16 %v1389_v47, %v1387_v46  ;;  %v1500_v44 = vld [vmem:[#allocation7 + $0x1098] sm:$0xff]  ;;  %v1497_v47 = vld [vmem:[#allocation7 + $0x1080] sm:$0xff] }
 0x198   : > { %v1504_v49 = vld [vmem:[#allocation7 + $0x10b8] sm:$0xff] }
 0x199   : > { %5245 = vmatpush1.bf16.msra.mxu1 %v5244_v56  ;;  %v1265_v56 = vld [vmem:[#allocation7 + $0xde0] sm:$0xff] }
 0x19a   : > { %5189 = vmatpush1.bf16.msra.mxu0 %v5188_v45  ;;  %5247 = vmatprep.subr.bf16.mxu1 %v5246_v59  ;;  %v5262_v45 = vpack.c.bf16 %v1390_v39, %v1388_v38  ;;  %v1393_v59 = vld [vmem:[#allocation7 + $0xf90] sm:$0xff]  ;;  %v5216_v4 = vpack.c.bf16 %v1267_v61, %v1265_v56  ;;  %v5292_v39 = vpack.c.bf16 %v1491_v35, %v1489_v34  ;;  %v1510_v61 = vld [vmem:[#allocation7 + $0x10e8] sm:$0xff]  ;;  %v1525_v35 = vld [vmem:[#allocation7 + $0x1160] sm:$0xff] }
 0x19b   : > { %5191 = vmatprep.subr.bf16.mxu0 %v5190_v50  ;;  %v1392_v50 = vld [vmem:[#allocation7 + $0xf88] sm:$0xff]  ;;  %v5268_v1 = vpack.c.bf16 %v1393_v59, %v1391_v58  ;;  %v5304_v56 = vpack.c.bf16 %v1503_v53, %v1501_v52  ;;  %v1505_v58 = vld [vmem:[#allocation7 + $0x10c0] sm:$0xff]  ;;  %v1507_v59 = vld [vmem:[#allocation7 + $0x10d0] sm:$0xff] }
 0x19c   : > { %v5308_v0 = vpack.c.bf16 %v1507_v59, %v1505_v58  ;;  %v1538_v52 = vld [vmem:[#allocation7 + $0x11c8] sm:$0xff]  ;;  %v1540_v53 = vld [vmem:[#allocation7 + $0x11d8] sm:$0xff] }
 0x19d   : > { %5249 = vmatpush1.bf16.msra.mxu1 %v5248_v2  ;;  %v1481_v2 = vld [vmem:[#allocation7 + $0x1000] sm:$0xff]  ;;  %v1542_v58 = vld [vmem:[#allocation7 + $0x11e8] sm:$0xff]  ;;  %v1544_v59 = vld [vmem:[#allocation7 + $0x11f8] sm:$0xff] }
 0x19e   : > { %5193 = vmatpush1.bf16.msra.mxu0 %v5192_v57  ;;  %5251 = vmatprep.subr.bf16.mxu1 %v5250_v7  ;;  %v5266_v57 = vpack.c.bf16 %v1394_v51, %v1392_v50  ;;  %v1397_v7 = vld [vmem:[#allocation7 + $0xfb0] sm:$0xff]  ;;  %v5284_v15 = vpack.c.bf16 %v1483_v9, %v1481_v2  ;;  %v1514_v2 = vld [vmem:[#allocation7 + $0x1108] sm:$0xff] }
 0x19f   : > { %5195 = vmatprep.subr.bf16.mxu0 %v5194_v62  ;;  %v1396_v62 = vld [vmem:[#allocation7 + $0xfa8] sm:$0xff]  ;;  %v5272_v14 = vpack.c.bf16 %v1397_v7, %v1395_v6  ;;  %v1515_v9 = vld [vmem:[#allocation7 + $0x1110] sm:$0xff] }
 0x1a1   : > { %5253 = vmatpush1.bf16.msra.mxu1 %v5252_v16  ;;  %v1485_v16 = vld [vmem:[#allocation7 + $0x1020] sm:$0xff] }
 0x1a2   : > { %5197 = vmatpush1.bf16.msra.mxu0 %v5196_v5  ;;  %5255 = vmatprep.subr.bf16.mxu1 %v5254_v19  ;;  %v5270_v5 = vpack.c.bf16 %v1398_v63, %v1396_v62  ;;  %v1401_v19 = vld [vmem:[#allocation7 + $0xfd0] sm:$0xff]  ;;  %v5288_v28 = vpack.c.bf16 %v1487_v22, %v1485_v16  ;;  %v1512_v62 = vld [vmem:[#allocation7 + $0x10f8] sm:$0xff] }
 0x1a3   : > { %5199 = vmatprep.subr.bf16.mxu0 %v5198_v10  ;;  %v1400_v10 = vld [vmem:[#allocation7 + $0xfc8] sm:$0xff]  ;;  %v5276_v27 = vpack.c.bf16 %v1401_v19, %v1399_v18  ;;  %v5310_v3 = vpack.c.bf16 %v1512_v62, %v1510_v61  ;;  %v1517_v19 = vld [vmem:[#allocation7 + $0x1120] sm:$0xff]  ;;  %v5342_v61 = vpack.c.bf16 %v1544_v59, %v1542_v58  ;;  %v1903_v59 = vld [vmem:[#allocation7 + $0x2b8] sm:$0xff] }
 0x1a4   : > { %v1541_v62 = vld [vmem:[#allocation7 + $0x11e0] sm:$0xff]  ;;  %v1901_v58 = vld [vmem:[#allocation7 + $0x2a8] sm:$0xff] }
 0x1a5   : > { %5257 = vmatpush1.bf16.msra.mxu1 %v5256_v29 }
 0x1a6   : > { %5201 = vmatpush1.bf16.msra.mxu0 %v5200_v17  ;;  %5259 = vmatprep.subr.bf16.mxu1 %v5258_v33  ;;  %v5274_v17 = vpack.c.bf16 %v1402_v11, %v1400_v10  ;;  %v5290_v33 = vpack.c.bf16 %v1492_v26, %v1490_v25  ;;  %v1518_v11 = vld [vmem:[#allocation7 + $0x1128] sm:$0xff] }
 0x1a7   : > { %5203 = vmatprep.subr.bf16.mxu0 %v5202_v23  ;;  %v1404_v23 = vld [vmem:[#allocation7 + $0xfe8] sm:$0xff]  ;;  %v5318_v18 = vpack.c.bf16 %v1520_v12, %v1518_v11 }
 0x1a8   : > { %v5278_v29 = vpack.c.bf16 %v1406_v24, %v1404_v23  ;;  %v1522_v23 = vld [vmem:[#allocation7 + $0x1148] sm:$0xff]  ;;  %v1524_v24 = vld [vmem:[#allocation7 + $0x1158] sm:$0xff] }
 0x1a9   : > { %5261 = vmatpush1.bf16.msra.mxu1 %v5260_v42  ;;  %v1495_v42 = vld [vmem:[#allocation7 + $0x1070] sm:$0xff] }
 0x1aa   : > { %5205 = vmatpush1.bf16.msra.mxu0 %v5204_v30  ;;  %5263 = vmatprep.subr.bf16.mxu1 %v5262_v45  ;;  %v1403_v30 = vld [vmem:[#allocation7 + $0xfe0] sm:$0xff]  ;;  %v5296_v45 = vpack.c.bf16 %v1495_v42, %v1493_v41 }
 0x1ab   : > { %5207 = vmatprep.subr.bf16.mxu0 %v5206_v36  ;;  %v1494_v36 = vld [vmem:[#allocation7 + $0x1068] sm:$0xff]  ;;  %v5280_v38 = vpack.c.bf16 %v1405_v32, %v1403_v30  ;;  %v1528_v32 = vld [vmem:[#allocation7 + $0x1178] sm:$0xff] }
 0x1ac   : > { %v5294_v40 = vpack.c.bf16 %v1496_v37, %v1494_v36  ;;  %v1526_v30 = vld [vmem:[#allocation7 + $0x1168] sm:$0xff]  ;;  %v1527_v36 = vld [vmem:[#allocation7 + $0x1170] sm:$0xff] }
 0x1ad   : > { %5265 = vmatpush1.bf16.msra.mxu1 %v5264_v54  ;;  %v1506_v54 = vld [vmem:[#allocation7 + $0x10c8] sm:$0xff]  ;;  %v5326_v34 = vpack.c.bf16 %v1528_v32, %v1526_v30 }
 0x1ae   : > { %5209 = vmatpush1.bf16.msra.mxu0 %v5208_v43  ;;  %5267 = vmatprep.subr.bf16.mxu1 %v5266_v57  ;;  %v1498_v43 = vld [vmem:[#allocation7 + $0x1088] sm:$0xff] }
 0x1af   : > { %5211 = vmatprep.subr.bf16.mxu0 %v5210_v48  ;;  %v5298_v46 = vpack.c.bf16 %v1500_v44, %v1498_v43  ;;  %v1502_v48 = vld [vmem:[#allocation7 + $0x10a8] sm:$0xff]  ;;  %v5328_v43 = vpack.c.bf16 %v1527_v36, %v1525_v35  ;;  %v1887_v35 = vld [vmem:[#allocation7 + $0x238] sm:$0xff] }
 0x1b0   : > { %v5302_v51 = vpack.c.bf16 %v1504_v49, %v1502_v48  ;;  %v1885_v32 = vld [vmem:[#allocation7 + $0x228] sm:$0xff] }
 0x1b1   : > { %5269 = vmatpush1.bf16.msra.mxu1 %v5268_v1  ;;  %v1509_v1 = vld [vmem:[#allocation7 + $0x10e0] sm:$0xff] }
 0x1b2   : > { %5213 = vmatpush1.bf16.msra.mxu0 %v5212_v55  ;;  %5271 = vmatprep.subr.bf16.mxu1 %v5270_v5  ;;  %v1508_v55 = vld [vmem:[#allocation7 + $0x10d8] sm:$0xff] }
 0x1b3   : > { %5215 = vmatprep.subr.bf16.mxu0 %v5214_v60  ;;  %v5306_v57 = vpack.c.bf16 %v1508_v55, %v1506_v54  ;;  %v1516_v5 = vld [vmem:[#allocation7 + $0x1118] sm:$0xff]  ;;  %v5338_v55 = vpack.c.bf16 %v1540_v53, %v1538_v52  ;;  %v1897_v52 = vld [vmem:[#allocation7 + $0x288] sm:$0xff] }
 0x1b4   : > { %v5314_v7 = vpack.c.bf16 %v1516_v5, %v1514_v2  ;;  %v1899_v53 = vld [vmem:[#allocation7 + $0x298] sm:$0xff] }
 0x1b5   : > { %5273 = vmatpush1.bf16.msra.mxu1 %v5272_v14  ;;  %v7310_v14 = vld [vmem:[#allocation3 + $0x10] sm:$0xff] }
 0x1b6   : > { %5217 = vmatpush1.bf16.msra.mxu0 %v5216_v4  ;;  %5275 = vmatprep.subr.bf16.mxu1 %v5274_v17  ;;  %v1511_v4 = vld [vmem:[#allocation7 + $0x10f0] sm:$0xff] }
 0x1b7   : > { %5283 = vmatprep.subr.bf16.mxu0 %v5282_v8  ;;  %v5312_v6 = vpack.c.bf16 %v1511_v4, %v1509_v1  ;;  %v1513_v8 = vld [vmem:[#allocation7 + $0x1100] sm:$0xff] }
 0x1b8   : > { %v5316_v17 = vpack.c.bf16 %v1515_v9, %v1513_v8 }
 0x1b9   : > { %1334 = vmatmul.mubr.f32.vlgmr.msra.gmra.mrb[6].mxu0 %v7299_v20  ;;  %5277 = vmatpush1.bf16.msra.mxu1 %v5276_v27  ;;  %v5322_v27 = vpack.c.bf16 %v1524_v24, %v1522_v23  ;;  %v1881_v24 = vld [vmem:[#allocation7 + $0x208] sm:$0xff] }
 0x1ba   : > { %5285 = vmatpush1.bf16.msra.mxu0 %v5284_v15  ;;  %1609 = vmatprep.mubr.f32.mxu0 %v7302_v31  ;;  %v1499_v31 = vld [vmem:[#allocation7 + $0x1090] sm:$0xff] }
 0x1bb   : > { %5287 = vmatprep.subr.bf16.mxu0 %v5286_v21  ;;  %5279 = vmatprep.subr.bf16.mxu1 %v5278_v29  ;;  %v5300_v50 = vpack.c.bf16 %v1499_v31, %v1497_v47  ;;  %v1519_v21 = vld [vmem:[#allocation7 + $0x1130] sm:$0xff]  ;;  %v1534_v47 = vld [vmem:[#allocation7 + $0x11a8] sm:$0xff]  ;;  %v1536_v31 = vld [vmem:[#allocation7 + $0x11b8] sm:$0xff] }
 0x1bc   : > { %v5320_v26 = vpack.c.bf16 %v1519_v21, %v1517_v19  ;;  %v1523_v29 = vld [vmem:[#allocation7 + $0x1150] sm:$0xff]  ;;  %v5334_v49 = vpack.c.bf16 %v1536_v31, %v1534_v47  ;;  %v1893_v47 = vld [vmem:[#allocation7 + $0x268] sm:$0xff]  ;;  %v1895_v31 = vld [vmem:[#allocation7 + $0x278] sm:$0xff] }
 0x1bd   : > { %5281 = vmatpush1.bf16.msra.mxu1 %v5280_v38  ;;  %v1530_v38 = vld [vmem:[#allocation7 + $0x1188] sm:$0xff] }
 0x1be   : > { %5289 = vmatpush1.bf16.msra.mxu0 %v5288_v28  ;;  %v1521_v28 = vld [vmem:[#allocation7 + $0x1140] sm:$0xff] }
 0x1bf   : > { %5291 = vmatprep.subr.bf16.mxu0 %v5290_v33  ;;  %v5324_v33 = vpack.c.bf16 %v1523_v29, %v1521_v28  ;;  %v1882_v28 = vld [vmem:[#allocation7 + $0x210] sm:$0xff] }
 0x1c0   : > { %1472 = vmatmul.mubr.f32.vlgmr.msra.gmra.mrb[6].mxu1 %v7299_v20 }
 0x1c2   : > { %5293 = vmatpush1.bf16.msra.mxu0 %v5292_v39  ;;  %v1532_v39 = vld [vmem:[#allocation7 + $0x1198] sm:$0xff] }
 0x1c3   : > { %5295 = vmatprep.subr.bf16.mxu0 %v5294_v40  ;;  %v5330_v44 = vpack.c.bf16 %v1532_v39, %v1530_v38  ;;  %v1884_v38 = vld [vmem:[#allocation7 + $0x220] sm:$0xff]  ;;  %v1886_v39 = vld [vmem:[#allocation7 + $0x230] sm:$0xff] }
 0x1c6   : > { %5297 = vmatpush1.bf16.msra.mxu0 %v5296_v45  ;;  %v1529_v45 = vld [vmem:[#allocation7 + $0x1180] sm:$0xff] }
 0x1c7   : > { %5299 = vmatprep.subr.bf16.mxu0 %v5298_v46  ;;  %v1531_v46 = vld [vmem:[#allocation7 + $0x1190] sm:$0xff] }
 0x1c8   : > { %v5332_v48 = vpack.c.bf16 %v1531_v46, %v1529_v45  ;;  %v1890_v45 = vld [vmem:[#allocation7 + $0x250] sm:$0xff] }
 0x1ca   : > { %5301 = vmatpush1.bf16.msra.mxu0 %v5300_v50  ;;  %v1533_v50 = vld [vmem:[#allocation7 + $0x11a0] sm:$0xff] }
 0x1cb   : > { %5303 = vmatprep.subr.bf16.mxu0 %v5302_v51  ;;  %v1535_v51 = vld [vmem:[#allocation7 + $0x11b0] sm:$0xff] }
 0x1cc   : > { %v507_v60 = vpop.f32.mrb[0].mxu0  ;;  %v5336_v54 = vpack.c.bf16 %v1535_v51, %v1533_v50  ;;  %v1894_v50 = vld [vmem:[#allocation7 + $0x270] sm:$0xff] }
 0x1cd   : > { %512 = vst [vmem:[#allocation3] sm:$0xf] %v507_v60  ;;  %v509_v63 = vpop.f32.mrb[1].mxu0 }
 0x1ce   : > { %513 = vst [vmem:[#allocation3 + $0x8] sm:$0xf] %v509_v63  ;;  %5305 = vmatpush1.bf16.msra.mxu0 %v5304_v56  ;;  %v1537_v56 = vld [vmem:[#allocation7 + $0x11c0] sm:$0xff]  ;;  %v1543_v63 = vld [vmem:[#allocation7 + $0x11f0] sm:$0xff] }
 0x1cf   : > { %5307 = vmatprep.subr.bf16.mxu0 %v5306_v57  ;;  %v1539_v57 = vld [vmem:[#allocation7 + $0x11d0] sm:$0xff] }
 0x1d0   : > { %v5340_v60 = vpack.c.bf16 %v1539_v57, %v1537_v56  ;;  %v1898_v56 = vld [vmem:[#allocation7 + $0x290] sm:$0xff] }
 0x1d2   : > { %5309 = vmatpush1.bf16.msra.mxu0 %v5308_v0  ;;  %v5344_v0 = vpack.c.bf16 %v1543_v63, %v1541_v62  ;;  %v1902_v62 = vld [vmem:[#allocation7 + $0x2b0] sm:$0xff] }
 0x1d3   : > { %5311 = vmatprep.subr.bf16.mxu0 %v5310_v3  ;;  %v645_v22 = vpop.f32.mrb[0].mxu1 }
 0x1d4   : > { %v1619_v10 = vld [vmem:[#allocation3] sm:$0xff]  ;;  %650 = vst [vmem:[#allocation3 + $0x20] sm:$0xf] %v645_v22  ;;  %v647_v25 = vpop.f32.mrb[1].mxu1  ;;  %v7323_v22 = vld [vmem:[#allocation9] sm:$0xff] }
 0x1d5   : > { %v1620_v13 = vld [vmem:[#allocation3 + $0x8] sm:$0xff]  ;;  %v5348_v15 = vpack.c.bf16 %v7310_v14, %v1619_v10  ;;  %651 = vst [vmem:[#allocation3 + $0x28] sm:$0xf] %v647_v25  ;;  %v1656_v23 = vcombine.high %v7323_v22, %v7323_v22 }
 0x1d6   : > { %5313 = vmatpush1.bf16.msra.mxu0 %v5312_v6  ;;  %v5346_v16 = vpack.c.bf16 %v7310_v14, %v1620_v13  ;;  %v1883_v25 = vld [vmem:[#allocation7 + $0x218] sm:$0xff] }
 0x1d7   : > { %5315 = vmatprep.subr.bf16.mxu0 %v5314_v7  ;;  %4759 = vmatprep.mubr.msk.f32.mxu1 %vm1657_vm0, %v1656_v23  ;;  %v1916_v23 = vld [vmem:[#allocation7 + $0x320] sm:$0xff] }
 0x1d8   : > { %5347 = vmatprep.subr.bf16.mxu1 %v5346_v16 }
 0x1d9   : > { %5349 = vmatpush1.bf16.msra.mxu1 %v5348_v15 }
 0x1da   : > { %5317 = vmatpush1.bf16.msra.mxu0 %v5316_v17 }
 0x1db   : > { %5319 = vmatprep.subr.bf16.mxu0 %v5318_v18  ;;  %v1623_v37 = vld [vmem:[#allocation3 + $0x20] sm:$0xff] }
 0x1dc   : > { %v1624_v40 = vld [vmem:[#allocation3 + $0x28] sm:$0xff]  ;;  %v5352_v41 = vpack.c.bf16 %v7310_v14, %v1623_v37  ;;  %v5450_v37 = vpack.c.bf16 %v1887_v35, %v1885_v32 }
 0x1dd   : > { %v5350_v42 = vpack.c.bf16 %v7310_v14, %v1624_v40  ;;  %v5452_v40 = vpack.c.bf16 %v1886_v39, %v1884_v38  ;;  %v1929_v39 = vld [vmem:[#allocation7 + $0x388] sm:$0xff] }
 0x1de   : > { %5321 = vmatpush1.bf16.msra.mxu0 %v5320_v26  ;;  %v5446_v26 = vpack.c.bf16 %v1883_v25, %v1881_v24  ;;  %v1918_v24 = vld [vmem:[#allocation7 + $0x330] sm:$0xff] }
 0x1df   : > { %5323 = vmatprep.subr.bf16.mxu0 %v5322_v27  ;;  %5351 = vmatprep.subr.bf16.mxu1 %v5350_v42  ;;  %v1880_v27 = vld [vmem:[#allocation7 + $0x200] sm:$0xff]  ;;  %v1891_v42 = vld [vmem:[#allocation7 + $0x258] sm:$0xff]  ;;  %v5484_v25 = vpack.c.bf16 %v1918_v24, %v1916_v23 }
 0x1e0   : > { %5353 = vmatpush1.bf16.msra.mxu1 %v5352_v41  ;;  %v5448_v30 = vpack.c.bf16 %v1882_v28, %v1880_v27  ;;  %v1889_v41 = vld [vmem:[#allocation7 + $0x248] sm:$0xff]  ;;  %v1923_v27 = vld [vmem:[#allocation7 + $0x358] sm:$0xff] }
 0x1e1   : > { %v1762_v23 = vld [vmem:[#allocation7 + $0x98] sm:$0xff] }
 0x1e2   : > { %5325 = vmatpush1.bf16.msra.mxu0 %v5324_v33 }
 0x1e3   : > { %5327 = vmatprep.subr.bf16.mxu0 %v5326_v34 }
 0x1e6   : > { %5329 = vmatpush1.bf16.msra.mxu0 %v5328_v43  ;;  %v5454_v43 = vpack.c.bf16 %v1891_v42, %v1889_v41 }
 0x1e7   : > { %5331 = vmatprep.subr.bf16.mxu0 %v5330_v44  ;;  %v1888_v44 = vld [vmem:[#allocation7 + $0x240] sm:$0xff] }
 0x1e8   : > { %v5456_v46 = vpack.c.bf16 %v1890_v45, %v1888_v44  ;;  %v1928_v44 = vld [vmem:[#allocation7 + $0x380] sm:$0xff]  ;;  %v1930_v45 = vld [vmem:[#allocation7 + $0x390] sm:$0xff] }
 0x1ea   : > { %5333 = vmatpush1.bf16.msra.mxu0 %v5332_v48  ;;  %v5458_v48 = vpack.c.bf16 %v1895_v31, %v1893_v47 }
 0x1eb   : > { %5335 = vmatprep.subr.bf16.mxu0 %v5334_v49  ;;  %v1892_v49 = vld [vmem:[#allocation7 + $0x260] sm:$0xff] }
 0x1ec   : > { %v5460_v51 = vpack.c.bf16 %v1894_v50, %v1892_v49 }
 0x1ee   : > { %5337 = vmatpush1.bf16.msra.mxu0 %v5336_v54  ;;  %v5462_v54 = vpack.c.bf16 %v1899_v53, %v1897_v52 }
 0x1ef   : > { %5339 = vmatprep.subr.bf16.mxu0 %v5338_v55  ;;  %v1896_v55 = vld [vmem:[#allocation7 + $0x280] sm:$0xff] }
 0x1f0   : > { %v5464_v57 = vpack.c.bf16 %v1898_v56, %v1896_v55 }
 0x1f2   : > { %5341 = vmatpush1.bf16.msra.mxu0 %v5340_v60  ;;  %v5466_v60 = vpack.c.bf16 %v1903_v59, %v1901_v58  ;;  %v1744_v58 = vld [vmem:[#allocation7 + $0x8] sm:$0xff]  ;;  %v1746_v59 = vld [vmem:[#allocation7 + $0x18] sm:$0xff] }
 0x1f3   : > { %5343 = vmatprep.subr.bf16.mxu0 %v5342_v61  ;;  %v1900_v61 = vld [vmem:[#allocation7 + $0x2a0] sm:$0xff] }
 0x1f4   : > { %v5468_v63 = vpack.c.bf16 %v1902_v62, %v1900_v61 }
 0x1f6   : > { %5345 = vmatpush1.bf16.msra.mxu0 %v5344_v0  ;;  %v1905_v0 = vld [vmem:[#allocation7 + $0x2c8] sm:$0xff] }
 0x1f7   : > { %5447 = vmatprep.subr.bf16.mxu0 %v5446_v26  ;;  %v1921_v26 = vld [vmem:[#allocation7 + $0x348] sm:$0xff] }
 0x1f8   : > { %v5486_v28 = vpack.c.bf16 %v1923_v27, %v1921_v26  ;;  %v1761_v26 = vld [vmem:[#allocation7 + $0x90] sm:$0xff]  ;;  %v1764_v27 = vld [vmem:[#allocation7 + $0xa8] sm:$0xff] }
 0x1f9   : > { %1610 = vmatmul.mubr.f32.vlgmr.msra.gmra.mrb[8].mxu0 %v7299_v20 }
 0x1fa   : > { %5449 = vmatpush1.bf16.msra.mxu0 %v5448_v30  ;;  %v1922_v30 = vld [vmem:[#allocation7 + $0x350] sm:$0xff] }
 0x1fb   : > { %5451 = vmatprep.subr.bf16.mxu0 %v5450_v37  ;;  %v1926_v37 = vld [vmem:[#allocation7 + $0x370] sm:$0xff] }
 0x1fe   : > { %5453 = vmatpush1.bf16.msra.mxu0 %v5452_v40  ;;  %v1931_v40 = vld [vmem:[#allocation7 + $0x398] sm:$0xff] }
 0x1ff   : > { %5455 = vmatprep.subr.bf16.mxu0 %v5454_v43  ;;  %v5494_v41 = vpack.c.bf16 %v1931_v40, %v1929_v39  ;;  %v1769_v39 = vld [vmem:[#allocation7 + $0xd0] sm:$0xff]  ;;  %v1772_v40 = vld [vmem:[#allocation7 + $0xe8] sm:$0xff] }
 0x202   : > { %5457 = vmatpush1.bf16.msra.mxu0 %v5456_v46  ;;  %v5496_v46 = vpack.c.bf16 %v1930_v45, %v1928_v44  ;;  %v1771_v44 = vld [vmem:[#allocation7 + $0xe0] sm:$0xff]  ;;  %v1773_v45 = vld [vmem:[#allocation7 + $0xf0] sm:$0xff] }
 0x203   : > { %5459 = vmatprep.subr.bf16.mxu0 %v5458_v48 }
 0x206   : > { %5461 = vmatpush1.bf16.msra.mxu0 %v5460_v51 }
 0x207   : > { %5463 = vmatprep.subr.bf16.mxu0 %v5462_v54 }
 0x20a   : > { %5465 = vmatpush1.bf16.msra.mxu0 %v5464_v57 }
 0x20b   : > { %5467 = vmatprep.subr.bf16.mxu0 %v5466_v60 }
 0x20c   : > { %v783_v3 = vpop.f32.mrb[2].mxu0 }
 0x20d   : > { %788 = vst [vmem:[#allocation3 + $0x40] sm:$0xf] %v783_v3  ;;  %v785_v1 = vpop.f32.mrb[3].mxu0  ;;  %v1907_v3 = vld [vmem:[#allocation7 + $0x2d8] sm:$0xff] }
 0x20e   : > { %789 = vst [vmem:[#allocation3 + $0x48] sm:$0xf] %v785_v1  ;;  %v5470_v1 = vpack.c.bf16 %v1907_v3, %v1905_v0  ;;  %5469 = vmatpush1.bf16.msra.mxu0 %v5468_v63  ;;  %v5382_v63 = vpack.c.bf16 %v1746_v59, %v1744_v58  ;;  %v1743_v0 = vld [vmem:[#allocation7] sm:$0xff]  ;;  %v1745_v3 = vld [vmem:[#allocation7 + $0x10] sm:$0xff]  ;;  %v1786_v58 = vld [vmem:[#allocation7 + $0x158] sm:$0xff] }
 0x210   : > { %5471 = vmatprep.subr.bf16.mxu0 %v5470_v1 }
 0x213   : > { %v921_v7 = vpop.f32.mrb[2].mxu1 }
 0x214   : > { %v1627_v4 = vld [vmem:[#allocation3 + $0x40] sm:$0xff]  ;;  %926 = vst [vmem:[#allocation3 + $0x60] sm:$0xf] %v921_v7  ;;  %v923_v8 = vpop.f32.mrb[3].mxu1  ;;  %v1911_v7 = vld [vmem:[#allocation7 + $0x2f8] sm:$0xff] }
 0x215   : > { %v1628_v2 = vld [vmem:[#allocation3 + $0x48] sm:$0xff]  ;;  %v5356_v5 = vpack.c.bf16 %v7310_v14, %v1627_v4  ;;  %927 = vst [vmem:[#allocation3 + $0x68] sm:$0xf] %v923_v8  ;;  %v1904_v4 = vld [vmem:[#allocation7 + $0x2c0] sm:$0xff] }
 0x216   : > { %v5354_v6 = vpack.c.bf16 %v7310_v14, %v1628_v2  ;;  %v1906_v2 = vld [vmem:[#allocation7 + $0x2d0] sm:$0xff] }
 0x218   : > { %5355 = vmatprep.subr.bf16.mxu1 %v5354_v6  ;;  %v1909_v6 = vld [vmem:[#allocation7 + $0x2e8] sm:$0xff] }
 0x219   : > { %5357 = vmatpush1.bf16.msra.mxu1 %v5356_v5  ;;  %v5472_v5 = vpack.c.bf16 %v1906_v2, %v1904_v4  ;;  %v5474_v8 = vpack.c.bf16 %v1911_v7, %v1909_v6  ;;  %v1748_v4 = vld [vmem:[#allocation7 + $0x28] sm:$0xff]  ;;  %v1750_v2 = vld [vmem:[#allocation7 + $0x38] sm:$0xff]  ;;  %v1747_v7 = vld [vmem:[#allocation7 + $0x20] sm:$0xff] }
 0x21a   : > { %v5386_v6 = vpack.c.bf16 %v1750_v2, %v1748_v4  ;;  %v1787_v4 = vld [vmem:[#allocation7 + $0x160] sm:$0xff]  ;;  %v1789_v2 = vld [vmem:[#allocation7 + $0x170] sm:$0xff] }
 0x21b   : > { %v1631_v9 = vld [vmem:[#allocation3 + $0x60] sm:$0xff]  ;;  %5473 = vmatpush1.bf16.msra.mxu0 %v5472_v5  ;;  %v5384_v5 = vpack.c.bf16 %v1745_v3, %v1743_v0  ;;  %v1790_v0 = vld [vmem:[#allocation7 + $0x178] sm:$0xff] }
 0x21c   : > { %v1632_v10 = vld [vmem:[#allocation3 + $0x68] sm:$0xff]  ;;  %v5360_v20 = vpack.c.bf16 %v7310_v14, %v1631_v9  ;;  %v1908_v9 = vld [vmem:[#allocation7 + $0x2e0] sm:$0xff]  ;;  %5475 = vmatprep.subr.bf16.mxu0 %v5474_v8  ;;  %v1749_v8 = vld [vmem:[#allocation7 + $0x30] sm:$0xff] }
 0x21d   : > { %v5358_v11 = vpack.c.bf16 %v7310_v14, %v1632_v10  ;;  %v1910_v10 = vld [vmem:[#allocation7 + $0x2f0] sm:$0xff] }
 0x21f   : > { %5359 = vmatprep.subr.bf16.mxu1 %v5358_v11  ;;  %v1913_v11 = vld [vmem:[#allocation7 + $0x308] sm:$0xff] }
 0x220   : > { %5361 = vmatpush1.bf16.msra.mxu1 %v5360_v20  ;;  %v5476_v20 = vpack.c.bf16 %v1910_v10, %v1908_v9  ;;  %v1752_v9 = vld [vmem:[#allocation7 + $0x48] sm:$0xff]  ;;  %v1754_v10 = vld [vmem:[#allocation7 + $0x58] sm:$0xff] }
 0x222   : > { %5477 = vmatpush1.bf16.msra.mxu0 %v5476_v20  ;;  %v5388_v20 = vpack.c.bf16 %v1749_v8, %v1747_v7  ;;  %v5428_v7 = vpack.c.bf16 %v1789_v2, %v1787_v4  ;;  %v2161_v4 = vld [vmem:[#allocation7 + $0x638] sm:$0xff]  ;;  %v2021_v2 = vld [vmem:[#allocation7 + $0x420] sm:$0xff] }
 0x24c   : > { %v1059_v12 = vpop.f32.mrb[4].mxu0 }
 0x24d   : > { %1064 = vst [vmem:[#allocation3 + $0x80] sm:$0xf] %v1059_v12  ;;  %v1061_v13 = vpop.f32.mrb[5].mxu0  ;;  %v1915_v12 = vld [vmem:[#allocation7 + $0x318] sm:$0xff] }
 0x24e   : > { %1065 = vst [vmem:[#allocation3 + $0x88] sm:$0xf] %v1061_v13  ;;  %v5478_v13 = vpack.c.bf16 %v1915_v12, %v1913_v11  ;;  %v5390_v11 = vpack.c.bf16 %v1754_v10, %v1752_v9  ;;  %v1751_v12 = vld [vmem:[#allocation7 + $0x40] sm:$0xff]  ;;  %v1793_v10 = vld [vmem:[#allocation7 + $0x190] sm:$0xff] }
 0x24f   : > { %v1791_v9 = vld [vmem:[#allocation7 + $0x180] sm:$0xff] }
 0x250   : > { %5479 = vmatprep.subr.bf16.mxu0 %v5478_v13  ;;  %v1753_v13 = vld [vmem:[#allocation7 + $0x50] sm:$0xff] }
 0x253   : > { %v1197_v19 = vpop.f32.mrb[4].mxu1 }
 0x254   : > { %v1635_v15 = vld [vmem:[#allocation3 + $0x80] sm:$0xff]  ;;  %1202 = vst [vmem:[#allocation3 + $0xa0] sm:$0xf] %v1197_v19  ;;  %v1199_v21 = vpop.f32.mrb[5].mxu1  ;;  %v1919_v19 = vld [vmem:[#allocation7 + $0x338] sm:$0xff] }
 0x255   : > { %v1636_v16 = vld [vmem:[#allocation3 + $0x88] sm:$0xff]  ;;  %v5364_v17 = vpack.c.bf16 %v7310_v14, %v1635_v15  ;;  %1203 = vst [vmem:[#allocation3 + $0xa8] sm:$0xf] %v1199_v21  ;;  %v1912_v15 = vld [vmem:[#allocation7 + $0x300] sm:$0xff] }
 0x256   : > { %v5362_v18 = vpack.c.bf16 %v7310_v14, %v1636_v16  ;;  %v1914_v16 = vld [vmem:[#allocation7 + $0x310] sm:$0xff] }
 0x258   : > { %5363 = vmatprep.subr.bf16.mxu1 %v5362_v18  ;;  %v1917_v18 = vld [vmem:[#allocation7 + $0x328] sm:$0xff] }
 0x259   : > { %5365 = vmatpush1.bf16.msra.mxu1 %v5364_v17  ;;  %v5480_v17 = vpack.c.bf16 %v1914_v16, %v1912_v15  ;;  %v5482_v21 = vpack.c.bf16 %v1919_v19, %v1917_v18  ;;  %v1758_v15 = vld [vmem:[#allocation7 + $0x78] sm:$0xff]  ;;  %v5392_v16 = vpack.c.bf16 %v1753_v13, %v1751_v12  ;;  %v1755_v18 = vld [vmem:[#allocation7 + $0x60] sm:$0xff]  ;;  %v1757_v19 = vld [vmem:[#allocation7 + $0x70] sm:$0xff] }
 0x25a   : > { %v5396_v24 = vpack.c.bf16 %v1757_v19, %v1755_v18  ;;  %v1798_v12 = vld [vmem:[#allocation7 + $0x1b8] sm:$0xff]  ;;  %v1933_v13 = vld [vmem:[#allocation7 + $0x3a8] sm:$0xff] }
 0x25b   : > { %v1639_v29 = vld [vmem:[#allocation3 + $0xa0] sm:$0xff]  ;;  %5481 = vmatpush1.bf16.msra.mxu0 %v5480_v17 }
 0x25c   : > { %v1640_v33 = vld [vmem:[#allocation3 + $0xa8] sm:$0xff]  ;;  %v5368_v34 = vpack.c.bf16 %v7310_v14, %v1639_v29  ;;  %5483 = vmatprep.subr.bf16.mxu0 %v5482_v21  ;;  %v1920_v29 = vld [vmem:[#allocation7 + $0x340] sm:$0xff]  ;;  %v1760_v21 = vld [vmem:[#allocation7 + $0x88] sm:$0xff] }
 0x25d   : > { %v5366_v36 = vpack.c.bf16 %v7310_v14, %v1640_v33  ;;  %v5488_v32 = vpack.c.bf16 %v1922_v30, %v1920_v29  ;;  %v1925_v33 = vld [vmem:[#allocation7 + $0x368] sm:$0xff] }
 0x25f   : > { %5367 = vmatprep.subr.bf16.mxu1 %v5366_v36  ;;  %5485 = vmatpush1.bf16.msra.mxu0 %v5484_v25  ;;  %v1924_v36 = vld [vmem:[#allocation7 + $0x360] sm:$0xff] }
 0x260   : > { %5369 = vmatpush1.bf16.msra.mxu1 %v5368_v34  ;;  %5487 = vmatprep.subr.bf16.mxu0 %v5486_v28  ;;  %v1927_v34 = vld [vmem:[#allocation7 + $0x378] sm:$0xff]  ;;  %v5492_v38 = vpack.c.bf16 %v1926_v37, %v1924_v36  ;;  %v1759_v25 = vld [vmem:[#allocation7 + $0x80] sm:$0xff] }
 0x261   : > { %v5490_v35 = vpack.c.bf16 %v1927_v34, %v1925_v33  ;;  %v1766_v28 = vld [vmem:[#allocation7 + $0xb8] sm:$0xff]  ;;  %v5400_v29 = vpack.c.bf16 %v1761_v26, %v1759_v25  ;;  %v1765_v33 = vld [vmem:[#allocation7 + $0xb0] sm:$0xff]  ;;  %v1768_v34 = vld [vmem:[#allocation7 + $0xc8] sm:$0xff] }
 0x262   : > { %v5402_v30 = vpack.c.bf16 %v1766_v28, %v1764_v27  ;;  %v1802_v25 = vld [vmem:[#allocation7 + $0x1d8] sm:$0xff]  ;;  %v1937_v26 = vld [vmem:[#allocation7 + $0x3c8] sm:$0xff] }
 0x263   : > { %5489 = vmatpush1.bf16.msra.mxu0 %v5488_v32  ;;  %v1763_v32 = vld [vmem:[#allocation7 + $0xa0] sm:$0xff]  ;;  %v1939_v28 = vld [vmem:[#allocation7 + $0x3d8] sm:$0xff] }
 0x264   : > { %5491 = vmatprep.subr.bf16.mxu0 %v5490_v35  ;;  %v1770_v35 = vld [vmem:[#allocation7 + $0xd8] sm:$0xff]  ;;  %v5404_v36 = vpack.c.bf16 %v1765_v33, %v1763_v32  ;;  %v5502_v32 = vpack.c.bf16 %v1939_v28, %v1937_v26  ;;  %v2030_v26 = vld [vmem:[#allocation7 + $0x468] sm:$0xff] }
 0x265   : > { %v5406_v37 = vpack.c.bf16 %v1770_v35, %v1768_v34  ;;  %v1936_v34 = vld [vmem:[#allocation7 + $0x3c0] sm:$0xff]  ;;  %v1938_v35 = vld [vmem:[#allocation7 + $0x3d0] sm:$0xff]  ;;  %v2167_v28 = vld [vmem:[#allocation7 + $0x668] sm:$0xff] }
 0x267   : > { %5493 = vmatpush1.bf16.msra.mxu0 %v5492_v38  ;;  %v1767_v38 = vld [vmem:[#allocation7 + $0xc0] sm:$0xff] }
 0x268   : > { %5495 = vmatprep.subr.bf16.mxu0 %v5494_v41  ;;  %v1774_v41 = vld [vmem:[#allocation7 + $0xf8] sm:$0xff] }
 0x26b   : > { %5497 = vmatpush1.bf16.msra.mxu0 %v5496_v46  ;;  %v1776_v46 = vld [vmem:[#allocation7 + $0x108] sm:$0xff] }
 0x28c   : > { %v1335_v42 = vpop.f32.mrb[6].mxu0 }
 0x28d   : > { %1340 = vst [vmem:[#allocation3 + $0xc0] sm:$0xf] %v1335_v42  ;;  %v1337_v43 = vpop.f32.mrb[7].mxu0  ;;  %v5408_v42 = vpack.c.bf16 %v1769_v39, %v1767_v38  ;;  %v1806_v38 = vld [vmem:[#allocation7 + $0x1f8] sm:$0xff]  ;;  %v1941_v39 = vld [vmem:[#allocation7 + $0x3e8] sm:$0xff] }
 0x28e   : > { %1341 = vst [vmem:[#allocation3 + $0xc8] sm:$0xf] %v1337_v43  ;;  %v5410_v43 = vpack.c.bf16 %v1774_v41, %v1772_v40  ;;  %v1943_v41 = vld [vmem:[#allocation7 + $0x3f8] sm:$0xff] }
 0x293   : > { %v1473_v50 = vpop.f32.mrb[6].mxu1 }
 0x294   : > { %v1643_v47 = vld [vmem:[#allocation3 + $0xc0] sm:$0xff]  ;;  %1478 = vst [vmem:[#allocation3 + $0xe0] sm:$0xf] %v1473_v50  ;;  %v1475_v51 = vpop.f32.mrb[7].mxu1 }
 0x295   : > { %v1644_v31 = vld [vmem:[#allocation3 + $0xc8] sm:$0xff]  ;;  %v5372_v48 = vpack.c.bf16 %v7310_v14, %v1643_v47  ;;  %1479 = vst [vmem:[#allocation3 + $0xe8] sm:$0xf] %v1475_v51  ;;  %v1777_v50 = vld [vmem:[#allocation7 + $0x110] sm:$0xff]  ;;  %v1780_v51 = vld [vmem:[#allocation7 + $0x128] sm:$0xff] }
 0x296   : > { %v5370_v49 = vpack.c.bf16 %v7310_v14, %v1644_v31  ;;  %v1778_v47 = vld [vmem:[#allocation7 + $0x118] sm:$0xff]  ;;  %v5412_v31 = vpack.c.bf16 %v1773_v45, %v1771_v44  ;;  %v5506_v44 = vpack.c.bf16 %v1943_v41, %v1941_v39  ;;  %v2034_v39 = vld [vmem:[#allocation7 + $0x488] sm:$0xff] }
 0x297   : > { %v2171_v41 = vld [vmem:[#allocation7 + $0x688] sm:$0xff] }
 0x298   : > { %5371 = vmatprep.subr.bf16.mxu1 %v5370_v49  ;;  %v1775_v49 = vld [vmem:[#allocation7 + $0x100] sm:$0xff] }
 0x299   : > { %5373 = vmatpush1.bf16.msra.mxu1 %v5372_v48  ;;  %v5414_v48 = vpack.c.bf16 %v1778_v47, %v1776_v46  ;;  %v1940_v46 = vld [vmem:[#allocation7 + $0x3e0] sm:$0xff]  ;;  %v1942_v47 = vld [vmem:[#allocation7 + $0x3f0] sm:$0xff] }
 0x29b   : > { %v1647_v52 = vld [vmem:[#allocation3 + $0xe0] sm:$0xff] }
 0x29c   : > { %v1648_v53 = vld [vmem:[#allocation3 + $0xe8] sm:$0xff]  ;;  %v5376_v54 = vpack.c.bf16 %v7310_v14, %v1647_v52 }
 0x29d   : > { %v5374_v55 = vpack.c.bf16 %v7310_v14, %v1648_v53  ;;  %v1782_v52 = vld [vmem:[#allocation7 + $0x138] sm:$0xff]  ;;  %v5416_v53 = vpack.c.bf16 %v1777_v50, %v1775_v49  ;;  %v2155_v50 = vld [vmem:[#allocation7 + $0x608] sm:$0xff] }
 0x29e   : > { %v2020_v49 = vld [vmem:[#allocation7 + $0x418] sm:$0xff] }
 0x29f   : > { %5375 = vmatprep.subr.bf16.mxu1 %v5374_v55  ;;  %v1779_v55 = vld [vmem:[#allocation7 + $0x120] sm:$0xff] }
 0x2a0   : > { %5377 = vmatpush1.bf16.msra.mxu1 %v5376_v54  ;;  %v5418_v54 = vpack.c.bf16 %v1782_v52, %v1780_v51  ;;  %v2157_v52 = vld [vmem:[#allocation7 + $0x618] sm:$0xff] }
 0x2cc   : > { %v1611_v56 = vpop.f32.mrb[8].mxu0 }
 0x2cd   : > { %1616 = vst [vmem:[#allocation3 + $0x100] sm:$0xf] %v1611_v56  ;;  %v1613_v57 = vpop.f32.mrb[9].mxu0  ;;  %v1781_v56 = vld [vmem:[#allocation7 + $0x130] sm:$0xff] }
 0x2ce   : > { %1617 = vst [vmem:[#allocation3 + $0x108] sm:$0xf] %v1613_v57  ;;  %v1784_v57 = vld [vmem:[#allocation7 + $0x148] sm:$0xff]  ;;  %v5420_v59 = vpack.c.bf16 %v1781_v56, %v1779_v55 }
 0x2d4   : > { %v1651_v60 = vld [vmem:[#allocation3 + $0x100] sm:$0xff] }
 0x2d5   : > { %v1652_v61 = vld [vmem:[#allocation3 + $0x108] sm:$0xff]  ;;  %v5380_v1 = vpack.c.bf16 %v7310_v14, %v1651_v60  ;;  %v5422_v60 = vpack.c.bf16 %v1786_v58, %v1784_v57 }
 0x2d6   : > { %v5378_v62 = vpack.c.bf16 %v7310_v14, %v1652_v61  ;;  %v1756_v14 = vld [vmem:[#allocation7 + $0x68] sm:$0xff]  ;;  %v1783_v61 = vld [vmem:[#allocation7 + $0x140] sm:$0xff] }
 0x2d7   : > { %v5394_v17 = vpack.c.bf16 %v1758_v15, %v1756_v14  ;;  %v1935_v15 = vld [vmem:[#allocation7 + $0x3b8] sm:$0xff] }
 0x2d8   : > { %5379 = vmatprep.subr.bf16.mxu1 %v5378_v62  ;;  %v1785_v62 = vld [vmem:[#allocation7 + $0x150] sm:$0xff]  ;;  %v5498_v18 = vpack.c.bf16 %v1935_v15, %v1933_v13  ;;  %v2163_v15 = vld [vmem:[#allocation7 + $0x648] sm:$0xff] }
 0x2d9   : > { %5381 = vmatpush1.bf16.msra.mxu1 %v5380_v1  ;;  %v5424_v3 = vpack.c.bf16 %v1785_v62, %v1783_v61  ;;  %v2019_v61 = vld [vmem:[#allocation7 + $0x410] sm:$0xff]  ;;  %v2154_v62 = vld [vmem:[#allocation7 + $0x600] sm:$0xff] }
 0x2da   : > { %5383 = vmatprep.subr.bf16.mxu1 %v5382_v63  ;;  %v1788_v63 = vld [vmem:[#allocation7 + $0x168] sm:$0xff]  ;;  %5499 = vmatprep.subr.bf16.mxu0 %v5498_v18 }
 0x2db   : > { %v5426_v1 = vpack.c.bf16 %v1790_v0, %v1788_v63  ;;  %v2156_v63 = vld [vmem:[#allocation7 + $0x610] sm:$0xff]  ;;  %v2022_v0 = vld [vmem:[#allocation7 + $0x428] sm:$0xff] }
 0x2dc   : > { %1725 = vmatmul.mubr.f32.vlgmr.msra.gmra.mrb[8].mxu1 %v7323_v22  ;;  %v5398_v22 = vpack.c.bf16 %v1762_v23, %v1760_v21  ;;  %v1932_v21 = vld [vmem:[#allocation7 + $0x3a0] sm:$0xff]  ;;  %v1934_v23 = vld [vmem:[#allocation7 + $0x3b0] sm:$0xff] }
 0x2dd   : > { %5385 = vmatpush1.bf16.msra.mxu1 %v5384_v5  ;;  %v1792_v5 = vld [vmem:[#allocation7 + $0x188] sm:$0xff] }
 0x2de   : > { %5387 = vmatprep.subr.bf16.mxu1 %v5386_v6  ;;  %v1794_v6 = vld [vmem:[#allocation7 + $0x198] sm:$0xff] }
 0x2df   : > { %v5430_v8 = vpack.c.bf16 %v1794_v6, %v1792_v5  ;;  %v5576_v6 = vpack.c.bf16 %v2156_v63, %v2154_v62  ;;  %v2042_v62 = vld [vmem:[#allocation7 + $0x4c8] sm:$0xff]  ;;  %v2044_v63 = vld [vmem:[#allocation7 + $0x4d8] sm:$0xff] }
 0x2e1   : > { %5389 = vmatpush1.bf16.msra.mxu1 %v5388_v20  ;;  %v5432_v20 = vpack.c.bf16 %v1793_v10, %v1791_v9  ;;  %v2160_v9 = vld [vmem:[#allocation7 + $0x630] sm:$0xff] }
 0x2e2   : > { %5391 = vmatprep.subr.bf16.mxu1 %v5390_v11  ;;  %v1796_v11 = vld [vmem:[#allocation7 + $0x1a8] sm:$0xff] }
 0x2e3   : > { %v5434_v14 = vpack.c.bf16 %v1798_v12, %v1796_v11  ;;  %v2028_v11 = vld [vmem:[#allocation7 + $0x458] sm:$0xff] }
 0x2e5   : > { %5393 = vmatpush1.bf16.msra.mxu1 %v5392_v16  ;;  %v1795_v16 = vld [vmem:[#allocation7 + $0x1a0] sm:$0xff] }
 0x2e6   : > { %5395 = vmatprep.subr.bf16.mxu1 %v5394_v17  ;;  %v1797_v17 = vld [vmem:[#allocation7 + $0x1b0] sm:$0xff] }
 0x2e7   : > { %v5436_v19 = vpack.c.bf16 %v1797_v17, %v1795_v16  ;;  %v2165_v16 = vld [vmem:[#allocation7 + $0x658] sm:$0xff] }
 0x2e9   : > { %5397 = vmatpush1.bf16.msra.mxu1 %v5396_v24  ;;  %v5500_v24 = vpack.c.bf16 %v1934_v23, %v1932_v21  ;;  %v2027_v21 = vld [vmem:[#allocation7 + $0x450] sm:$0xff] }
 0x2ea   : > { %5399 = vmatprep.subr.bf16.mxu1 %v5398_v22  ;;  %v1800_v22 = vld [vmem:[#allocation7 + $0x1c8] sm:$0xff] }
 0x2eb   : > { %5501 = vmatpush1.bf16.msra.mxu0 %v5500_v24  ;;  %v5438_v27 = vpack.c.bf16 %v1802_v25, %v1800_v22  ;;  %v5582_v24 = vpack.c.bf16 %v2165_v16, %v2163_v15  ;;  %v2162_v22 = vld [vmem:[#allocation7 + $0x640] sm:$0xff]  ;;  %v2164_v25 = vld [vmem:[#allocation7 + $0x650] sm:$0xff] }
 0x2ec   : > { %5503 = vmatprep.subr.bf16.mxu0 %v5502_v32  ;;  %v5584_v32 = vpack.c.bf16 %v2164_v25, %v2162_v22  ;;  %v2050_v22 = vld [vmem:[#allocation7 + $0x508] sm:$0xff]  ;;  %v2052_v25 = vld [vmem:[#allocation7 + $0x518] sm:$0xff] }
 0x2ed   : > { %5401 = vmatpush1.bf16.msra.mxu1 %v5400_v29  ;;  %v1799_v29 = vld [vmem:[#allocation7 + $0x1c0] sm:$0xff] }
 0x2ee   : > { %5403 = vmatprep.subr.bf16.mxu1 %v5402_v30  ;;  %v1801_v30 = vld [vmem:[#allocation7 + $0x1d0] sm:$0xff] }
 0x2ef   : > { %v5440_v33 = vpack.c.bf16 %v1801_v30, %v1799_v29  ;;  %v2169_v29 = vld [vmem:[#allocation7 + $0x678] sm:$0xff] }
 0x2f1   : > { %5405 = vmatpush1.bf16.msra.mxu1 %v5404_v36  ;;  %v5504_v36 = vpack.c.bf16 %v1938_v35, %v1936_v34  ;;  %v2031_v34 = vld [vmem:[#allocation7 + $0x470] sm:$0xff] }
 0x2f2   : > { %5407 = vmatprep.subr.bf16.mxu1 %v5406_v37  ;;  %v1804_v37 = vld [vmem:[#allocation7 + $0x1e8] sm:$0xff] }
 0x2f3   : > { %v5442_v40 = vpack.c.bf16 %v1806_v38, %v1804_v37  ;;  %5505 = vmatpush1.bf16.msra.mxu0 %v5504_v36  ;;  %v5586_v36 = vpack.c.bf16 %v2169_v29, %v2167_v28  ;;  %v2166_v37 = vld [vmem:[#allocation7 + $0x660] sm:$0xff]  ;;  %v2168_v38 = vld [vmem:[#allocation7 + $0x670] sm:$0xff] }
 0x2f4   : > { %5507 = vmatprep.subr.bf16.mxu0 %v5506_v44  ;;  %v5588_v44 = vpack.c.bf16 %v2168_v38, %v2166_v37  ;;  %v2054_v37 = vld [vmem:[#allocation7 + $0x528] sm:$0xff]  ;;  %v2056_v38 = vld [vmem:[#allocation7 + $0x538] sm:$0xff] }
 0x2f5   : > { %5409 = vmatpush1.bf16.msra.mxu1 %v5408_v42  ;;  %v1803_v42 = vld [vmem:[#allocation7 + $0x1e0] sm:$0xff] }
 0x2f6   : > { %5411 = vmatprep.subr.bf16.mxu1 %v5410_v43  ;;  %v1805_v43 = vld [vmem:[#allocation7 + $0x1f0] sm:$0xff] }
 0x2f7   : > { %v5444_v45 = vpack.c.bf16 %v1805_v43, %v1803_v42  ;;  %v2173_v42 = vld [vmem:[#allocation7 + $0x698] sm:$0xff] }
 0x2f9   : > { %5413 = vmatpush1.bf16.msra.mxu1 %v5412_v31  ;;  %v5508_v31 = vpack.c.bf16 %v1942_v47, %v1940_v46  ;;  %v2035_v46 = vld [vmem:[#allocation7 + $0x490] sm:$0xff] }
 0x2fa   : > { %5415 = vmatprep.subr.bf16.mxu1 %v5414_v48  ;;  %v2018_v48 = vld [vmem:[#allocation7 + $0x408] sm:$0xff] }
 0x2fb   : > { %5509 = vmatpush1.bf16.msra.mxu0 %v5508_v31  ;;  %v5510_v51 = vpack.c.bf16 %v2020_v49, %v2018_v48  ;;  %v5590_v31 = vpack.c.bf16 %v2173_v42, %v2171_v41  ;;  %v2170_v48 = vld [vmem:[#allocation7 + $0x680] sm:$0xff]  ;;  %v2172_v49 = vld [vmem:[#allocation7 + $0x690] sm:$0xff] }
 0x2fd   : > { %5417 = vmatpush1.bf16.msra.mxu1 %v5416_v53  ;;  %v5574_v53 = vpack.c.bf16 %v2157_v52, %v2155_v50  ;;  %v2038_v50 = vld [vmem:[#allocation7 + $0x4a8] sm:$0xff] }
 0x2fe   : > { %5419 = vmatprep.subr.bf16.mxu1 %v5418_v54  ;;  %v2175_v52 = vld [vmem:[#allocation7 + $0x6a8] sm:$0xff] }
 0x2ff   : > { %5575 = vmatprep.subr.bf16.mxu0 %v5574_v53  ;;  %v2177_v53 = vld [vmem:[#allocation7 + $0x6b8] sm:$0xff] }
 0x301   : > { %5421 = vmatpush1.bf16.msra.mxu1 %v5420_v59 }
 0x302   : > { %5423 = vmatprep.subr.bf16.mxu1 %v5422_v60  ;;  %v2017_v60 = vld [vmem:[#allocation7 + $0x400] sm:$0xff] }
 0x303   : > { %v5512_v5 = vpack.c.bf16 %v2019_v61, %v2017_v60  ;;  %v2174_v60 = vld [vmem:[#allocation7 + $0x6a0] sm:$0xff]  ;;  %v2176_v61 = vld [vmem:[#allocation7 + $0x6b0] sm:$0xff] }
 0x305   : > { %5425 = vmatpush1.bf16.msra.mxu1 %v5424_v3  ;;  %v2024_v3 = vld [vmem:[#allocation7 + $0x438] sm:$0xff] }
 0x306   : > { %5427 = vmatprep.subr.bf16.mxu1 %v5426_v1  ;;  %v2159_v1 = vld [vmem:[#allocation7 + $0x628] sm:$0xff]  ;;  %v5514_v13 = vpack.c.bf16 %v2024_v3, %v2022_v0  ;;  %v2181_v3 = vld [vmem:[#allocation7 + $0x6d8] sm:$0xff] }
 0x307   : > { %v2179_v0 = vld [vmem:[#allocation7 + $0x6c8] sm:$0xff] }
 0x309   : > { %5429 = vmatpush1.bf16.msra.mxu1 %v5428_v7  ;;  %v2023_v7 = vld [vmem:[#allocation7 + $0x430] sm:$0xff] }
 0x30a   : > { %5431 = vmatprep.subr.bf16.mxu1 %v5430_v8  ;;  %v2158_v8 = vld [vmem:[#allocation7 + $0x620] sm:$0xff]  ;;  %v5516_v17 = vpack.c.bf16 %v2023_v7, %v2021_v2  ;;  %v5598_v7 = vpack.c.bf16 %v2181_v3, %v2179_v0 }
 0x30b   : > { %v5580_v18 = vpack.c.bf16 %v2160_v9, %v2158_v8  ;;  %v2041_v2 = vld [vmem:[#allocation7 + $0x4c0] sm:$0xff]  ;;  %v2180_v9 = vld [vmem:[#allocation7 + $0x6d0] sm:$0xff] }
 0x30c   : > { %v2178_v8 = vld [vmem:[#allocation7 + $0x6c0] sm:$0xff] }
 0x30d   : > { %5433 = vmatpush1.bf16.msra.mxu1 %v5432_v20  ;;  %v2026_v20 = vld [vmem:[#allocation7 + $0x448] sm:$0xff]  ;;  %v5600_v16 = vpack.c.bf16 %v2180_v9, %v2178_v8  ;;  %v2068_v9 = vld [vmem:[#allocation7 + $0x598] sm:$0xff] }
 0x30e   : > { %5435 = vmatprep.subr.bf16.mxu1 %v5434_v14  ;;  %v5578_v14 = vpack.c.bf16 %v2161_v4, %v2159_v1  ;;  %v5518_v23 = vpack.c.bf16 %v2028_v11, %v2026_v20  ;;  %v5596_v4 = vpack.c.bf16 %v2176_v61, %v2174_v60  ;;  %v2046_v20 = vld [vmem:[#allocation7 + $0x4e8] sm:$0xff]  ;;  %v2048_v11 = vld [vmem:[#allocation7 + $0x4f8] sm:$0xff] }
 0x30f   : > { %v2062_v60 = vld [vmem:[#allocation7 + $0x568] sm:$0xff]  ;;  %v2064_v61 = vld [vmem:[#allocation7 + $0x578] sm:$0xff] }
 0x310   : > { %v2066_v8 = vld [vmem:[#allocation7 + $0x588] sm:$0xff] }
 0x311   : > { %5437 = vmatpush1.bf16.msra.mxu1 %v5436_v19  ;;  %v2025_v19 = vld [vmem:[#allocation7 + $0x440] sm:$0xff] }
 0x312   : > { %5439 = vmatprep.subr.bf16.mxu1 %v5438_v27  ;;  %v2032_v27 = vld [vmem:[#allocation7 + $0x478] sm:$0xff]  ;;  %v5520_v30 = vpack.c.bf16 %v2027_v21, %v2025_v19  ;;  %v5538_v19 = vpack.c.bf16 %v2048_v11, %v2046_v20  ;;  %v2203_v20 = vld [vmem:[#allocation7 + $0x788] sm:$0xff] }
 0x313   : > { %v5522_v35 = vpack.c.bf16 %v2032_v27, %v2030_v26  ;;  %v2187_v26 = vld [vmem:[#allocation7 + $0x708] sm:$0xff]  ;;  %v2189_v27 = vld [vmem:[#allocation7 + $0x718] sm:$0xff] }
 0x314   : > { %v2205_v11 = vld [vmem:[#allocation7 + $0x798] sm:$0xff] }
 0x315   : > { %5441 = vmatpush1.bf16.msra.mxu1 %v5440_v33  ;;  %v2029_v33 = vld [vmem:[#allocation7 + $0x460] sm:$0xff] }
 0x316   : > { %5443 = vmatprep.subr.bf16.mxu1 %v5442_v40  ;;  %v2036_v40 = vld [vmem:[#allocation7 + $0x498] sm:$0xff]  ;;  %v5524_v43 = vpack.c.bf16 %v2031_v34, %v2029_v33  ;;  %v5542_v33 = vpack.c.bf16 %v2052_v25, %v2050_v22  ;;  %v5606_v34 = vpack.c.bf16 %v2189_v27, %v2187_v26  ;;  %v2207_v22 = vld [vmem:[#allocation7 + $0x7a8] sm:$0xff] }
 0x317   : > { %v5526_v47 = vpack.c.bf16 %v2036_v40, %v2034_v39  ;;  %v2191_v39 = vld [vmem:[#allocation7 + $0x728] sm:$0xff]  ;;  %v2193_v40 = vld [vmem:[#allocation7 + $0x738] sm:$0xff] }
 0x318   : > { %v2209_v25 = vld [vmem:[#allocation7 + $0x7b8] sm:$0xff] }
 0x319   : > { %5445 = vmatpush1.bf16.msra.mxu1 %v5444_v45  ;;  %v2033_v45 = vld [vmem:[#allocation7 + $0x480] sm:$0xff] }
 0x31a   : > { %5511 = vmatprep.subr.bf16.mxu1 %v5510_v51  ;;  %v2040_v51 = vld [vmem:[#allocation7 + $0x4b8] sm:$0xff] }
 0x3af   : > { %v1726_v54 = vpop.f32.mrb[8].mxu1 }
 0x3b0   : > { %v1731_v55 = vmax.f32 %v1726_v54, 0.0  ;;  %v1728_v56 = vpop.f32.mrb[9].mxu1  ;;  %v5528_v54 = vpack.c.bf16 %v2035_v46, %v2033_v45  ;;  %v5546_v45 = vpack.c.bf16 %v2056_v38, %v2054_v37  ;;  %v5610_v46 = vpack.c.bf16 %v2193_v40, %v2191_v39  ;;  %v2211_v37 = vld [vmem:[#allocation7 + $0x7c8] sm:$0xff]  ;;  %v2213_v38 = vld [vmem:[#allocation7 + $0x7d8] sm:$0xff] }
 0x3b1   : > { %v1732_v57 = vmax.f32 %v1728_v56, 0.0  ;;  %v2037_v56 = vld [vmem:[#allocation7 + $0x4a0] sm:$0xff] }
 0x3b2   : > { %v1735_v58 = vrot.slane %v1731_v55, 4  ;;  %v5592_v55 = vpack.c.bf16 %v2172_v49, %v2170_v48  ;;  %v2058_v48 = vld [vmem:[#allocation7 + $0x548] sm:$0xff]  ;;  %v2060_v49 = vld [vmem:[#allocation7 + $0x558] sm:$0xff] }
 0x3b3   : > { %v1736_v59 = vrot.slane %v1732_v57, 4  ;;  %v2039_v57 = vld [vmem:[#allocation7 + $0x4b0] sm:$0xff] }
 0x3b4   : > { %1739 = vst [vmem:[#allocation2] sm:$0xf0] %v1735_v58  ;;  %v5530_v58 = vpack.c.bf16 %v2040_v51, %v2038_v50  ;;  %v5532_v1 = vpack.c.bf16 %v2039_v57, %v2037_v56  ;;  %v2195_v50 = vld [vmem:[#allocation7 + $0x748] sm:$0xff]  ;;  %v2197_v51 = vld [vmem:[#allocation7 + $0x758] sm:$0xff]  ;;  %v5550_v56 = vpack.c.bf16 %v2060_v49, %v2058_v48 }
 0x3b5   : > { %1740 = vst [vmem:[#allocation2 + $0x8] sm:$0xf0] %v1736_v59  ;;  %v5594_v59 = vpack.c.bf16 %v2177_v53, %v2175_v52  ;;  %v5614_v57 = vpack.c.bf16 %v2197_v51, %v2195_v50  ;;  %v2215_v48 = vld [vmem:[#allocation7 + $0x7e8] sm:$0xff]  ;;  %v2217_v49 = vld [vmem:[#allocation7 + $0x7f8] sm:$0xff] }
 0x3bb   : > { %v7341_v12 = vld [vmem:[#allocation2] sm:$0xff] }
 0x3bc   : > { %v7337_v10 = vld [vmem:[#allocation2 + $0x8] sm:$0xff] }
 0x3bd   : > { %1871 = vmatprep.mubr.f32.mxu1 %v7337_v10  ;;  %2008 = vmatprep.mubr.f32.mxu0 %v7337_v10 }
 0x3be   : > { %1872 = vmatmul.mubr.f32.vlgmr.msra.gmra.mrb[10].mxu1 %v7341_v12  ;;  %2009 = vmatmul.mubr.f32.vlgmr.msra.gmra.mrb[10].mxu0 %v7341_v12 }
 0x3bf   : > { %5513 = vmatpush1.bf16.msra.mxu1 %v5512_v5  ;;  %5577 = vmatpush1.bf16.msra.mxu0 %v5576_v6  ;;  %v2043_v5 = vld [vmem:[#allocation7 + $0x4d0] sm:$0xff]  ;;  %v5534_v6 = vpack.c.bf16 %v2044_v63, %v2042_v62  ;;  %v2199_v62 = vld [vmem:[#allocation7 + $0x768] sm:$0xff]  ;;  %v2201_v63 = vld [vmem:[#allocation7 + $0x778] sm:$0xff] }
 0x3c0   : > { %2145 = vmatprep.mubr.f32.mxu1 %v7337_v10  ;;  %2282 = vmatprep.mubr.f32.mxu0 %v7337_v10  ;;  %v5536_v15 = vpack.c.bf16 %v2043_v5, %v2041_v2  ;;  %v5554_v2 = vpack.c.bf16 %v2064_v61, %v2062_v60  ;;  %v5618_v5 = vpack.c.bf16 %v2201_v63, %v2199_v62  ;;  %v2429_v60 = vld [vmem:[#allocation7 + $0xa08] sm:$0xff]  ;;  %v2431_v61 = vld [vmem:[#allocation7 + $0xa18] sm:$0xff] }
 0x3c1   : > { %5515 = vmatprep.subr.bf16.mxu1 %v5514_v13  ;;  %5579 = vmatprep.subr.bf16.mxu0 %v5578_v14  ;;  %v2183_v13 = vld [vmem:[#allocation7 + $0x6e8] sm:$0xff]  ;;  %v2185_v14 = vld [vmem:[#allocation7 + $0x6f8] sm:$0xff] }
 0x3c2   : > { %v5602_v21 = vpack.c.bf16 %v2185_v14, %v2183_v13 }
 0x3c3   : > { %5517 = vmatpush1.bf16.msra.mxu1 %v5516_v17  ;;  %5581 = vmatpush1.bf16.msra.mxu0 %v5580_v18  ;;  %v2045_v17 = vld [vmem:[#allocation7 + $0x4e0] sm:$0xff]  ;;  %v2047_v18 = vld [vmem:[#allocation7 + $0x4f0] sm:$0xff] }
 0x3c4   : > { %5519 = vmatprep.subr.bf16.mxu1 %v5518_v23  ;;  %5583 = vmatprep.subr.bf16.mxu0 %v5582_v24  ;;  %v2182_v23 = vld [vmem:[#allocation7 + $0x6e0] sm:$0xff]  ;;  %v2184_v24 = vld [vmem:[#allocation7 + $0x6f0] sm:$0xff]  ;;  %v5540_v28 = vpack.c.bf16 %v2047_v18, %v2045_v17  ;;  %v5558_v17 = vpack.c.bf16 %v2068_v9, %v2066_v8  ;;  %v5622_v18 = vpack.c.bf16 %v2205_v11, %v2203_v20  ;;  %v2433_v8 = vld [vmem:[#allocation7 + $0xa28] sm:$0xff] }
 0x3c5   : > { %v5604_v29 = vpack.c.bf16 %v2184_v24, %v2182_v23  ;;  %v2070_v23 = vld [vmem:[#allocation7 + $0x5a8] sm:$0xff]  ;;  %v2072_v24 = vld [vmem:[#allocation7 + $0x5b8] sm:$0xff] }
 0x3c6   : > { %v2435_v9 = vld [vmem:[#allocation7 + $0xa38] sm:$0xff] }
 0x3c7   : > { %5521 = vmatpush1.bf16.msra.mxu1 %v5520_v30  ;;  %5585 = vmatpush1.bf16.msra.mxu0 %v5584_v32  ;;  %v2049_v30 = vld [vmem:[#allocation7 + $0x500] sm:$0xff]  ;;  %v2051_v32 = vld [vmem:[#allocation7 + $0x510] sm:$0xff] }
 0x3c8   : > { %5523 = vmatprep.subr.bf16.mxu1 %v5522_v35  ;;  %5587 = vmatprep.subr.bf16.mxu0 %v5586_v36  ;;  %v2186_v35 = vld [vmem:[#allocation7 + $0x700] sm:$0xff]  ;;  %v2188_v36 = vld [vmem:[#allocation7 + $0x710] sm:$0xff]  ;;  %v5544_v41 = vpack.c.bf16 %v2051_v32, %v2049_v30  ;;  %v5562_v30 = vpack.c.bf16 %v2072_v24, %v2070_v23  ;;  %v5626_v32 = vpack.c.bf16 %v2209_v25, %v2207_v22  ;;  %v2437_v23 = vld [vmem:[#allocation7 + $0xa48] sm:$0xff] }
 0x3c9   : > { %v5608_v42 = vpack.c.bf16 %v2188_v36, %v2186_v35  ;;  %v2074_v35 = vld [vmem:[#allocation7 + $0x5c8] sm:$0xff]  ;;  %v2076_v36 = vld [vmem:[#allocation7 + $0x5d8] sm:$0xff] }
 0x3ca   : > { %v2439_v24 = vld [vmem:[#allocation7 + $0xa58] sm:$0xff] }
 0x3cb   : > { %5525 = vmatpush1.bf16.msra.mxu1 %v5524_v43  ;;  %5589 = vmatpush1.bf16.msra.mxu0 %v5588_v44  ;;  %v2053_v43 = vld [vmem:[#allocation7 + $0x520] sm:$0xff]  ;;  %v2055_v44 = vld [vmem:[#allocation7 + $0x530] sm:$0xff] }
 0x3cc   : > { %5527 = vmatprep.subr.bf16.mxu1 %v5526_v47  ;;  %5591 = vmatprep.subr.bf16.mxu0 %v5590_v31  ;;  %v2190_v47 = vld [vmem:[#allocation7 + $0x720] sm:$0xff]  ;;  %v2192_v31 = vld [vmem:[#allocation7 + $0x730] sm:$0xff]  ;;  %v5548_v52 = vpack.c.bf16 %v2055_v44, %v2053_v43  ;;  %v5566_v43 = vpack.c.bf16 %v2076_v36, %v2074_v35  ;;  %v5630_v44 = vpack.c.bf16 %v2213_v38, %v2211_v37  ;;  %v2443_v35 = vld [vmem:[#allocation7 + $0xa78] sm:$0xff] }
 0x3cd   : > { %v5612_v53 = vpack.c.bf16 %v2192_v31, %v2190_v47  ;;  %v2078_v47 = vld [vmem:[#allocation7 + $0x5e8] sm:$0xff]  ;;  %v2080_v31 = vld [vmem:[#allocation7 + $0x5f8] sm:$0xff] }
 0x3cf   : > { %5529 = vmatpush1.bf16.msra.mxu1 %v5528_v54  ;;  %5593 = vmatpush1.bf16.msra.mxu0 %v5592_v55  ;;  %v2057_v54 = vld [vmem:[#allocation7 + $0x540] sm:$0xff]  ;;  %v2059_v55 = vld [vmem:[#allocation7 + $0x550] sm:$0xff] }
 0x3d0   : > { %5531 = vmatprep.subr.bf16.mxu1 %v5530_v58  ;;  %5595 = vmatprep.subr.bf16.mxu0 %v5594_v59  ;;  %v2194_v58 = vld [vmem:[#allocation7 + $0x740] sm:$0xff]  ;;  %v2196_v59 = vld [vmem:[#allocation7 + $0x750] sm:$0xff]  ;;  %v5552_v0 = vpack.c.bf16 %v2059_v55, %v2057_v54  ;;  %v5570_v54 = vpack.c.bf16 %v2080_v31, %v2078_v47  ;;  %v5634_v55 = vpack.c.bf16 %v2217_v49, %v2215_v48 }
 0x3d1   : > { %v5616_v3 = vpack.c.bf16 %v2196_v59, %v2194_v58  ;;  %v2292_v58 = vld [vmem:[#allocation7 + $0x808] sm:$0xff]  ;;  %v2294_v59 = vld [vmem:[#allocation7 + $0x818] sm:$0xff]  ;;  %v2307_v49 = vld [vmem:[#allocation7 + $0x880] sm:$0xff] }
 0x3d3   : > { %5533 = vmatpush1.bf16.msra.mxu1 %v5532_v1  ;;  %5597 = vmatpush1.bf16.msra.mxu0 %v5596_v4  ;;  %v2061_v1 = vld [vmem:[#allocation7 + $0x560] sm:$0xff]  ;;  %v2063_v4 = vld [vmem:[#allocation7 + $0x570] sm:$0xff] }
 0x3d4   : > { %5535 = vmatprep.subr.bf16.mxu1 %v5534_v6  ;;  %5599 = vmatprep.subr.bf16.mxu0 %v5598_v7  ;;  %v2198_v6 = vld [vmem:[#allocation7 + $0x760] sm:$0xff]  ;;  %v2200_v7 = vld [vmem:[#allocation7 + $0x770] sm:$0xff]  ;;  %v5556_v13 = vpack.c.bf16 %v2063_v4, %v2061_v1 }
 0x3d5   : > { %v5620_v14 = vpack.c.bf16 %v2200_v7, %v2198_v6  ;;  %v2291_v1 = vld [vmem:[#allocation7 + $0x800] sm:$0xff]  ;;  %v2293_v4 = vld [vmem:[#allocation7 + $0x810] sm:$0xff]  ;;  %v2296_v6 = vld [vmem:[#allocation7 + $0x828] sm:$0xff] }
 0x3d6   : > { %v2298_v7 = vld [vmem:[#allocation7 + $0x838] sm:$0xff]  ;;  %v5640_v20 = vpack.c.bf16 %v2293_v4, %v2291_v1  ;;  %v2316_v1 = vld [vmem:[#allocation7 + $0x8c8] sm:$0xff] }
 0x3d7   : > { %5537 = vmatpush1.bf16.msra.mxu1 %v5536_v15  ;;  %5601 = vmatpush1.bf16.msra.mxu0 %v5600_v16  ;;  %v2065_v15 = vld [vmem:[#allocation7 + $0x580] sm:$0xff]  ;;  %v2067_v16 = vld [vmem:[#allocation7 + $0x590] sm:$0xff]  ;;  %v2318_v4 = vld [vmem:[#allocation7 + $0x8d8] sm:$0xff] }
 0x3d8   : > { %5539 = vmatprep.subr.bf16.mxu1 %v5538_v19  ;;  %5603 = vmatprep.subr.bf16.mxu0 %v5602_v21  ;;  %v2202_v19 = vld [vmem:[#allocation7 + $0x780] sm:$0xff]  ;;  %v2204_v21 = vld [vmem:[#allocation7 + $0x790] sm:$0xff]  ;;  %v5560_v26 = vpack.c.bf16 %v2067_v16, %v2065_v15  ;;  %v5642_v16 = vpack.c.bf16 %v2298_v7, %v2296_v6 }
 0x3d9   : > { %v5624_v27 = vpack.c.bf16 %v2204_v21, %v2202_v19  ;;  %v2432_v15 = vld [vmem:[#allocation7 + $0xa20] sm:$0xff]  ;;  %v2300_v19 = vld [vmem:[#allocation7 + $0x848] sm:$0xff]  ;;  %v2302_v21 = vld [vmem:[#allocation7 + $0x858] sm:$0xff] }
 0x3db   : > { %5541 = vmatpush1.bf16.msra.mxu1 %v5540_v28  ;;  %5605 = vmatpush1.bf16.msra.mxu0 %v5604_v29  ;;  %v2069_v28 = vld [vmem:[#allocation7 + $0x5a0] sm:$0xff]  ;;  %v2071_v29 = vld [vmem:[#allocation7 + $0x5b0] sm:$0xff] }
 0x3dc   : > { %5543 = vmatprep.subr.bf16.mxu1 %v5542_v33  ;;  %5607 = vmatprep.subr.bf16.mxu0 %v5606_v34  ;;  %v2206_v33 = vld [vmem:[#allocation7 + $0x7a0] sm:$0xff]  ;;  %v2208_v34 = vld [vmem:[#allocation7 + $0x7b0] sm:$0xff]  ;;  %v5564_v39 = vpack.c.bf16 %v2071_v29, %v2069_v28 }
 0x3dd   : > { %v5628_v40 = vpack.c.bf16 %v2208_v34, %v2206_v33  ;;  %v2301_v28 = vld [vmem:[#allocation7 + $0x850] sm:$0xff]  ;;  %v2436_v29 = vld [vmem:[#allocation7 + $0xa40] sm:$0xff]  ;;  %v2304_v33 = vld [vmem:[#allocation7 + $0x868] sm:$0xff] }
 0x3de   : > { %v2441_v34 = vld [vmem:[#allocation7 + $0xa68] sm:$0xff] }
 0x3df   : > { %5545 = vmatpush1.bf16.msra.mxu1 %v5544_v41  ;;  %5609 = vmatpush1.bf16.msra.mxu0 %v5608_v42  ;;  %v2073_v41 = vld [vmem:[#allocation7 + $0x5c0] sm:$0xff]  ;;  %v2075_v42 = vld [vmem:[#allocation7 + $0x5d0] sm:$0xff] }
 0x3e0   : > { %5547 = vmatprep.subr.bf16.mxu1 %v5546_v45  ;;  %5611 = vmatprep.subr.bf16.mxu0 %v5610_v46  ;;  %v2210_v45 = vld [vmem:[#allocation7 + $0x7c0] sm:$0xff]  ;;  %v2212_v46 = vld [vmem:[#allocation7 + $0x7d0] sm:$0xff]  ;;  %v5568_v50 = vpack.c.bf16 %v2075_v42, %v2073_v41  ;;  %v5714_v41 = vpack.c.bf16 %v2443_v35, %v2441_v34 }
 0x3e1   : > { %v5632_v51 = vpack.c.bf16 %v2212_v46, %v2210_v45  ;;  %v2442_v42 = vld [vmem:[#allocation7 + $0xa70] sm:$0xff]  ;;  %v2445_v45 = vld [vmem:[#allocation7 + $0xa88] sm:$0xff]  ;;  %v2447_v46 = vld [vmem:[#allocation7 + $0xa98] sm:$0xff] }
 0x3e2   : > { %v2323_v35 = vld [vmem:[#allocation7 + $0x900] sm:$0xff] }
 0x3e3   : > { %5549 = vmatpush1.bf16.msra.mxu1 %v5548_v52  ;;  %5613 = vmatpush1.bf16.msra.mxu0 %v5612_v53  ;;  %v2077_v52 = vld [vmem:[#allocation7 + $0x5e0] sm:$0xff]  ;;  %v2079_v53 = vld [vmem:[#allocation7 + $0x5f0] sm:$0xff] }
 0x3e4   : > { %5551 = vmatprep.subr.bf16.mxu1 %v5550_v56  ;;  %5615 = vmatprep.subr.bf16.mxu0 %v5614_v57  ;;  %v2214_v56 = vld [vmem:[#allocation7 + $0x7e0] sm:$0xff]  ;;  %v2216_v57 = vld [vmem:[#allocation7 + $0x7f0] sm:$0xff]  ;;  %v5572_v62 = vpack.c.bf16 %v2079_v53, %v2077_v52  ;;  %v5718_v52 = vpack.c.bf16 %v2447_v46, %v2445_v45 }
 0x3e5   : > { %v5636_v63 = vpack.c.bf16 %v2216_v57, %v2214_v56  ;;  %v2446_v53 = vld [vmem:[#allocation7 + $0xa90] sm:$0xff]  ;;  %v2449_v56 = vld [vmem:[#allocation7 + $0xaa8] sm:$0xff]  ;;  %v2451_v57 = vld [vmem:[#allocation7 + $0xab8] sm:$0xff] }
 0x3e6   : > { %v2327_v46 = vld [vmem:[#allocation7 + $0x920] sm:$0xff] }
 0x3e7   : > { %5553 = vmatpush1.bf16.msra.mxu1 %v5552_v0  ;;  %5617 = vmatpush1.bf16.msra.mxu0 %v5616_v3  ;;  %v5638_v0 = vpack.c.bf16 %v2294_v59, %v2292_v58  ;;  %v5702_v3 = vpack.c.bf16 %v2431_v61, %v2429_v60  ;;  %v2311_v61 = vld [vmem:[#allocation7 + $0x8a0] sm:$0xff] }
 0x3e8   : > { %5555 = vmatprep.subr.bf16.mxu1 %v5554_v2  ;;  %5619 = vmatprep.subr.bf16.mxu0 %v5618_v5  ;;  %v2428_v2 = vld [vmem:[#allocation7 + $0xa00] sm:$0xff]  ;;  %v2430_v5 = vld [vmem:[#allocation7 + $0xa10] sm:$0xff] }
 0x3e9   : > { %v5704_v11 = vpack.c.bf16 %v2430_v5, %v2428_v2  ;;  %v2453_v2 = vld [vmem:[#allocation7 + $0xac8] sm:$0xff]  ;;  %v2455_v5 = vld [vmem:[#allocation7 + $0xad8] sm:$0xff] }
 0x3eb   : > { %5557 = vmatpush1.bf16.msra.mxu1 %v5556_v13  ;;  %5621 = vmatpush1.bf16.msra.mxu0 %v5620_v14  ;;  %v2295_v13 = vld [vmem:[#allocation7 + $0x820] sm:$0xff]  ;;  %v2297_v14 = vld [vmem:[#allocation7 + $0x830] sm:$0xff] }
 0x3ec   : > { %5559 = vmatprep.subr.bf16.mxu1 %v5558_v17  ;;  %5623 = vmatprep.subr.bf16.mxu0 %v5622_v18  ;;  %v5706_v17 = vpack.c.bf16 %v2435_v9, %v2433_v8  ;;  %v2434_v18 = vld [vmem:[#allocation7 + $0xa30] sm:$0xff]  ;;  %v5644_v22 = vpack.c.bf16 %v2297_v14, %v2295_v13  ;;  %v5662_v8 = vpack.c.bf16 %v2318_v4, %v2316_v1  ;;  %v2315_v9 = vld [vmem:[#allocation7 + $0x8c0] sm:$0xff] }
 0x3ed   : > { %v5708_v25 = vpack.c.bf16 %v2434_v18, %v2432_v15  ;;  %v5726_v13 = vpack.c.bf16 %v2455_v5, %v2453_v2  ;;  %v2454_v14 = vld [vmem:[#allocation7 + $0xad0] sm:$0xff]  ;;  %v2320_v15 = vld [vmem:[#allocation7 + $0x8e8] sm:$0xff]  ;;  %v2459_v18 = vld [vmem:[#allocation7 + $0xaf8] sm:$0xff] }
 0x3ee   : > { %v2335_v5 = vld [vmem:[#allocation7 + $0x960] sm:$0xff] }
 0x3ef   : > { %5561 = vmatpush1.bf16.msra.mxu1 %v5560_v26  ;;  %5625 = vmatpush1.bf16.msra.mxu0 %v5624_v27  ;;  %v5646_v26 = vpack.c.bf16 %v2302_v21, %v2300_v19  ;;  %v2299_v27 = vld [vmem:[#allocation7 + $0x840] sm:$0xff] }
 0x3f0   : > { %5563 = vmatprep.subr.bf16.mxu1 %v5562_v30  ;;  %5627 = vmatprep.subr.bf16.mxu0 %v5626_v32  ;;  %v5710_v30 = vpack.c.bf16 %v2439_v24, %v2437_v23  ;;  %v2438_v32 = vld [vmem:[#allocation7 + $0xa50] sm:$0xff]  ;;  %v5648_v36 = vpack.c.bf16 %v2301_v28, %v2299_v27  ;;  %v2319_v24 = vld [vmem:[#allocation7 + $0x8e0] sm:$0xff]  ;;  %v2324_v28 = vld [vmem:[#allocation7 + $0x908] sm:$0xff] }
 0x3f1   : > { %v5712_v37 = vpack.c.bf16 %v2438_v32, %v2436_v29  ;;  %v2458_v27 = vld [vmem:[#allocation7 + $0xaf0] sm:$0xff]  ;;  %v2326_v29 = vld [vmem:[#allocation7 + $0x918] sm:$0xff] }
 0x3f2   : > { %v2463_v32 = vld [vmem:[#allocation7 + $0xb18] sm:$0xff]  ;;  %v5670_v34 = vpack.c.bf16 %v2326_v29, %v2324_v28 }
 0x3f3   : > { %5565 = vmatpush1.bf16.msra.mxu1 %v5564_v39  ;;  %5629 = vmatpush1.bf16.msra.mxu0 %v5628_v40  ;;  %v2305_v39 = vld [vmem:[#allocation7 + $0x870] sm:$0xff]  ;;  %v2440_v40 = vld [vmem:[#allocation7 + $0xa60] sm:$0xff] }
 0x3f4   : > { %5567 = vmatprep.subr.bf16.mxu1 %v5566_v43  ;;  %5631 = vmatprep.subr.bf16.mxu0 %v5630_v44  ;;  %v2308_v43 = vld [vmem:[#allocation7 + $0x888] sm:$0xff]  ;;  %v2310_v44 = vld [vmem:[#allocation7 + $0x898] sm:$0xff]  ;;  %v5716_v31 = vpack.c.bf16 %v2442_v42, %v2440_v40 }
 0x3f5   : > { %v5654_v48 = vpack.c.bf16 %v2310_v44, %v2308_v43  ;;  %v2330_v40 = vld [vmem:[#allocation7 + $0x938] sm:$0xff] }
 0x3f6   : > { %v2467_v42 = vld [vmem:[#allocation7 + $0xb38] sm:$0xff] }
 0x3f7   : > { %5569 = vmatpush1.bf16.msra.mxu1 %v5568_v50  ;;  %5633 = vmatpush1.bf16.msra.mxu0 %v5632_v51  ;;  %v2309_v50 = vld [vmem:[#allocation7 + $0x890] sm:$0xff]  ;;  %v2444_v51 = vld [vmem:[#allocation7 + $0xa80] sm:$0xff] }
 0x3f8   : > { %5571 = vmatprep.subr.bf16.mxu1 %v5570_v54  ;;  %5635 = vmatprep.subr.bf16.mxu0 %v5634_v55  ;;  %v2312_v54 = vld [vmem:[#allocation7 + $0x8a8] sm:$0xff]  ;;  %v2314_v55 = vld [vmem:[#allocation7 + $0x8b8] sm:$0xff]  ;;  %v5656_v58 = vpack.c.bf16 %v2309_v50, %v2307_v49  ;;  %v5720_v59 = vpack.c.bf16 %v2446_v53, %v2444_v51  ;;  %v2466_v49 = vld [vmem:[#allocation7 + $0xb30] sm:$0xff] }
 0x3f9   : > { %v5658_v60 = vpack.c.bf16 %v2314_v55, %v2312_v54  ;;  %v2332_v50 = vld [vmem:[#allocation7 + $0x948] sm:$0xff]  ;;  %v2334_v51 = vld [vmem:[#allocation7 + $0x958] sm:$0xff] }
 0x3fa   : > { %v2471_v53 = vld [vmem:[#allocation7 + $0xb58] sm:$0xff] }
 0x3fb   : > { %5573 = vmatpush1.bf16.msra.mxu1 %v5572_v62  ;;  %5637 = vmatpush1.bf16.msra.mxu0 %v5636_v63  ;;  %v2313_v62 = vld [vmem:[#allocation7 + $0x8b0] sm:$0xff]  ;;  %v2448_v63 = vld [vmem:[#allocation7 + $0xaa0] sm:$0xff] }
 0x3fc   : > { %5639 = vmatprep.subr.bf16.mxu1 %v5638_v0  ;;  %5703 = vmatprep.subr.bf16.mxu0 %v5702_v3  ;;  %v5722_v0 = vpack.c.bf16 %v2451_v57, %v2449_v56  ;;  %v2450_v3 = vld [vmem:[#allocation7 + $0xab0] sm:$0xff]  ;;  %v5660_v6 = vpack.c.bf16 %v2313_v62, %v2311_v61  ;;  %v5678_v56 = vpack.c.bf16 %v2334_v51, %v2332_v50  ;;  %v2331_v57 = vld [vmem:[#allocation7 + $0x940] sm:$0xff]  ;;  %v2336_v62 = vld [vmem:[#allocation7 + $0x968] sm:$0xff] }
 0x3fd   : > { %v5724_v7 = vpack.c.bf16 %v2450_v3, %v2448_v63  ;;  %v2470_v61 = vld [vmem:[#allocation7 + $0xb50] sm:$0xff]  ;;  %v2338_v63 = vld [vmem:[#allocation7 + $0x978] sm:$0xff] }
 0x3fe   : > { %2146 = vmatmul.mubr.f32.vlgmr.msra.gmra.mrb[12].mxu1 %v7341_v12  ;;  %2283 = vmatmul.mubr.f32.vlgmr.msra.gmra.mrb[12].mxu0 %v7341_v12  ;;  %v2306_v12 = vld [vmem:[#allocation7 + $0x878] sm:$0xff]  ;;  %v5682_v2 = vpack.c.bf16 %v2338_v63, %v2336_v62 }
 0x3ff   : > { %5641 = vmatpush1.bf16.msra.mxu1 %v5640_v20  ;;  %2419 = vmatprep.mubr.f32.mxu1 %v7337_v10  ;;  %v5650_v38 = vpack.c.bf16 %v2306_v12, %v2304_v33  ;;  %v2317_v20 = vld [vmem:[#allocation7 + $0x8d0] sm:$0xff]  ;;  %v2475_v3 = vld [vmem:[#allocation7 + $0xb78] sm:$0xff] }
 0x400   : > { %5705 = vmatpush1.bf16.msra.mxu0 %v5704_v11  ;;  %2556 = vmatprep.mubr.f32.mxu0 %v7337_v10  ;;  %v2303_v10 = vld [vmem:[#allocation7 + $0x860] sm:$0xff]  ;;  %v5664_v19 = vpack.c.bf16 %v2317_v20, %v2315_v9  ;;  %v2474_v9 = vld [vmem:[#allocation7 + $0xb70] sm:$0xff]  ;;  %v2340_v20 = vld [vmem:[#allocation7 + $0x988] sm:$0xff] }
 0x401   : > { %5643 = vmatprep.subr.bf16.mxu1 %v5642_v16  ;;  %5707 = vmatprep.subr.bf16.mxu0 %v5706_v17  ;;  %v5652_v47 = vpack.c.bf16 %v2305_v39, %v2303_v10  ;;  %v2452_v11 = vld [vmem:[#allocation7 + $0xac0] sm:$0xff]  ;;  %v2322_v16 = vld [vmem:[#allocation7 + $0x8f8] sm:$0xff]  ;;  %v2457_v17 = vld [vmem:[#allocation7 + $0xae8] sm:$0xff] }
 0x402   : > { %v5728_v21 = vpack.c.bf16 %v2454_v14, %v2452_v11  ;;  %v5666_v23 = vpack.c.bf16 %v2322_v16, %v2320_v15  ;;  %v2462_v10 = vld [vmem:[#allocation7 + $0xb10] sm:$0xff]  ;;  %v2328_v39 = vld [vmem:[#allocation7 + $0x928] sm:$0xff]  ;;  %v2342_v11 = vld [vmem:[#allocation7 + $0x998] sm:$0xff] }
 0x403   : > { %5645 = vmatpush1.bf16.msra.mxu1 %v5644_v22  ;;  %v2321_v22 = vld [vmem:[#allocation7 + $0x8f0] sm:$0xff]  ;;  %v5674_v45 = vpack.c.bf16 %v2330_v40, %v2328_v39  ;;  %v2479_v14 = vld [vmem:[#allocation7 + $0xb98] sm:$0xff] }
 0x404   : > { %5709 = vmatpush1.bf16.msra.mxu0 %v5708_v25  ;;  %5647 = vmatprep.subr.bf16.mxu1 %v5646_v26  ;;  %v2456_v25 = vld [vmem:[#allocation7 + $0xae0] sm:$0xff]  ;;  %v5730_v26 = vpack.c.bf16 %v2459_v18, %v2457_v17  ;;  %v5668_v33 = vpack.c.bf16 %v2321_v22, %v2319_v24  ;;  %v5686_v17 = vpack.c.bf16 %v2342_v11, %v2340_v20  ;;  %v2478_v24 = vld [vmem:[#allocation7 + $0xb90] sm:$0xff]  ;;  %v2344_v22 = vld [vmem:[#allocation7 + $0x9a8] sm:$0xff] }
 0x405   : > { %5711 = vmatprep.subr.bf16.mxu0 %v5710_v30  ;;  %v2461_v30 = vld [vmem:[#allocation7 + $0xb08] sm:$0xff]  ;;  %v5732_v12 = vpack.c.bf16 %v2458_v27, %v2456_v25  ;;  %v2339_v18 = vld [vmem:[#allocation7 + $0x980] sm:$0xff]  ;;  %v2346_v25 = vld [vmem:[#allocation7 + $0x9b8] sm:$0xff] }
 0x406   : > { %v2483_v27 = vld [vmem:[#allocation7 + $0xbb8] sm:$0xff] }
 0x407   : > { %5649 = vmatpush1.bf16.msra.mxu1 %v5648_v36  ;;  %v2325_v36 = vld [vmem:[#allocation7 + $0x910] sm:$0xff]  ;;  %v2709_v20 = vld [vmem:[#allocation7 + $0xe38] sm:$0xff] }
 0x408   : > { %5713 = vmatpush1.bf16.msra.mxu0 %v5712_v37  ;;  %5651 = vmatprep.subr.bf16.mxu1 %v5650_v38  ;;  %v2460_v37 = vld [vmem:[#allocation7 + $0xb00] sm:$0xff]  ;;  %v5734_v38 = vpack.c.bf16 %v2463_v32, %v2461_v30  ;;  %v5672_v43 = vpack.c.bf16 %v2325_v36, %v2323_v35  ;;  %v5690_v30 = vpack.c.bf16 %v2346_v25, %v2344_v22  ;;  %v2482_v35 = vld [vmem:[#allocation7 + $0xbb0] sm:$0xff]  ;;  %v2348_v36 = vld [vmem:[#allocation7 + $0x9c8] sm:$0xff] }
 0x409   : > { %5715 = vmatprep.subr.bf16.mxu0 %v5714_v41  ;;  %v2465_v41 = vld [vmem:[#allocation7 + $0xb28] sm:$0xff]  ;;  %v5736_v44 = vpack.c.bf16 %v2462_v10, %v2460_v37  ;;  %v2343_v32 = vld [vmem:[#allocation7 + $0x9a0] sm:$0xff]  ;;  %v2350_v37 = vld [vmem:[#allocation7 + $0x9d8] sm:$0xff] }
 0x40a   : > { %v2487_v10 = vld [vmem:[#allocation7 + $0xbd8] sm:$0xff] }
 0x40b   : > { %5653 = vmatpush1.bf16.msra.mxu1 %v5652_v47  ;;  %v2329_v47 = vld [vmem:[#allocation7 + $0x930] sm:$0xff]  ;;  %v2713_v22 = vld [vmem:[#allocation7 + $0xe58] sm:$0xff] }
 0x40c   : > { %5717 = vmatpush1.bf16.msra.mxu0 %v5716_v31  ;;  %5655 = vmatprep.subr.bf16.mxu1 %v5654_v48  ;;  %v2464_v31 = vld [vmem:[#allocation7 + $0xb20] sm:$0xff]  ;;  %v5738_v48 = vpack.c.bf16 %v2467_v42, %v2465_v41  ;;  %v5676_v54 = vpack.c.bf16 %v2329_v47, %v2327_v46  ;;  %v5694_v41 = vpack.c.bf16 %v2350_v37, %v2348_v36  ;;  %v2486_v46 = vld [vmem:[#allocation7 + $0xbd0] sm:$0xff]  ;;  %v2352_v47 = vld [vmem:[#allocation7 + $0x9e8] sm:$0xff] }
 0x40d   : > { %5719 = vmatprep.subr.bf16.mxu0 %v5718_v52  ;;  %v2469_v52 = vld [vmem:[#allocation7 + $0xb48] sm:$0xff]  ;;  %v5740_v55 = vpack.c.bf16 %v2466_v49, %v2464_v31  ;;  %v2347_v42 = vld [vmem:[#allocation7 + $0x9c0] sm:$0xff]  ;;  %v2354_v31 = vld [vmem:[#allocation7 + $0x9f8] sm:$0xff] }
 0x40e   : > { %v2491_v49 = vld [vmem:[#allocation7 + $0xbf8] sm:$0xff]  ;;  %v2715_v36 = vld [vmem:[#allocation7 + $0xe68] sm:$0xff] }
 0x40f   : > { %5657 = vmatpush1.bf16.msra.mxu1 %v5656_v58  ;;  %v2333_v58 = vld [vmem:[#allocation7 + $0x950] sm:$0xff]  ;;  %v2717_v37 = vld [vmem:[#allocation7 + $0xe78] sm:$0xff] }
 0x410   : > { %5721 = vmatpush1.bf16.msra.mxu0 %v5720_v59  ;;  %5659 = vmatprep.subr.bf16.mxu1 %v5658_v60  ;;  %v2468_v59 = vld [vmem:[#allocation7 + $0xb40] sm:$0xff]  ;;  %v5742_v60 = vpack.c.bf16 %v2471_v53, %v2469_v52  ;;  %v5680_v1 = vpack.c.bf16 %v2333_v58, %v2331_v57  ;;  %v5698_v52 = vpack.c.bf16 %v2354_v31, %v2352_v47  ;;  %v2490_v57 = vld [vmem:[#allocation7 + $0xbf0] sm:$0xff]  ;;  %v2566_v58 = vld [vmem:[#allocation7 + $0xc08] sm:$0xff] }
 0x411   : > { %5723 = vmatprep.subr.bf16.mxu0 %v5722_v0  ;;  %v2473_v0 = vld [vmem:[#allocation7 + $0xb68] sm:$0xff]  ;;  %v5744_v4 = vpack.c.bf16 %v2470_v61, %v2468_v59  ;;  %v2351_v53 = vld [vmem:[#allocation7 + $0x9e0] sm:$0xff]  ;;  %v2568_v59 = vld [vmem:[#allocation7 + $0xc18] sm:$0xff] }
 0x412   : > { %v2705_v61 = vld [vmem:[#allocation7 + $0xe18] sm:$0xff]  ;;  %v2719_v47 = vld [vmem:[#allocation7 + $0xe88] sm:$0xff] }
 0x413   : > { %5661 = vmatpush1.bf16.msra.mxu1 %v5660_v6  ;;  %v2337_v6 = vld [vmem:[#allocation7 + $0x970] sm:$0xff]  ;;  %v2721_v31 = vld [vmem:[#allocation7 + $0xe98] sm:$0xff] }
 0x414   : > { %5725 = vmatpush1.bf16.msra.mxu0 %v5724_v7  ;;  %5663 = vmatprep.subr.bf16.mxu1 %v5662_v8  ;;  %v2472_v7 = vld [vmem:[#allocation7 + $0xb60] sm:$0xff]  ;;  %v5746_v8 = vpack.c.bf16 %v2475_v3, %v2473_v0  ;;  %v5684_v15 = vpack.c.bf16 %v2337_v6, %v2335_v5  ;;  %v5766_v0 = vpack.c.bf16 %v2568_v59, %v2566_v58  ;;  %v2704_v5 = vld [vmem:[#allocation7 + $0xe10] sm:$0xff]  ;;  %v2570_v6 = vld [vmem:[#allocation7 + $0xc28] sm:$0xff] }
 0x415   : > { %5727 = vmatprep.subr.bf16.mxu0 %v5726_v13  ;;  %v2477_v13 = vld [vmem:[#allocation7 + $0xb88] sm:$0xff]  ;;  %v5748_v16 = vpack.c.bf16 %v2474_v9, %v2472_v7  ;;  %v2565_v3 = vld [vmem:[#allocation7 + $0xc00] sm:$0xff]  ;;  %v2572_v7 = vld [vmem:[#allocation7 + $0xc38] sm:$0xff] }
 0x416   : > { %v2707_v9 = vld [vmem:[#allocation7 + $0xe28] sm:$0xff]  ;;  %v2725_v59 = vld [vmem:[#allocation7 + $0xeb8] sm:$0xff] }
 0x417   : > { %5665 = vmatpush1.bf16.msra.mxu1 %v5664_v19  ;;  %v2341_v19 = vld [vmem:[#allocation7 + $0x990] sm:$0xff]  ;;  %v2723_v58 = vld [vmem:[#allocation7 + $0xea8] sm:$0xff] }
 0x418   : > { %5729 = vmatpush1.bf16.msra.mxu0 %v5728_v21  ;;  %5667 = vmatprep.subr.bf16.mxu1 %v5666_v23  ;;  %v2476_v21 = vld [vmem:[#allocation7 + $0xb80] sm:$0xff]  ;;  %v5750_v23 = vpack.c.bf16 %v2479_v14, %v2477_v13  ;;  %v5688_v28 = vpack.c.bf16 %v2341_v19, %v2339_v18  ;;  %v2571_v14 = vld [vmem:[#allocation7 + $0xc30] sm:$0xff]  ;;  %v2574_v18 = vld [vmem:[#allocation7 + $0xc48] sm:$0xff] }
 0x419   : > { %5731 = vmatprep.subr.bf16.mxu0 %v5730_v26  ;;  %v2481_v26 = vld [vmem:[#allocation7 + $0xba8] sm:$0xff]  ;;  %v5752_v29 = vpack.c.bf16 %v2478_v24, %v2476_v21  ;;  %v2569_v13 = vld [vmem:[#allocation7 + $0xc20] sm:$0xff]  ;;  %v2576_v19 = vld [vmem:[#allocation7 + $0xc58] sm:$0xff] }
 0x41a   : > { %v7351_v21 = vld [vmem:[#allocation2] sm:$0xff]  ;;  %v2711_v24 = vld [vmem:[#allocation7 + $0xe48] sm:$0xff]  ;;  %v5772_v25 = vpack.c.bf16 %v2571_v14, %v2569_v13  ;;  %v2726_v14 = vld [vmem:[#allocation7 + $0xec0] sm:$0xff] }
 0x41b   : > { %5669 = vmatpush1.bf16.msra.mxu1 %v5668_v33  ;;  %v2345_v33 = vld [vmem:[#allocation7 + $0x9b0] sm:$0xff] }
 0x41c   : > { %5733 = vmatpush1.bf16.msra.mxu0 %v5732_v12  ;;  %5671 = vmatprep.subr.bf16.mxu1 %v5670_v34  ;;  %v2480_v12 = vld [vmem:[#allocation7 + $0xba0] sm:$0xff]  ;;  %v5754_v34 = vpack.c.bf16 %v2483_v27, %v2481_v26  ;;  %v5692_v39 = vpack.c.bf16 %v2345_v33, %v2343_v32  ;;  %v7355_v26 = vld [vmem:[#allocation2 + $0x8] sm:$0xff]  ;;  %v5838_v33 = vpack.c.bf16 %v2713_v22, %v2711_v24  ;;  %v2591_v13 = vld [vmem:[#allocation7 + $0xcd0] sm:$0xff] }
 0x41d   : > { %5735 = vmatprep.subr.bf16.mxu0 %v5734_v38  ;;  %v2485_v38 = vld [vmem:[#allocation7 + $0xbc8] sm:$0xff]  ;;  %v5756_v40 = vpack.c.bf16 %v2482_v35, %v2480_v12  ;;  %v2710_v32 = vld [vmem:[#allocation7 + $0xe40] sm:$0xff]  ;;  %v2712_v12 = vld [vmem:[#allocation7 + $0xe50] sm:$0xff] }
 0x41e   : > { %v2580_v35 = vld [vmem:[#allocation7 + $0xc78] sm:$0xff] }
 0x41f   : > { %5673 = vmatpush1.bf16.msra.mxu1 %v5672_v43  ;;  %v2349_v43 = vld [vmem:[#allocation7 + $0x9d0] sm:$0xff] }
 0x420   : > { %5737 = vmatpush1.bf16.msra.mxu0 %v5736_v44  ;;  %5675 = vmatprep.subr.bf16.mxu1 %v5674_v45  ;;  %v2484_v44 = vld [vmem:[#allocation7 + $0xbc0] sm:$0xff]  ;;  %v5758_v45 = vpack.c.bf16 %v2487_v10, %v2485_v38  ;;  %v5696_v50 = vpack.c.bf16 %v2349_v43, %v2347_v42  ;;  %v5840_v10 = vpack.c.bf16 %v2712_v12, %v2710_v32  ;;  %v2732_v32 = vld [vmem:[#allocation7 + $0xef0] sm:$0xff]  ;;  %v2600_v12 = vld [vmem:[#allocation7 + $0xd18] sm:$0xff] }
 0x421   : > { %5739 = vmatprep.subr.bf16.mxu0 %v5738_v48  ;;  %v2489_v48 = vld [vmem:[#allocation7 + $0xbe8] sm:$0xff]  ;;  %v5760_v51 = vpack.c.bf16 %v2486_v46, %v2484_v44  ;;  %v2714_v42 = vld [vmem:[#allocation7 + $0xe60] sm:$0xff]  ;;  %v5842_v43 = vpack.c.bf16 %v2717_v37, %v2715_v36  ;;  %v2716_v44 = vld [vmem:[#allocation7 + $0xe70] sm:$0xff] }
 0x422   : > { %v2584_v46 = vld [vmem:[#allocation7 + $0xc98] sm:$0xff] }
 0x423   : > { %5677 = vmatpush1.bf16.msra.mxu1 %v5676_v54  ;;  %v2353_v54 = vld [vmem:[#allocation7 + $0x9f0] sm:$0xff] }
 0x424   : > { %5741 = vmatpush1.bf16.msra.mxu0 %v5740_v55  ;;  %5679 = vmatprep.subr.bf16.mxu1 %v5678_v56  ;;  %v2488_v55 = vld [vmem:[#allocation7 + $0xbe0] sm:$0xff]  ;;  %v5762_v56 = vpack.c.bf16 %v2491_v49, %v2489_v48  ;;  %v5700_v62 = vpack.c.bf16 %v2353_v54, %v2351_v53  ;;  %v5844_v49 = vpack.c.bf16 %v2716_v44, %v2714_v42  ;;  %v2736_v42 = vld [vmem:[#allocation7 + $0xf10] sm:$0xff]  ;;  %v2604_v44 = vld [vmem:[#allocation7 + $0xd38] sm:$0xff] }
 0x425   : > { %5743 = vmatprep.subr.bf16.mxu0 %v5742_v60  ;;  %v2703_v60 = vld [vmem:[#allocation7 + $0xe08] sm:$0xff]  ;;  %v5764_v63 = vpack.c.bf16 %v2490_v57, %v2488_v55  ;;  %v2718_v53 = vld [vmem:[#allocation7 + $0xe80] sm:$0xff]  ;;  %v5846_v54 = vpack.c.bf16 %v2721_v31, %v2719_v47  ;;  %v2720_v55 = vld [vmem:[#allocation7 + $0xe90] sm:$0xff] }
 0x426   : > { %v2588_v57 = vld [vmem:[#allocation7 + $0xcb8] sm:$0xff] }
 0x427   : > { %5681 = vmatpush1.bf16.msra.mxu1 %v5680_v1  ;;  %v2567_v1 = vld [vmem:[#allocation7 + $0xc10] sm:$0xff] }
 0x428   : > { %5745 = vmatpush1.bf16.msra.mxu0 %v5744_v4  ;;  %5683 = vmatprep.subr.bf16.mxu1 %v5682_v2  ;;  %v5830_v4 = vpack.c.bf16 %v2705_v61, %v2703_v60  ;;  %v2702_v2 = vld [vmem:[#allocation7 + $0xe00] sm:$0xff]  ;;  %v5848_v61 = vpack.c.bf16 %v2720_v55, %v2718_v53  ;;  %v2740_v53 = vld [vmem:[#allocation7 + $0xf30] sm:$0xff]  ;;  %v2608_v55 = vld [vmem:[#allocation7 + $0xd58] sm:$0xff] }
 0x429   : > { %5747 = vmatprep.subr.bf16.mxu0 %v5746_v8  ;;  %v5768_v8 = vpack.c.bf16 %v2567_v1, %v2565_v3  ;;  %v5832_v11 = vpack.c.bf16 %v2704_v5, %v2702_v2  ;;  %v2722_v3 = vld [vmem:[#allocation7 + $0xea0] sm:$0xff]  ;;  %v5850_v1 = vpack.c.bf16 %v2725_v59, %v2723_v58  ;;  %v2590_v2 = vld [vmem:[#allocation7 + $0xcc8] sm:$0xff]  ;;  %v2592_v5 = vld [vmem:[#allocation7 + $0xcd8] sm:$0xff] }
 0x42b   : > { %5685 = vmatpush1.bf16.msra.mxu1 %v5684_v15  ;;  %v2706_v15 = vld [vmem:[#allocation7 + $0xe20] sm:$0xff] }
 0x42c   : > { %5749 = vmatpush1.bf16.msra.mxu0 %v5748_v16  ;;  %5687 = vmatprep.subr.bf16.mxu1 %v5686_v17  ;;  %v5770_v16 = vpack.c.bf16 %v2572_v7, %v2570_v6  ;;  %v2708_v17 = vld [vmem:[#allocation7 + $0xe30] sm:$0xff]  ;;  %v2727_v6 = vld [vmem:[#allocation7 + $0xec8] sm:$0xff]  ;;  %v2729_v7 = vld [vmem:[#allocation7 + $0xed8] sm:$0xff] }
 0x42d   : > { %5751 = vmatprep.subr.bf16.mxu0 %v5750_v23  ;;  %v5834_v23 = vpack.c.bf16 %v2709_v20, %v2707_v9  ;;  %v5836_v27 = vpack.c.bf16 %v2708_v17, %v2706_v15  ;;  %v5790_v20 = vpack.c.bf16 %v2592_v5, %v2590_v2  ;;  %v5854_v15 = vpack.c.bf16 %v2729_v7, %v2727_v6  ;;  %v2594_v17 = vld [vmem:[#allocation7 + $0xce8] sm:$0xff]  ;;  %v2749_v5 = vld [vmem:[#allocation7 + $0xf78] sm:$0xff] }
 0x42e   : > { %v2747_v2 = vld [vmem:[#allocation7 + $0xf68] sm:$0xff] }
 0x42f   : > { %5689 = vmatpush1.bf16.msra.mxu1 %v5688_v28  ;;  %v5774_v28 = vpack.c.bf16 %v2576_v19, %v2574_v18  ;;  %v2596_v18 = vld [vmem:[#allocation7 + $0xcf8] sm:$0xff]  ;;  %v2731_v19 = vld [vmem:[#allocation7 + $0xee8] sm:$0xff] }
 0x430   : > { %5753 = vmatpush1.bf16.msra.mxu0 %v5752_v29  ;;  %5691 = vmatprep.subr.bf16.mxu1 %v5690_v30  ;;  %v2573_v29 = vld [vmem:[#allocation7 + $0xc40] sm:$0xff]  ;;  %v2575_v30 = vld [vmem:[#allocation7 + $0xc50] sm:$0xff] }
 0x431   : > { %5755 = vmatprep.subr.bf16.mxu0 %v5754_v34  ;;  %v2578_v34 = vld [vmem:[#allocation7 + $0xc68] sm:$0xff]  ;;  %v5776_v38 = vpack.c.bf16 %v2575_v30, %v2573_v29  ;;  %v2730_v29 = vld [vmem:[#allocation7 + $0xee0] sm:$0xff] }
 0x432   : > { %v5860_v37 = vpack.c.bf16 %v2732_v32, %v2730_v29  ;;  %v2752_v29 = vld [vmem:[#allocation7 + $0xf90] sm:$0xff]  ;;  %v2620_v32 = vld [vmem:[#allocation7 + $0xdb8] sm:$0xff] }
 0x433   : > { %5693 = vmatpush1.bf16.msra.mxu1 %v5692_v39  ;;  %v5778_v39 = vpack.c.bf16 %v2580_v35, %v2578_v34  ;;  %v2735_v34 = vld [vmem:[#allocation7 + $0xf08] sm:$0xff]  ;;  %v2737_v35 = vld [vmem:[#allocation7 + $0xf18] sm:$0xff] }
 0x434   : > { %5757 = vmatpush1.bf16.msra.mxu0 %v5756_v40  ;;  %5695 = vmatprep.subr.bf16.mxu1 %v5694_v41  ;;  %v2577_v40 = vld [vmem:[#allocation7 + $0xc60] sm:$0xff]  ;;  %v2579_v41 = vld [vmem:[#allocation7 + $0xc70] sm:$0xff] }
 0x435   : > { %5759 = vmatprep.subr.bf16.mxu0 %v5758_v45  ;;  %v2582_v45 = vld [vmem:[#allocation7 + $0xc88] sm:$0xff]  ;;  %v5780_v48 = vpack.c.bf16 %v2579_v41, %v2577_v40  ;;  %v2734_v40 = vld [vmem:[#allocation7 + $0xf00] sm:$0xff]  ;;  %v5862_v41 = vpack.c.bf16 %v2737_v35, %v2735_v34 }
 0x436   : > { %v5864_v31 = vpack.c.bf16 %v2736_v42, %v2734_v40  ;;  %v2756_v40 = vld [vmem:[#allocation7 + $0xfb0] sm:$0xff]  ;;  %v2624_v42 = vld [vmem:[#allocation7 + $0xdd8] sm:$0xff] }
 0x437   : > { %5697 = vmatpush1.bf16.msra.mxu1 %v5696_v50  ;;  %v5782_v50 = vpack.c.bf16 %v2584_v46, %v2582_v45  ;;  %v2739_v45 = vld [vmem:[#allocation7 + $0xf28] sm:$0xff]  ;;  %v2741_v46 = vld [vmem:[#allocation7 + $0xf38] sm:$0xff] }
 0x438   : > { %5761 = vmatpush1.bf16.msra.mxu0 %v5760_v51  ;;  %5699 = vmatprep.subr.bf16.mxu1 %v5698_v52  ;;  %v2581_v51 = vld [vmem:[#allocation7 + $0xc80] sm:$0xff]  ;;  %v2583_v52 = vld [vmem:[#allocation7 + $0xc90] sm:$0xff] }
 0x439   : > { %5763 = vmatprep.subr.bf16.mxu0 %v5762_v56  ;;  %v2586_v56 = vld [vmem:[#allocation7 + $0xca8] sm:$0xff]  ;;  %v5784_v60 = vpack.c.bf16 %v2583_v52, %v2581_v51  ;;  %v2738_v51 = vld [vmem:[#allocation7 + $0xf20] sm:$0xff]  ;;  %v5866_v52 = vpack.c.bf16 %v2741_v46, %v2739_v45 }
 0x43a   : > { %v5868_v59 = vpack.c.bf16 %v2740_v53, %v2738_v51  ;;  %v2760_v51 = vld [vmem:[#allocation7 + $0xfd0] sm:$0xff]  ;;  %v2628_v53 = vld [vmem:[#allocation7 + $0xdf8] sm:$0xff] }
 0x43b   : > { %5701 = vmatpush1.bf16.msra.mxu1 %v5700_v62  ;;  %v5786_v62 = vpack.c.bf16 %v2588_v57, %v2586_v56  ;;  %v2743_v56 = vld [vmem:[#allocation7 + $0xf48] sm:$0xff]  ;;  %v2745_v57 = vld [vmem:[#allocation7 + $0xf58] sm:$0xff] }
 0x43c   : > { %5765 = vmatpush1.bf16.msra.mxu0 %v5764_v63  ;;  %5767 = vmatprep.subr.bf16.mxu1 %v5766_v0  ;;  %v2585_v63 = vld [vmem:[#allocation7 + $0xca0] sm:$0xff]  ;;  %v2587_v0 = vld [vmem:[#allocation7 + $0xcb0] sm:$0xff] }
 0x43d   : > { %5831 = vmatprep.subr.bf16.mxu0 %v5830_v4  ;;  %v2724_v4 = vld [vmem:[#allocation7 + $0xeb0] sm:$0xff] }
 0x43e   : > { %2420 = vmatmul.mubr.f32.vlgmr.msra.gmra.mrb[14].mxu1 %v7351_v21  ;;  %v5852_v9 = vpack.c.bf16 %v2724_v4, %v2722_v3  ;;  %v2744_v3 = vld [vmem:[#allocation7 + $0xf50] sm:$0xff]  ;;  %v2612_v4 = vld [vmem:[#allocation7 + $0xd78] sm:$0xff] }
 0x43f   : > { %2557 = vmatmul.mubr.f32.vlgmr.msra.gmra.mrb[14].mxu0 %v7351_v21  ;;  %5769 = vmatpush1.bf16.msra.mxu1 %v5768_v8  ;;  %v5788_v8 = vpack.c.bf16 %v2587_v0, %v2585_v63  ;;  %v2742_v63 = vld [vmem:[#allocation7 + $0xf40] sm:$0xff]  ;;  %v5870_v0 = vpack.c.bf16 %v2745_v57, %v2743_v56 }
 0x440   : > { %2693 = vmatprep.mubr.f32.mxu1 %v7355_v26  ;;  %5833 = vmatpush1.bf16.msra.mxu0 %v5832_v11  ;;  %v2589_v11 = vld [vmem:[#allocation7 + $0xcc0] sm:$0xff]  ;;  %v5872_v7 = vpack.c.bf16 %v2744_v3, %v2742_v63  ;;  %v2764_v63 = vld [vmem:[#allocation7 + $0xff0] sm:$0xff]  ;;  %v2842_v3 = vld [vmem:[#allocation7 + $0x1018] sm:$0xff] }
 0x441   : > { %2830 = vmatprep.mubr.f32.mxu0 %v7355_v26  ;;  %5771 = vmatprep.subr.bf16.mxu1 %v5770_v16  ;;  %v2728_v16 = vld [vmem:[#allocation7 + $0xed0] sm:$0xff]  ;;  %v5792_v24 = vpack.c.bf16 %v2591_v13, %v2589_v11  ;;  %v2746_v11 = vld [vmem:[#allocation7 + $0xf60] sm:$0xff]  ;;  %v5874_v13 = vpack.c.bf16 %v2749_v5, %v2747_v2 }
 0x442   : > { %5835 = vmatprep.subr.bf16.mxu0 %v5834_v23  ;;  %v2733_v23 = vld [vmem:[#allocation7 + $0xef8] sm:$0xff]  ;;  %v5856_v22 = vpack.c.bf16 %v2728_v16, %v2726_v14  ;;  %v2748_v14 = vld [vmem:[#allocation7 + $0xf70] sm:$0xff]  ;;  %v2839_v5 = vld [vmem:[#allocation7 + $0x1000] sm:$0xff] }
 0x443   : > { %5773 = vmatpush1.bf16.msra.mxu1 %v5772_v25  ;;  %v5794_v25 = vpack.c.bf16 %v2596_v18, %v2594_v17  ;;  %v5858_v30 = vpack.c.bf16 %v2733_v23, %v2731_v19  ;;  %v2616_v16 = vld [vmem:[#allocation7 + $0xd98] sm:$0xff]  ;;  %v2751_v17 = vld [vmem:[#allocation7 + $0xf88] sm:$0xff]  ;;  %v5876_v23 = vpack.c.bf16 %v2748_v14, %v2746_v11  ;;  %v2843_v11 = vld [vmem:[#allocation7 + $0x1020] sm:$0xff] }
 0x444   : > { %5837 = vmatpush1.bf16.msra.mxu0 %v5836_v27  ;;  %5775 = vmatprep.subr.bf16.mxu1 %v5774_v28  ;;  %v2593_v27 = vld [vmem:[#allocation7 + $0xce0] sm:$0xff]  ;;  %v2595_v28 = vld [vmem:[#allocation7 + $0xcf0] sm:$0xff]  ;;  %v2753_v18 = vld [vmem:[#allocation7 + $0xf98] sm:$0xff] }
 0x445   : > { %5839 = vmatprep.subr.bf16.mxu0 %v5838_v33  ;;  %v2598_v33 = vld [vmem:[#allocation7 + $0xd08] sm:$0xff]  ;;  %v5796_v36 = vpack.c.bf16 %v2595_v28, %v2593_v27  ;;  %v2750_v27 = vld [vmem:[#allocation7 + $0xf80] sm:$0xff]  ;;  %v5878_v28 = vpack.c.bf16 %v2753_v18, %v2751_v17 }
 0x446   : > { %v5880_v35 = vpack.c.bf16 %v2752_v29, %v2750_v27  ;;  %v2848_v14 = vld [vmem:[#allocation7 + $0x1048] sm:$0xff]  ;;  %v2847_v18 = vld [vmem:[#allocation7 + $0x1040] sm:$0xff] }
 0x447   : > { %5777 = vmatpush1.bf16.msra.mxu1 %v5776_v38  ;;  %v5798_v38 = vpack.c.bf16 %v2600_v12, %v2598_v33  ;;  %v2755_v33 = vld [vmem:[#allocation7 + $0xfa8] sm:$0xff]  ;;  %v2757_v12 = vld [vmem:[#allocation7 + $0xfb8] sm:$0xff]  ;;  %v2851_v27 = vld [vmem:[#allocation7 + $0x1060] sm:$0xff] }
 0x448   : > { %5841 = vmatpush1.bf16.msra.mxu0 %v5840_v10  ;;  %5779 = vmatprep.subr.bf16.mxu1 %v5778_v39  ;;  %v2597_v10 = vld [vmem:[#allocation7 + $0xd00] sm:$0xff]  ;;  %v2599_v39 = vld [vmem:[#allocation7 + $0xd10] sm:$0xff]  ;;  %v2856_v29 = vld [vmem:[#allocation7 + $0x1088] sm:$0xff] }
 0x449   : > { %5843 = vmatprep.subr.bf16.mxu0 %v5842_v43  ;;  %v2602_v43 = vld [vmem:[#allocation7 + $0xd28] sm:$0xff]  ;;  %v5800_v47 = vpack.c.bf16 %v2599_v39, %v2597_v10  ;;  %v2754_v10 = vld [vmem:[#allocation7 + $0xfa0] sm:$0xff]  ;;  %v5882_v39 = vpack.c.bf16 %v2757_v12, %v2755_v33 }
 0x44a   : > { %v5884_v46 = vpack.c.bf16 %v2756_v40, %v2754_v10  ;;  %v2855_v12 = vld [vmem:[#allocation7 + $0x1080] sm:$0xff]  ;;  %v2861_v10 = vld [vmem:[#allocation7 + $0x10b0] sm:$0xff]  ;;  %v2866_v40 = vld [vmem:[#allocation7 + $0x10d8] sm:$0xff] }
 0x44b   : > { %5781 = vmatpush1.bf16.msra.mxu1 %v5780_v48  ;;  %v5802_v48 = vpack.c.bf16 %v2604_v44, %v2602_v43  ;;  %v2759_v43 = vld [vmem:[#allocation7 + $0xfc8] sm:$0xff]  ;;  %v2761_v44 = vld [vmem:[#allocation7 + $0xfd8] sm:$0xff] }
 0x44c   : > { %5845 = vmatpush1.bf16.msra.mxu0 %v5844_v49  ;;  %5783 = vmatprep.subr.bf16.mxu1 %v5782_v50  ;;  %v2601_v49 = vld [vmem:[#allocation7 + $0xd20] sm:$0xff]  ;;  %v2603_v50 = vld [vmem:[#allocation7 + $0xd30] sm:$0xff] }
 0x44d   : > { %5847 = vmatprep.subr.bf16.mxu0 %v5846_v54  ;;  %v2606_v54 = vld [vmem:[#allocation7 + $0xd48] sm:$0xff]  ;;  %v5804_v58 = vpack.c.bf16 %v2603_v50, %v2601_v49  ;;  %v2758_v49 = vld [vmem:[#allocation7 + $0xfc0] sm:$0xff]  ;;  %v5886_v50 = vpack.c.bf16 %v2761_v44, %v2759_v43  ;;  %v2865_v44 = vld [vmem:[#allocation7 + $0x10d0] sm:$0xff] }
 0x44e   : > { %v5888_v57 = vpack.c.bf16 %v2760_v51, %v2758_v49  ;;  %v2863_v43 = vld [vmem:[#allocation7 + $0x10c0] sm:$0xff] }
 0x44f   : > { %5785 = vmatpush1.bf16.msra.mxu1 %v5784_v60  ;;  %v5806_v60 = vpack.c.bf16 %v2608_v55, %v2606_v54  ;;  %v2763_v54 = vld [vmem:[#allocation7 + $0xfe8] sm:$0xff]  ;;  %v2765_v55 = vld [vmem:[#allocation7 + $0xff8] sm:$0xff]  ;;  %v7362_v51 = vld [vmem:[#allocation3 + $0x10] sm:$0xff] }
 0x450   : > { %5849 = vmatpush1.bf16.msra.mxu0 %v5848_v61  ;;  %5787 = vmatprep.subr.bf16.mxu1 %v5786_v62  ;;  %v2605_v61 = vld [vmem:[#allocation7 + $0xd40] sm:$0xff]  ;;  %v2607_v62 = vld [vmem:[#allocation7 + $0xd50] sm:$0xff] }
 0x451   : > { %5851 = vmatprep.subr.bf16.mxu0 %v5850_v1  ;;  %v2610_v1 = vld [vmem:[#allocation7 + $0xd68] sm:$0xff]  ;;  %v5808_v6 = vpack.c.bf16 %v2607_v62, %v2605_v61  ;;  %v2762_v61 = vld [vmem:[#allocation7 + $0xfe0] sm:$0xff]  ;;  %v5890_v62 = vpack.c.bf16 %v2765_v55, %v2763_v54  ;;  %v2869_v55 = vld [vmem:[#allocation7 + $0x10f0] sm:$0xff] }
 0x452   : > { %v2867_v54 = vld [vmem:[#allocation7 + $0x10e0] sm:$0xff] }
 0x453   : > { %5789 = vmatpush1.bf16.msra.mxu1 %v5788_v8  ;;  %v5810_v8 = vpack.c.bf16 %v2612_v4, %v2610_v1  ;;  %v5892_v4 = vpack.c.bf16 %v2764_v63, %v2762_v61  ;;  %v2873_v63 = vld [vmem:[#allocation7 + $0x1110] sm:$0xff] }
 0x454   : > { %5853 = vmatpush1.bf16.msra.mxu0 %v5852_v9  ;;  %5791 = vmatprep.subr.bf16.mxu1 %v5790_v20  ;;  %v2609_v9 = vld [vmem:[#allocation7 + $0xd60] sm:$0xff]  ;;  %v2611_v20 = vld [vmem:[#allocation7 + $0xd70] sm:$0xff] }
 0x455   : > { %5855 = vmatprep.subr.bf16.mxu0 %v5854_v15  ;;  %v2614_v15 = vld [vmem:[#allocation7 + $0xd88] sm:$0xff]  ;;  %v5812_v19 = vpack.c.bf16 %v2611_v20, %v2609_v9 }
 0x457   : > { %5793 = vmatpush1.bf16.msra.mxu1 %v5792_v24  ;;  %v5814_v24 = vpack.c.bf16 %v2616_v16, %v2614_v15  ;;  %v2850_v15 = vld [vmem:[#allocation7 + $0x1058] sm:$0xff] }
 0x458   : > { %5857 = vmatpush1.bf16.msra.mxu0 %v5856_v22  ;;  %5795 = vmatprep.subr.bf16.mxu1 %v5794_v25  ;;  %v2613_v22 = vld [vmem:[#allocation7 + $0xd80] sm:$0xff]  ;;  %v2615_v25 = vld [vmem:[#allocation7 + $0xd90] sm:$0xff]  ;;  %v5902_v17 = vpack.c.bf16 %v2850_v15, %v2848_v14  ;;  %v2884_v14 = vld [vmem:[#allocation7 + $0x1168] sm:$0xff] }
 0x459   : > { %5859 = vmatprep.subr.bf16.mxu0 %v5858_v30  ;;  %v2618_v30 = vld [vmem:[#allocation7 + $0xda8] sm:$0xff]  ;;  %v5816_v34 = vpack.c.bf16 %v2615_v25, %v2613_v22  ;;  %v2886_v15 = vld [vmem:[#allocation7 + $0x1178] sm:$0xff] }
 0x45b   : > { %5797 = vmatpush1.bf16.msra.mxu1 %v5796_v36  ;;  %v5818_v36 = vpack.c.bf16 %v2620_v32, %v2618_v30  ;;  %v2858_v30 = vld [vmem:[#allocation7 + $0x1098] sm:$0xff] }
 0x45c   : > { %5861 = vmatpush1.bf16.msra.mxu0 %v5860_v37  ;;  %5799 = vmatprep.subr.bf16.mxu1 %v5798_v38  ;;  %v2617_v37 = vld [vmem:[#allocation7 + $0xda0] sm:$0xff]  ;;  %v2619_v38 = vld [vmem:[#allocation7 + $0xdb0] sm:$0xff]  ;;  %v5910_v33 = vpack.c.bf16 %v2858_v30, %v2856_v29  ;;  %v2892_v29 = vld [vmem:[#allocation7 + $0x11a8] sm:$0xff] }
 0x45d   : > { %5863 = vmatprep.subr.bf16.mxu0 %v5862_v41  ;;  %v2622_v41 = vld [vmem:[#allocation7 + $0xdc8] sm:$0xff]  ;;  %v5820_v45 = vpack.c.bf16 %v2619_v38, %v2617_v37  ;;  %v2859_v38 = vld [vmem:[#allocation7 + $0x10a0] sm:$0xff]  ;;  %v2894_v30 = vld [vmem:[#allocation7 + $0x11b8] sm:$0xff] }
 0x45f   : > { %5801 = vmatpush1.bf16.msra.mxu1 %v5800_v47  ;;  %v5822_v47 = vpack.c.bf16 %v2624_v42, %v2622_v41  ;;  %v5916_v41 = vpack.c.bf16 %v2861_v10, %v2859_v38  ;;  %v2895_v38 = vld [vmem:[#allocation7 + $0x11c0] sm:$0xff]  ;;  %v2897_v10 = vld [vmem:[#allocation7 + $0x11d0] sm:$0xff] }
 0x460   : > { %5865 = vmatpush1.bf16.msra.mxu0 %v5864_v31  ;;  %5803 = vmatprep.subr.bf16.mxu1 %v5802_v48  ;;  %v2621_v31 = vld [vmem:[#allocation7 + $0xdc0] sm:$0xff]  ;;  %v2623_v48 = vld [vmem:[#allocation7 + $0xdd0] sm:$0xff] }
 0x461   : > { %5867 = vmatprep.subr.bf16.mxu0 %v5866_v52  ;;  %v2626_v52 = vld [vmem:[#allocation7 + $0xde8] sm:$0xff]  ;;  %v5824_v56 = vpack.c.bf16 %v2623_v48, %v2621_v31  ;;  %v2870_v31 = vld [vmem:[#allocation7 + $0x10f8] sm:$0xff] }
 0x463   : > { %5805 = vmatpush1.bf16.msra.mxu1 %v5804_v58  ;;  %v5826_v58 = vpack.c.bf16 %v2628_v53, %v2626_v52 }
 0x464   : > { %5869 = vmatpush1.bf16.msra.mxu0 %v5868_v59  ;;  %5807 = vmatprep.subr.bf16.mxu1 %v5806_v60  ;;  %v2625_v59 = vld [vmem:[#allocation7 + $0xde0] sm:$0xff]  ;;  %v2627_v60 = vld [vmem:[#allocation7 + $0xdf0] sm:$0xff] }
 0x465   : > { %5871 = vmatprep.subr.bf16.mxu0 %v5870_v0  ;;  %v2840_v0 = vld [vmem:[#allocation7 + $0x1008] sm:$0xff]  ;;  %v5828_v1 = vpack.c.bf16 %v2627_v60, %v2625_v59  ;;  %v5924_v60 = vpack.c.bf16 %v2869_v55, %v2867_v54  ;;  %v3245_v55 = vld [vmem:[#allocation7 + $0x220] sm:$0xff] }
 0x466   : > { %v5894_v2 = vpack.c.bf16 %v2842_v3, %v2840_v0  ;;  %v2876_v3 = vld [vmem:[#allocation7 + $0x1128] sm:$0xff] }
 0x467   : > { %5809 = vmatpush1.bf16.msra.mxu1 %v5808_v6  ;;  %v2841_v6 = vld [vmem:[#allocation7 + $0x1010] sm:$0xff] }
 0x468   : > { %5873 = vmatpush1.bf16.msra.mxu0 %v5872_v7  ;;  %5811 = vmatprep.subr.bf16.mxu1 %v5810_v8  ;;  %v2844_v7 = vld [vmem:[#allocation7 + $0x1028] sm:$0xff]  ;;  %v2846_v8 = vld [vmem:[#allocation7 + $0x1038] sm:$0xff]  ;;  %v5896_v9 = vpack.c.bf16 %v2841_v6, %v2839_v5  ;;  %v2875_v5 = vld [vmem:[#allocation7 + $0x1120] sm:$0xff] }
 0x469   : > { %5875 = vmatprep.subr.bf16.mxu0 %v5874_v13  ;;  %v5898_v20 = vpack.c.bf16 %v2846_v8, %v2844_v7  ;;  %v2845_v13 = vld [vmem:[#allocation7 + $0x1030] sm:$0xff]  ;;  %v2880_v7 = vld [vmem:[#allocation7 + $0x1148] sm:$0xff]  ;;  %v2882_v8 = vld [vmem:[#allocation7 + $0x1158] sm:$0xff] }
 0x46a   : > { %v5900_v16 = vpack.c.bf16 %v2845_v13, %v2843_v11  ;;  %v2877_v6 = vld [vmem:[#allocation7 + $0x1130] sm:$0xff]  ;;  %v2879_v11 = vld [vmem:[#allocation7 + $0x1140] sm:$0xff] }
 0x46b   : > { %5813 = vmatpush1.bf16.msra.mxu1 %v5812_v19  ;;  %v2849_v19 = vld [vmem:[#allocation7 + $0x1050] sm:$0xff] }
 0x46c   : > { %5877 = vmatpush1.bf16.msra.mxu0 %v5876_v23  ;;  %5815 = vmatprep.subr.bf16.mxu1 %v5814_v24  ;;  %v2852_v23 = vld [vmem:[#allocation7 + $0x1068] sm:$0xff]  ;;  %v2854_v24 = vld [vmem:[#allocation7 + $0x1078] sm:$0xff]  ;;  %v5904_v22 = vpack.c.bf16 %v2849_v19, %v2847_v18  ;;  %v2881_v13 = vld [vmem:[#allocation7 + $0x1150] sm:$0xff] }
 0x46d   : > { %5879 = vmatprep.subr.bf16.mxu0 %v5878_v28  ;;  %v5906_v25 = vpack.c.bf16 %v2854_v24, %v2852_v23  ;;  %v2853_v28 = vld [vmem:[#allocation7 + $0x1070] sm:$0xff]  ;;  %v2883_v18 = vld [vmem:[#allocation7 + $0x1160] sm:$0xff]  ;;  %v2888_v23 = vld [vmem:[#allocation7 + $0x1188] sm:$0xff] }
 0x46e   : > { %v5908_v32 = vpack.c.bf16 %v2853_v28, %v2851_v27  ;;  %v2885_v19 = vld [vmem:[#allocation7 + $0x1170] sm:$0xff]  ;;  %v2890_v24 = vld [vmem:[#allocation7 + $0x1198] sm:$0xff]  ;;  %v2887_v27 = vld [vmem:[#allocation7 + $0x1180] sm:$0xff] }
 0x46f   : > { %5817 = vmatpush1.bf16.msra.mxu1 %v5816_v34  ;;  %v2860_v34 = vld [vmem:[#allocation7 + $0x10a8] sm:$0xff]  ;;  %v2889_v28 = vld [vmem:[#allocation7 + $0x1190] sm:$0xff] }
 0x470   : > { %5881 = vmatpush1.bf16.msra.mxu0 %v5880_v35  ;;  %5819 = vmatprep.subr.bf16.mxu1 %v5818_v36  ;;  %v2862_v35 = vld [vmem:[#allocation7 + $0x10b8] sm:$0xff] }
 0x471   : > { %5883 = vmatprep.subr.bf16.mxu0 %v5882_v39  ;;  %v5914_v37 = vpack.c.bf16 %v2862_v35, %v2860_v34  ;;  %v2864_v39 = vld [vmem:[#allocation7 + $0x10c8] sm:$0xff]  ;;  %v2898_v35 = vld [vmem:[#allocation7 + $0x11d8] sm:$0xff] }
 0x472   : > { %v5918_v42 = vpack.c.bf16 %v2866_v40, %v2864_v39  ;;  %v2896_v34 = vld [vmem:[#allocation7 + $0x11c8] sm:$0xff]  ;;  %v2902_v40 = vld [vmem:[#allocation7 + $0x11f8] sm:$0xff] }
 0x473   : > { %5821 = vmatpush1.bf16.msra.mxu1 %v5820_v45  ;;  %v2900_v39 = vld [vmem:[#allocation7 + $0x11e8] sm:$0xff] }
 0x474   : > { %5885 = vmatpush1.bf16.msra.mxu0 %v5884_v46  ;;  %5823 = vmatprep.subr.bf16.mxu1 %v5822_v47  ;;  %v2868_v47 = vld [vmem:[#allocation7 + $0x10e8] sm:$0xff] }
 0x475   : > { %5887 = vmatprep.subr.bf16.mxu0 %v5886_v50  ;;  %v5920_v50 = vpack.c.bf16 %v2865_v44, %v2863_v43  ;;  %v5922_v53 = vpack.c.bf16 %v2870_v31, %v2868_v47  ;;  %v2899_v43 = vld [vmem:[#allocation7 + $0x11e0] sm:$0xff]  ;;  %v2901_v44 = vld [vmem:[#allocation7 + $0x11f0] sm:$0xff] }
 0x476   : > { %v5956_v47 = vpack.c.bf16 %v2901_v44, %v2899_v43  ;;  %v3275_v43 = vld [vmem:[#allocation7 + $0x310] sm:$0xff] }
 0x477   : > { %5825 = vmatpush1.bf16.msra.mxu1 %v5824_v56 }
 0x478   : > { %5889 = vmatpush1.bf16.msra.mxu0 %v5888_v57  ;;  %5827 = vmatprep.subr.bf16.mxu1 %v5826_v58  ;;  %v2872_v57 = vld [vmem:[#allocation7 + $0x1108] sm:$0xff]  ;;  %v2874_v58 = vld [vmem:[#allocation7 + $0x1118] sm:$0xff] }
 0x479   : > { %5891 = vmatprep.subr.bf16.mxu0 %v5890_v62  ;;  %v5926_v61 = vpack.c.bf16 %v2874_v58, %v2872_v57  ;;  %v2871_v62 = vld [vmem:[#allocation7 + $0x1100] sm:$0xff]  ;;  %v3250_v57 = vld [vmem:[#allocation7 + $0x248] sm:$0xff]  ;;  %v3252_v58 = vld [vmem:[#allocation7 + $0x258] sm:$0xff] }
 0x47b   : > { %5829 = vmatpush1.bf16.msra.mxu1 %v5828_v1  ;;  %v2878_v1 = vld [vmem:[#allocation7 + $0x1138] sm:$0xff] }
 0x47c   : > { %5893 = vmatpush1.bf16.msra.mxu0 %v5892_v4  ;;  %5895 = vmatprep.subr.bf16.mxu1 %v5894_v2  ;;  %v5928_v4 = vpack.c.bf16 %v2873_v63, %v2871_v62  ;;  %v5930_v2 = vpack.c.bf16 %v2878_v1, %v2876_v3  ;;  %v3249_v62 = vld [vmem:[#allocation7 + $0x240] sm:$0xff]  ;;  %v3251_v63 = vld [vmem:[#allocation7 + $0x250] sm:$0xff]  ;;  %v3256_v3 = vld [vmem:[#allocation7 + $0x278] sm:$0xff] }
 0x47d   : > { %v6068_v1 = vpack.c.bf16 %v3251_v63, %v3249_v62  ;;  %v3285_v62 = vld [vmem:[#allocation7 + $0x360] sm:$0xff]  ;;  %v3287_v63 = vld [vmem:[#allocation7 + $0x370] sm:$0xff] }
 0x47e   : > { %2694 = vmatmul.mubr.f32.vlgmr.msra.gmra.mrb[16].mxu1 %v7351_v21 }
 0x47f   : > { %2831 = vmatmul.mubr.f32.vlgmr.msra.gmra.mrb[16].mxu0 %v7351_v21  ;;  %5897 = vmatpush1.bf16.msra.mxu1 %v5896_v9  ;;  %v5932_v9 = vpack.c.bf16 %v2877_v6, %v2875_v5  ;;  %v3255_v5 = vld [vmem:[#allocation7 + $0x270] sm:$0xff]  ;;  %v3258_v6 = vld [vmem:[#allocation7 + $0x288] sm:$0xff] }
 0x480   : > { %2967 = vmatprep.mubr.f32.mxu1 %v7355_v26  ;;  %5899 = vmatprep.subr.bf16.mxu1 %v5898_v20  ;;  %v2857_v26 = vld [vmem:[#allocation7 + $0x1090] sm:$0xff]  ;;  %v5934_v20 = vpack.c.bf16 %v2882_v8, %v2880_v7 }
 0x481   : > { %v5912_v36 = vpack.c.bf16 %v2857_v26, %v2855_v12  ;;  %v2891_v12 = vld [vmem:[#allocation7 + $0x11a0] sm:$0xff]  ;;  %v2893_v26 = vld [vmem:[#allocation7 + $0x11b0] sm:$0xff] }
 0x483   : > { %5901 = vmatpush1.bf16.msra.mxu1 %v5900_v16  ;;  %v5936_v16 = vpack.c.bf16 %v2881_v13, %v2879_v11  ;;  %v3262_v11 = vld [vmem:[#allocation7 + $0x2a8] sm:$0xff]  ;;  %v3264_v13 = vld [vmem:[#allocation7 + $0x2b8] sm:$0xff] }
 0x484   : > { %5903 = vmatprep.subr.bf16.mxu1 %v5902_v17  ;;  %v5938_v17 = vpack.c.bf16 %v2886_v15, %v2884_v14  ;;  %v6078_v15 = vpack.c.bf16 %v3264_v13, %v3262_v11  ;;  %v3298_v11 = vld [vmem:[#allocation7 + $0x3c8] sm:$0xff]  ;;  %v3300_v13 = vld [vmem:[#allocation7 + $0x3d8] sm:$0xff] }
 0x487   : > { %5905 = vmatpush1.bf16.msra.mxu1 %v5904_v22  ;;  %v5940_v22 = vpack.c.bf16 %v2885_v19, %v2883_v18  ;;  %v3266_v18 = vld [vmem:[#allocation7 + $0x2c8] sm:$0xff]  ;;  %v3268_v19 = vld [vmem:[#allocation7 + $0x2d8] sm:$0xff] }
 0x488   : > { %5907 = vmatprep.subr.bf16.mxu1 %v5906_v25  ;;  %v5942_v25 = vpack.c.bf16 %v2890_v24, %v2888_v23  ;;  %v6082_v24 = vpack.c.bf16 %v3268_v19, %v3266_v18  ;;  %v3302_v18 = vld [vmem:[#allocation7 + $0x3e8] sm:$0xff]  ;;  %v3304_v19 = vld [vmem:[#allocation7 + $0x3f8] sm:$0xff] }
 0x48b   : > { %5909 = vmatpush1.bf16.msra.mxu1 %v5908_v32  ;;  %v5944_v32 = vpack.c.bf16 %v2889_v28, %v2887_v27 }
 0x48c   : > { %5911 = vmatprep.subr.bf16.mxu1 %v5910_v33  ;;  %v5946_v33 = vpack.c.bf16 %v2894_v30, %v2892_v29  ;;  %v3270_v29 = vld [vmem:[#allocation7 + $0x2e8] sm:$0xff]  ;;  %v3272_v30 = vld [vmem:[#allocation7 + $0x2f8] sm:$0xff] }
 0x48f   : > { %5913 = vmatpush1.bf16.msra.mxu1 %v5912_v36  ;;  %v5948_v36 = vpack.c.bf16 %v2893_v26, %v2891_v12 }
 0x490   : > { %5915 = vmatprep.subr.bf16.mxu1 %v5914_v37  ;;  %v5950_v37 = vpack.c.bf16 %v2898_v35, %v2896_v34  ;;  %v6086_v34 = vpack.c.bf16 %v3272_v30, %v3270_v29  ;;  %v3269_v35 = vld [vmem:[#allocation7 + $0x2e0] sm:$0xff] }
 0x491   : > { %v1873_v45 = vpop.f32.mrb[10].mxu1  ;;  %v2010_v46 = vpop.f32.mrb[10].mxu0 }
 0x492   : > { %v1875_v48 = vpop.f32.mrb[11].mxu1  ;;  %v2012_v49 = vpop.f32.mrb[11].mxu0  ;;  %v5960_v56 = vpack.c.bf16 %v7362_v51, %v1873_v45  ;;  %v5964_v0 = vpack.c.bf16 %v7362_v51, %v2010_v46  ;;  %v3242_v45 = vld [vmem:[#allocation7 + $0x208] sm:$0xff]  ;;  %v3244_v46 = vld [vmem:[#allocation7 + $0x218] sm:$0xff] }
 0x493   : > { %5917 = vmatpush1.bf16.msra.mxu1 %v5916_v41  ;;  %v5958_v52 = vpack.c.bf16 %v7362_v51, %v1875_v48  ;;  %v5962_v59 = vpack.c.bf16 %v7362_v51, %v2012_v49  ;;  %v5952_v41 = vpack.c.bf16 %v2897_v10, %v2895_v38  ;;  %v6058_v31 = vpack.c.bf16 %v3244_v46, %v3242_v45  ;;  %v3241_v48 = vld [vmem:[#allocation7 + $0x200] sm:$0xff]  ;;  %v3243_v49 = vld [vmem:[#allocation7 + $0x210] sm:$0xff]  ;;  %v3274_v38 = vld [vmem:[#allocation7 + $0x308] sm:$0xff] }
 0x494   : > { %5919 = vmatprep.subr.bf16.mxu1 %v5918_v42  ;;  %v5954_v42 = vpack.c.bf16 %v2902_v40, %v2900_v39  ;;  %v3276_v10 = vld [vmem:[#allocation7 + $0x318] sm:$0xff]  ;;  %v3278_v45 = vld [vmem:[#allocation7 + $0x328] sm:$0xff] }
 0x495   : > { %5959 = vmatprep.subr.bf16.mxu0 %v5958_v52  ;;  %v3248_v52 = vld [vmem:[#allocation7 + $0x238] sm:$0xff] }
 0x496   : > { %5961 = vmatpush1.bf16.msra.mxu0 %v5960_v56  ;;  %v3247_v56 = vld [vmem:[#allocation7 + $0x230] sm:$0xff]  ;;  %v3280_v46 = vld [vmem:[#allocation7 + $0x338] sm:$0xff] }
 0x497   : > { %5921 = vmatpush1.bf16.msra.mxu1 %v5920_v50  ;;  %5963 = vmatprep.subr.bf16.mxu0 %v5962_v59  ;;  %v3246_v50 = vld [vmem:[#allocation7 + $0x228] sm:$0xff]  ;;  %v7369_v59 = vld [vmem:[#allocation2 + $0x8] sm:$0xff] }
 0x498   : > { %5923 = vmatprep.subr.bf16.mxu1 %v5922_v53  ;;  %v6060_v53 = vpack.c.bf16 %v3243_v49, %v3241_v48  ;;  %v6062_v54 = vpack.c.bf16 %v3248_v52, %v3246_v50  ;;  %v3277_v48 = vld [vmem:[#allocation7 + $0x320] sm:$0xff]  ;;  %v3279_v49 = vld [vmem:[#allocation7 + $0x330] sm:$0xff]  ;;  %v3282_v50 = vld [vmem:[#allocation7 + $0x348] sm:$0xff] }
 0x499   : > { %v3284_v52 = vld [vmem:[#allocation7 + $0x358] sm:$0xff] }
 0x49a   : > { %5965 = vmatpush1.bf16.msra.mxu0 %v5964_v0  ;;  %v3254_v0 = vld [vmem:[#allocation7 + $0x268] sm:$0xff] }
 0x49b   : > { %5925 = vmatpush1.bf16.msra.mxu1 %v5924_v60  ;;  %v6064_v60 = vpack.c.bf16 %v3247_v56, %v3245_v55  ;;  %v3281_v55 = vld [vmem:[#allocation7 + $0x340] sm:$0xff]  ;;  %v3283_v56 = vld [vmem:[#allocation7 + $0x350] sm:$0xff] }
 0x49c   : > { %5927 = vmatprep.subr.bf16.mxu1 %v5926_v61  ;;  %v6066_v61 = vpack.c.bf16 %v3252_v58, %v3250_v57  ;;  %v3286_v57 = vld [vmem:[#allocation7 + $0x368] sm:$0xff]  ;;  %v3288_v58 = vld [vmem:[#allocation7 + $0x378] sm:$0xff] }
 0x49f   : > { %5929 = vmatpush1.bf16.msra.mxu1 %v5928_v4  ;;  %v6070_v4 = vpack.c.bf16 %v3256_v3, %v3254_v0  ;;  %v3290_v0 = vld [vmem:[#allocation7 + $0x388] sm:$0xff]  ;;  %v3292_v3 = vld [vmem:[#allocation7 + $0x398] sm:$0xff] }
 0x4a0   : > { %5931 = vmatprep.subr.bf16.mxu1 %v5930_v2  ;;  %v3253_v2 = vld [vmem:[#allocation7 + $0x260] sm:$0xff] }
 0x4a1   : > { %v6072_v7 = vpack.c.bf16 %v3255_v5, %v3253_v2  ;;  %v3289_v2 = vld [vmem:[#allocation7 + $0x380] sm:$0xff]  ;;  %v3291_v5 = vld [vmem:[#allocation7 + $0x390] sm:$0xff] }
 0x4a3   : > { %5933 = vmatpush1.bf16.msra.mxu1 %v5932_v9  ;;  %v3257_v9 = vld [vmem:[#allocation7 + $0x280] sm:$0xff] }
 0x4a4   : > { %5935 = vmatprep.subr.bf16.mxu1 %v5934_v20  ;;  %v3259_v20 = vld [vmem:[#allocation7 + $0x290] sm:$0xff] }
 0x4a5   : > { %v6076_v14 = vpack.c.bf16 %v3259_v20, %v3257_v9  ;;  %v3293_v9 = vld [vmem:[#allocation7 + $0x3a0] sm:$0xff]  ;;  %v3295_v20 = vld [vmem:[#allocation7 + $0x3b0] sm:$0xff] }
 0x4a7   : > { %5937 = vmatpush1.bf16.msra.mxu1 %v5936_v16  ;;  %v3261_v16 = vld [vmem:[#allocation7 + $0x2a0] sm:$0xff] }
 0x4a8   : > { %5939 = vmatprep.subr.bf16.mxu1 %v5938_v17  ;;  %v3263_v17 = vld [vmem:[#allocation7 + $0x2b0] sm:$0xff] }
 0x4a9   : > { %v6080_v23 = vpack.c.bf16 %v3263_v17, %v3261_v16  ;;  %v3297_v16 = vld [vmem:[#allocation7 + $0x3c0] sm:$0xff]  ;;  %v3299_v17 = vld [vmem:[#allocation7 + $0x3d0] sm:$0xff] }
 0x4ab   : > { %5941 = vmatpush1.bf16.msra.mxu1 %v5940_v22  ;;  %v3265_v22 = vld [vmem:[#allocation7 + $0x2c0] sm:$0xff] }
 0x4ac   : > { %5943 = vmatprep.subr.bf16.mxu1 %v5942_v25  ;;  %v3267_v25 = vld [vmem:[#allocation7 + $0x2d0] sm:$0xff] }
 0x4ad   : > { %v6084_v12 = vpack.c.bf16 %v3267_v25, %v3265_v22  ;;  %v3301_v22 = vld [vmem:[#allocation7 + $0x3e0] sm:$0xff]  ;;  %v3303_v25 = vld [vmem:[#allocation7 + $0x3f0] sm:$0xff] }
 0x4af   : > { %5945 = vmatpush1.bf16.msra.mxu1 %v5944_v32 }
 0x4b0   : > { %5947 = vmatprep.subr.bf16.mxu1 %v5946_v33 }
 0x4b3   : > { %5949 = vmatpush1.bf16.msra.mxu1 %v5948_v36  ;;  %v3271_v36 = vld [vmem:[#allocation7 + $0x2f0] sm:$0xff] }
 0x4b4   : > { %5951 = vmatprep.subr.bf16.mxu1 %v5950_v37  ;;  %v6088_v40 = vpack.c.bf16 %v3271_v36, %v3269_v35  ;;  %v7382_v35 = vld [vmem:[#allocation10] sm:$0xff] }
 0x4b5   : > { %v3014_v36 = vcombine.high %v7382_v35, %v7382_v35 }
 0x4b7   : > { %5953 = vmatpush1.bf16.msra.mxu1 %v5952_v41  ;;  %v6090_v41 = vpack.c.bf16 %v3276_v10, %v3274_v38  ;;  %4760 = vmatprep.mubr.msk.f32.mxu0 %vm1657_vm0, %v3014_v36 }
 0x4b8   : > { %5955 = vmatprep.subr.bf16.mxu1 %v5954_v42  ;;  %v3273_v42 = vld [vmem:[#allocation7 + $0x300] sm:$0xff] }
 0x4bb   : > { %5957 = vmatpush1.bf16.msra.mxu1 %v5956_v47  ;;  %v6092_v47 = vpack.c.bf16 %v3275_v43, %v3273_v42 }
 0x4bc   : > { %6059 = vmatprep.subr.bf16.mxu1 %v6058_v31  ;;  %v6094_v31 = vpack.c.bf16 %v3280_v46, %v3278_v45  ;;  %v3532_v45 = vld [vmem:[#allocation7 + $0x608] sm:$0xff]  ;;  %v3534_v46 = vld [vmem:[#allocation7 + $0x618] sm:$0xff] }
 0x4be   : > { %2968 = vmatmul.mubr.f32.vlgmr.msra.gmra.mrb[18].mxu1 %v7351_v21  ;;  %v3260_v21 = vld [vmem:[#allocation7 + $0x298] sm:$0xff] }
 0x4bf   : > { %6061 = vmatpush1.bf16.msra.mxu1 %v6060_v53  ;;  %3369 = vmatprep.mubr.f32.mxu1 %v7369_v59  ;;  %v6074_v8 = vpack.c.bf16 %v3260_v21, %v3258_v6  ;;  %v6096_v53 = vpack.c.bf16 %v3279_v49, %v3277_v48  ;;  %v3294_v6 = vld [vmem:[#allocation7 + $0x3a8] sm:$0xff]  ;;  %v3296_v21 = vld [vmem:[#allocation7 + $0x3b8] sm:$0xff]  ;;  %v3533_v48 = vld [vmem:[#allocation7 + $0x610] sm:$0xff] }
 0x4c0   : > { %6063 = vmatprep.subr.bf16.mxu1 %v6062_v54  ;;  %v6098_v54 = vpack.c.bf16 %v3284_v52, %v3282_v50  ;;  %v3536_v50 = vld [vmem:[#allocation7 + $0x628] sm:$0xff]  ;;  %v3538_v52 = vld [vmem:[#allocation7 + $0x638] sm:$0xff] }
 0x4c3   : > { %6065 = vmatpush1.bf16.msra.mxu1 %v6064_v60  ;;  %v6100_v60 = vpack.c.bf16 %v3283_v56, %v3281_v55  ;;  %v3537_v55 = vld [vmem:[#allocation7 + $0x630] sm:$0xff] }
 0x4c4   : > { %6067 = vmatprep.subr.bf16.mxu1 %v6066_v61  ;;  %v6102_v61 = vpack.c.bf16 %v3288_v58, %v3286_v57  ;;  %v3540_v57 = vld [vmem:[#allocation7 + $0x648] sm:$0xff]  ;;  %v3542_v58 = vld [vmem:[#allocation7 + $0x658] sm:$0xff] }
 0x4c7   : > { %6069 = vmatpush1.bf16.msra.mxu1 %v6068_v1  ;;  %v6104_v1 = vpack.c.bf16 %v3287_v63, %v3285_v62  ;;  %v3541_v62 = vld [vmem:[#allocation7 + $0x650] sm:$0xff] }
 0x4c8   : > { %6071 = vmatprep.subr.bf16.mxu1 %v6070_v4  ;;  %v6106_v4 = vpack.c.bf16 %v3292_v3, %v3290_v0  ;;  %v3544_v0 = vld [vmem:[#allocation7 + $0x668] sm:$0xff]  ;;  %v3546_v3 = vld [vmem:[#allocation7 + $0x678] sm:$0xff] }
 0x4cb   : > { %6073 = vmatpush1.bf16.msra.mxu1 %v6072_v7  ;;  %v6108_v7 = vpack.c.bf16 %v3291_v5, %v3289_v2  ;;  %v3545_v2 = vld [vmem:[#allocation7 + $0x670] sm:$0xff] }
 0x4cc   : > { %6075 = vmatprep.subr.bf16.mxu1 %v6074_v8  ;;  %v6110_v8 = vpack.c.bf16 %v3296_v21, %v3294_v6  ;;  %v3548_v6 = vld [vmem:[#allocation7 + $0x688] sm:$0xff]  ;;  %v3550_v21 = vld [vmem:[#allocation7 + $0x698] sm:$0xff] }
 0x4cf   : > { %6077 = vmatpush1.bf16.msra.mxu1 %v6076_v14  ;;  %v6112_v14 = vpack.c.bf16 %v3295_v20, %v3293_v9  ;;  %v3549_v9 = vld [vmem:[#allocation7 + $0x690] sm:$0xff] }
 0x4d0   : > { %6079 = vmatprep.subr.bf16.mxu1 %v6078_v15  ;;  %v6114_v15 = vpack.c.bf16 %v3300_v13, %v3298_v11  ;;  %v3552_v11 = vld [vmem:[#allocation7 + $0x6a8] sm:$0xff]  ;;  %v3554_v13 = vld [vmem:[#allocation7 + $0x6b8] sm:$0xff] }
 0x4d1   : > { %v2147_v27 = vpop.f32.mrb[12].mxu1  ;;  %v2284_v28 = vpop.f32.mrb[12].mxu0 }
 0x4d2   : > { %v2149_v32 = vpop.f32.mrb[13].mxu1  ;;  %v2286_v33 = vpop.f32.mrb[13].mxu0  ;;  %v5968_v37 = vpack.c.bf16 %v7362_v51, %v2147_v27  ;;  %v5972_v44 = vpack.c.bf16 %v7362_v51, %v2284_v28  ;;  %v6120_v27 = vpack.c.bf16 %v3303_v25, %v3301_v22  ;;  %v7376_v28 = vld [vmem:[#allocation2] sm:$0xff] }
 0x4d3   : > { %6081 = vmatpush1.bf16.msra.mxu1 %v6080_v23  ;;  %v5966_v26 = vpack.c.bf16 %v7362_v51, %v2149_v32  ;;  %v5970_v39 = vpack.c.bf16 %v7362_v51, %v2286_v33  ;;  %v6116_v23 = vpack.c.bf16 %v3299_v17, %v3297_v16  ;;  %v3553_v16 = vld [vmem:[#allocation7 + $0x6b0] sm:$0xff] }
 0x4d4   : > { %6083 = vmatprep.subr.bf16.mxu1 %v6082_v24  ;;  %v6118_v24 = vpack.c.bf16 %v3304_v19, %v3302_v18  ;;  %v3556_v18 = vld [vmem:[#allocation7 + $0x6c8] sm:$0xff]  ;;  %v3558_v19 = vld [vmem:[#allocation7 + $0x6d8] sm:$0xff]  ;;  %v3557_v22 = vld [vmem:[#allocation7 + $0x6d0] sm:$0xff] }
 0x4d5   : > { %5967 = vmatprep.subr.bf16.mxu0 %v5966_v26 }
 0x4d6   : > { %5969 = vmatpush1.bf16.msra.mxu0 %v5968_v37 }
 0x4d7   : > { %6085 = vmatpush1.bf16.msra.mxu1 %v6084_v12  ;;  %5971 = vmatprep.subr.bf16.mxu0 %v5970_v39 }
 0x4d8   : > { %6087 = vmatprep.subr.bf16.mxu1 %v6086_v34 }
 0x4da   : > { %5973 = vmatpush1.bf16.msra.mxu0 %v5972_v44 }
 0x4db   : > { %6089 = vmatpush1.bf16.msra.mxu1 %v6088_v40 }
 0x4dc   : > { %6091 = vmatprep.subr.bf16.mxu1 %v6090_v41 }
 0x4df   : > { %6093 = vmatpush1.bf16.msra.mxu1 %v6092_v47  ;;  %v6186_v47 = vpack.c.bf16 %v3534_v46, %v3532_v45  ;;  %v3572_v45 = vld [vmem:[#allocation7 + $0x748] sm:$0xff]  ;;  %v3574_v46 = vld [vmem:[#allocation7 + $0x758] sm:$0xff] }
 0x4e0   : > { %6095 = vmatprep.subr.bf16.mxu1 %v6094_v31  ;;  %v3531_v31 = vld [vmem:[#allocation7 + $0x600] sm:$0xff] }
 0x4e1   : > { %v6188_v49 = vpack.c.bf16 %v3533_v48, %v3531_v31  ;;  %v3571_v31 = vld [vmem:[#allocation7 + $0x740] sm:$0xff]  ;;  %v3573_v48 = vld [vmem:[#allocation7 + $0x750] sm:$0xff] }
 0x4e3   : > { %6097 = vmatpush1.bf16.msra.mxu1 %v6096_v53  ;;  %v6190_v53 = vpack.c.bf16 %v3538_v52, %v3536_v50  ;;  %v3576_v50 = vld [vmem:[#allocation7 + $0x768] sm:$0xff]  ;;  %v3578_v52 = vld [vmem:[#allocation7 + $0x778] sm:$0xff] }
 0x4e4   : > { %6099 = vmatprep.subr.bf16.mxu1 %v6098_v54  ;;  %v3535_v54 = vld [vmem:[#allocation7 + $0x620] sm:$0xff] }
 0x4e5   : > { %v6192_v56 = vpack.c.bf16 %v3537_v55, %v3535_v54  ;;  %v3575_v54 = vld [vmem:[#allocation7 + $0x760] sm:$0xff]  ;;  %v3577_v55 = vld [vmem:[#allocation7 + $0x770] sm:$0xff] }
 0x4e7   : > { %6101 = vmatpush1.bf16.msra.mxu1 %v6100_v60  ;;  %v6194_v60 = vpack.c.bf16 %v3542_v58, %v3540_v57  ;;  %v3097_v57 = vld [vmem:[#allocation7 + $0x8] sm:$0xff]  ;;  %v3099_v58 = vld [vmem:[#allocation7 + $0x18] sm:$0xff] }
 0x4e8   : > { %6103 = vmatprep.subr.bf16.mxu1 %v6102_v61  ;;  %v3539_v61 = vld [vmem:[#allocation7 + $0x640] sm:$0xff] }
 0x4e9   : > { %v6196_v63 = vpack.c.bf16 %v3541_v62, %v3539_v61 }
 0x4eb   : > { %6105 = vmatpush1.bf16.msra.mxu1 %v6104_v1  ;;  %v6198_v1 = vpack.c.bf16 %v3546_v3, %v3544_v0  ;;  %v3096_v0 = vld [vmem:[#allocation7] sm:$0xff]  ;;  %v3098_v3 = vld [vmem:[#allocation7 + $0x10] sm:$0xff] }
 0x4ec   : > { %6107 = vmatprep.subr.bf16.mxu1 %v6106_v4  ;;  %v3543_v4 = vld [vmem:[#allocation7 + $0x660] sm:$0xff] }
 0x4ed   : > { %v6200_v5 = vpack.c.bf16 %v3545_v2, %v3543_v4  ;;  %v3101_v4 = vld [vmem:[#allocation7 + $0x28] sm:$0xff]  ;;  %v3103_v2 = vld [vmem:[#allocation7 + $0x38] sm:$0xff] }
 0x4ef   : > { %6109 = vmatpush1.bf16.msra.mxu1 %v6108_v7  ;;  %v6202_v7 = vpack.c.bf16 %v3550_v21, %v3548_v6  ;;  %v5998_v6 = vpack.c.bf16 %v3103_v2, %v3101_v4  ;;  %v3100_v21 = vld [vmem:[#allocation7 + $0x20] sm:$0xff] }
 0x4f0   : > { %6111 = vmatprep.subr.bf16.mxu1 %v6110_v8  ;;  %v3547_v8 = vld [vmem:[#allocation7 + $0x680] sm:$0xff] }
 0x4f1   : > { %v6204_v20 = vpack.c.bf16 %v3549_v9, %v3547_v8  ;;  %v3105_v8 = vld [vmem:[#allocation7 + $0x48] sm:$0xff]  ;;  %v3107_v9 = vld [vmem:[#allocation7 + $0x58] sm:$0xff] }
 0x4f3   : > { %6113 = vmatpush1.bf16.msra.mxu1 %v6112_v14  ;;  %v6206_v14 = vpack.c.bf16 %v3554_v13, %v3552_v11  ;;  %v6002_v11 = vpack.c.bf16 %v3107_v9, %v3105_v8  ;;  %v3104_v13 = vld [vmem:[#allocation7 + $0x40] sm:$0xff] }
 0x4f4   : > { %6115 = vmatprep.subr.bf16.mxu1 %v6114_v15  ;;  %v3551_v15 = vld [vmem:[#allocation7 + $0x6a0] sm:$0xff] }
 0x4f5   : > { %v6208_v17 = vpack.c.bf16 %v3553_v16, %v3551_v15  ;;  %v3109_v15 = vld [vmem:[#allocation7 + $0x68] sm:$0xff]  ;;  %v3111_v16 = vld [vmem:[#allocation7 + $0x78] sm:$0xff] }
 0x4f7   : > { %6117 = vmatpush1.bf16.msra.mxu1 %v6116_v23  ;;  %v6210_v23 = vpack.c.bf16 %v3558_v19, %v3556_v18  ;;  %v6006_v18 = vpack.c.bf16 %v3111_v16, %v3109_v15  ;;  %v3108_v19 = vld [vmem:[#allocation7 + $0x60] sm:$0xff] }
 0x4f8   : > { %6119 = vmatprep.subr.bf16.mxu1 %v6118_v24  ;;  %v3555_v24 = vld [vmem:[#allocation7 + $0x6c0] sm:$0xff] }
 0x4f9   : > { %v6212_v25 = vpack.c.bf16 %v3557_v22, %v3555_v24  ;;  %v3113_v24 = vld [vmem:[#allocation7 + $0x88] sm:$0xff]  ;;  %v3115_v22 = vld [vmem:[#allocation7 + $0x98] sm:$0xff] }
 0x4fb   : > { %6121 = vmatpush1.bf16.msra.mxu1 %v6120_v27  ;;  %v3560_v27 = vld [vmem:[#allocation7 + $0x6e8] sm:$0xff] }
 0x4fc   : > { %6187 = vmatprep.subr.bf16.mxu1 %v6186_v47  ;;  %v6226_v47 = vpack.c.bf16 %v3574_v46, %v3572_v45  ;;  %v3126_v45 = vld [vmem:[#allocation7 + $0xf0] sm:$0xff]  ;;  %v3129_v46 = vld [vmem:[#allocation7 + $0x108] sm:$0xff] }
 0x4fe   : > { %3370 = vmatmul.mubr.f32.vlgmr.msra.gmra.mrb[20].mxu1 %v7376_v28 }
 0x4ff   : > { %6189 = vmatpush1.bf16.msra.mxu1 %v6188_v49  ;;  %v6228_v49 = vpack.c.bf16 %v3573_v48, %v3571_v31 }
 0x500   : > { %6191 = vmatprep.subr.bf16.mxu1 %v6190_v53  ;;  %v6230_v53 = vpack.c.bf16 %v3578_v52, %v3576_v50  ;;  %v3130_v50 = vld [vmem:[#allocation7 + $0x110] sm:$0xff]  ;;  %v3133_v52 = vld [vmem:[#allocation7 + $0x128] sm:$0xff] }
 0x503   : > { %6193 = vmatpush1.bf16.msra.mxu1 %v6192_v56  ;;  %v6232_v56 = vpack.c.bf16 %v3577_v55, %v3575_v54 }
 0x504   : > { %6195 = vmatprep.subr.bf16.mxu1 %v6194_v60 }
 0x507   : > { %6197 = vmatpush1.bf16.msra.mxu1 %v6196_v63  ;;  %v5994_v63 = vpack.c.bf16 %v3099_v58, %v3097_v57  ;;  %v3134_v57 = vld [vmem:[#allocation7 + $0x130] sm:$0xff]  ;;  %v3137_v58 = vld [vmem:[#allocation7 + $0x148] sm:$0xff] }
 0x508   : > { %6199 = vmatprep.subr.bf16.mxu1 %v6198_v1 }
 0x50b   : > { %6201 = vmatpush1.bf16.msra.mxu1 %v6200_v5  ;;  %v5996_v5 = vpack.c.bf16 %v3098_v3, %v3096_v0  ;;  %v3138_v0 = vld [vmem:[#allocation7 + $0x150] sm:$0xff]  ;;  %v3141_v3 = vld [vmem:[#allocation7 + $0x168] sm:$0xff] }
 0x50c   : > { %6203 = vmatprep.subr.bf16.mxu1 %v6202_v7  ;;  %v3102_v7 = vld [vmem:[#allocation7 + $0x30] sm:$0xff] }
 0x50f   : > { %6205 = vmatpush1.bf16.msra.mxu1 %v6204_v20  ;;  %v6000_v20 = vpack.c.bf16 %v3102_v7, %v3100_v21  ;;  %v3145_v21 = vld [vmem:[#allocation7 + $0x188] sm:$0xff]  ;;  %v3147_v7 = vld [vmem:[#allocation7 + $0x198] sm:$0xff] }
 0x510   : > { %6207 = vmatprep.subr.bf16.mxu1 %v6206_v14  ;;  %v3106_v14 = vld [vmem:[#allocation7 + $0x50] sm:$0xff]  ;;  %v6042_v9 = vpack.c.bf16 %v3147_v7, %v3145_v21  ;;  %v3411_v21 = vld [vmem:[#allocation7 + $0x4c8] sm:$0xff]  ;;  %v3413_v7 = vld [vmem:[#allocation7 + $0x4d8] sm:$0xff] }
 0x511   : > { %v2421_v29 = vpop.f32.mrb[14].mxu1 }
 0x512   : > { %v2558_v30 = vpop.f32.mrb[14].mxu0  ;;  %v2423_v32 = vpop.f32.mrb[15].mxu1  ;;  %v5976_v26 = vpack.c.bf16 %v7362_v51, %v2421_v29  ;;  %v3562_v29 = vld [vmem:[#allocation7 + $0x6f8] sm:$0xff] }
 0x513   : > { %v2560_v33 = vpop.f32.mrb[15].mxu0  ;;  %v5974_v12 = vpack.c.bf16 %v7362_v51, %v2423_v32  ;;  %v5980_v37 = vpack.c.bf16 %v7362_v51, %v2558_v30  ;;  %6209 = vmatpush1.bf16.msra.mxu1 %v6208_v17  ;;  %v6214_v30 = vpack.c.bf16 %v3562_v29, %v3560_v27  ;;  %v3559_v32 = vld [vmem:[#allocation7 + $0x6e0] sm:$0xff]  ;;  %v6004_v17 = vpack.c.bf16 %v3106_v14, %v3104_v13  ;;  %v3114_v27 = vld [vmem:[#allocation7 + $0x90] sm:$0xff]  ;;  %v3117_v29 = vld [vmem:[#allocation7 + $0xa8] sm:$0xff] }
 0x514   : > { %v5978_v34 = vpack.c.bf16 %v7362_v51, %v2560_v33  ;;  %6211 = vmatprep.subr.bf16.mxu1 %v6210_v23  ;;  %v3561_v33 = vld [vmem:[#allocation7 + $0x6f0] sm:$0xff]  ;;  %v3149_v13 = vld [vmem:[#allocation7 + $0x1a8] sm:$0xff]  ;;  %v3151_v14 = vld [vmem:[#allocation7 + $0x1b8] sm:$0xff] }
 0x515   : > { %5975 = vmatprep.subr.bf16.mxu0 %v5974_v12  ;;  %v6216_v12 = vpack.c.bf16 %v3561_v33, %v3559_v32  ;;  %v3110_v23 = vld [vmem:[#allocation7 + $0x70] sm:$0xff]  ;;  %v6046_v16 = vpack.c.bf16 %v3151_v14, %v3149_v13  ;;  %v3580_v13 = vld [vmem:[#allocation7 + $0x788] sm:$0xff] }
 0x516   : > { %5977 = vmatpush1.bf16.msra.mxu0 %v5976_v26  ;;  %v3564_v26 = vld [vmem:[#allocation7 + $0x708] sm:$0xff] }
 0x517   : > { %5979 = vmatprep.subr.bf16.mxu0 %v5978_v34  ;;  %6213 = vmatpush1.bf16.msra.mxu1 %v6212_v25  ;;  %v3566_v34 = vld [vmem:[#allocation7 + $0x718] sm:$0xff]  ;;  %v6010_v25 = vpack.c.bf16 %v3115_v22, %v3113_v24  ;;  %v3415_v14 = vld [vmem:[#allocation7 + $0x4e8] sm:$0xff] }
 0x518   : > { %6215 = vmatprep.subr.bf16.mxu1 %v6214_v30  ;;  %v6218_v36 = vpack.c.bf16 %v3566_v34, %v3564_v26  ;;  %v3119_v30 = vld [vmem:[#allocation7 + $0xb8] sm:$0xff]  ;;  %v3118_v26 = vld [vmem:[#allocation7 + $0xb0] sm:$0xff]  ;;  %v3121_v34 = vld [vmem:[#allocation7 + $0xc8] sm:$0xff] }
 0x519   : > { %v6014_v33 = vpack.c.bf16 %v3119_v30, %v3117_v29 }
 0x51a   : > { %5981 = vmatpush1.bf16.msra.mxu0 %v5980_v37  ;;  %v3563_v37 = vld [vmem:[#allocation7 + $0x700] sm:$0xff] }
 0x51b   : > { %6217 = vmatpush1.bf16.msra.mxu1 %v6216_v12  ;;  %v3116_v12 = vld [vmem:[#allocation7 + $0xa0] sm:$0xff] }
 0x51c   : > { %6219 = vmatprep.subr.bf16.mxu1 %v6218_v36  ;;  %v3123_v36 = vld [vmem:[#allocation7 + $0xd8] sm:$0xff] }
 0x551   : > { %v2695_v38 = vpop.f32.mrb[16].mxu1 }
 0x552   : > { %v2832_v10 = vpop.f32.mrb[16].mxu0  ;;  %v2697_v39 = vpop.f32.mrb[17].mxu1  ;;  %v5984_v42 = vpack.c.bf16 %v7362_v51, %v2695_v38  ;;  %v3565_v38 = vld [vmem:[#allocation7 + $0x710] sm:$0xff] }
 0x553   : > { %v2834_v40 = vpop.f32.mrb[17].mxu0  ;;  %v5982_v41 = vpack.c.bf16 %v7362_v51, %v2697_v39  ;;  %v5988_v44 = vpack.c.bf16 %v7362_v51, %v2832_v10  ;;  %v6220_v10 = vpack.c.bf16 %v3565_v38, %v3563_v37  ;;  %v3568_v39 = vld [vmem:[#allocation7 + $0x728] sm:$0xff]  ;;  %v6016_v37 = vpack.c.bf16 %v3118_v26, %v3116_v12  ;;  %v3389_v26 = vld [vmem:[#allocation7 + $0x418] sm:$0xff] }
 0x554   : > { %v5986_v43 = vpack.c.bf16 %v7362_v51, %v2834_v40  ;;  %v3570_v40 = vld [vmem:[#allocation7 + $0x738] sm:$0xff]  ;;  %v6018_v38 = vpack.c.bf16 %v3123_v36, %v3121_v34  ;;  %v3387_v12 = vld [vmem:[#allocation7 + $0x408] sm:$0xff] }
 0x555   : > { %5983 = vmatprep.subr.bf16.mxu0 %v5982_v41  ;;  %v6222_v41 = vpack.c.bf16 %v3570_v40, %v3568_v39  ;;  %6221 = vmatpush1.bf16.msra.mxu1 %v6220_v10  ;;  %v3120_v10 = vld [vmem:[#allocation7 + $0xc0] sm:$0xff]  ;;  %v3122_v39 = vld [vmem:[#allocation7 + $0xd0] sm:$0xff]  ;;  %v3125_v40 = vld [vmem:[#allocation7 + $0xe8] sm:$0xff] }
 0x556   : > { %5985 = vmatpush1.bf16.msra.mxu0 %v5984_v42  ;;  %v3567_v42 = vld [vmem:[#allocation7 + $0x720] sm:$0xff] }
 0x557   : > { %5987 = vmatprep.subr.bf16.mxu0 %v5986_v43  ;;  %v3569_v43 = vld [vmem:[#allocation7 + $0x730] sm:$0xff]  ;;  %6223 = vmatprep.subr.bf16.mxu1 %v6222_v41  ;;  %v3127_v41 = vld [vmem:[#allocation7 + $0xf8] sm:$0xff] }
 0x55a   : > { %5989 = vmatpush1.bf16.msra.mxu0 %v5988_v44  ;;  %v6224_v44 = vpack.c.bf16 %v3569_v43, %v3567_v42  ;;  %v6020_v42 = vpack.c.bf16 %v3122_v39, %v3120_v10  ;;  %v6022_v43 = vpack.c.bf16 %v3127_v41, %v3125_v40  ;;  %v3386_v10 = vld [vmem:[#allocation7 + $0x400] sm:$0xff]  ;;  %v3388_v39 = vld [vmem:[#allocation7 + $0x410] sm:$0xff]  ;;  %v3391_v40 = vld [vmem:[#allocation7 + $0x428] sm:$0xff] }
 0x55b   : > { %v3393_v41 = vld [vmem:[#allocation7 + $0x438] sm:$0xff] }
 0x55c   : > { %6225 = vmatpush1.bf16.msra.mxu1 %v6224_v44  ;;  %v3124_v44 = vld [vmem:[#allocation7 + $0xe0] sm:$0xff] }
 0x55d   : > { %6227 = vmatprep.subr.bf16.mxu1 %v6226_v47  ;;  %v3131_v47 = vld [vmem:[#allocation7 + $0x118] sm:$0xff]  ;;  %v6024_v31 = vpack.c.bf16 %v3126_v45, %v3124_v44  ;;  %v3390_v44 = vld [vmem:[#allocation7 + $0x420] sm:$0xff]  ;;  %v3392_v45 = vld [vmem:[#allocation7 + $0x430] sm:$0xff] }
 0x55e   : > { %v6026_v48 = vpack.c.bf16 %v3131_v47, %v3129_v46  ;;  %v3395_v46 = vld [vmem:[#allocation7 + $0x448] sm:$0xff]  ;;  %v3397_v47 = vld [vmem:[#allocation7 + $0x458] sm:$0xff] }
 0x560   : > { %6229 = vmatpush1.bf16.msra.mxu1 %v6228_v49  ;;  %v3128_v49 = vld [vmem:[#allocation7 + $0x100] sm:$0xff] }
 0x561   : > { %6231 = vmatprep.subr.bf16.mxu1 %v6230_v53  ;;  %v3135_v53 = vld [vmem:[#allocation7 + $0x138] sm:$0xff]  ;;  %v6028_v54 = vpack.c.bf16 %v3130_v50, %v3128_v49  ;;  %v3394_v49 = vld [vmem:[#allocation7 + $0x440] sm:$0xff]  ;;  %v3396_v50 = vld [vmem:[#allocation7 + $0x450] sm:$0xff] }
 0x562   : > { %v6030_v55 = vpack.c.bf16 %v3135_v53, %v3133_v52  ;;  %v3399_v52 = vld [vmem:[#allocation7 + $0x468] sm:$0xff]  ;;  %v3401_v53 = vld [vmem:[#allocation7 + $0x478] sm:$0xff] }
 0x564   : > { %6233 = vmatpush1.bf16.msra.mxu1 %v6232_v56  ;;  %v3132_v56 = vld [vmem:[#allocation7 + $0x120] sm:$0xff] }
 0x591   : > { %v2969_v60 = vpop.f32.mrb[18].mxu1 }
 0x592   : > { %v2971_v61 = vpop.f32.mrb[19].mxu1  ;;  %v5992_v1 = vpack.c.bf16 %v7362_v51, %v2969_v60  ;;  %v3139_v60 = vld [vmem:[#allocation7 + $0x158] sm:$0xff] }
 0x593   : > { %v5990_v62 = vpack.c.bf16 %v7362_v51, %v2971_v61  ;;  %v6032_v61 = vpack.c.bf16 %v3134_v57, %v3132_v56  ;;  %v3398_v56 = vld [vmem:[#allocation7 + $0x460] sm:$0xff]  ;;  %v3400_v57 = vld [vmem:[#allocation7 + $0x470] sm:$0xff] }
 0x595   : > { %5991 = vmatprep.subr.bf16.mxu0 %v5990_v62  ;;  %v6034_v62 = vpack.c.bf16 %v3139_v60, %v3137_v58  ;;  %v3403_v58 = vld [vmem:[#allocation7 + $0x488] sm:$0xff]  ;;  %v3405_v60 = vld [vmem:[#allocation7 + $0x498] sm:$0xff] }
 0x596   : > { %5993 = vmatpush1.bf16.msra.mxu0 %v5992_v1  ;;  %v3143_v1 = vld [vmem:[#allocation7 + $0x178] sm:$0xff] }
 0x597   : > { %5995 = vmatprep.subr.bf16.mxu0 %v5994_v63  ;;  %v3136_v63 = vld [vmem:[#allocation7 + $0x140] sm:$0xff]  ;;  %v6038_v2 = vpack.c.bf16 %v3143_v1, %v3141_v3  ;;  %v3407_v3 = vld [vmem:[#allocation7 + $0x4a8] sm:$0xff]  ;;  %v3409_v1 = vld [vmem:[#allocation7 + $0x4b8] sm:$0xff] }
 0x598   : > { %v6036_v4 = vpack.c.bf16 %v3138_v0, %v3136_v63  ;;  %v3402_v63 = vld [vmem:[#allocation7 + $0x480] sm:$0xff]  ;;  %v3404_v0 = vld [vmem:[#allocation7 + $0x490] sm:$0xff] }
 0x599   : > { %3082 = vmatmul.mubr.f32.vlgmr.msra.gmra.mrb[18].mxu0 %v7382_v35  ;;  %v6008_v35 = vpack.c.bf16 %v3110_v23, %v3108_v19  ;;  %v3153_v19 = vld [vmem:[#allocation7 + $0x1c8] sm:$0xff]  ;;  %v3155_v23 = vld [vmem:[#allocation7 + $0x1d8] sm:$0xff] }
 0x59a   : > { %5997 = vmatpush1.bf16.msra.mxu0 %v5996_v5  ;;  %3224 = vmatprep.mubr.f32.mxu0 %v7369_v59  ;;  %v3112_v59 = vld [vmem:[#allocation7 + $0x80] sm:$0xff]  ;;  %v6050_v22 = vpack.c.bf16 %v3155_v23, %v3153_v19  ;;  %v3581_v19 = vld [vmem:[#allocation7 + $0x790] sm:$0xff] }
 0x59b   : > { %5999 = vmatprep.subr.bf16.mxu0 %v5998_v6  ;;  %v6012_v32 = vpack.c.bf16 %v3114_v27, %v3112_v59  ;;  %v3140_v5 = vld [vmem:[#allocation7 + $0x160] sm:$0xff]  ;;  %v3142_v6 = vld [vmem:[#allocation7 + $0x170] sm:$0xff]  ;;  %v3157_v59 = vld [vmem:[#allocation7 + $0x1e8] sm:$0xff] }
 0x59c   : > { %v6040_v8 = vpack.c.bf16 %v3142_v6, %v3140_v5  ;;  %v3159_v27 = vld [vmem:[#allocation7 + $0x1f8] sm:$0xff]  ;;  %v3406_v5 = vld [vmem:[#allocation7 + $0x4a0] sm:$0xff]  ;;  %v3408_v6 = vld [vmem:[#allocation7 + $0x4b0] sm:$0xff] }
 0x59d   : > { %v6054_v30 = vpack.c.bf16 %v3159_v27, %v3157_v59  ;;  %v3584_v59 = vld [vmem:[#allocation7 + $0x7a8] sm:$0xff] }
 0x59e   : > { %6001 = vmatpush1.bf16.msra.mxu0 %v6000_v20  ;;  %v3144_v20 = vld [vmem:[#allocation7 + $0x180] sm:$0xff]  ;;  %v3419_v27 = vld [vmem:[#allocation7 + $0x508] sm:$0xff] }
 0x59f   : > { %6003 = vmatprep.subr.bf16.mxu0 %v6002_v11  ;;  %v3146_v11 = vld [vmem:[#allocation7 + $0x190] sm:$0xff] }
 0x5a0   : > { %v6044_v15 = vpack.c.bf16 %v3146_v11, %v3144_v20  ;;  %v3410_v20 = vld [vmem:[#allocation7 + $0x4c0] sm:$0xff]  ;;  %v3412_v11 = vld [vmem:[#allocation7 + $0x4d0] sm:$0xff] }
 0x5a1   : > { %v6148_v23 = vpack.c.bf16 %v3412_v11, %v3410_v20  ;;  %v3434_v11 = vld [vmem:[#allocation7 + $0x580] sm:$0xff] }
 0x5a2   : > { %6005 = vmatpush1.bf16.msra.mxu0 %v6004_v17  ;;  %v3148_v17 = vld [vmem:[#allocation7 + $0x1a0] sm:$0xff] }
 0x5a3   : > { %6007 = vmatprep.subr.bf16.mxu0 %v6006_v18  ;;  %v3150_v18 = vld [vmem:[#allocation7 + $0x1b0] sm:$0xff] }
 0x5a4   : > { %v6048_v24 = vpack.c.bf16 %v3150_v18, %v3148_v17  ;;  %v3579_v18 = vld [vmem:[#allocation7 + $0x780] sm:$0xff] }
 0x5a6   : > { %6009 = vmatpush1.bf16.msra.mxu0 %v6008_v35  ;;  %v3152_v35 = vld [vmem:[#allocation7 + $0x1c0] sm:$0xff] }
 0x5a7   : > { %6011 = vmatprep.subr.bf16.mxu0 %v6010_v25  ;;  %v3154_v25 = vld [vmem:[#allocation7 + $0x1d0] sm:$0xff] }
 0x5a8   : > { %v6052_v29 = vpack.c.bf16 %v3154_v25, %v3152_v35  ;;  %v3414_v35 = vld [vmem:[#allocation7 + $0x4e0] sm:$0xff]  ;;  %v3416_v25 = vld [vmem:[#allocation7 + $0x4f0] sm:$0xff] }
 0x5aa   : > { %6013 = vmatpush1.bf16.msra.mxu0 %v6012_v32  ;;  %v3156_v32 = vld [vmem:[#allocation7 + $0x1e0] sm:$0xff] }
 0x5ab   : > { %6015 = vmatprep.subr.bf16.mxu0 %v6014_v33  ;;  %v3158_v33 = vld [vmem:[#allocation7 + $0x1f0] sm:$0xff] }
 0x5ae   : > { %6017 = vmatpush1.bf16.msra.mxu0 %v6016_v37  ;;  %v6056_v37 = vpack.c.bf16 %v3158_v33, %v3156_v32  ;;  %v3583_v33 = vld [vmem:[#allocation7 + $0x7a0] sm:$0xff] }
 0x5af   : > { %6019 = vmatprep.subr.bf16.mxu0 %v6018_v38  ;;  %v6122_v38 = vpack.c.bf16 %v3389_v26, %v3387_v12  ;;  %v3585_v12 = vld [vmem:[#allocation7 + $0x7b0] sm:$0xff]  ;;  %v6152_v26 = vpack.c.bf16 %v3416_v25, %v3414_v35  ;;  %v3442_v25 = vld [vmem:[#allocation7 + $0x5c0] sm:$0xff] }
 0x5b2   : > { %6021 = vmatpush1.bf16.msra.mxu0 %v6020_v42  ;;  %v6124_v42 = vpack.c.bf16 %v3388_v39, %v3386_v10  ;;  %v3418_v10 = vld [vmem:[#allocation7 + $0x500] sm:$0xff]  ;;  %v3420_v39 = vld [vmem:[#allocation7 + $0x510] sm:$0xff] }
 0x5b3   : > { %6023 = vmatprep.subr.bf16.mxu0 %v6022_v43  ;;  %v6126_v43 = vpack.c.bf16 %v3393_v41, %v3391_v40  ;;  %v3587_v41 = vld [vmem:[#allocation7 + $0x7c0] sm:$0xff] }
 0x5b6   : > { %6025 = vmatpush1.bf16.msra.mxu0 %v6024_v31  ;;  %v6128_v31 = vpack.c.bf16 %v3392_v45, %v3390_v44  ;;  %v3589_v44 = vld [vmem:[#allocation7 + $0x7d0] sm:$0xff] }
 0x5b7   : > { %6027 = vmatprep.subr.bf16.mxu0 %v6026_v48  ;;  %v6130_v48 = vpack.c.bf16 %v3397_v47, %v3395_v46  ;;  %v6244_v45 = vpack.c.bf16 %v3589_v44, %v3587_v41  ;;  %v6156_v46 = vpack.c.bf16 %v3420_v39, %v3418_v10  ;;  %v3676_v41 = vld [vmem:[#allocation7 + $0x800] sm:$0xff] }
 0x5b8   : > { %v3821_v44 = vld [vmem:[#allocation7 + $0xa00] sm:$0xff] }
 0x5ba   : > { %6029 = vmatpush1.bf16.msra.mxu0 %v6028_v54  ;;  %v6132_v54 = vpack.c.bf16 %v3396_v50, %v3394_v49  ;;  %v3592_v49 = vld [vmem:[#allocation7 + $0x7e8] sm:$0xff] }
 0x5bb   : > { %6031 = vmatprep.subr.bf16.mxu0 %v6030_v55  ;;  %v6134_v55 = vpack.c.bf16 %v3401_v53, %v3399_v52  ;;  %v3427_v50 = vld [vmem:[#allocation7 + $0x548] sm:$0xff]  ;;  %v3429_v52 = vld [vmem:[#allocation7 + $0x558] sm:$0xff] }
 0x5bc   : > { %v3594_v53 = vld [vmem:[#allocation7 + $0x7f8] sm:$0xff] }
 0x5be   : > { %6033 = vmatpush1.bf16.msra.mxu0 %v6032_v61  ;;  %v6136_v61 = vpack.c.bf16 %v3400_v57, %v3398_v56  ;;  %v3593_v56 = vld [vmem:[#allocation7 + $0x7f0] sm:$0xff] }
 0x5bf   : > { %6035 = vmatprep.subr.bf16.mxu0 %v6034_v62  ;;  %v6138_v62 = vpack.c.bf16 %v3405_v60, %v3403_v58  ;;  %v3822_v60 = vld [vmem:[#allocation7 + $0xa08] sm:$0xff] }
 0x5c2   : > { %6037 = vmatpush1.bf16.msra.mxu0 %v6036_v4  ;;  %v6140_v4 = vpack.c.bf16 %v3404_v0, %v3402_v63  ;;  %v3428_v63 = vld [vmem:[#allocation7 + $0x550] sm:$0xff]  ;;  %v3824_v0 = vld [vmem:[#allocation7 + $0xa18] sm:$0xff] }
 0x5c3   : > { %6039 = vmatprep.subr.bf16.mxu0 %v6038_v2  ;;  %v6142_v2 = vpack.c.bf16 %v3409_v1, %v3407_v3  ;;  %v3431_v3 = vld [vmem:[#allocation7 + $0x568] sm:$0xff]  ;;  %v3433_v1 = vld [vmem:[#allocation7 + $0x578] sm:$0xff] }
 0x5c6   : > { %6041 = vmatpush1.bf16.msra.mxu0 %v6040_v8  ;;  %v6144_v8 = vpack.c.bf16 %v3408_v6, %v3406_v5  ;;  %v6166_v5 = vpack.c.bf16 %v3433_v1, %v3431_v3  ;;  %v3430_v6 = vld [vmem:[#allocation7 + $0x560] sm:$0xff] }
 0x5c7   : > { %6043 = vmatprep.subr.bf16.mxu0 %v6042_v9  ;;  %v6146_v9 = vpack.c.bf16 %v3413_v7, %v3411_v21  ;;  %v3432_v21 = vld [vmem:[#allocation7 + $0x570] sm:$0xff]  ;;  %v3435_v7 = vld [vmem:[#allocation7 + $0x588] sm:$0xff] }
 0x5ca   : > { %6045 = vmatpush1.bf16.msra.mxu0 %v6044_v15  ;;  %v3417_v15 = vld [vmem:[#allocation7 + $0x4f8] sm:$0xff] }
 0x5cb   : > { %6047 = vmatprep.subr.bf16.mxu0 %v6046_v16  ;;  %v3582_v16 = vld [vmem:[#allocation7 + $0x798] sm:$0xff] }
 0x5cc   : > { %v6234_v17 = vpack.c.bf16 %v3582_v16, %v3580_v13  ;;  %v3436_v13 = vld [vmem:[#allocation7 + $0x590] sm:$0xff] }
 0x5cd   : > { %v6172_v16 = vpack.c.bf16 %v3436_v13, %v3434_v11 }
 0x5ce   : > { %6049 = vmatpush1.bf16.msra.mxu0 %v6048_v24  ;;  %v6236_v24 = vpack.c.bf16 %v3581_v19, %v3579_v18  ;;  %6235 = vmatprep.subr.bf16.mxu1 %v6234_v17  ;;  %v3438_v18 = vld [vmem:[#allocation7 + $0x5a0] sm:$0xff]  ;;  %v3440_v19 = vld [vmem:[#allocation7 + $0x5b0] sm:$0xff] }
 0x5cf   : > { %6051 = vmatprep.subr.bf16.mxu0 %v6050_v22  ;;  %v6150_v22 = vpack.c.bf16 %v3417_v15, %v3415_v14  ;;  %v3439_v14 = vld [vmem:[#allocation7 + $0x5a8] sm:$0xff]  ;;  %v3441_v15 = vld [vmem:[#allocation7 + $0x5b8] sm:$0xff] }
 0x5d0   : > { %6237 = vmatpush1.bf16.msra.mxu1 %v6236_v24  ;;  %v6174_v17 = vpack.c.bf16 %v3441_v15, %v3439_v14  ;;  %v3445_v24 = vld [vmem:[#allocation7 + $0x5d8] sm:$0xff]  ;;  %v3688_v14 = vld [vmem:[#allocation7 + $0x860] sm:$0xff]  ;;  %v3690_v15 = vld [vmem:[#allocation7 + $0x870] sm:$0xff] }
 0x5d1   : > { %v3371_v34 = vpop.f32.mrb[20].mxu1 }
 0x5d2   : > { %3382 = vst [vmem:[#allocation3 + $0x20] sm:$0xff] %v3371_v34  ;;  %v3373_v36 = vpop.f32.mrb[21].mxu1  ;;  %6053 = vmatpush1.bf16.msra.mxu0 %v6052_v29  ;;  %v3421_v29 = vld [vmem:[#allocation7 + $0x518] sm:$0xff]  ;;  %v6240_v34 = vpack.c.bf16 %v3585_v12, %v3583_v33  ;;  %v3446_v33 = vld [vmem:[#allocation7 + $0x5e0] sm:$0xff]  ;;  %v3448_v12 = vld [vmem:[#allocation7 + $0x5f0] sm:$0xff] }
 0x5d3   : > { %3383 = vst [vmem:[#allocation3 + $0x28] sm:$0xff] %v3373_v36  ;;  %6055 = vmatprep.subr.bf16.mxu0 %v6054_v30  ;;  %v3586_v30 = vld [vmem:[#allocation7 + $0x7b8] sm:$0xff]  ;;  %v3588_v36 = vld [vmem:[#allocation7 + $0x7c8] sm:$0xff] }
 0x5d4   : > { %v6238_v32 = vpack.c.bf16 %v3586_v30, %v3584_v59  ;;  %v3444_v59 = vld [vmem:[#allocation7 + $0x5d0] sm:$0xff] }
 0x5d5   : > { %v6180_v30 = vpack.c.bf16 %v3444_v59, %v3442_v25  ;;  %v6264_v25 = vpack.c.bf16 %v3690_v15, %v3688_v14  ;;  %v3708_v14 = vld [vmem:[#allocation7 + $0x900] sm:$0xff]  ;;  %v3710_v15 = vld [vmem:[#allocation7 + $0x910] sm:$0xff] }
 0x5d6   : > { %6057 = vmatpush1.bf16.msra.mxu0 %v6056_v37  ;;  %v3590_v37 = vld [vmem:[#allocation7 + $0x7d8] sm:$0xff]  ;;  %6239 = vmatprep.subr.bf16.mxu1 %v6238_v32 }
 0x5d7   : > { %6123 = vmatprep.subr.bf16.mxu0 %v6122_v38  ;;  %v6154_v38 = vpack.c.bf16 %v3421_v29, %v3419_v27  ;;  %v6242_v40 = vpack.c.bf16 %v3590_v37, %v3588_v36  ;;  %6241 = vmatpush1.bf16.msra.mxu1 %v6240_v34  ;;  %v3447_v27 = vld [vmem:[#allocation7 + $0x5e8] sm:$0xff]  ;;  %v3449_v29 = vld [vmem:[#allocation7 + $0x5f8] sm:$0xff]  ;;  %v6184_v36 = vpack.c.bf16 %v3448_v12, %v3446_v33  ;;  %v3837_v33 = vld [vmem:[#allocation7 + $0xa80] sm:$0xff] }
 0x5d8   : > { %v6182_v32 = vpack.c.bf16 %v3449_v29, %v3447_v27  ;;  %v3679_v34 = vld [vmem:[#allocation7 + $0x818] sm:$0xff]  ;;  %v3692_v27 = vld [vmem:[#allocation7 + $0x880] sm:$0xff]  ;;  %v3694_v29 = vld [vmem:[#allocation7 + $0x890] sm:$0xff] }
 0x5d9   : > { %3225 = vmatmul.mubr.f32.vlgmr.msra.gmra.mrb[20].mxu0 %v7376_v28  ;;  %6243 = vmatprep.subr.bf16.mxu1 %v6242_v40  ;;  %v3839_v12 = vld [vmem:[#allocation7 + $0xa90] sm:$0xff] }
 0x5da   : > { %6125 = vmatpush1.bf16.msra.mxu0 %v6124_v42  ;;  %v3423_v42 = vld [vmem:[#allocation7 + $0x528] sm:$0xff] }
 0x5db   : > { %6127 = vmatprep.subr.bf16.mxu0 %v6126_v43  ;;  %v3425_v43 = vld [vmem:[#allocation7 + $0x538] sm:$0xff]  ;;  %6245 = vmatpush1.bf16.msra.mxu1 %v6244_v45  ;;  %v3823_v45 = vld [vmem:[#allocation7 + $0xa10] sm:$0xff] }
 0x5dc   : > { %v6158_v47 = vpack.c.bf16 %v3425_v43, %v3423_v42  ;;  %v3678_v42 = vld [vmem:[#allocation7 + $0x810] sm:$0xff] }
 0x5de   : > { %6129 = vmatpush1.bf16.msra.mxu0 %v6128_v31  ;;  %v3422_v31 = vld [vmem:[#allocation7 + $0x520] sm:$0xff] }
 0x5df   : > { %6131 = vmatprep.subr.bf16.mxu0 %v6130_v48  ;;  %v3424_v48 = vld [vmem:[#allocation7 + $0x530] sm:$0xff] }
 0x5e0   : > { %v6160_v57 = vpack.c.bf16 %v3424_v48, %v3422_v31  ;;  %v3683_v31 = vld [vmem:[#allocation7 + $0x838] sm:$0xff]  ;;  %v3826_v48 = vld [vmem:[#allocation7 + $0xa28] sm:$0xff] }
 0x5e2   : > { %6133 = vmatpush1.bf16.msra.mxu0 %v6132_v54  ;;  %v6246_v54 = vpack.c.bf16 %v3594_v53, %v3592_v49  ;;  %v3828_v49 = vld [vmem:[#allocation7 + $0xa38] sm:$0xff]  ;;  %v6316_v53 = vpack.c.bf16 %v3823_v45, %v3821_v44  ;;  %v3841_v44 = vld [vmem:[#allocation7 + $0xaa0] sm:$0xff]  ;;  %v3843_v45 = vld [vmem:[#allocation7 + $0xab0] sm:$0xff] }
 0x5e3   : > { %6135 = vmatprep.subr.bf16.mxu0 %v6134_v55  ;;  %v3591_v55 = vld [vmem:[#allocation7 + $0x7e0] sm:$0xff] }
 0x5e4   : > { %v6248_v58 = vpack.c.bf16 %v3593_v56, %v3591_v55  ;;  %6247 = vmatprep.subr.bf16.mxu1 %v6246_v54  ;;  %v3680_v54 = vld [vmem:[#allocation7 + $0x820] sm:$0xff]  ;;  %v3682_v55 = vld [vmem:[#allocation7 + $0x830] sm:$0xff] }
 0x5e5   : > { %v3825_v56 = vld [vmem:[#allocation7 + $0xa20] sm:$0xff]  ;;  %v6256_v3 = vpack.c.bf16 %v3682_v55, %v3680_v54  ;;  %v3702_v55 = vld [vmem:[#allocation7 + $0x8d0] sm:$0xff] }
 0x5e6   : > { %6137 = vmatpush1.bf16.msra.mxu0 %v6136_v61  ;;  %v6162_v61 = vpack.c.bf16 %v3429_v52, %v3427_v50  ;;  %6249 = vmatpush1.bf16.msra.mxu1 %v6248_v58  ;;  %v7405_v50 = vld [vmem:[#allocation2 + $0x8] sm:$0xff]  ;;  %v6252_v52 = vpack.c.bf16 %v3678_v42, %v3676_v41  ;;  %v3700_v54 = vld [vmem:[#allocation7 + $0x8c0] sm:$0xff] }
 0x5e7   : > { %6139 = vmatprep.subr.bf16.mxu0 %v6138_v62  ;;  %v3426_v62 = vld [vmem:[#allocation7 + $0x540] sm:$0xff] }
 0x5ea   : > { %6141 = vmatpush1.bf16.msra.mxu0 %v6140_v4  ;;  %v6314_v4 = vpack.c.bf16 %v3824_v0, %v3822_v60  ;;  %v6318_v60 = vpack.c.bf16 %v3828_v49, %v3826_v48  ;;  %v3832_v0 = vld [vmem:[#allocation7 + $0xa58] sm:$0xff]  ;;  %v3846_v48 = vld [vmem:[#allocation7 + $0xac8] sm:$0xff] }
 0x5eb   : > { %6143 = vmatprep.subr.bf16.mxu0 %v6142_v2  ;;  %v6164_v2 = vpack.c.bf16 %v3428_v63, %v3426_v62  ;;  %v3687_v62 = vld [vmem:[#allocation7 + $0x858] sm:$0xff]  ;;  %v3830_v63 = vld [vmem:[#allocation7 + $0xa48] sm:$0xff] }
 0x5ec   : > { %6315 = vmatprep.subr.bf16.mxu1 %v6314_v4  ;;  %v3684_v4 = vld [vmem:[#allocation7 + $0x840] sm:$0xff]  ;;  %v3848_v49 = vld [vmem:[#allocation7 + $0xad8] sm:$0xff] }
 0x5ee   : > { %6145 = vmatpush1.bf16.msra.mxu0 %v6144_v8  ;;  %v3437_v8 = vld [vmem:[#allocation7 + $0x598] sm:$0xff] }
 0x5ef   : > { %6147 = vmatprep.subr.bf16.mxu0 %v6146_v9  ;;  %v6168_v9 = vpack.c.bf16 %v3432_v21, %v3430_v6  ;;  %v6170_v20 = vpack.c.bf16 %v3437_v8, %v3435_v7  ;;  %v3831_v6 = vld [vmem:[#allocation7 + $0xa50] sm:$0xff]  ;;  %v3689_v21 = vld [vmem:[#allocation7 + $0x868] sm:$0xff]  ;;  %v3691_v8 = vld [vmem:[#allocation7 + $0x878] sm:$0xff] }
 0x5f2   : > { %6149 = vmatpush1.bf16.msra.mxu0 %v6148_v23  ;;  %v3443_v23 = vld [vmem:[#allocation7 + $0x5c8] sm:$0xff] }
 0x5f3   : > { %6151 = vmatprep.subr.bf16.mxu0 %v6150_v22  ;;  %v6176_v22 = vpack.c.bf16 %v3440_v19, %v3438_v18  ;;  %v6178_v35 = vpack.c.bf16 %v3445_v24, %v3443_v23  ;;  %v3833_v18 = vld [vmem:[#allocation7 + $0xa60] sm:$0xff]  ;;  %v3835_v19 = vld [vmem:[#allocation7 + $0xa70] sm:$0xff]  ;;  %v3693_v23 = vld [vmem:[#allocation7 + $0x888] sm:$0xff] }
 0x5f4   : > { %v3695_v24 = vld [vmem:[#allocation7 + $0x898] sm:$0xff]  ;;  %v6328_v59 = vpack.c.bf16 %v3835_v19, %v3833_v18  ;;  %v3853_v18 = vld [vmem:[#allocation7 + $0xb00] sm:$0xff]  ;;  %v3855_v19 = vld [vmem:[#allocation7 + $0xb10] sm:$0xff] }
 0x5f6   : > { %6153 = vmatpush1.bf16.msra.mxu0 %v6152_v26  ;;  %v3677_v26 = vld [vmem:[#allocation7 + $0x808] sm:$0xff] }
 0x5f7   : > { %6155 = vmatprep.subr.bf16.mxu0 %v6154_v38  ;;  %v6250_v37 = vpack.c.bf16 %v3679_v34, %v3677_v26  ;;  %v3697_v26 = vld [vmem:[#allocation7 + $0x8a8] sm:$0xff]  ;;  %v3699_v34 = vld [vmem:[#allocation7 + $0x8b8] sm:$0xff] }
 0x5f8   : > { %v6270_v41 = vpack.c.bf16 %v3699_v34, %v3697_v26  ;;  %v3717_v26 = vld [vmem:[#allocation7 + $0x948] sm:$0xff]  ;;  %v3719_v34 = vld [vmem:[#allocation7 + $0x958] sm:$0xff] }
 0x5fa   : > { %6157 = vmatpush1.bf16.msra.mxu0 %v6156_v46 }
 0x5fb   : > { %6159 = vmatprep.subr.bf16.mxu0 %v6158_v47  ;;  %v3681_v47 = vld [vmem:[#allocation7 + $0x828] sm:$0xff] }
 0x5fc   : > { %v6254_v58 = vpack.c.bf16 %v3683_v31, %v3681_v47  ;;  %v3701_v47 = vld [vmem:[#allocation7 + $0x8c8] sm:$0xff]  ;;  %v3703_v31 = vld [vmem:[#allocation7 + $0x8d8] sm:$0xff] }
 0x5fe   : > { %6161 = vmatpush1.bf16.msra.mxu0 %v6160_v57  ;;  %v3827_v57 = vld [vmem:[#allocation7 + $0xa30] sm:$0xff] }
 0x5ff   : > { %6163 = vmatprep.subr.bf16.mxu0 %v6162_v61  ;;  %v3685_v61 = vld [vmem:[#allocation7 + $0x848] sm:$0xff]  ;;  %v6320_v1 = vpack.c.bf16 %v3827_v57, %v3825_v56  ;;  %v6274_v56 = vpack.c.bf16 %v3703_v31, %v3701_v47  ;;  %v6338_v57 = vpack.c.bf16 %v3848_v49, %v3846_v48  ;;  %v3723_v31 = vld [vmem:[#allocation7 + $0x978] sm:$0xff] }
 0x600   : > { %v6258_v7 = vpack.c.bf16 %v3687_v62, %v3685_v61  ;;  %v3705_v61 = vld [vmem:[#allocation7 + $0x8e8] sm:$0xff]  ;;  %v3707_v62 = vld [vmem:[#allocation7 + $0x8f8] sm:$0xff] }
 0x601   : > { %v3721_v47 = vld [vmem:[#allocation7 + $0x968] sm:$0xff]  ;;  %v3868_v49 = vld [vmem:[#allocation7 + $0xb78] sm:$0xff] }
 0x602   : > { %6165 = vmatpush1.bf16.msra.mxu0 %v6164_v2  ;;  %v3686_v2 = vld [vmem:[#allocation7 + $0x850] sm:$0xff]  ;;  %v3866_v48 = vld [vmem:[#allocation7 + $0xb68] sm:$0xff] }
 0x603   : > { %6167 = vmatprep.subr.bf16.mxu0 %v6166_v5  ;;  %v3829_v5 = vld [vmem:[#allocation7 + $0xa40] sm:$0xff]  ;;  %v6260_v11 = vpack.c.bf16 %v3686_v2, %v3684_v4  ;;  %v3706_v2 = vld [vmem:[#allocation7 + $0x8f0] sm:$0xff] }
 0x604   : > { %v6324_v13 = vpack.c.bf16 %v3831_v6, %v3829_v5  ;;  %v3704_v4 = vld [vmem:[#allocation7 + $0x8e0] sm:$0xff]  ;;  %v6278_v5 = vpack.c.bf16 %v3707_v62, %v3705_v61  ;;  %v3725_v61 = vld [vmem:[#allocation7 + $0x988] sm:$0xff]  ;;  %v3727_v62 = vld [vmem:[#allocation7 + $0x998] sm:$0xff] }
 0x606   : > { %6169 = vmatpush1.bf16.msra.mxu0 %v6168_v9  ;;  %v3834_v9 = vld [vmem:[#allocation7 + $0xa68] sm:$0xff] }
 0x607   : > { %6171 = vmatprep.subr.bf16.mxu0 %v6170_v20  ;;  %v3836_v20 = vld [vmem:[#allocation7 + $0xa78] sm:$0xff] }
 0x60a   : > { %6173 = vmatpush1.bf16.msra.mxu0 %v6172_v16  ;;  %v6262_v16 = vpack.c.bf16 %v3691_v8, %v3689_v21  ;;  %v3849_v21 = vld [vmem:[#allocation7 + $0xae0] sm:$0xff]  ;;  %v3711_v8 = vld [vmem:[#allocation7 + $0x918] sm:$0xff] }
 0x60b   : > { %6175 = vmatprep.subr.bf16.mxu0 %v6174_v17  ;;  %v6326_v17 = vpack.c.bf16 %v3836_v20, %v3834_v9  ;;  %v3854_v9 = vld [vmem:[#allocation7 + $0xb08] sm:$0xff]  ;;  %v3856_v20 = vld [vmem:[#allocation7 + $0xb18] sm:$0xff] }
 0x60e   : > { %6177 = vmatpush1.bf16.msra.mxu0 %v6176_v22  ;;  %v3838_v22 = vld [vmem:[#allocation7 + $0xa88] sm:$0xff] }
 0x60f   : > { %6179 = vmatprep.subr.bf16.mxu0 %v6178_v35  ;;  %v3840_v35 = vld [vmem:[#allocation7 + $0xa98] sm:$0xff] }
 0x612   : > { %6181 = vmatpush1.bf16.msra.mxu0 %v6180_v30  ;;  %v6266_v30 = vpack.c.bf16 %v3695_v24, %v3693_v23  ;;  %v3713_v23 = vld [vmem:[#allocation7 + $0x928] sm:$0xff]  ;;  %v3715_v24 = vld [vmem:[#allocation7 + $0x938] sm:$0xff] }
 0x613   : > { %6183 = vmatprep.subr.bf16.mxu0 %v6182_v32  ;;  %v6330_v32 = vpack.c.bf16 %v3840_v35, %v3838_v22  ;;  %v3858_v22 = vld [vmem:[#allocation7 + $0xb28] sm:$0xff]  ;;  %v3860_v35 = vld [vmem:[#allocation7 + $0xb38] sm:$0xff] }
 0x616   : > { %6185 = vmatpush1.bf16.msra.mxu0 %v6184_v36  ;;  %v3842_v36 = vld [vmem:[#allocation7 + $0xaa8] sm:$0xff] }
 0x617   : > { %6251 = vmatprep.subr.bf16.mxu0 %v6250_v37  ;;  %v3844_v37 = vld [vmem:[#allocation7 + $0xab8] sm:$0xff] }
 0x618   : > { %v6334_v42 = vpack.c.bf16 %v3844_v37, %v3842_v36  ;;  %v3862_v36 = vld [vmem:[#allocation7 + $0xb48] sm:$0xff]  ;;  %v3864_v37 = vld [vmem:[#allocation7 + $0xb58] sm:$0xff] }
 0x66c   : > { %v3083_v38 = vpop.f32.mrb[18].mxu0 }
 0x66d   : > { %v3088_v10 = vmax.f32 %v3083_v38, 0.0  ;;  %v3085_v39 = vpop.f32.mrb[19].mxu0  ;;  %v6268_v38 = vpack.c.bf16 %v3694_v29, %v3692_v27  ;;  %v3712_v27 = vld [vmem:[#allocation7 + $0x920] sm:$0xff]  ;;  %v3714_v29 = vld [vmem:[#allocation7 + $0x930] sm:$0xff] }
 0x66e   : > { %v3089_v40 = vmax.f32 %v3085_v39, 0.0  ;;  %v3696_v39 = vld [vmem:[#allocation7 + $0x8a0] sm:$0xff] }
 0x66f   : > { %3090 = vst [vmem:[#allocation2 + $0x10] sm:$0xf] %v3088_v10  ;;  %v6332_v10 = vpack.c.bf16 %v3839_v12, %v3837_v33  ;;  %v3857_v33 = vld [vmem:[#allocation7 + $0xb20] sm:$0xff]  ;;  %v3859_v12 = vld [vmem:[#allocation7 + $0xb30] sm:$0xff] }
 0x670   : > { %3091 = vst [vmem:[#allocation2 + $0x18] sm:$0xf] %v3089_v40  ;;  %v3698_v40 = vld [vmem:[#allocation7 + $0x8b0] sm:$0xff] }
 0x676   : > { %v7401_v46 = vld [vmem:[#allocation2 + $0x10] sm:$0xf] }
 0x677   : > { %v7397_v43 = vld [vmem:[#allocation2 + $0x18] sm:$0xf] }
 0x678   : > { %3230 = vmatprep.mubr.f32.mxu0 %v7397_v43  ;;  %3375 = vmatprep.mubr.f32.mxu1 %v7397_v43 }
 0x679   : > { %3231 = vmatmul.mubr.f32.gmra.mrb[22].mxu0 %v7401_v46  ;;  %3376 = vmatmul.mubr.f32.gmra.mrb[22].mxu1 %v7401_v46 }
 0x67a   : > { %3514 = vmatprep.mubr.f32.mxu0 %v7405_v50  ;;  %3659 = vmatprep.mubr.f32.mxu1 %v7405_v50 }
 0x67d   : > { %3515 = vmatmul.mubr.f32.vlgmr.msra.gmra.mrb[24].mxu0 %v7376_v28  ;;  %3660 = vmatmul.mubr.f32.vlgmr.msra.gmra.mrb[24].mxu1 %v7376_v28  ;;  %v6322_v28 = vpack.c.bf16 %v3832_v0, %v3830_v63  ;;  %v3850_v63 = vld [vmem:[#allocation7 + $0xae8] sm:$0xff]  ;;  %v3852_v0 = vld [vmem:[#allocation7 + $0xaf8] sm:$0xff] }
 0x67e   : > { %6253 = vmatpush1.bf16.msra.mxu0 %v6252_v52  ;;  %6317 = vmatpush1.bf16.msra.mxu1 %v6316_v53  ;;  %v6272_v52 = vpack.c.bf16 %v3698_v40, %v3696_v39  ;;  %v6336_v53 = vpack.c.bf16 %v3843_v45, %v3841_v44  ;;  %v6342_v6 = vpack.c.bf16 %v3852_v0, %v3850_v63  ;;  %v3716_v39 = vld [vmem:[#allocation7 + $0x940] sm:$0xff]  ;;  %v3718_v40 = vld [vmem:[#allocation7 + $0x950] sm:$0xff]  ;;  %v3870_v63 = vld [vmem:[#allocation7 + $0xb88] sm:$0xff] }
 0x67f   : > { %3520 = vmatprep.mubr.f32.mxu0 %v7397_v43  ;;  %3665 = vmatprep.mubr.f32.mxu1 %v7397_v43  ;;  %v3861_v44 = vld [vmem:[#allocation7 + $0xb40] sm:$0xff]  ;;  %v3863_v45 = vld [vmem:[#allocation7 + $0xb50] sm:$0xff]  ;;  %v3872_v0 = vld [vmem:[#allocation7 + $0xb98] sm:$0xff] }
 0x680   : > { %6255 = vmatprep.subr.bf16.mxu0 %v6254_v58  ;;  %6319 = vmatprep.subr.bf16.mxu1 %v6318_v60  ;;  %v3845_v58 = vld [vmem:[#allocation7 + $0xac0] sm:$0xff]  ;;  %v3847_v60 = vld [vmem:[#allocation7 + $0xad0] sm:$0xff] }
 0x681   : > { %3521 = vmatmul.mubr.f32.gmra.mrb[26].mxu0 %v7401_v46  ;;  %3666 = vmatmul.mubr.f32.gmra.mrb[26].mxu1 %v7401_v46 }
 0x682   : > { %6257 = vmatpush1.bf16.msra.mxu0 %v6256_v3  ;;  %6321 = vmatpush1.bf16.msra.mxu1 %v6320_v1  ;;  %v6276_v3 = vpack.c.bf16 %v3702_v55, %v3700_v54  ;;  %v6340_v1 = vpack.c.bf16 %v3847_v60, %v3845_v58  ;;  %v3720_v54 = vld [vmem:[#allocation7 + $0x960] sm:$0xff]  ;;  %v3722_v55 = vld [vmem:[#allocation7 + $0x970] sm:$0xff] }
 0x683   : > { %3804 = vmatprep.mubr.f32.mxu0 %v7405_v50  ;;  %3949 = vmatprep.mubr.f32.mxu1 %v7405_v50  ;;  %v3865_v58 = vld [vmem:[#allocation7 + $0xb60] sm:$0xff]  ;;  %v3867_v60 = vld [vmem:[#allocation7 + $0xb70] sm:$0xff] }
 0x684   : > { %6259 = vmatprep.subr.bf16.mxu0 %v6258_v7  ;;  %6323 = vmatprep.subr.bf16.mxu1 %v6322_v28  ;;  %v3851_v7 = vld [vmem:[#allocation7 + $0xaf0] sm:$0xff]  ;;  %v3709_v28 = vld [vmem:[#allocation7 + $0x908] sm:$0xff] }
 0x686   : > { %6261 = vmatpush1.bf16.msra.mxu0 %v6260_v11  ;;  %6325 = vmatpush1.bf16.msra.mxu1 %v6324_v13  ;;  %v6280_v11 = vpack.c.bf16 %v3706_v2, %v3704_v4  ;;  %v6344_v13 = vpack.c.bf16 %v3851_v7, %v3849_v21  ;;  %v3724_v4 = vld [vmem:[#allocation7 + $0x980] sm:$0xff]  ;;  %v3726_v2 = vld [vmem:[#allocation7 + $0x990] sm:$0xff] }
 0x687   : > { %6263 = vmatprep.subr.bf16.mxu0 %v6262_v16  ;;  %6327 = vmatprep.subr.bf16.mxu1 %v6326_v17  ;;  %v6282_v16 = vpack.c.bf16 %v3711_v8, %v3709_v28  ;;  %v6346_v17 = vpack.c.bf16 %v3856_v20, %v3854_v9  ;;  %v3869_v21 = vld [vmem:[#allocation7 + $0xb80] sm:$0xff]  ;;  %v3871_v7 = vld [vmem:[#allocation7 + $0xb90] sm:$0xff]  ;;  %v3729_v28 = vld [vmem:[#allocation7 + $0x9a8] sm:$0xff] }
 0x688   : > { %v3731_v8 = vld [vmem:[#allocation7 + $0x9b8] sm:$0xff]  ;;  %v3874_v9 = vld [vmem:[#allocation7 + $0xba8] sm:$0xff] }
 0x689   : > { %v3876_v20 = vld [vmem:[#allocation7 + $0xbb8] sm:$0xff] }
 0x68a   : > { %6265 = vmatpush1.bf16.msra.mxu0 %v6264_v25  ;;  %6329 = vmatpush1.bf16.msra.mxu1 %v6328_v59  ;;  %v6284_v25 = vpack.c.bf16 %v3710_v15, %v3708_v14  ;;  %v6348_v59 = vpack.c.bf16 %v3855_v19, %v3853_v18  ;;  %v3728_v14 = vld [vmem:[#allocation7 + $0x9a0] sm:$0xff]  ;;  %v3730_v15 = vld [vmem:[#allocation7 + $0x9b0] sm:$0xff] }
 0x68b   : > { %6267 = vmatprep.subr.bf16.mxu0 %v6266_v30  ;;  %6331 = vmatprep.subr.bf16.mxu1 %v6330_v32  ;;  %v6286_v30 = vpack.c.bf16 %v3715_v24, %v3713_v23  ;;  %v6350_v32 = vpack.c.bf16 %v3860_v35, %v3858_v22  ;;  %v3873_v18 = vld [vmem:[#allocation7 + $0xba0] sm:$0xff]  ;;  %v3875_v19 = vld [vmem:[#allocation7 + $0xbb0] sm:$0xff]  ;;  %v3733_v23 = vld [vmem:[#allocation7 + $0x9c8] sm:$0xff] }
 0x68c   : > { %v3735_v22 = vld [vmem:[#allocation7 + $0x9d8] sm:$0xff]  ;;  %v3878_v35 = vld [vmem:[#allocation7 + $0xbc8] sm:$0xff] }
 0x68e   : > { %6269 = vmatpush1.bf16.msra.mxu0 %v6268_v38  ;;  %6333 = vmatpush1.bf16.msra.mxu1 %v6332_v10  ;;  %v6288_v38 = vpack.c.bf16 %v3714_v29, %v3712_v27  ;;  %v6352_v10 = vpack.c.bf16 %v3859_v12, %v3857_v33  ;;  %v6304_v27 = vpack.c.bf16 %v3730_v15, %v3728_v14  ;;  %v4122_v14 = vld [vmem:[#allocation7 + $0xe58] sm:$0xff] }
 0x68f   : > { %6271 = vmatprep.subr.bf16.mxu0 %v6270_v41  ;;  %6335 = vmatprep.subr.bf16.mxu1 %v6334_v42  ;;  %v6290_v41 = vpack.c.bf16 %v3719_v34, %v3717_v26  ;;  %v6354_v42 = vpack.c.bf16 %v3864_v37, %v3862_v36  ;;  %v6368_v29 = vpack.c.bf16 %v3875_v19, %v3873_v18  ;;  %v3877_v26 = vld [vmem:[#allocation7 + $0xbc0] sm:$0xff]  ;;  %v3879_v34 = vld [vmem:[#allocation7 + $0xbd0] sm:$0xff]  ;;  %v3737_v36 = vld [vmem:[#allocation7 + $0x9e8] sm:$0xff] }
 0x690   : > { %v6306_v33 = vpack.c.bf16 %v3735_v22, %v3733_v23  ;;  %v3739_v37 = vld [vmem:[#allocation7 + $0x9f8] sm:$0xff]  ;;  %v3976_v18 = vld [vmem:[#allocation7 + $0xc50] sm:$0xff]  ;;  %v4119_v22 = vld [vmem:[#allocation7 + $0xe40] sm:$0xff] }
 0x692   : > { %6273 = vmatpush1.bf16.msra.mxu0 %v6272_v52  ;;  %6337 = vmatpush1.bf16.msra.mxu1 %v6336_v53  ;;  %v6292_v52 = vpack.c.bf16 %v3718_v40, %v3716_v39  ;;  %v6356_v53 = vpack.c.bf16 %v3863_v45, %v3861_v44  ;;  %v6372_v40 = vpack.c.bf16 %v3879_v34, %v3877_v26 }
 0x693   : > { %6275 = vmatprep.subr.bf16.mxu0 %v6274_v56  ;;  %6339 = vmatprep.subr.bf16.mxu1 %v6338_v57  ;;  %v6294_v56 = vpack.c.bf16 %v3723_v31, %v3721_v47  ;;  %v6358_v57 = vpack.c.bf16 %v3868_v49, %v3866_v48  ;;  %v6310_v44 = vpack.c.bf16 %v3739_v37, %v3737_v36  ;;  %v3881_v47 = vld [vmem:[#allocation7 + $0xbe0] sm:$0xff]  ;;  %v3883_v31 = vld [vmem:[#allocation7 + $0xbf0] sm:$0xff]  ;;  %v3967_v48 = vld [vmem:[#allocation7 + $0xc08] sm:$0xff] }
 0x694   : > { %v3969_v49 = vld [vmem:[#allocation7 + $0xc18] sm:$0xff]  ;;  %v4123_v36 = vld [vmem:[#allocation7 + $0xe60] sm:$0xff]  ;;  %v4125_v37 = vld [vmem:[#allocation7 + $0xe70] sm:$0xff] }
 0x696   : > { %6277 = vmatpush1.bf16.msra.mxu0 %v6276_v3  ;;  %6341 = vmatpush1.bf16.msra.mxu1 %v6340_v1  ;;  %v6296_v3 = vpack.c.bf16 %v3722_v55, %v3720_v54  ;;  %v6360_v1 = vpack.c.bf16 %v3867_v60, %v3865_v58  ;;  %v6376_v55 = vpack.c.bf16 %v3883_v31, %v3881_v47  ;;  %v3966_v58 = vld [vmem:[#allocation7 + $0xc00] sm:$0xff]  ;;  %v3968_v60 = vld [vmem:[#allocation7 + $0xc10] sm:$0xff] }
 0x697   : > { %6279 = vmatprep.subr.bf16.mxu0 %v6278_v5  ;;  %6343 = vmatprep.subr.bf16.mxu1 %v6342_v6  ;;  %v6298_v5 = vpack.c.bf16 %v3727_v62, %v3725_v61  ;;  %v6362_v6 = vpack.c.bf16 %v3872_v0, %v3870_v63  ;;  %v4111_v61 = vld [vmem:[#allocation7 + $0xe00] sm:$0xff]  ;;  %v4113_v62 = vld [vmem:[#allocation7 + $0xe10] sm:$0xff]  ;;  %v3971_v63 = vld [vmem:[#allocation7 + $0xc28] sm:$0xff] }
 0x698   : > { %v3973_v0 = vld [vmem:[#allocation7 + $0xc38] sm:$0xff]  ;;  %v4127_v47 = vld [vmem:[#allocation7 + $0xe80] sm:$0xff]  ;;  %v4129_v31 = vld [vmem:[#allocation7 + $0xe90] sm:$0xff] }
 0x69a   : > { %6281 = vmatpush1.bf16.msra.mxu0 %v6280_v11  ;;  %6345 = vmatpush1.bf16.msra.mxu1 %v6344_v13  ;;  %v6300_v11 = vpack.c.bf16 %v3726_v2, %v3724_v4  ;;  %v6364_v13 = vpack.c.bf16 %v3871_v7, %v3869_v21  ;;  %v6380_v4 = vpack.c.bf16 %v3968_v60, %v3966_v58 }
 0x69b   : > { %6283 = vmatprep.subr.bf16.mxu0 %v6282_v16  ;;  %6347 = vmatprep.subr.bf16.mxu1 %v6346_v17  ;;  %v6302_v16 = vpack.c.bf16 %v3731_v8, %v3729_v28  ;;  %v6366_v17 = vpack.c.bf16 %v3876_v20, %v3874_v9  ;;  %v6444_v2 = vpack.c.bf16 %v4113_v62, %v4111_v61  ;;  %v4115_v28 = vld [vmem:[#allocation7 + $0xe20] sm:$0xff]  ;;  %v4117_v8 = vld [vmem:[#allocation7 + $0xe30] sm:$0xff]  ;;  %v3975_v9 = vld [vmem:[#allocation7 + $0xc48] sm:$0xff] }
 0x69c   : > { %v6382_v21 = vpack.c.bf16 %v3973_v0, %v3971_v63  ;;  %v7423_v20 = vld [vmem:[#allocation2] sm:$0xff]  ;;  %v4131_v61 = vld [vmem:[#allocation7 + $0xea0] sm:$0xff]  ;;  %v3991_v63 = vld [vmem:[#allocation7 + $0xcc8] sm:$0xff] }
 0x69d   : > { %v4133_v62 = vld [vmem:[#allocation7 + $0xeb0] sm:$0xff]  ;;  %v3993_v0 = vld [vmem:[#allocation7 + $0xcd8] sm:$0xff] }
 0x69e   : > { %6285 = vmatpush1.bf16.msra.mxu0 %v6284_v25  ;;  %6349 = vmatpush1.bf16.msra.mxu1 %v6348_v59  ;;  %v3880_v25 = vld [vmem:[#allocation7 + $0xbd8] sm:$0xff] }
 0x69f   : > { %6287 = vmatprep.subr.bf16.mxu0 %v6286_v30  ;;  %6351 = vmatprep.subr.bf16.mxu1 %v6350_v32  ;;  %v3732_v30 = vld [vmem:[#allocation7 + $0x9c0] sm:$0xff]  ;;  %v3734_v32 = vld [vmem:[#allocation7 + $0x9d0] sm:$0xff]  ;;  %v6370_v12 = vpack.c.bf16 %v3880_v25, %v3878_v35  ;;  %v3979_v25 = vld [vmem:[#allocation7 + $0xc68] sm:$0xff] }
 0x6a0   : > { %v6308_v39 = vpack.c.bf16 %v3734_v32, %v3732_v30  ;;  %v4121_v35 = vld [vmem:[#allocation7 + $0xe50] sm:$0xff] }
 0x6a1   : > { %v6452_v32 = vpack.c.bf16 %v4121_v35, %v4119_v22  ;;  %v4139_v22 = vld [vmem:[#allocation7 + $0xee0] sm:$0xff]  ;;  %v4141_v35 = vld [vmem:[#allocation7 + $0xef0] sm:$0xff] }
 0x6a2   : > { %6289 = vmatpush1.bf16.msra.mxu0 %v6288_v38  ;;  %6353 = vmatpush1.bf16.msra.mxu1 %v6352_v10  ;;  %v3882_v38 = vld [vmem:[#allocation7 + $0xbe8] sm:$0xff]  ;;  %v3884_v10 = vld [vmem:[#allocation7 + $0xbf8] sm:$0xff] }
 0x6a3   : > { %6291 = vmatprep.subr.bf16.mxu0 %v6290_v41  ;;  %6355 = vmatprep.subr.bf16.mxu1 %v6354_v42  ;;  %v3736_v41 = vld [vmem:[#allocation7 + $0x9e0] sm:$0xff]  ;;  %v3738_v42 = vld [vmem:[#allocation7 + $0x9f0] sm:$0xff]  ;;  %v6374_v45 = vpack.c.bf16 %v3884_v10, %v3882_v38  ;;  %v3985_v38 = vld [vmem:[#allocation7 + $0xc98] sm:$0xff] }
 0x6a4   : > { %v6312_v54 = vpack.c.bf16 %v3738_v42, %v3736_v41  ;;  %v4128_v10 = vld [vmem:[#allocation7 + $0xe88] sm:$0xff]  ;;  %v3982_v41 = vld [vmem:[#allocation7 + $0xc80] sm:$0xff]  ;;  %v3984_v42 = vld [vmem:[#allocation7 + $0xc90] sm:$0xff] }
 0x6a6   : > { %6293 = vmatpush1.bf16.msra.mxu0 %v6292_v52  ;;  %6357 = vmatpush1.bf16.msra.mxu1 %v6356_v53  ;;  %v4112_v52 = vld [vmem:[#allocation7 + $0xe08] sm:$0xff]  ;;  %v4114_v53 = vld [vmem:[#allocation7 + $0xe18] sm:$0xff] }
 0x6a7   : > { %6295 = vmatprep.subr.bf16.mxu0 %v6294_v56  ;;  %6359 = vmatprep.subr.bf16.mxu1 %v6358_v57  ;;  %v6378_v56 = vpack.c.bf16 %v3969_v49, %v3967_v48  ;;  %v6442_v57 = vpack.c.bf16 %v4114_v53, %v4112_v52  ;;  %v3987_v48 = vld [vmem:[#allocation7 + $0xca8] sm:$0xff]  ;;  %v3989_v49 = vld [vmem:[#allocation7 + $0xcb8] sm:$0xff] }
 0x6a8   : > { %v4132_v52 = vld [vmem:[#allocation7 + $0xea8] sm:$0xff]  ;;  %v4134_v53 = vld [vmem:[#allocation7 + $0xeb8] sm:$0xff]  ;;  %v6398_v58 = vpack.c.bf16 %v3989_v49, %v3987_v48 }
 0x6a9   : > { %v6462_v60 = vpack.c.bf16 %v4134_v53, %v4132_v52  ;;  %v4007_v48 = vld [vmem:[#allocation7 + $0xd48] sm:$0xff]  ;;  %v4009_v49 = vld [vmem:[#allocation7 + $0xd58] sm:$0xff] }
 0x6aa   : > { %6297 = vmatpush1.bf16.msra.mxu0 %v6296_v3  ;;  %6361 = vmatpush1.bf16.msra.mxu1 %v6360_v1  ;;  %v4116_v3 = vld [vmem:[#allocation7 + $0xe28] sm:$0xff]  ;;  %v4118_v1 = vld [vmem:[#allocation7 + $0xe38] sm:$0xff] }
 0x6ab   : > { %6299 = vmatprep.subr.bf16.mxu0 %v6298_v5  ;;  %6363 = vmatprep.subr.bf16.mxu1 %v6362_v6  ;;  %v3970_v5 = vld [vmem:[#allocation7 + $0xc20] sm:$0xff]  ;;  %v3972_v6 = vld [vmem:[#allocation7 + $0xc30] sm:$0xff]  ;;  %v6446_v7 = vpack.c.bf16 %v4118_v1, %v4116_v3  ;;  %v4136_v3 = vld [vmem:[#allocation7 + $0xec8] sm:$0xff] }
 0x6ac   : > { %v7417_v24 = vpop.f32.mrb[20].mxu0  ;;  %v6384_v15 = vpack.c.bf16 %v3972_v6, %v3970_v5  ;;  %v4138_v1 = vld [vmem:[#allocation7 + $0xed8] sm:$0xff]  ;;  %v3990_v5 = vld [vmem:[#allocation7 + $0xcc0] sm:$0xff]  ;;  %v3992_v6 = vld [vmem:[#allocation7 + $0xcd0] sm:$0xff] }
 0x6ad   : > { %3237 = vst [vmem:[#allocation3] sm:$0xff] %v7417_v24  ;;  %v7420_v59 = vpop.f32.mrb[21].mxu0  ;;  %v4152_v52 = vld [vmem:[#allocation7 + $0xf48] sm:$0xff]  ;;  %v4154_v53 = vld [vmem:[#allocation7 + $0xf58] sm:$0xff] }
 0x6ae   : > { %3238 = vst [vmem:[#allocation3 + $0x8] sm:$0xff] %v7420_v59  ;;  %6301 = vmatpush1.bf16.msra.mxu0 %v6300_v11  ;;  %6365 = vmatpush1.bf16.msra.mxu1 %v6364_v13  ;;  %v3977_v11 = vld [vmem:[#allocation7 + $0xc58] sm:$0xff]  ;;  %v4120_v13 = vld [vmem:[#allocation7 + $0xe48] sm:$0xff] }
 0x6af   : > { %6303 = vmatprep.subr.bf16.mxu0 %v6302_v16  ;;  %6367 = vmatprep.subr.bf16.mxu1 %v6366_v17  ;;  %v6448_v16 = vpack.c.bf16 %v4117_v8, %v4115_v28  ;;  %v3974_v17 = vld [vmem:[#allocation7 + $0xc40] sm:$0xff]  ;;  %v6386_v19 = vpack.c.bf16 %v3977_v11, %v3975_v9  ;;  %v6450_v23 = vpack.c.bf16 %v4122_v14, %v4120_v13  ;;  %v4137_v8 = vld [vmem:[#allocation7 + $0xed0] sm:$0xff]  ;;  %v3995_v9 = vld [vmem:[#allocation7 + $0xce8] sm:$0xff] }
 0x6b0   : > { %v6388_v30 = vpack.c.bf16 %v3976_v18, %v3974_v17  ;;  %v4135_v28 = vld [vmem:[#allocation7 + $0xec0] sm:$0xff]  ;;  %v3997_v11 = vld [vmem:[#allocation7 + $0xcf8] sm:$0xff]  ;;  %v4140_v13 = vld [vmem:[#allocation7 + $0xee8] sm:$0xff] }
 0x6b1   : > { %v4142_v14 = vld [vmem:[#allocation7 + $0xef8] sm:$0xff]  ;;  %v3994_v17 = vld [vmem:[#allocation7 + $0xce0] sm:$0xff]  ;;  %v3996_v18 = vld [vmem:[#allocation7 + $0xcf0] sm:$0xff] }
 0x6b2   : > { %6305 = vmatpush1.bf16.msra.mxu0 %v6304_v27  ;;  %6369 = vmatpush1.bf16.msra.mxu1 %v6368_v29  ;;  %v3981_v27 = vld [vmem:[#allocation7 + $0xc78] sm:$0xff]  ;;  %v4124_v29 = vld [vmem:[#allocation7 + $0xe68] sm:$0xff] }
 0x6b3   : > { %6307 = vmatprep.subr.bf16.mxu0 %v6306_v33  ;;  %6371 = vmatprep.subr.bf16.mxu1 %v6370_v12  ;;  %v3978_v33 = vld [vmem:[#allocation7 + $0xc60] sm:$0xff]  ;;  %v3980_v12 = vld [vmem:[#allocation7 + $0xc70] sm:$0xff]  ;;  %v6390_v26 = vpack.c.bf16 %v3981_v27, %v3979_v25  ;;  %v3999_v25 = vld [vmem:[#allocation7 + $0xd08] sm:$0xff] }
 0x6b4   : > { %v4001_v27 = vld [vmem:[#allocation7 + $0xd18] sm:$0xff] }
 0x6b6   : > { %6309 = vmatpush1.bf16.msra.mxu0 %v6308_v39  ;;  %6373 = vmatpush1.bf16.msra.mxu1 %v6372_v40  ;;  %v4130_v39 = vld [vmem:[#allocation7 + $0xe98] sm:$0xff]  ;;  %v6392_v40 = vpack.c.bf16 %v3980_v12, %v3978_v33  ;;  %v3998_v33 = vld [vmem:[#allocation7 + $0xd00] sm:$0xff]  ;;  %v4000_v12 = vld [vmem:[#allocation7 + $0xd10] sm:$0xff] }
 0x6b7   : > { %6311 = vmatprep.subr.bf16.mxu0 %v6310_v44  ;;  %6375 = vmatprep.subr.bf16.mxu1 %v6374_v45  ;;  %v6458_v45 = vpack.c.bf16 %v4130_v39, %v4128_v10  ;;  %v4148_v10 = vld [vmem:[#allocation7 + $0xf28] sm:$0xff]  ;;  %v4150_v39 = vld [vmem:[#allocation7 + $0xf38] sm:$0xff] }
 0x6ba   : > { %6313 = vmatpush1.bf16.msra.mxu0 %v6312_v54  ;;  %6377 = vmatpush1.bf16.msra.mxu1 %v6376_v55  ;;  %v6396_v54 = vpack.c.bf16 %v3984_v42, %v3982_v41  ;;  %v6460_v55 = vpack.c.bf16 %v4129_v31, %v4127_v47  ;;  %v4002_v41 = vld [vmem:[#allocation7 + $0xd20] sm:$0xff]  ;;  %v4004_v42 = vld [vmem:[#allocation7 + $0xd30] sm:$0xff] }
 0x6bb   : > { %6379 = vmatprep.subr.bf16.mxu0 %v6378_v56  ;;  %6443 = vmatprep.subr.bf16.mxu1 %v6442_v57  ;;  %v3986_v56 = vld [vmem:[#allocation7 + $0xca0] sm:$0xff]  ;;  %v3988_v57 = vld [vmem:[#allocation7 + $0xcb0] sm:$0xff] }
 0x6bc   : > { %v4147_v47 = vld [vmem:[#allocation7 + $0xf20] sm:$0xff]  ;;  %v4149_v31 = vld [vmem:[#allocation7 + $0xf30] sm:$0xff] }
 0x6bd   : > { %3805 = vmatmul.mubr.f32.vlgmr.msra.gmra.mrb[28].mxu0 %v7423_v20  ;;  %3950 = vmatmul.mubr.f32.vlgmr.msra.gmra.mrb[28].mxu1 %v7423_v20 }
 0x6be   : > { %3810 = vmatprep.mubr.f32.mxu0 %v7397_v43  ;;  %3955 = vmatprep.mubr.f32.mxu1 %v7397_v43  ;;  %v4126_v43 = vld [vmem:[#allocation7 + $0xe78] sm:$0xff] }
 0x6bf   : > { %6381 = vmatpush1.bf16.msra.mxu0 %v6380_v4  ;;  %6445 = vmatpush1.bf16.msra.mxu1 %v6444_v2  ;;  %v6454_v34 = vpack.c.bf16 %v4126_v43, %v4124_v29  ;;  %v6400_v4 = vpack.c.bf16 %v3988_v57, %v3986_v56  ;;  %v6464_v2 = vpack.c.bf16 %v4133_v62, %v4131_v61  ;;  %v4144_v29 = vld [vmem:[#allocation7 + $0xf08] sm:$0xff]  ;;  %v4146_v43 = vld [vmem:[#allocation7 + $0xf18] sm:$0xff]  ;;  %v4006_v56 = vld [vmem:[#allocation7 + $0xd40] sm:$0xff] }
 0x6c0   : > { %6383 = vmatprep.subr.bf16.mxu0 %v6382_v21  ;;  %6447 = vmatprep.subr.bf16.mxu1 %v6446_v7  ;;  %v6402_v21 = vpack.c.bf16 %v3993_v0, %v3991_v63  ;;  %v6466_v7 = vpack.c.bf16 %v4138_v1, %v4136_v3  ;;  %v4008_v57 = vld [vmem:[#allocation7 + $0xd50] sm:$0xff]  ;;  %v4151_v61 = vld [vmem:[#allocation7 + $0xf40] sm:$0xff]  ;;  %v4011_v63 = vld [vmem:[#allocation7 + $0xd68] sm:$0xff] }
 0x6c1   : > { %3811 = vmatmul.mubr.f32.gmra.mrb[30].mxu0 %v7401_v46  ;;  %3956 = vmatmul.mubr.f32.gmra.mrb[30].mxu1 %v7401_v46  ;;  %v3983_v46 = vld [vmem:[#allocation7 + $0xc88] sm:$0xff]  ;;  %v4153_v62 = vld [vmem:[#allocation7 + $0xf50] sm:$0xff]  ;;  %v4013_v0 = vld [vmem:[#allocation7 + $0xd78] sm:$0xff] }
 0x6c2   : > { %4094 = vmatprep.mubr.f32.mxu0 %v7405_v50  ;;  %4239 = vmatprep.mubr.f32.mxu1 %v7405_v50  ;;  %v6456_v50 = vpack.c.bf16 %v4125_v37, %v4123_v36  ;;  %v6394_v44 = vpack.c.bf16 %v3985_v38, %v3983_v46  ;;  %v4143_v36 = vld [vmem:[#allocation7 + $0xf00] sm:$0xff]  ;;  %v4145_v37 = vld [vmem:[#allocation7 + $0xf10] sm:$0xff]  ;;  %v4003_v46 = vld [vmem:[#allocation7 + $0xd28] sm:$0xff] }
 0x6c3   : > { %6385 = vmatpush1.bf16.msra.mxu0 %v6384_v15  ;;  %6449 = vmatpush1.bf16.msra.mxu1 %v6448_v16  ;;  %v6404_v15 = vpack.c.bf16 %v3992_v6, %v3990_v5  ;;  %v6468_v16 = vpack.c.bf16 %v4137_v8, %v4135_v28  ;;  %v4005_v38 = vld [vmem:[#allocation7 + $0xd38] sm:$0xff]  ;;  %v4156_v3 = vld [vmem:[#allocation7 + $0xf68] sm:$0xff]  ;;  %v4010_v5 = vld [vmem:[#allocation7 + $0xd60] sm:$0xff] }
 0x6c4   : > { %6387 = vmatprep.subr.bf16.mxu0 %v6386_v19  ;;  %6451 = vmatprep.subr.bf16.mxu1 %v6450_v23  ;;  %v6406_v19 = vpack.c.bf16 %v3997_v11, %v3995_v9  ;;  %v6470_v23 = vpack.c.bf16 %v4142_v14, %v4140_v13  ;;  %v4158_v1 = vld [vmem:[#allocation7 + $0xf78] sm:$0xff]  ;;  %v4012_v6 = vld [vmem:[#allocation7 + $0xd70] sm:$0xff]  ;;  %v4155_v28 = vld [vmem:[#allocation7 + $0xf60] sm:$0xff] }
 0x6c5   : > { %v4157_v8 = vld [vmem:[#allocation7 + $0xf70] sm:$0xff]  ;;  %v4015_v9 = vld [vmem:[#allocation7 + $0xd88] sm:$0xff]  ;;  %v4017_v11 = vld [vmem:[#allocation7 + $0xd98] sm:$0xff] }
 0x6c6   : > { %v4160_v13 = vld [vmem:[#allocation7 + $0xf88] sm:$0xff]  ;;  %v4162_v14 = vld [vmem:[#allocation7 + $0xf98] sm:$0xff] }
 0x6c7   : > { %6389 = vmatpush1.bf16.msra.mxu0 %v6388_v30  ;;  %6453 = vmatpush1.bf16.msra.mxu1 %v6452_v32  ;;  %v6408_v30 = vpack.c.bf16 %v3996_v18, %v3994_v17  ;;  %v6472_v32 = vpack.c.bf16 %v4141_v35, %v4139_v22  ;;  %v4014_v17 = vld [vmem:[#allocation7 + $0xd80] sm:$0xff]  ;;  %v4016_v18 = vld [vmem:[#allocation7 + $0xd90] sm:$0xff] }
 0x6c8   : > { %6391 = vmatprep.subr.bf16.mxu0 %v6390_v26  ;;  %6455 = vmatprep.subr.bf16.mxu1 %v6454_v34  ;;  %v6410_v26 = vpack.c.bf16 %v4001_v27, %v3999_v25  ;;  %v6474_v34 = vpack.c.bf16 %v4146_v43, %v4144_v29  ;;  %v4159_v22 = vld [vmem:[#allocation7 + $0xf80] sm:$0xff]  ;;  %v4161_v35 = vld [vmem:[#allocation7 + $0xf90] sm:$0xff]  ;;  %v4019_v25 = vld [vmem:[#allocation7 + $0xda8] sm:$0xff] }
 0x6c9   : > { %v4021_v27 = vld [vmem:[#allocation7 + $0xdb8] sm:$0xff]  ;;  %v4164_v29 = vld [vmem:[#allocation7 + $0xfa8] sm:$0xff] }
 0x6ca   : > { %v4166_v43 = vld [vmem:[#allocation7 + $0xfb8] sm:$0xff] }
 0x6cb   : > { %6393 = vmatpush1.bf16.msra.mxu0 %v6392_v40  ;;  %6457 = vmatpush1.bf16.msra.mxu1 %v6456_v50  ;;  %v6412_v40 = vpack.c.bf16 %v4000_v12, %v3998_v33  ;;  %v6476_v50 = vpack.c.bf16 %v4145_v37, %v4143_v36  ;;  %v4018_v33 = vld [vmem:[#allocation7 + $0xda0] sm:$0xff]  ;;  %v4020_v12 = vld [vmem:[#allocation7 + $0xdb0] sm:$0xff] }
 0x6cc   : > { %6395 = vmatprep.subr.bf16.mxu0 %v6394_v44  ;;  %6459 = vmatprep.subr.bf16.mxu1 %v6458_v45  ;;  %v6414_v44 = vpack.c.bf16 %v4005_v38, %v4003_v46  ;;  %v6478_v45 = vpack.c.bf16 %v4150_v39, %v4148_v10  ;;  %v4163_v36 = vld [vmem:[#allocation7 + $0xfa0] sm:$0xff]  ;;  %v4165_v37 = vld [vmem:[#allocation7 + $0xfb0] sm:$0xff]  ;;  %v4023_v46 = vld [vmem:[#allocation7 + $0xdc8] sm:$0xff] }
 0x6cd   : > { %v4025_v38 = vld [vmem:[#allocation7 + $0xdd8] sm:$0xff]  ;;  %v4168_v10 = vld [vmem:[#allocation7 + $0xfc8] sm:$0xff] }
 0x6ce   : > { %v4170_v39 = vld [vmem:[#allocation7 + $0xfd8] sm:$0xff] }
 0x6cf   : > { %6397 = vmatpush1.bf16.msra.mxu0 %v6396_v54  ;;  %6461 = vmatpush1.bf16.msra.mxu1 %v6460_v55  ;;  %v6416_v54 = vpack.c.bf16 %v4004_v42, %v4002_v41  ;;  %v6480_v55 = vpack.c.bf16 %v4149_v31, %v4147_v47  ;;  %v4022_v41 = vld [vmem:[#allocation7 + $0xdc0] sm:$0xff]  ;;  %v4024_v42 = vld [vmem:[#allocation7 + $0xdd0] sm:$0xff] }
 0x6d0   : > { %6399 = vmatprep.subr.bf16.mxu0 %v6398_v58  ;;  %6463 = vmatprep.subr.bf16.mxu1 %v6462_v60  ;;  %v6418_v58 = vpack.c.bf16 %v4009_v49, %v4007_v48  ;;  %v6482_v60 = vpack.c.bf16 %v4154_v53, %v4152_v52  ;;  %v4167_v47 = vld [vmem:[#allocation7 + $0xfc0] sm:$0xff]  ;;  %v4169_v31 = vld [vmem:[#allocation7 + $0xfd0] sm:$0xff]  ;;  %v4027_v48 = vld [vmem:[#allocation7 + $0xde8] sm:$0xff] }
 0x6d1   : > { %v4029_v49 = vld [vmem:[#allocation7 + $0xdf8] sm:$0xff]  ;;  %v4172_v52 = vld [vmem:[#allocation7 + $0xfe8] sm:$0xff] }
 0x6d2   : > { %v4174_v53 = vld [vmem:[#allocation7 + $0xff8] sm:$0xff] }
 0x6d3   : > { %6401 = vmatpush1.bf16.msra.mxu0 %v6400_v4  ;;  %6465 = vmatpush1.bf16.msra.mxu1 %v6464_v2  ;;  %v6420_v4 = vpack.c.bf16 %v4008_v57, %v4006_v56  ;;  %v6484_v2 = vpack.c.bf16 %v4153_v62, %v4151_v61  ;;  %v4026_v56 = vld [vmem:[#allocation7 + $0xde0] sm:$0xff]  ;;  %v6438_v57 = vpack.c.bf16 %v4029_v49, %v4027_v48  ;;  %v4173_v62 = vld [vmem:[#allocation7 + $0xff0] sm:$0xff] }
 0x6d4   : > { %6403 = vmatprep.subr.bf16.mxu0 %v6402_v21  ;;  %6467 = vmatprep.subr.bf16.mxu1 %v6466_v7  ;;  %v6422_v21 = vpack.c.bf16 %v4013_v0, %v4011_v63  ;;  %v6486_v7 = vpack.c.bf16 %v4158_v1, %v4156_v3  ;;  %v4171_v61 = vld [vmem:[#allocation7 + $0xfe0] sm:$0xff]  ;;  %v4257_v63 = vld [vmem:[#allocation7 + $0x1008] sm:$0xff]  ;;  %v4259_v0 = vld [vmem:[#allocation7 + $0x1018] sm:$0xff] }
 0x6d5   : > { %v6504_v1 = vpack.c.bf16 %v4173_v62, %v4171_v61  ;;  %v4293_v61 = vld [vmem:[#allocation7 + $0x1128] sm:$0xff]  ;;  %v4295_v62 = vld [vmem:[#allocation7 + $0x1138] sm:$0xff] }
 0x6d7   : > { %6405 = vmatpush1.bf16.msra.mxu0 %v6404_v15  ;;  %6469 = vmatpush1.bf16.msra.mxu1 %v6468_v16  ;;  %v6424_v15 = vpack.c.bf16 %v4012_v6, %v4010_v5  ;;  %v6488_v16 = vpack.c.bf16 %v4157_v8, %v4155_v28  ;;  %v4258_v5 = vld [vmem:[#allocation7 + $0x1010] sm:$0xff]  ;;  %v4261_v6 = vld [vmem:[#allocation7 + $0x1028] sm:$0xff]  ;;  %v4260_v8 = vld [vmem:[#allocation7 + $0x1020] sm:$0xff] }
 0x6d8   : > { %6407 = vmatprep.subr.bf16.mxu0 %v6406_v19  ;;  %6471 = vmatprep.subr.bf16.mxu1 %v6470_v23  ;;  %v6426_v19 = vpack.c.bf16 %v4017_v11, %v4015_v9  ;;  %v6490_v23 = vpack.c.bf16 %v4162_v14, %v4160_v13  ;;  %v4262_v9 = vld [vmem:[#allocation7 + $0x1030] sm:$0xff]  ;;  %v4265_v11 = vld [vmem:[#allocation7 + $0x1048] sm:$0xff]  ;;  %v4267_v13 = vld [vmem:[#allocation7 + $0x1058] sm:$0xff] }
 0x6d9   : > { %v7435_v14 = vld [vmem:[#allocation2 + $0x18] sm:$0xf] }
 0x6db   : > { %6409 = vmatpush1.bf16.msra.mxu0 %v6408_v30  ;;  %6473 = vmatpush1.bf16.msra.mxu1 %v6472_v32  ;;  %v6428_v30 = vpack.c.bf16 %v4016_v18, %v4014_v17  ;;  %v6492_v32 = vpack.c.bf16 %v4161_v35, %v4159_v22  ;;  %v4264_v17 = vld [vmem:[#allocation7 + $0x1040] sm:$0xff]  ;;  %v4266_v18 = vld [vmem:[#allocation7 + $0x1050] sm:$0xff]  ;;  %v4271_v22 = vld [vmem:[#allocation7 + $0x1078] sm:$0xff] }
 0x6dc   : > { %6411 = vmatprep.subr.bf16.mxu0 %v6410_v26  ;;  %6475 = vmatprep.subr.bf16.mxu1 %v6474_v34  ;;  %v6430_v26 = vpack.c.bf16 %v4021_v27, %v4019_v25  ;;  %v6494_v34 = vpack.c.bf16 %v4166_v43, %v4164_v29  ;;  %v6724_v35 = vld [vmem:[#allocation2 + $0x8] sm:$0xff]  ;;  %v6516_v25 = vpack.c.bf16 %v4266_v18, %v4264_v17  ;;  %v4268_v29 = vld [vmem:[#allocation7 + $0x1060] sm:$0xff]  ;;  %v4270_v43 = vld [vmem:[#allocation7 + $0x1070] sm:$0xff] }
 0x6dd   : > { %v4307_v17 = vld [vmem:[#allocation7 + $0x1198] sm:$0xff] }
 0x6df   : > { %6413 = vmatpush1.bf16.msra.mxu0 %v6412_v40  ;;  %6477 = vmatpush1.bf16.msra.mxu1 %v6476_v50  ;;  %v6432_v40 = vpack.c.bf16 %v4020_v12, %v4018_v33  ;;  %v6496_v50 = vpack.c.bf16 %v4165_v37, %v4163_v36  ;;  %v6520_v33 = vpack.c.bf16 %v4270_v43, %v4268_v29  ;;  %v4277_v36 = vld [vmem:[#allocation7 + $0x10a8] sm:$0xff]  ;;  %v4279_v37 = vld [vmem:[#allocation7 + $0x10b8] sm:$0xff] }
 0x6e0   : > { %6415 = vmatprep.subr.bf16.mxu0 %v6414_v44  ;;  %6479 = vmatprep.subr.bf16.mxu1 %v6478_v45  ;;  %v6434_v44 = vpack.c.bf16 %v4025_v38, %v4023_v46  ;;  %v6498_v45 = vpack.c.bf16 %v4170_v39, %v4168_v10  ;;  %v6526_v38 = vpack.c.bf16 %v4279_v37, %v4277_v36  ;;  %v4276_v10 = vld [vmem:[#allocation7 + $0x10a0] sm:$0xff]  ;;  %v4278_v39 = vld [vmem:[#allocation7 + $0x10b0] sm:$0xff] }
 0x6e1   : > { %v4312_v36 = vld [vmem:[#allocation7 + $0x11c0] sm:$0xff]  ;;  %v4314_v37 = vld [vmem:[#allocation7 + $0x11d0] sm:$0xff] }
 0x6e3   : > { %6417 = vmatpush1.bf16.msra.mxu0 %v6416_v54  ;;  %6481 = vmatpush1.bf16.msra.mxu1 %v6480_v55  ;;  %v6436_v54 = vpack.c.bf16 %v4024_v42, %v4022_v41  ;;  %v6500_v55 = vpack.c.bf16 %v4169_v31, %v4167_v47  ;;  %v6528_v41 = vpack.c.bf16 %v4278_v39, %v4276_v10  ;;  %v4285_v47 = vld [vmem:[#allocation7 + $0x10e8] sm:$0xff]  ;;  %v4287_v31 = vld [vmem:[#allocation7 + $0x10f8] sm:$0xff] }
 0x6e4   : > { %6419 = vmatprep.subr.bf16.mxu0 %v6418_v58  ;;  %6483 = vmatprep.subr.bf16.mxu1 %v6482_v60  ;;  %v6502_v58 = vpack.c.bf16 %v4174_v53, %v4172_v52  ;;  %v4028_v60 = vld [vmem:[#allocation7 + $0xdf0] sm:$0xff]  ;;  %v6534_v49 = vpack.c.bf16 %v4287_v31, %v4285_v47  ;;  %v4284_v52 = vld [vmem:[#allocation7 + $0x10e0] sm:$0xff]  ;;  %v6564_v10 = vpack.c.bf16 %v4314_v37, %v4312_v36 }
 0x6e5   : > { %v6440_v3 = vpack.c.bf16 %v4028_v60, %v4026_v56  ;;  %v4286_v53 = vld [vmem:[#allocation7 + $0x10f0] sm:$0xff] }
 0x6e6   : > { %v6536_v56 = vpack.c.bf16 %v4286_v53, %v4284_v52  ;;  %v4290_v60 = vld [vmem:[#allocation7 + $0x1110] sm:$0xff] }
 0x6e7   : > { %6421 = vmatpush1.bf16.msra.mxu0 %v6420_v4  ;;  %6485 = vmatpush1.bf16.msra.mxu1 %v6484_v2  ;;  %v6506_v4 = vpack.c.bf16 %v4259_v0, %v4257_v63  ;;  %v4256_v2 = vld [vmem:[#allocation7 + $0x1000] sm:$0xff]  ;;  %v6542_v0 = vpack.c.bf16 %v4295_v62, %v4293_v61 }
 0x6e8   : > { %6423 = vmatprep.subr.bf16.mxu0 %v6422_v21  ;;  %6487 = vmatprep.subr.bf16.mxu1 %v6486_v7  ;;  %v4263_v21 = vld [vmem:[#allocation7 + $0x1038] sm:$0xff]  ;;  %v6508_v7 = vpack.c.bf16 %v4258_v5, %v4256_v2 }
 0x6e9   : > { %v6510_v28 = vpack.c.bf16 %v4263_v21, %v4261_v6  ;;  %v4299_v2 = vld [vmem:[#allocation7 + $0x1158] sm:$0xff]  ;;  %v4296_v21 = vld [vmem:[#allocation7 + $0x1140] sm:$0xff] }
 0x6eb   : > { %6425 = vmatpush1.bf16.msra.mxu0 %v6424_v15  ;;  %6489 = vmatpush1.bf16.msra.mxu1 %v6488_v16  ;;  %v6512_v15 = vpack.c.bf16 %v4262_v9, %v4260_v8  ;;  %v6514_v16 = vpack.c.bf16 %v4267_v13, %v4265_v11  ;;  %v4303_v8 = vld [vmem:[#allocation7 + $0x1178] sm:$0xff]  ;;  %v4300_v13 = vld [vmem:[#allocation7 + $0x1160] sm:$0xff] }
 0x6ec   : > { %6427 = vmatprep.subr.bf16.mxu0 %v6426_v19  ;;  %6491 = vmatprep.subr.bf16.mxu1 %v6490_v23  ;;  %v7439_v19 = vld [vmem:[#allocation2 + $0x10] sm:$0xf]  ;;  %v4269_v23 = vld [vmem:[#allocation7 + $0x1068] sm:$0xff] }
 0x6ed   : > { %v6518_v27 = vpack.c.bf16 %v4271_v22, %v4269_v23  ;;  %v4304_v22 = vld [vmem:[#allocation7 + $0x1180] sm:$0xff] }
 0x6ef   : > { %6429 = vmatpush1.bf16.msra.mxu0 %v6428_v30  ;;  %6493 = vmatpush1.bf16.msra.mxu1 %v6492_v32  ;;  %v4273_v30 = vld [vmem:[#allocation7 + $0x1088] sm:$0xff]  ;;  %v4275_v32 = vld [vmem:[#allocation7 + $0x1098] sm:$0xff] }
 0x6f0   : > { %6431 = vmatprep.subr.bf16.mxu0 %v6430_v26  ;;  %6495 = vmatprep.subr.bf16.mxu1 %v6494_v34  ;;  %v6522_v12 = vpack.c.bf16 %v4275_v32, %v4273_v30  ;;  %v4272_v26 = vld [vmem:[#allocation7 + $0x1080] sm:$0xff]  ;;  %v4274_v34 = vld [vmem:[#allocation7 + $0x1090] sm:$0xff] }
 0x6f1   : > { %v6524_v46 = vpack.c.bf16 %v4274_v34, %v4272_v26  ;;  %v4308_v30 = vld [vmem:[#allocation7 + $0x11a0] sm:$0xff]  ;;  %v4310_v32 = vld [vmem:[#allocation7 + $0x11b0] sm:$0xff] }
 0x6f2   : > { %v6560_v26 = vpack.c.bf16 %v4310_v32, %v4308_v30 }
 0x6f3   : > { %6433 = vmatpush1.bf16.msra.mxu0 %v6432_v40  ;;  %6497 = vmatpush1.bf16.msra.mxu1 %v6496_v50  ;;  %v4281_v40 = vld [vmem:[#allocation7 + $0x10c8] sm:$0xff]  ;;  %v4283_v50 = vld [vmem:[#allocation7 + $0x10d8] sm:$0xff] }
 0x6f4   : > { %6435 = vmatprep.subr.bf16.mxu0 %v6434_v44  ;;  %6499 = vmatprep.subr.bf16.mxu1 %v6498_v45  ;;  %v6530_v42 = vpack.c.bf16 %v4283_v50, %v4281_v40  ;;  %v4280_v44 = vld [vmem:[#allocation7 + $0x10c0] sm:$0xff]  ;;  %v4282_v45 = vld [vmem:[#allocation7 + $0x10d0] sm:$0xff] }
 0x6f5   : > { %v6532_v48 = vpack.c.bf16 %v4282_v45, %v4280_v44  ;;  %v4316_v40 = vld [vmem:[#allocation7 + $0x11e0] sm:$0xff]  ;;  %v4318_v50 = vld [vmem:[#allocation7 + $0x11f0] sm:$0xff] }
 0x6f7   : > { %6437 = vmatpush1.bf16.msra.mxu0 %v6436_v54  ;;  %6501 = vmatpush1.bf16.msra.mxu1 %v6500_v55  ;;  %v4289_v54 = vld [vmem:[#allocation7 + $0x1108] sm:$0xff]  ;;  %v4291_v55 = vld [vmem:[#allocation7 + $0x1118] sm:$0xff] }
 0x6f8   : > { %6439 = vmatprep.subr.bf16.mxu0 %v6438_v57  ;;  %6503 = vmatprep.subr.bf16.mxu1 %v6502_v58  ;;  %v6538_v57 = vpack.c.bf16 %v4291_v55, %v4289_v54  ;;  %v4288_v58 = vld [vmem:[#allocation7 + $0x1100] sm:$0xff] }
 0x6f9   : > { %v6540_v63 = vpack.c.bf16 %v4290_v60, %v4288_v58  ;;  %v4407_v60 = vld [vmem:[#allocation3 + $0x28] sm:$0xff] }
 0x6fb   : > { %6441 = vmatpush1.bf16.msra.mxu0 %v6440_v3  ;;  %6505 = vmatpush1.bf16.msra.mxu1 %v6504_v1  ;;  %v4292_v3 = vld [vmem:[#allocation7 + $0x1120] sm:$0xff]  ;;  %v4294_v1 = vld [vmem:[#allocation7 + $0x1130] sm:$0xff] }
 0x6fc   : > { %6507 = vmatprep.subr.bf16.mxu0 %v6506_v4  ;;  %v4297_v4 = vld [vmem:[#allocation7 + $0x1148] sm:$0xff]  ;;  %v6544_v5 = vpack.c.bf16 %v4294_v1, %v4292_v3 }
 0x6fd   : > { %v6546_v6 = vpack.c.bf16 %v4299_v2, %v4297_v4 }
 0x6fe   : > { %4095 = vmatmul.mubr.f32.vlgmr.msra.gmra.mrb[32].mxu0 %v7423_v20  ;;  %4240 = vmatmul.mubr.f32.vlgmr.msra.gmra.mrb[32].mxu1 %v7423_v20 }
 0x6ff   : > { %4100 = vmatprep.mubr.f32.mxu0 %v7435_v14  ;;  %4245 = vmatprep.mubr.f32.mxu1 %v7435_v14 }
 0x700   : > { %6509 = vmatpush1.bf16.msra.mxu0 %v6508_v7  ;;  %v4298_v7 = vld [vmem:[#allocation7 + $0x1150] sm:$0xff] }
 0x701   : > { %6511 = vmatprep.subr.bf16.mxu0 %v6510_v28  ;;  %v4301_v28 = vld [vmem:[#allocation7 + $0x1168] sm:$0xff]  ;;  %v6548_v9 = vpack.c.bf16 %v4298_v7, %v4296_v21 }
 0x702   : > { %4101 = vmatmul.mubr.f32.gmra.mrb[34].mxu0 %v7439_v19  ;;  %4246 = vmatmul.mubr.f32.gmra.mrb[34].mxu1 %v7439_v19  ;;  %v6550_v11 = vpack.c.bf16 %v4303_v8, %v4301_v28 }
 0x703   : > { %4384 = vmatprep.mubr.f32.mxu0 %v6724_v35  ;;  %v4306_v35 = vld [vmem:[#allocation7 + $0x1190] sm:$0xff] }
 0x704   : > { %6513 = vmatpush1.bf16.msra.mxu0 %v6512_v15  ;;  %v4302_v15 = vld [vmem:[#allocation7 + $0x1170] sm:$0xff]  ;;  %v6556_v29 = vpack.c.bf16 %v4306_v35, %v4304_v22 }
 0x705   : > { %6515 = vmatprep.subr.bf16.mxu0 %v6514_v16  ;;  %v4305_v16 = vld [vmem:[#allocation7 + $0x1188] sm:$0xff]  ;;  %v6552_v18 = vpack.c.bf16 %v4302_v15, %v4300_v13 }
 0x706   : > { %v6554_v23 = vpack.c.bf16 %v4307_v17, %v4305_v16 }
 0x708   : > { %6517 = vmatpush1.bf16.msra.mxu0 %v6516_v25  ;;  %v4309_v25 = vld [vmem:[#allocation7 + $0x11a8] sm:$0xff] }
 0x709   : > { %6519 = vmatprep.subr.bf16.mxu0 %v6518_v27  ;;  %v4311_v27 = vld [vmem:[#allocation7 + $0x11b8] sm:$0xff] }
 0x70a   : > { %v6558_v43 = vpack.c.bf16 %v4311_v27, %v4309_v25  ;;  %v4401_v27 = vld [vmem:[#allocation12] sm:$0xff] }
 0x70c   : > { %6521 = vmatpush1.bf16.msra.mxu0 %v6520_v33  ;;  %v4313_v33 = vld [vmem:[#allocation7 + $0x11c8] sm:$0xff] }
 0x70d   : > { %6523 = vmatprep.subr.bf16.mxu0 %v6522_v12  ;;  %v4315_v12 = vld [vmem:[#allocation7 + $0x11d8] sm:$0xff] }
 0x70e   : > { %v6562_v34 = vpack.c.bf16 %v4315_v12, %v4313_v33 }
 0x710   : > { %6525 = vmatpush1.bf16.msra.mxu0 %v6524_v46  ;;  %v4317_v46 = vld [vmem:[#allocation7 + $0x11e8] sm:$0xff] }
 0x711   : > { %6527 = vmatprep.subr.bf16.mxu0 %v6526_v38  ;;  %v4319_v38 = vld [vmem:[#allocation7 + $0x11f8] sm:$0xff] }
 0x712   : > { %v6566_v39 = vpack.c.bf16 %v4319_v38, %v4317_v46 }
 0x714   : > { %6529 = vmatpush1.bf16.msra.mxu0 %v6528_v41  ;;  %v6568_v41 = vpack.c.bf16 %v4318_v50, %v4316_v40 }
 0x715   : > { %6531 = vmatprep.subr.bf16.mxu0 %v6530_v42 }
 0x718   : > { %6533 = vmatpush1.bf16.msra.mxu0 %v6532_v48 }
 0x719   : > { %6535 = vmatprep.subr.bf16.mxu0 %v6534_v49 }
 0x71c   : > { %6537 = vmatpush1.bf16.msra.mxu0 %v6536_v56 }
 0x71d   : > { %6539 = vmatprep.subr.bf16.mxu0 %v6538_v57 }
 0x720   : > { %6541 = vmatpush1.bf16.msra.mxu0 %v6540_v63  ;;  %v4406_v63 = vld [vmem:[#allocation3 + $0x20] sm:$0xff] }
 0x721   : > { %6543 = vmatprep.subr.bf16.mxu0 %v6542_v0 }
 0x724   : > { %6545 = vmatpush1.bf16.msra.mxu0 %v6544_v5 }
 0x725   : > { %6547 = vmatprep.subr.bf16.mxu0 %v6546_v6 }
 0x728   : > { %6549 = vmatpush1.bf16.msra.mxu0 %v6548_v9 }
 0x729   : > { %6551 = vmatprep.subr.bf16.mxu0 %v6550_v11 }
 0x72c   : > { %6553 = vmatpush1.bf16.msra.mxu0 %v6552_v18 }
 0x72d   : > { %6555 = vmatprep.subr.bf16.mxu0 %v6554_v23 }
 0x730   : > { %6557 = vmatpush1.bf16.msra.mxu0 %v6556_v29 }
 0x731   : > { %6559 = vmatprep.subr.bf16.mxu0 %v6558_v43  ;;  %v4439_v43 = vcombine.high %v4401_v27, %v4401_v27 }
 0x733   : > { %4761 = vmatprep.mubr.msk.f32.mxu1 %vm1657_vm0, %v4439_v43 }
 0x734   : > { %6561 = vmatpush1.bf16.msra.mxu0 %v6560_v26 }
 0x735   : > { %6563 = vmatprep.subr.bf16.mxu0 %v6562_v34 }
 0x738   : > { %6565 = vmatpush1.bf16.msra.mxu0 %v6564_v10 }
 0x739   : > { %6567 = vmatprep.subr.bf16.mxu0 %v6566_v39 }
 0x73c   : > { %6569 = vmatpush1.bf16.msra.mxu0 %v6568_v41 }
 0x73f   : > { %4385 = vmatmul.mubr.f32.vlgmr.msra.gmra.mrb[36].mxu0 %v7423_v20 }
 0x740   : > { %4390 = vmatprep.mubr.f32.mxu0 %v7435_v14 }
 0x743   : > { %4391 = vmatmul.mubr.f32.gmra.mrb[38].mxu0 %v7439_v19 }
 0x74c   : > { %v3232_v42 = vpop.f32.mrb[22].mxu0  ;;  %v3377_v44 = vpop.f32.mrb[22].mxu1 }
 0x74d   : > { %3239 = vst [vmem:[#allocation3 + $0x10] sm:$0xf] %v3232_v42  ;;  %3384 = vst [vmem:[#allocation3 + $0x30] sm:$0xf] %v3377_v44  ;;  %v3234_v45 = vpop.f32.mrb[23].mxu0  ;;  %v3379_v47 = vpop.f32.mrb[23].mxu1 }
 0x74e   : > { %3240 = vst [vmem:[#allocation3 + $0x18] sm:$0xf] %v3234_v45  ;;  %3385 = vst [vmem:[#allocation3 + $0x38] sm:$0xf] %v3379_v47 }
 0x750   : > { %v3516_v31 = vpop.f32.mrb[24].mxu0  ;;  %v3661_v48 = vpop.f32.mrb[24].mxu1 }
 0x751   : > { %3527 = vst [vmem:[#allocation3 + $0x40] sm:$0xff] %v3516_v31  ;;  %3672 = vst [vmem:[#allocation3 + $0x60] sm:$0xff] %v3661_v48  ;;  %v3518_v49 = vpop.f32.mrb[25].mxu0  ;;  %v3663_v52 = vpop.f32.mrb[25].mxu1 }
 0x752   : > { %3528 = vst [vmem:[#allocation3 + $0x48] sm:$0xff] %v3518_v49  ;;  %3673 = vst [vmem:[#allocation3 + $0x68] sm:$0xff] %v3663_v52 }
 0x754   : > { %v3522_v20 = vpop.f32.mrb[26].mxu0  ;;  %v3667_v14 = vpop.f32.mrb[26].mxu1  ;;  %v4404_v53 = vld [vmem:[#allocation3 + $0x10] sm:$0xff] }
 0x755   : > { %3529 = vst [vmem:[#allocation3 + $0x50] sm:$0xf] %v3522_v20  ;;  %3674 = vst [vmem:[#allocation3 + $0x70] sm:$0xf] %v3667_v14  ;;  %v3524_v19 = vpop.f32.mrb[27].mxu0  ;;  %v3669_v54 = vpop.f32.mrb[27].mxu1  ;;  %v6572_v58 = vpack.c.bf16 %v4404_v53, %v7417_v24 }
 0x756   : > { %v4405_v55 = vld [vmem:[#allocation3 + $0x18] sm:$0xff]  ;;  %3530 = vst [vmem:[#allocation3 + $0x58] sm:$0xf] %v3524_v19  ;;  %3675 = vst [vmem:[#allocation3 + $0x78] sm:$0xf] %v3669_v54  ;;  %v4408_v62 = vld [vmem:[#allocation3 + $0x30] sm:$0xff] }
 0x757   : > { %v4409_v56 = vld [vmem:[#allocation3 + $0x38] sm:$0xff]  ;;  %v6570_v57 = vpack.c.bf16 %v4405_v55, %v7420_v59  ;;  %v6576_v0 = vpack.c.bf16 %v4408_v62, %v4406_v63  ;;  %v4523_v62 = vld [vmem:[#allocation2] sm:$0xff] }
 0x758   : > { %v6574_v61 = vpack.c.bf16 %v4409_v56, %v4407_v60 }
 0x759   : > { %6571 = vmatprep.subr.bf16.mxu1 %v6570_v57 }
 0x75a   : > { %6573 = vmatpush1.bf16.msra.mxu1 %v6572_v58  ;;  %v4524_v58 = vld [vmem:[#allocation2 + $0x8] sm:$0xff] }
 0x75b   : > { %6575 = vmatprep.subr.bf16.mxu1 %v6574_v61 }
 0x75c   : > { %v4412_v3 = vld [vmem:[#allocation3 + $0x50] sm:$0xff] }
 0x75d   : > { %v4413_v1 = vld [vmem:[#allocation3 + $0x58] sm:$0xff]  ;;  %v6580_v5 = vpack.c.bf16 %v4412_v3, %v3516_v31  ;;  %v4416_v21 = vld [vmem:[#allocation3 + $0x70] sm:$0xff] }
 0x75e   : > { %6577 = vmatpush1.bf16.msra.mxu1 %v6576_v0  ;;  %v4417_v4 = vld [vmem:[#allocation3 + $0x78] sm:$0xff]  ;;  %v6578_v2 = vpack.c.bf16 %v4413_v1, %v3518_v49  ;;  %v6584_v24 = vpack.c.bf16 %v4416_v21, %v3661_v48 }
 0x75f   : > { %v6582_v6 = vpack.c.bf16 %v4417_v4, %v3663_v52 }
 0x760   : > { %6579 = vmatprep.subr.bf16.mxu1 %v6578_v2 }
 0x762   : > { %6581 = vmatpush1.bf16.msra.mxu1 %v6580_v5 }
 0x763   : > { %6583 = vmatprep.subr.bf16.mxu1 %v6582_v6 }
 0x766   : > { %6585 = vmatpush1.bf16.msra.mxu1 %v6584_v24 }
 0x790   : > { %v3806_v59 = vpop.f32.mrb[28].mxu0  ;;  %v3951_v7 = vpop.f32.mrb[28].mxu1 }
 0x791   : > { %3817 = vst [vmem:[#allocation3 + $0x80] sm:$0xff] %v3806_v59  ;;  %3962 = vst [vmem:[#allocation3 + $0xa0] sm:$0xff] %v3951_v7  ;;  %v3808_v28 = vpop.f32.mrb[29].mxu0  ;;  %v3953_v8 = vpop.f32.mrb[29].mxu1 }
 0x792   : > { %3818 = vst [vmem:[#allocation3 + $0x88] sm:$0xff] %v3808_v28  ;;  %3963 = vst [vmem:[#allocation3 + $0xa8] sm:$0xff] %v3953_v8 }
 0x794   : > { %v3812_v9 = vpop.f32.mrb[30].mxu0  ;;  %v3957_v11 = vpop.f32.mrb[30].mxu1 }
 0x795   : > { %3819 = vst [vmem:[#allocation3 + $0x90] sm:$0xf] %v3812_v9  ;;  %3964 = vst [vmem:[#allocation3 + $0xb0] sm:$0xf] %v3957_v11  ;;  %v3814_v13 = vpop.f32.mrb[31].mxu0  ;;  %v3959_v15 = vpop.f32.mrb[31].mxu1 }
 0x796   : > { %3820 = vst [vmem:[#allocation3 + $0x98] sm:$0xf] %v3814_v13  ;;  %3965 = vst [vmem:[#allocation3 + $0xb8] sm:$0xf] %v3959_v15 }
 0x79c   : > { %v4420_v16 = vld [vmem:[#allocation3 + $0x90] sm:$0xff] }
 0x79d   : > { %v4421_v17 = vld [vmem:[#allocation3 + $0x98] sm:$0xff]  ;;  %v6588_v22 = vpack.c.bf16 %v4420_v16, %v3806_v59  ;;  %v4424_v25 = vld [vmem:[#allocation3 + $0xb0] sm:$0xff] }
 0x79e   : > { %v4425_v18 = vld [vmem:[#allocation3 + $0xb8] sm:$0xff]  ;;  %v6586_v23 = vpack.c.bf16 %v4421_v17, %v3808_v28  ;;  %v6592_v29 = vpack.c.bf16 %v4424_v25, %v3951_v7 }
 0x79f   : > { %v6590_v35 = vpack.c.bf16 %v4425_v18, %v3953_v8 }
 0x7a0   : > { %6587 = vmatprep.subr.bf16.mxu1 %v6586_v23 }
 0x7a1   : > { %6589 = vmatpush1.bf16.msra.mxu1 %v6588_v22 }
 0x7a2   : > { %6591 = vmatprep.subr.bf16.mxu1 %v6590_v35 }
 0x7a5   : > { %6593 = vmatpush1.bf16.msra.mxu1 %v6592_v29 }
 0x7d1   : > { %v4096_v30 = vpop.f32.mrb[32].mxu0  ;;  %v4241_v32 = vpop.f32.mrb[32].mxu1 }
 0x7d2   : > { %4107 = vst [vmem:[#allocation3 + $0xc0] sm:$0xff] %v4096_v30  ;;  %4252 = vst [vmem:[#allocation3 + $0xe0] sm:$0xff] %v4241_v32  ;;  %v4098_v33 = vpop.f32.mrb[33].mxu0  ;;  %v4243_v12 = vpop.f32.mrb[33].mxu1 }
 0x7d3   : > { %4108 = vst [vmem:[#allocation3 + $0xc8] sm:$0xff] %v4098_v33  ;;  %4253 = vst [vmem:[#allocation3 + $0xe8] sm:$0xff] %v4243_v12 }
 0x7d5   : > { %v4102_v26 = vpop.f32.mrb[34].mxu0  ;;  %v4247_v34 = vpop.f32.mrb[34].mxu1 }
 0x7d6   : > { %4109 = vst [vmem:[#allocation3 + $0xd0] sm:$0xf] %v4102_v26  ;;  %4254 = vst [vmem:[#allocation3 + $0xf0] sm:$0xf] %v4247_v34  ;;  %v4104_v36 = vpop.f32.mrb[35].mxu0  ;;  %v4249_v37 = vpop.f32.mrb[35].mxu1 }
 0x7d7   : > { %4110 = vst [vmem:[#allocation3 + $0xd8] sm:$0xf] %v4104_v36  ;;  %4255 = vst [vmem:[#allocation3 + $0xf8] sm:$0xf] %v4249_v37 }
 0x7dd   : > { %v4428_v46 = vld [vmem:[#allocation3 + $0xd0] sm:$0xff] }
 0x7de   : > { %v4429_v38 = vld [vmem:[#allocation3 + $0xd8] sm:$0xff]  ;;  %v6596_v40 = vpack.c.bf16 %v4428_v46, %v4096_v30  ;;  %v4432_v41 = vld [vmem:[#allocation3 + $0xf0] sm:$0xff] }
 0x7df   : > { %v4433_v10 = vld [vmem:[#allocation3 + $0xf8] sm:$0xff]  ;;  %v6594_v39 = vpack.c.bf16 %v4429_v38, %v4098_v33  ;;  %v6600_v42 = vpack.c.bf16 %v4432_v41, %v4241_v32 }
 0x7e0   : > { %v6598_v50 = vpack.c.bf16 %v4433_v10, %v4243_v12 }
 0x7e1   : > { %6595 = vmatprep.subr.bf16.mxu1 %v6594_v39 }
 0x7e2   : > { %6597 = vmatpush1.bf16.msra.mxu1 %v6596_v40 }
 0x7e3   : > { %6599 = vmatprep.subr.bf16.mxu1 %v6598_v50 }
 0x7e6   : > { %6601 = vmatpush1.bf16.msra.mxu1 %v6600_v42 }
 0x812   : > { %v4386_v44 = vpop.f32.mrb[36].mxu0 }
 0x813   : > { %4397 = vst [vmem:[#allocation3 + $0x100] sm:$0xff] %v4386_v44  ;;  %v4388_v45 = vpop.f32.mrb[37].mxu0 }
 0x814   : > { %4398 = vst [vmem:[#allocation3 + $0x108] sm:$0xff] %v4388_v45 }
 0x816   : > { %v4392_v47 = vpop.f32.mrb[38].mxu0 }
 0x817   : > { %4399 = vst [vmem:[#allocation3 + $0x110] sm:$0xf] %v4392_v47  ;;  %v4394_v31 = vpop.f32.mrb[39].mxu0 }
 0x818   : > { %4400 = vst [vmem:[#allocation3 + $0x118] sm:$0xf] %v4394_v31 }
 0x81e   : > { %v4436_v48 = vld [vmem:[#allocation3 + $0x110] sm:$0xff] }
 0x81f   : > { %v4437_v49 = vld [vmem:[#allocation3 + $0x118] sm:$0xff]  ;;  %v6604_v20 = vpack.c.bf16 %v4436_v48, %v4386_v44 }
 0x820   : > { %v6602_v52 = vpack.c.bf16 %v4437_v49, %v4388_v45 }
 0x822   : > { %6603 = vmatprep.subr.bf16.mxu1 %v6602_v52 }
 0x823   : > { %6605 = vmatpush1.bf16.msra.mxu1 %v6604_v20 }
 0x826   : > { %4507 = vmatmul.mubr.f32.vlgmr.msra.gmra.mrb[36].mxu1 %v4401_v27 }
 0x827   : > { %4595 = vmatprep.mubr.f32.mxu1 %v7362_v51  ;;  %v4527_v51 = vld [vmem:[#allocation13] sm:$0xf] }
 0x8f9   : > { %v4508_v14 = vpop.f32.mrb[36].mxu1 }
 0x8fa   : > { %v4513_v53 = vmax.f32 %v4508_v14, 0.0  ;;  %v4510_v19 = vpop.f32.mrb[37].mxu1 }
 0x8fb   : > { %v4514_v54 = vmax.f32 %v4510_v19, 0.0 }
 0x8fc   : > { %v4517_v55 = vrot.slane %v4513_v53, 4 }
 0x8fd   : > { %v4518_v56 = vrot.slane %v4514_v54, 4 }
 0x8fe   : > { %4521 = vst [vmem:[#allocation2 + $0x10] sm:$0xf0] %v4517_v55 }
 0x8ff   : > { %4522 = vst [vmem:[#allocation2 + $0x18] sm:$0xf0] %v4518_v56 }
 0x905   : > { %v4525_v57 = vld [vmem:[#allocation2 + $0x10] sm:$0xff] }
 0x906   : > { %v4526_v60 = vld [vmem:[#allocation2 + $0x18] sm:$0xff]  ;;  %v6608_v63 = vpack.c.bf16 %v4525_v57, %v4523_v62 }
 0x907   : > { %v6606_v61 = vpack.c.bf16 %v4526_v60, %v4524_v58 }
 0x909   : > { %6607 = vmatprep.subr.bf16.mxu1 %v6606_v61 }
 0x90a   : > { %6609 = vmatpush1.bf16.msra.mxu1 %v6608_v63 }
 0x90d   : > { %4762 = vmatmul.mubr.msk.f32.vlgmr.msra.gmra.mrb[38].mxu1 %vm1657_vm0, %v4527_v51 }
 0x9e0   : > { %v4597_v0 = vpop.f32.mrb[38].mxu1 }
 0x9e1   : > { %v4598_v3 = vadd.f32 %v4597_v0, %v4523_v62  ;;  %v4599_v1 = vpop.f32.mrb[39].mxu1 }
 0x9e2   : > { %v4600_v4 = vadd.f32 %v4599_v1, %v4524_v58 }
 0x9e4   : > { %v4604_v2 = vcombine.low %v4598_v3, %v4600_v4 }
 0x9e6   : > { %4606 = vst [vmem:[%s332_s11] sm:$0xff] %v4604_v2 }
 0x9e7   : > { %6908 = shalt.err (!%p6905_p0)
}
 0x9e8   : > { %s6909_s8 = scalar_lea.hbm %s7457_s29, 128  ;;  %s6913_s13 = scalar_lea.hbm %s7507_s6, 256 }
 0x9e9   : > { %p6910_p6 = scmp.ne.s32.totalorder %s7457_s29, %s6909_s8  ;;  %p6914_p8 = scmp.lt.u32.totalorder %s7457_s29, %s7507_s6 }
 0x9ea   : > { %p6915_p5 = scmp.lt.u32.totalorder %s6913_s13, %s6909_s8  ;;  %p6917_p7 = scmp.lt.u32.totalorder %s6909_s8, %s7457_s29 }
 0x9eb   : > { %p6911_p10 = pnand %p6910_p6, %p7526_p4 }
 0x9ec   : > { %p6916_p9 = por %p6915_p5, %p6914_p8 }
 0x9ed   : > { %p6912_p11 = pneg %p6911_p10 }
 0x9ee   : > { %p6918_p12 = por %p6917_p7, %p6916_p9 }
 0x9f0   : > { %p6919_p13 = pnand %p6918_p12, %p6912_p11 }
 0x9f2   : > { %6922 = shalt.err (!%p6919_p13)
}
 0x9f3   : > { %6632 = dma.vmem_to_hbm [thread:$0]  (%p7526_p4), %s7459_s19, 128, %s7457_s29, %s4608_s26  }
 0x9f4 PF: > { %s4634_s11 = sand.u32 1, %s6961_s21   ;;  %p7527_p1 = scmp.ne.s32.totalorder %s7517_s12, 0 }
 0x9f5   : > { %p7528_p3 = scmp.ge.s32.totalorder %s6973_s24, 2  ;;  %s4635_s25 = scalar_lea.sflag [#allocation6], %s4634_s11 }
 0x9f7   : > { %p6655_p2 = pnand %p7528_p3, %p7527_p1 }
 0x9f9   : > { %6956 = dma.done.wait (!%p6655_p2), %s4635_s25, 128  }
 0x9fa   : > { %6958 = vsyncadd (!%p6655_p2), %s4635_s25, 4294967168  ;;  %p22_p0 = scmp.ge.s32.totalorder %s7178_s7, 4   ;;  %s7529_s21 = smov %s6965_s22 }
 0x9fb   : > { %s7530_s22 = smov %s6969_s23  ;;  %s7531_s23 = smov %s7190_s9 }
 0x9fc   : > { %s7532_s24 = smov %s7178_s7  ;;  %24 = sbr.rel (!%p22_p0) target bundleno = 8 (0x8), region = 117 }
 0xa03   :  { %4640 = vsyncpa [#allocation5], 1 }
 0xa04   :  { %4642 = vsyncpa [#allocation5 + $0x1], 1 }
 0xa05   :  { %4643 = vsyncpa [#allocation8], 1 }
 0xa06   :  { %4644 = vsyncpa [#allocation11], 1 }
 0xa07   :  { %4645 = vsyncpa [#allocation14], 1 }
 0xa08   :  { %4646 = vsyncpa [#allocation6], 1 }
 0xa09   :  { %4648 = vsyncpa [#allocation6 + $0x1], 1 }

</bundles_post_ra>
